<compile_context>
chip_gen: v6e
topology: v6e:2x2x1
jax: 0.10.0
libtpu: 0.0.40
codegen_flags: <defaults>
</compile_context>

<pallas_src>
import jax
import jax.numpy as jnp
from jax.experimental import pallas as pl
from jax.experimental.pallas import tpu as pltpu

_VMEM_LIMIT = 48 * 1024 * 1024  # bytes; > our ~17 MiB need, < v7x 64 MiB VMEM


# ----------------------------------------------------------------------------
# Kernel A: h2 = relu( (x @ W1 + b1) @ W2[:, tile] + b2[tile] )
# Grid = (N2 // tn,), all blocks full-K, no accumulator needed.
# ----------------------------------------------------------------------------
def _l1_l2_kernel(x_ref, w1_ref, b1_ref, w2_ref, b2_ref, o_ref):
    h1 = jnp.dot(
        x_ref[...].astype(jnp.bfloat16), w1_ref[...],
        preferred_element_type=jnp.float32,
    ) + b1_ref[...]
    h2 = jnp.dot(
        h1.astype(jnp.bfloat16), w2_ref[...],
        preferred_element_type=jnp.float32,
    ) + b2_ref[...]
    o_ref[...] = jnp.maximum(h2, 0.0).astype(o_ref.dtype)


def fused_l1_l2(x, w1, b1, w2, b2, *, tn=2048):
    M, K1 = x.shape
    K1w, N1 = w1.shape
    N1w, N2 = w2.shape
    assert K1 == K1w and N1 == N1w and N2 % tn == 0
    return pl.pallas_call(
        _l1_l2_kernel,
        out_shape=jax.ShapeDtypeStruct((M, N2), jnp.bfloat16),
        grid_spec=pltpu.PrefetchScalarGridSpec(
            num_scalar_prefetch=0,
            grid=(N2 // tn,),
            in_specs=[
                pl.BlockSpec((M, K1), lambda j: (0, 0)),    # activations (resident)
                pl.BlockSpec((K1, N1), lambda j: (0, 0)),   # W1 (resident, 1.5 MB)
                pl.BlockSpec((1, N1), lambda j: (0, 0)),    # b1
                pl.BlockSpec((N1, tn), lambda j: (0, j)),   # W2 N-tile (streamed)
                pl.BlockSpec((1, tn), lambda j: (0, j)),    # b2 N-tile
            ],
            out_specs=pl.BlockSpec((M, tn), lambda j: (0, j)),
        ),
        compiler_params=pltpu.CompilerParams(
            dimension_semantics=("parallel",),
            vmem_limit_bytes=_VMEM_LIMIT,
        ),
    )(x, w1, b1.reshape(1, -1), w2, b2.reshape(1, -1))


# ----------------------------------------------------------------------------
# Kernel B: per (parallel part p, inner tile j):
#   h3_tile = relu( h2 @ W3[:, tile] + b3[tile] )
#   acc    += h3_tile @ W4[tile, :]            (padded 128-wide head)
# Output is one partial (M, 128) block per parallel part; summed + bias outside.
# ----------------------------------------------------------------------------
def _l3_head_kernel(h_ref, w3_ref, b3_ref, w4_ref, o_ref, acc_ref):
    j = pl.program_id(1)

    @pl.when(j == 0)
    def _():
        acc_ref[...] = jnp.zeros_like(acc_ref)

    h3 = jnp.dot(
        h_ref[...], w3_ref[...], preferred_element_type=jnp.float32
    ) + b3_ref[...]
    h3 = jnp.maximum(h3, 0.0)
    acc_ref[...] += jnp.dot(
        h3.astype(jnp.bfloat16), w4_ref[...], preferred_element_type=jnp.float32
    )

    @pl.when(j == pl.num_programs(1) - 1)
    def _():
        o_ref[0] = acc_ref[...]


def fused_l3_head(h, w3, b3, w4, *, tn=1024, parts=2):
    M, K = h.shape
    Kw, N = w3.shape
    Nw, H = w4.shape
    assert K == Kw and N == Nw and N % tn == 0
    nb = N // tn
    assert nb % parts == 0
    nbj = nb // parts
    return pl.pallas_call(
        _l3_head_kernel,
        out_shape=jax.ShapeDtypeStruct((parts, M, H), jnp.float32),
        grid_spec=pltpu.PrefetchScalarGridSpec(
            num_scalar_prefetch=0,
            grid=(parts, nbj),
            in_specs=[
                pl.BlockSpec((M, K), lambda p, j: (0, 0)),             # h2 (resident)
                pl.BlockSpec((K, tn), lambda p, j: (0, p * nbj + j)),  # W3 N-tile
                pl.BlockSpec((1, tn), lambda p, j: (0, p * nbj + j)),  # b3 N-tile
                pl.BlockSpec((tn, H), lambda p, j: (p * nbj + j, 0)),  # W4 K-tile
            ],
            out_specs=pl.BlockSpec((1, M, H), lambda p, j: (p, 0, 0)),
            scratch_shapes=[pltpu.VMEM((M, H), jnp.float32)],
        ),
        compiler_params=pltpu.CompilerParams(
            dimension_semantics=("parallel", "arbitrary"),
            vmem_limit_bytes=_VMEM_LIMIT,
        ),
    )(h, w3, b3.reshape(1, -1), w4)


# ----------------------------------------------------------------------------
# Deterministic parameter init (PyTorch Linear-style uniform), weights in bf16.
# ----------------------------------------------------------------------------
def _init_linear(key, fan_in, fan_out):
    k_w, k_b = jax.random.split(key)
    bound = 1.0 / (fan_in ** 0.5)
    w = jax.random.uniform(k_w, (fan_in, fan_out), jnp.float32, -bound, bound)
    b = jax.random.uniform(k_b, (fan_out,), jnp.float32, -bound, bound)
    return w.astype(jnp.bfloat16), b


def init_params(key):
    keys = jax.random.split(key, 4)
    params = {}
    # dim_ensional: Linear(768, 1024)
    params["dim_w"], params["dim_b"] = _init_linear(keys[0], 768, 1024)
    # classifier: Linear(1024,4096)+ReLU -> Linear(4096,4096)+ReLU -> Linear(4096,5)
    params["c0_w"], params["c0_b"] = _init_linear(keys[1], 1024, 4096)
    params["c1_w"], params["c1_b"] = _init_linear(keys[2], 4096, 4096)
    w3, b3 = _init_linear(keys[3], 4096, 5)
    # Pad the 5-class head to 128 lanes (unmasked stores); padded cols are zero.
    params["c2_w_pad"] = jnp.zeros((4096, 128), jnp.bfloat16).at[:, :5].set(w3)
    params["c2_b_pad"] = jnp.zeros((128,), jnp.float32).at[:5].set(b3)
    return params


# ----------------------------------------------------------------------------
# Forward pass of MyModel (eval mode; dropout = identity).
# ----------------------------------------------------------------------------
def my_model_forward(params, img_feat, surf_feat):
    del surf_feat  # only feeds the dead x_v branch in the reference forward
    h2 = fused_l1_l2(
        img_feat, params["dim_w"], params["dim_b"], params["c0_w"], params["c0_b"]
    )                                                                # (B, 4096) bf16
    partials = fused_l3_head(
        h2, params["c1_w"], params["c1_b"], params["c2_w_pad"]
    )                                                                # (2, B, 128) f32
    logits = jnp.sum(partials, axis=0) + params["c2_b_pad"]          # (B, 128)
    return logits[:, :5]                                             # (B, 5)


if __name__ == "__main__":
    key = jax.random.PRNGKey(0)
    k_params, k_img, k_surf = jax.random.split(key, 3)

    batch = 8
    img_feat = jax.random.normal(k_img, (batch, 768), jnp.float32)
    surf_feat = jax.random.normal(k_surf, (batch, 64), jnp.float32)

    params = init_params(k_params)

    out = my_model_forward(params, img_feat, surf_feat)
    jax.block_until_ready(out)
    assert out.shape == (batch, 5), out.shape

    # Reference in plain JAX with the same bf16 weights / activation casts.
    xb = img_feat.astype(jnp.bfloat16)
    h1 = jnp.dot(xb, params["dim_w"], preferred_element_type=jnp.float32)
    h1 = h1 + params["dim_b"]
    h2 = jnp.dot(h1.astype(jnp.bfloat16), params["c0_w"],
                 preferred_element_type=jnp.float32) + params["c0_b"]
    h2 = jnp.maximum(h2, 0.0)
    h3 = jnp.dot(h2.astype(jnp.bfloat16), params["c1_w"],
                 preferred_element_type=jnp.float32) + params["c1_b"]
    h3 = jnp.maximum(h3, 0.0)
    ref = jnp.dot(h3.astype(jnp.bfloat16), params["c2_w_pad"],
                  preferred_element_type=jnp.float32) + params["c2_b_pad"]
    ref = ref[:, :5]

    assert jnp.allclose(out, ref, rtol=2e-3, atol=2e-3), (
        jnp.max(jnp.abs(out - ref)))

    print("KERNEL_OK")
</pallas_src>

<mosaic_0001>
module attributes {stable_mosaic.version = 11 : i64} {
  func.func @_l1_l2_kernel(%arg0: i32, %arg1: memref<8x768xf32, #tpu.memory_space<vmem>>, %arg2: memref<768x1024xbf16, #tpu.memory_space<vmem>>, %arg3: memref<1x1024xf32, #tpu.memory_space<vmem>>, %arg4: memref<1024x2048xbf16, #tpu.memory_space<vmem>>, %arg5: memref<1x2048xf32, #tpu.memory_space<vmem>>, %arg6: memref<8x2048xbf16, #tpu.memory_space<vmem>>) attributes {dimension_semantics = [#tpu.dimension_semantics<parallel>], iteration_bounds = array<i64: 2>, scalar_prefetch = 0 : i64, scratch_operands = 0 : i64, tpu.core_type = #tpu.core_type<tc>, window_params = [{pipeline_mode = #tpu.pipeline_mode<synchronous>, transform_indices = @transform_0, window_bounds = array<i64: 8, 768>}, {pipeline_mode = #tpu.pipeline_mode<synchronous>, transform_indices = @transform_1, window_bounds = array<i64: 768, 1024>}, {pipeline_mode = #tpu.pipeline_mode<synchronous>, transform_indices = @transform_2, window_bounds = array<i64: 1, 1024>}, {transform_indices = @transform_3, window_bounds = array<i64: 1024, 2048>}, {transform_indices = @transform_4, window_bounds = array<i64: 1, 2048>}, {transform_indices = @transform_5, window_bounds = array<i64: 8, 2048>}]} {
    %c0 = arith.constant 0 : index
    %c0_0 = arith.constant 0 : index
    %0 = vector.load %arg1[%c0, %c0_0] : memref<8x768xf32, #tpu.memory_space<vmem>>, vector<8x768xf32>
    %1 = arith.truncf %0 : vector<8x768xf32> to vector<8x768xbf16>
    %c0_1 = arith.constant 0 : index
    %c0_2 = arith.constant 0 : index
    %2 = vector.load %arg2[%c0_1, %c0_2] : memref<768x1024xbf16, #tpu.memory_space<vmem>>, vector<768x1024xbf16>
    %cst = arith.constant dense<0.000000e+00> : vector<8x1024xf32>
    %3 = tpu.matmul %1, %2, %cst {dimension_numbers = #tpu.dot_dimension_numbers<[1], [0], [0], [1], [0, 0, 1, 1], [], []>} : vector<8x768xbf16>, vector<768x1024xbf16>, vector<8x1024xf32> -> vector<8x1024xf32>
    %c0_3 = arith.constant 0 : index
    %c0_4 = arith.constant 0 : index
    %4 = vector.load %arg3[%c0_3, %c0_4] : memref<1x1024xf32, #tpu.memory_space<vmem>>, vector<1x1024xf32>
    %5 = vector.broadcast %4 : vector<1x1024xf32> to vector<8x1024xf32>
    %6 = arith.addf %3, %5 : vector<8x1024xf32>
    %7 = arith.truncf %6 : vector<8x1024xf32> to vector<8x1024xbf16>
    %c0_5 = arith.constant 0 : index
    %c0_6 = arith.constant 0 : index
    %8 = vector.load %arg4[%c0_5, %c0_6] : memref<1024x2048xbf16, #tpu.memory_space<vmem>>, vector<1024x2048xbf16>
    %cst_7 = arith.constant dense<0.000000e+00> : vector<8x2048xf32>
    %9 = tpu.matmul %7, %8, %cst_7 {dimension_numbers = #tpu.dot_dimension_numbers<[1], [0], [0], [1], [0, 0, 1, 1], [], []>} : vector<8x1024xbf16>, vector<1024x2048xbf16>, vector<8x2048xf32> -> vector<8x2048xf32>
    %c0_8 = arith.constant 0 : index
    %c0_9 = arith.constant 0 : index
    %10 = vector.load %arg5[%c0_8, %c0_9] : memref<1x2048xf32, #tpu.memory_space<vmem>>, vector<1x2048xf32>
    %11 = vector.broadcast %10 : vector<1x2048xf32> to vector<8x2048xf32>
    %12 = arith.addf %9, %11 : vector<8x2048xf32>
    %cst_10 = arith.constant 0.000000e+00 : f32
    %13 = vector.broadcast %cst_10 : f32 to vector<8x2048xf32>
    %14 = arith.maximumf %12, %13 : vector<8x2048xf32>
    %15 = arith.truncf %14 : vector<8x2048xf32> to vector<8x2048xbf16>
    %c0_11 = arith.constant 0 : index
    %c0_12 = arith.constant 0 : index
    %16 = vector.load %arg6[%c0_11, %c0_12] : memref<8x2048xbf16, #tpu.memory_space<vmem>>, vector<8x2048xbf16>
    tpu.vector_store %arg6[%c0_11, %c0_12], %15 {strides = array<i32>} : memref<8x2048xbf16, #tpu.memory_space<vmem>>, vector<8x2048xbf16>,
    return
  }
  func.func @transform_0(%arg0: i32) -> (i32, i32) {
    %c0_i32 = arith.constant 0 : i32
    %c0_i32_0 = arith.constant 0 : i32
    %c0_i32_1 = arith.constant 0 : i32
    return %c0_i32, %c0_i32_0 : i32, i32
  }
  func.func @transform_1(%arg0: i32) -> (i32, i32) {
    %c0_i32 = arith.constant 0 : i32
    %c0_i32_0 = arith.constant 0 : i32
    %c0_i32_1 = arith.constant 0 : i32
    return %c0_i32, %c0_i32_0 : i32, i32
  }
  func.func @transform_2(%arg0: i32) -> (i32, i32) {
    %c0_i32 = arith.constant 0 : i32
    %c0_i32_0 = arith.constant 0 : i32
    %c0_i32_1 = arith.constant 0 : i32
    return %c0_i32, %c0_i32_0 : i32, i32
  }
  func.func @transform_3(%arg0: i32) -> (i32, i32) {
    %c0_i32 = arith.constant 0 : i32
    %c0_i32_0 = arith.constant 0 : i32
    return %c0_i32, %arg0 : i32, i32
  }
  func.func @transform_4(%arg0: i32) -> (i32, i32) {
    %c0_i32 = arith.constant 0 : i32
    %c0_i32_0 = arith.constant 0 : i32
    return %c0_i32, %arg0 : i32, i32
  }
  func.func @transform_5(%arg0: i32) -> (i32, i32) {
    %c0_i32 = arith.constant 0 : i32
    %c0_i32_0 = arith.constant 0 : i32
    return %c0_i32, %arg0 : i32, i32
  }
}

</mosaic_0001>

<bundles_post_ra>
// kernel: tpu_custom_call.1
= control target key start
LH: loop header
LB: loop body
LE: loop exit
PB: predicated region body
PF: predicated region fallthrough
CT: control target
= control target key end

     0   :  { %10 = vsyncpa [#allocation3], 0  ;;  %s14324_s0 = inlined_call_operand.hbm [shape: f32[8,768], index: 0, kind: input, shape index: {}]   ;;  %s14325_s1 = inlined_call_operand.hbm [shape: bf16[768,1024], index: 1, kind: input, shape index: {}]   ;;  %s14326_s2 = inlined_call_operand.hbm [shape: f32[1,1024], index: 2, kind: input, shape index: {}]   ;;  %s14327_s3 = inlined_call_operand.hbm [shape: bf16[1024,4096], index: 3, kind: input, shape index: {}]   ;;  %s14328_s4 = inlined_call_operand.hbm [shape: f32[1,4096], index: 4, kind: input, shape index: {}]   ;;  %s14329_s5 = inlined_call_operand.hbm [shape: bf16[8,4096], index: 5, kind: output, shape index: {}]  }
   0x1   :  { %11 = vsyncpa [#allocation6], 0 }
   0x2   :  { %12 = vsyncpa [#allocation9], 0 }
   0x3   :  { %14 = vsyncpa [#allocation9 + $0x1], 0 }
   0x4   :  { %15 = vsyncpa [#allocation4], 0 }
   0x5   :  { %17 = vsyncpa [#allocation4 + $0x1], 0  ;;  %s12734_s18 = smov 0   ;;  %s12736_s19 = smov 0  }
   0x6   :  { %s12738_s20 = smov 0   ;;  %s12740_s21 = smov 0  }
   0x7 LB: > { %s12755_s22 = sadd.s32 4294967295, %s12691_s21   ;;  %s10943_s23 = sadd.s32 4294967294, %s12691_s21   ;;  %s12691_s21 = sphi %s12740_s21, %s14366_s21   ;;  %s12687_s20 = sphi %s12738_s20, %s14365_s20   ;;  %s12683_s19 = sphi %s12736_s19, %s14364_s19   ;;  %s12679_s18 = sphi %s12734_s18, %s14363_s18  }
   0x8   : > { %s12759_s24 = sadd.s32 1, %s12691_s21   ;;  %s93_s25 = sadd.s32 1, %s12687_s20 }
   0x9   : > { %s90_s26 = ssub.s32 %s12691_s21, %s12759_s24  ;;  %p100_p0 = scmp.ne.s32.totalorder %s12687_s20, %s12683_s19 }
   0xa   : > { %p91_p1 = scmp.eq.s32.totalorder %s90_s26, 0  ;;  %p101_p2 = scmp.eq.s32.totalorder %s12691_s21, 0 }
   0xb   : > { %p106_p3 = scmp.ne.s32.totalorder %s12683_s19, %s12679_s18  ;;  %p14332_p4 = scmp.eq.s32.totalorder %s12755_s22, 0 }
   0xc   : > { %s12771_s27 = scalar_select %p91_p1, %s12687_s20, %s93_s25  }
   0xd   : > { %p12773_p5 = por %p101_p2, %p100_p0  ;;  %p12779_p6 = por %p14332_p4, %p106_p3 }
   0xe   : > { %14339 = sst [smem:[#allocation16_spill]] %s12771_s27  ;;  %p156_p7 = scmp.eq.s32.totalorder %s12755_s22, 1 }
   0xf   : > { %s14341_s29 = scalar_select %p12779_p6, 1, 0 }
  0x10   : > { %p162_p8 = scmp.eq.s32.totalorder %s10943_s23, 1  ;;  %p10944_p9 = scmp.ge.s32.totalorder %s12691_s21, 1 }
  0x11   : > { %p169_p10 = scmp.lt.s32.totalorder %s12691_s21, 3  ;;  %p12786_p11 = por %p156_p7, %p100_p0 }
  0x12   : > { %p12790_p12 = por %p162_p8, %p106_p3  ;;  %s12693_s8 = smov [#allocation5]  }
  0x13   : > { %s14342_s30 = scalar_select %p12786_p11, 1, 0 }
  0x14   : > { %s14343_s6 = scalar_select %p12790_p12, 1, 0 }
  0x15   : > { %p12794_p13 = pnand %p10944_p9, %p169_p10  ;;  %s192_s9 = sshll.u32 %s12693_s8, 4  ;;  %s193_s9 = int_to_ptr.vmem [resolvable:$true] %s192_s9 }
  0x16   : > { %p12436_p3 = scmp.lt.s32.totalorder %s12691_s21, 2  ;;  %s217_s11 = sand.u32 1, %s12691_s21  }
  0x17   : > { %s14344_s7 = scalar_select %p12794_p13, 1, 0 }
  0x18   : > { %p12412_p1 = pneg %p12794_p13  ;;  %s12496_s12 = scalar_lea.vmem %s193_s9, 49152 }
  0x19   : > { %p12497_p8 = scmp.ne.s32.totalorder %s193_s9, %s12496_s12  ;;  %p12504_p12 = scmp.lt.s32.totalorder %s193_s9, %s193_s9 }
  0x1a   : > { %p12802_p2 = pnand %p12412_p1, %p14332_p4  ;;  %p12505_p11 = scmp.lt.s32.totalorder %s12496_s12, %s12496_s12 }
  0x1c   : > { %p14333_p7 = pneg %p12802_p2  ;;  %p12506_p6 = por %p12505_p11, %p12504_p12 }
  0x1e   : > { %p12499_p9 = pnand %p12497_p8, %p14333_p7 }
  0x20   : > { %p12500_p10 = pneg %p12499_p9 }
  0x22   : > { %p12507_p1 = pnand %p12506_p6, %p12500_p10 }
  0x24   : > { %12510 = shalt.err (!%p12507_p1)
}
  0x25   : > { %s12694_s13 = smov 512   ;;  %s12695_s14 = smov 32  }
  0x26   : > { %12418 = dma.hbm_to_vmem [thread:$0]  (!%p12802_p2), %s14325_s1, 49152, %s193_s9, [#allocation6], %s12694_s13, %s12694_s13, %s12695_s14  }
  0x27   : > { %p12823_p8 = pnand %p12436_p3, %p12773_p5  ;;  %s14335_s23 = sand.u32 1, %s12687_s20  }
  0x28   : > { %s10949_s25 = sshll.u32 %s14335_s23, 13  ;;  %s12383_s26 = sshll.u32 %s12691_s21, 10 }
  0x29   : > { %s14346_s17 = scalar_select %p12823_p8, 1, 0 }
  0x2a   : > { %s12834_s27 = scalar_lea.hbm %s14327_s3, %s12383_s26  ;;  %s221_s28 = scalar_lea.vmem [#allocation8], %s10949_s25 }
  0x2b   : > { %s228_s9 = sshll.u32 %s221_s28, 4  ;;  %s12838_s13 = scalar_lea.sflag [#allocation9], %s217_s11  ;;  %s12836_s9 = int_to_ptr.vmem [resolvable:$true] %s228_s9 }
  0x2c   : > { %s12511_s14 = scalar_lea.hbm %s12834_s27, 131072  ;;  %p14336_p6 = pneg %p12823_p8 }
  0x2d   : > { %p12512_p5 = scmp.ne.s32.totalorder %s12834_s27, %s12511_s14  ;;  %s12516_s26 = scalar_lea.hbm %s14327_s3, 262144 }
  0x2e   : > { %p12517_p3 = scmp.lt.s32.totalorder %s12834_s27, %s14327_s3  ;;  %p12518_p9 = scmp.lt.s32.totalorder %s12516_s26, %s12511_s14 }
  0x2f   : > { %p12514_p11 = pnand %p14336_p6, %p12512_p5 }
  0x30   : > { %p12519_p10 = por %p12518_p9, %p12517_p3 }
  0x31   : > { %p12515_p12 = pneg %p12514_p11 }
  0x33   : > { %p12520_p1 = pnand %p12519_p10, %p12515_p12 }
  0x35   : > { %12523 = shalt.err (!%p12520_p1)
}
  0x36   : > { %s12524_s11 = scalar_lea.vmem %s12836_s9, 131072  ;;  %s12696_s25 = smov [#allocation8]  }
  0x37   : > { %p12525_p0 = scmp.ne.s32.totalorder %s12836_s9, %s12524_s11  ;;  %s12529_s28 = sshll.u32 %s12696_s25, 4  ;;  %s12530_s28 = int_to_ptr.vmem [resolvable:$false] %s12529_s28 }
  0x38   : > { %s12531_s15 = scalar_lea.vmem %s12530_s28, 262144  ;;  %p12532_p4 = scmp.lt.s32.totalorder %s12836_s9, %s12530_s28 }
  0x39   : > { %p12527_p5 = pnand %p12525_p0, %p14336_p6  ;;  %p12533_p7 = scmp.lt.s32.totalorder %s12531_s15, %s12524_s11 }
  0x3b   : > { %p12528_p11 = pneg %p12527_p5  ;;  %p12534_p13 = por %p12533_p7, %p12532_p4 }
  0x3d   : > { %p12535_p3 = pnand %p12534_p13, %p12528_p11 }
  0x3f   : > { %12538 = shalt.err (!%p12535_p3)
}
  0x40   : > { %s12697_s14 = smov 2048   ;;  %s12698_s16 = smov 1024  }
  0x41   : > { %s12699_s26 = smov 64   ;;  %s12700_s8 = smov [#allocation2]  }
  0x42   : > { %12425 = dma.hbm_to_vmem [thread:$0]  (!%p12823_p8), %s12834_s27, 131072, %s12836_s9, %s12838_s13, %s12697_s14, %s12698_s16, %s12699_s26  }
  0x43   : > { %s182_s12 = sshll.u32 %s12700_s8, 4  ;;  %s12701_s25 = smov [#allocation7]   ;;  %s183_s12 = int_to_ptr.vmem [resolvable:$true] %s182_s12 }
  0x44   : > { %s206_s23 = sshll.u32 %s12701_s25, 4  ;;  %s12550_s11 = scalar_lea.vmem %s183_s12, 768  ;;  %s207_s23 = int_to_ptr.vmem [resolvable:$true] %s206_s23 }
  0x45   : > { %p12551_p4 = scmp.ne.s32.totalorder %s183_s12, %s12550_s11  ;;  %p14347_p13 = pneg %p12802_p2 }
  0x46   : > { %p12558_p12 = scmp.lt.s32.totalorder %s183_s12, %s183_s12  ;;  %p12559_p9 = scmp.lt.s32.totalorder %s12550_s11, %s12550_s11 }
  0x47   : > { %p12553_p0 = pnand %p12551_p4, %p14347_p13 }
  0x48   : > { %p12560_p10 = por %p12559_p9, %p12558_p12 }
  0x49   : > { %p12554_p7 = pneg %p12553_p0 }
  0x4b   : > { %p12561_p1 = pnand %p12560_p10, %p12554_p7 }
  0x4d   : > { %12564 = shalt.err (!%p12561_p1)
}
  0x4e   : > { %12415 = dma.hbm_to_vmem [thread:$0]  (!%p12802_p2), %s14324_s0, 768, %s183_s12, [#allocation3]  }
  0x4f   : > { %s12576_s28 = scalar_lea.vmem %s207_s23, 128  ;;  %p14348_p11 = pmov %p14347_p13 }
  0x50   : > { %p12577_p5 = scmp.ne.s32.totalorder %s207_s23, %s12576_s28  ;;  %p12584_p4 = scmp.lt.s32.totalorder %s207_s23, %s207_s23 }
  0x51   : > { %p12585_p13 = scmp.lt.s32.totalorder %s12576_s28, %s12576_s28 }
  0x52   : > { %p12579_p3 = pnand %p12577_p5, %p14348_p11 }
  0x53   : > { %p12586_p0 = por %p12585_p13, %p12584_p4 }
  0x54   : > { %p12580_p6 = pneg %p12579_p3 }
  0x56   : > { %p12587_p8 = pnand %p12586_p0, %p12580_p6 }
  0x58   : > { %12590 = shalt.err (!%p12587_p8)
}
  0x59   : > { %12421 = dma.hbm_to_vmem [thread:$0]  (!%p12802_p2), %s14326_s2, 128, %s207_s23, [#allocation6]  }
  0x5a   : > { %s14349_s16 = sand.u32 1, %s12687_s20   ;;  %s12384_s8 = sshll.u32 %s12691_s21, 8 }
  0x5b   : > { %s10952_s26 = sshll.u32 %s14349_s16, 4  ;;  %s248_s11 = scalar_lea.hbm %s14328_s4, %s12384_s8 }
  0x5c   : > { %s242_s27 = scalar_lea.vmem [#allocation10], %s10952_s26  ;;  %s12591_s28 = scalar_lea.hbm %s248_s11, 256 }
  0x5d   : > { %s250_s9 = sshll.u32 %s242_s27, 4  ;;  %p12592_p8 = scmp.ne.s32.totalorder %s248_s11, %s12591_s28  ;;  %s251_s9 = int_to_ptr.vmem [resolvable:$true] %s250_s9 }
  0x5e   : > { %p14350_p6 = scmp.ne.s32.totalorder %s14346_s17, 0  ;;  %s12596_s23 = scalar_lea.hbm %s14328_s4, 512 }
  0x5f   : > { %p12597_p2 = scmp.lt.s32.totalorder %s248_s11, %s14328_s4  ;;  %p12598_p10 = scmp.lt.s32.totalorder %s12596_s23, %s12591_s28 }
  0x60   : > { %p14351_p7 = pneg %p14350_p6 }
  0x61   : > { %p12599_p1 = por %p12598_p10, %p12597_p2 }
  0x62   : > { %p12594_p12 = pnand %p12592_p8, %p14351_p7 }
  0x64   : > { %p12595_p9 = pneg %p12594_p12 }
  0x66   : > { %p12600_p5 = pnand %p12599_p1, %p12595_p9 }
  0x68   : > { %12603 = shalt.err (!%p12600_p5)
}
  0x69   : > { %s12604_s26 = scalar_lea.vmem %s251_s9, 256  ;;  %p14352_p3 = pmov %p14351_p7 }
  0x6a   : > { %p12605_p11 = scmp.ne.s32.totalorder %s251_s9, %s12604_s26  ;;  %s12702_s8 = smov [#allocation10]  }
  0x6b   : > { %s12609_s12 = sshll.u32 %s12702_s8, 4  ;;  %s12610_s12 = int_to_ptr.vmem [resolvable:$false] %s12609_s12 }
  0x6c   : > { %p12607_p4 = pnand %p12605_p11, %p14352_p3  ;;  %s12611_s25 = scalar_lea.vmem %s12610_s12, 512 }
  0x6d   : > { %p12612_p0 = scmp.lt.s32.totalorder %s251_s9, %s12610_s12  ;;  %p12613_p8 = scmp.lt.s32.totalorder %s12611_s25, %s12604_s26 }
  0x6e   : > { %p12608_p13 = pneg %p12607_p4 }
  0x6f   : > { %p12614_p7 = por %p12613_p8, %p12612_p0 }
  0x71   : > { %p12615_p12 = pnand %p12614_p7, %p12608_p13 }
  0x73   : > { %12618 = shalt.err (!%p12615_p12)
}
  0x74   : > { %12428 = dma.hbm_to_vmem [thread:$0]  (!%p14350_p6), %s248_s11, 256, %s251_s9, %s12838_s13  }
  0x75   : > { %p14353_p9 = scmp.ne.s32.totalorder %s14344_s7, 0 }
  0x76   : > { %p14354_p2 = scmp.eq.s32.totalorder (!%p14353_p9), %s12755_s22, 0 }
  0x77   : > { %259 = sbr.rel (%p14353_p9) target bundleno = 1835 (0x72b), region = 40 }
  0x7c   : > { %12662 = dma.done.wait (%p14354_p2), [#allocation3], 768   ;;  %p14355_p10 = pmov %p14354_p2 }
  0x7d   : > { %p14356_p1 = pmov %p14354_p2 }
  0x7e   : > { %12664 = vsyncadd (%p14355_p10), [#allocation3], 4294966528 }
  0x7f   : > { %12666 = dma.done.wait (%p14356_p1), [#allocation6], 49280   ;;  %p14357_p5 = pmov %p14356_p1 }
  0x80   : > { %s273_s17 = sand.u32 1, %s12755_s22   ;;  %s12914_s13 = sand.u32 1, %s12683_s19  }
  0x81   : > { %12668 = vsyncadd (%p14357_p5), [#allocation6], 4294918016  ;;  %s10959_s7 = sshll.u32 %s12914_s13, 13  ;;  %s274_s11 = scalar_lea.sflag [#allocation9], %s273_s17 }
  0x82   : > { %s12917_s27 = scalar_lea.vmem [#allocation8], %s10959_s7  ;;  %p14358_p6 = scmp.ne.s32.totalorder %s14341_s29, 0 }
  0x84   : > { %12670 = dma.done.wait (%p14358_p6), %s274_s11, 131328  }
  0x85   : > { %12672 = vsyncadd (%p14358_p6), %s274_s11, 4294835968  ;;  %v389_v0 = vld [vmem:[#allocation5 + $0x1c0] sm:$0xff]  ;;  %v322_v53 = vld [vmem:[#allocation2 + $0x8] sm:$0xff]  ;;  %s10960_s29 = sshll.u32 %s12914_s13, 4  ;;  %s10961_s28 = sshll.u32 %s12914_s13, 6 }
  0x86   : > { %v393_v1 = vld [vmem:[#allocation5 + $0x1e0] sm:$0xff]  ;;  %v324_v54 = vld [vmem:[#allocation2 + $0x18] sm:$0xff]  ;;  %v12923_v58 = vpack.c.bf16 %v322_v53, %v322_v53  ;;  %s13306_s9 = scalar_lea.vmem [#allocation10], %s10960_s29  ;;  %s13496_s10 = scalar_lea.vmem [#allocation11], %s10961_s28 }
  0x87   : > { %v517_v2 = vld [vmem:[#allocation5 + $0x5c0] sm:$0xff]  ;;  %v11019_v3 = vcombine.high %v389_v0, %v393_v1  ;;  %v11018_v5 = vcombine.low %v389_v0, %v393_v1  ;;  %v12925_v59 = vpack.c.bf16 %v324_v54, %v324_v54  ;;  %s12393_s15 = sshll.u32 %s12755_s22, 10  ;;  %s10822_s23 = sshll.u32 %s13496_s10, 4  ;;  %s10823_s23 = int_to_ptr.vmem [resolvable:$true] %s10822_s23 }
  0x88   : > { %v521_v4 = vld [vmem:[#allocation5 + $0x5e0] sm:$0xff]  ;;  %2711 = vmatprep.mubr.bf16.mxu0 %v12923_v58  ;;  %s10820_s26 = scalar_lea.hbm %s14329_s5, %s12393_s15  ;;  %s10808_s8 = scalar_lea.sflag [#allocation4], %s12914_s13 }
  0x89   : > { %v381_v6 = vld [vmem:[#allocation5 + $0x180] sm:$0xff]  ;;  %v11147_v8 = vcombine.high %v517_v2, %v521_v4  ;;  %v11146_v9 = vcombine.low %v517_v2, %v521_v4  ;;  %2679 = vmatprep.subr.bf16.mxu0 %v11019_v3  ;;  %2752 = vmatprep.mubr.bf16.mxu1 %v12925_v59  ;;  %s12619_s12 = scalar_lea.vmem %s10823_s23, 1024  ;;  %p14359_p3 = scmp.ne.s32.totalorder %s14342_s30, 0 }
  0x8a   : > { %v385_v7 = vld [vmem:[#allocation5 + $0x1a0] sm:$0xff]  ;;  %2680 = vmatpush1.bf16.msra.mxu0 %v11018_v5  ;;  %p12620_p11 = scmp.ne.s32.totalorder %s10823_s23, %s12619_s12  ;;  %s12703_s25 = smov [#allocation11]  }
  0x8b   : > { %v11011_v10 = vcombine.high %v381_v6, %v385_v7  ;;  %v509_v11 = vld [vmem:[#allocation5 + $0x580] sm:$0xff]  ;;  %2720 = vmatprep.subr.bf16.mxu1 %v11147_v8  ;;  %v11010_v18 = vcombine.low %v381_v6, %v385_v7  ;;  %s12623_s17 = sshll.u32 %s12703_s25, 4  ;;  %s12624_s17 = int_to_ptr.vmem [resolvable:$false] %s12623_s17 }
  0x8c   : > { %v513_v12 = vld [vmem:[#allocation5 + $0x5a0] sm:$0xff]  ;;  %2721 = vmatpush1.bf16.msra.mxu1 %v11146_v9  ;;  %p12621_p4 = pnand %p12620_p11, %p14359_p3  ;;  %s12625_s22 = scalar_lea.vmem %s12624_s17, 2048 }
  0x8d   : > { %v373_v13 = vld [vmem:[#allocation5 + $0x140] sm:$0xff]  ;;  %v11139_v14 = vcombine.high %v509_v11, %v513_v12  ;;  %2681 = vmatprep.subr.bf16.mxu0 %v11011_v10  ;;  %v11138_v19 = vcombine.low %v509_v11, %v513_v12  ;;  %p12626_p0 = scmp.lt.s32.totalorder %s10823_s23, %s12624_s17  ;;  %p12627_p8 = scmp.lt.s32.totalorder %s12625_s22, %s12619_s12 }
  0x8e   : > { %v377_v15 = vld [vmem:[#allocation5 + $0x160] sm:$0xff]  ;;  %2682 = vmatpush1.bf16.msra.mxu0 %v11010_v18  ;;  %p12622_p13 = pneg %p12621_p4 }
  0x8f   : > { %v501_v16 = vld [vmem:[#allocation5 + $0x540] sm:$0xff]  ;;  %v11003_v20 = vcombine.high %v373_v13, %v377_v15  ;;  %2722 = vmatprep.subr.bf16.mxu1 %v11139_v14  ;;  %v11002_v26 = vcombine.low %v373_v13, %v377_v15  ;;  %p12628_p7 = por %p12627_p8, %p12626_p0 }
  0x90   : > { %v505_v17 = vld [vmem:[#allocation5 + $0x560] sm:$0xff]  ;;  %2723 = vmatpush1.bf16.msra.mxu1 %v11138_v19 }
  0x91   : > { %v11131_v21 = vcombine.high %v501_v16, %v505_v17  ;;  %v365_v22 = vld [vmem:[#allocation5 + $0x100] sm:$0xff]  ;;  %2683 = vmatprep.subr.bf16.mxu0 %v11003_v20  ;;  %v11130_v27 = vcombine.low %v501_v16, %v505_v17  ;;  %p12629_p12 = pnand %p12628_p7, %p12622_p13 }
  0x92   : > { %v369_v23 = vld [vmem:[#allocation5 + $0x120] sm:$0xff]  ;;  %2684 = vmatpush1.bf16.msra.mxu0 %v11002_v26 }
  0x93   : > { %v493_v24 = vld [vmem:[#allocation5 + $0x500] sm:$0xff]  ;;  %v10995_v28 = vcombine.high %v365_v22, %v369_v23  ;;  %2724 = vmatprep.subr.bf16.mxu1 %v11131_v21  ;;  %v10994_v34 = vcombine.low %v365_v22, %v369_v23 }
  0x94   : > { %v497_v25 = vld [vmem:[#allocation5 + $0x520] sm:$0xff]  ;;  %2725 = vmatpush1.bf16.msra.mxu1 %v11130_v27 }
  0x95   : > { %v11123_v29 = vcombine.high %v493_v24, %v497_v25  ;;  %v357_v30 = vld [vmem:[#allocation5 + $0xc0] sm:$0xff]  ;;  %2685 = vmatprep.subr.bf16.mxu0 %v10995_v28  ;;  %v11122_v35 = vcombine.low %v493_v24, %v497_v25 }
  0x96   : > { %v361_v31 = vld [vmem:[#allocation5 + $0xe0] sm:$0xff]  ;;  %2686 = vmatpush1.bf16.msra.mxu0 %v10994_v34 }
  0x97   : > { %v485_v32 = vld [vmem:[#allocation5 + $0x4c0] sm:$0xff]  ;;  %v10987_v36 = vcombine.high %v357_v30, %v361_v31  ;;  %2726 = vmatprep.subr.bf16.mxu1 %v11123_v29  ;;  %v10986_v42 = vcombine.low %v357_v30, %v361_v31 }
  0x98   : > { %v489_v33 = vld [vmem:[#allocation5 + $0x4e0] sm:$0xff]  ;;  %2727 = vmatpush1.bf16.msra.mxu1 %v11122_v35 }
  0x99   : > { %v11115_v37 = vcombine.high %v485_v32, %v489_v33  ;;  %v349_v38 = vld [vmem:[#allocation5 + $0x80] sm:$0xff]  ;;  %2687 = vmatprep.subr.bf16.mxu0 %v10987_v36  ;;  %v11114_v43 = vcombine.low %v485_v32, %v489_v33 }
  0x9a   : > { %v353_v39 = vld [vmem:[#allocation5 + $0xa0] sm:$0xff]  ;;  %2688 = vmatpush1.bf16.msra.mxu0 %v10986_v42 }
  0x9b   : > { %v477_v40 = vld [vmem:[#allocation5 + $0x480] sm:$0xff]  ;;  %v10979_v44 = vcombine.high %v349_v38, %v353_v39  ;;  %2728 = vmatprep.subr.bf16.mxu1 %v11115_v37  ;;  %v10978_v50 = vcombine.low %v349_v38, %v353_v39 }
  0x9c   : > { %v481_v41 = vld [vmem:[#allocation5 + $0x4a0] sm:$0xff]  ;;  %2729 = vmatpush1.bf16.msra.mxu1 %v11114_v43 }
  0x9d   : > { %v11107_v45 = vcombine.high %v477_v40, %v481_v41  ;;  %v341_v46 = vld [vmem:[#allocation5 + $0x40] sm:$0xff]  ;;  %2689 = vmatprep.subr.bf16.mxu0 %v10979_v44  ;;  %v11106_v51 = vcombine.low %v477_v40, %v481_v41 }
  0x9e   : > { %v345_v47 = vld [vmem:[#allocation5 + $0x60] sm:$0xff]  ;;  %2690 = vmatpush1.bf16.msra.mxu0 %v10978_v50 }
  0x9f   : > { %v469_v48 = vld [vmem:[#allocation5 + $0x440] sm:$0xff]  ;;  %v10971_v52 = vcombine.high %v341_v46, %v345_v47  ;;  %2730 = vmatprep.subr.bf16.mxu1 %v11107_v45  ;;  %v10970_v62 = vcombine.low %v341_v46, %v345_v47 }
  0xa0   : > { %v473_v49 = vld [vmem:[#allocation5 + $0x460] sm:$0xff]  ;;  %2731 = vmatpush1.bf16.msra.mxu1 %v11106_v51 }
  0xa1   : > { %v11099_v55 = vcombine.high %v469_v48, %v473_v49  ;;  %v333_v56 = vld [vmem:[#allocation5] sm:$0xff]  ;;  %2691 = vmatprep.subr.bf16.mxu0 %v10971_v52  ;;  %v11098_v63 = vcombine.low %v469_v48, %v473_v49 }
  0xa2   : > { %v337_v57 = vld [vmem:[#allocation5 + $0x20] sm:$0xff]  ;;  %2692 = vmatpush1.bf16.msra.mxu0 %v10970_v62 }
  0xa3   : > { %v461_v60 = vld [vmem:[#allocation5 + $0x400] sm:$0xff]  ;;  %v10963_v0 = vcombine.high %v333_v56, %v337_v57  ;;  %2732 = vmatprep.subr.bf16.mxu1 %v11099_v55  ;;  %v10962_v6 = vcombine.low %v333_v56, %v337_v57 }
  0xa4   : > { %v465_v61 = vld [vmem:[#allocation5 + $0x420] sm:$0xff]  ;;  %2733 = vmatpush1.bf16.msra.mxu1 %v11098_v63 }
  0xa5   : > { %v11091_v1 = vcombine.high %v461_v60, %v465_v61  ;;  %v453_v2 = vld [vmem:[#allocation5 + $0x3c0] sm:$0xff]  ;;  %2693 = vmatprep.subr.bf16.mxu0 %v10963_v0  ;;  %v11090_v7 = vcombine.low %v461_v60, %v465_v61 }
  0xa6   : > { %v457_v3 = vld [vmem:[#allocation5 + $0x3e0] sm:$0xff]  ;;  %2694 = vmatpush1.bf16.msra.mxu0 %v10962_v6  ;;  %v390_v6 = vld [vmem:[#allocation5 + $0x1c8] sm:$0xff] }
  0xa7   : > { %v581_v4 = vld [vmem:[#allocation5 + $0x7c0] sm:$0xff]  ;;  %v11083_v8 = vcombine.high %v453_v2, %v457_v3  ;;  %2734 = vmatprep.subr.bf16.mxu1 %v11091_v1  ;;  %v11082_v14 = vcombine.low %v453_v2, %v457_v3 }
  0xa8   : > { %v585_v5 = vld [vmem:[#allocation5 + $0x7e0] sm:$0xff]  ;;  %2735 = vmatpush1.bf16.msra.mxu1 %v11090_v7  ;;  %v394_v7 = vld [vmem:[#allocation5 + $0x1e8] sm:$0xff] }
  0xa9   : > { %v11211_v9 = vcombine.high %v581_v4, %v585_v5  ;;  %v445_v10 = vld [vmem:[#allocation5 + $0x380] sm:$0xff]  ;;  %2695 = vmatprep.subr.bf16.mxu0 %v11083_v8  ;;  %v11210_v15 = vcombine.low %v581_v4, %v585_v5 }
  0xaa   : > { %v449_v11 = vld [vmem:[#allocation5 + $0x3a0] sm:$0xff]  ;;  %2696 = vmatpush2.bf16.msra.mxu0 %v11082_v14 }
  0xab   : > { %v573_v12 = vld [vmem:[#allocation5 + $0x780] sm:$0xff]  ;;  %v11075_v16 = vcombine.high %v445_v10, %v449_v11  ;;  %2736 = vmatprep.subr.bf16.mxu1 %v11211_v9  ;;  %v11074_v22 = vcombine.low %v445_v10, %v449_v11  ;;  %v321_v9 = vld [vmem:[#allocation2] sm:$0xff] }
  0xac   : > { %v577_v13 = vld [vmem:[#allocation5 + $0x7a0] sm:$0xff]  ;;  %2737 = vmatpush2.bf16.msra.mxu1 %v11210_v15 }
  0xad   : > { %v11203_v17 = vcombine.high %v573_v12, %v577_v13  ;;  %v437_v18 = vld [vmem:[#allocation5 + $0x340] sm:$0xff]  ;;  %2697 = vmatprep.subr.bf16.mxu0 %v11075_v16  ;;  %v11202_v23 = vcombine.low %v573_v12, %v577_v13  ;;  %v11021_v13 = vcombine.high %v390_v6, %v394_v7  ;;  %v12929_v16 = vpack.c.bf16 %v321_v9, %v321_v9 }
  0xae   : > { %v441_v19 = vld [vmem:[#allocation5 + $0x360] sm:$0xff]  ;;  %2698 = vmatpush2.bf16.msra.mxu0 %v11074_v22  ;;  %v11020_v22 = vcombine.low %v390_v6, %v394_v7  ;;  %v334_v6 = vld [vmem:[#allocation5 + $0x8] sm:$0xff] }
  0xaf   : > { %v565_v20 = vld [vmem:[#allocation5 + $0x740] sm:$0xff]  ;;  %v11067_v24 = vcombine.high %v437_v18, %v441_v19  ;;  %2738 = vmatprep.subr.bf16.mxu1 %v11203_v17  ;;  %v11066_v30 = vcombine.low %v437_v18, %v441_v19  ;;  %v382_v17 = vld [vmem:[#allocation5 + $0x188] sm:$0xff]  ;;  %v326_v19 = vld [vmem:[#allocation2 + $0x28] sm:$0xff] }
  0xb0   : > { %v569_v21 = vld [vmem:[#allocation5 + $0x760] sm:$0xff]  ;;  %2739 = vmatpush2.bf16.msra.mxu1 %v11202_v23  ;;  %v386_v18 = vld [vmem:[#allocation5 + $0x1a8] sm:$0xff] }
  0xb1   : > { %v11195_v25 = vcombine.high %v565_v20, %v569_v21  ;;  %v429_v26 = vld [vmem:[#allocation5 + $0x300] sm:$0xff]  ;;  %2699 = vmatprep.subr.bf16.mxu0 %v11067_v24  ;;  %v11194_v31 = vcombine.low %v565_v20, %v569_v21  ;;  %v11013_v24 = vcombine.high %v382_v17, %v386_v18  ;;  %v338_v7 = vld [vmem:[#allocation5 + $0x28] sm:$0xff] }
  0xb2   : > { %v433_v27 = vld [vmem:[#allocation5 + $0x320] sm:$0xff]  ;;  %2700 = vmatpush2.bf16.msra.mxu0 %v11066_v30 }
  0xb3   : > { %v557_v28 = vld [vmem:[#allocation5 + $0x700] sm:$0xff]  ;;  %v11059_v32 = vcombine.high %v429_v26, %v433_v27  ;;  %2740 = vmatprep.subr.bf16.mxu1 %v11195_v25  ;;  %v11058_v38 = vcombine.low %v429_v26, %v433_v27  ;;  %v12933_v27 = vpack.c.bf16 %v326_v19, %v326_v19 }
  0xb4   : > { %v561_v29 = vld [vmem:[#allocation5 + $0x720] sm:$0xff]  ;;  %2741 = vmatpush2.bf16.msra.mxu1 %v11194_v31  ;;  %v11012_v31 = vcombine.low %v382_v17, %v386_v18  ;;  %v10964_v18 = vcombine.low %v334_v6, %v338_v7 }
  0xb5   : > { %v11187_v33 = vcombine.high %v557_v28, %v561_v29  ;;  %v421_v34 = vld [vmem:[#allocation5 + $0x2c0] sm:$0xff]  ;;  %2701 = vmatprep.subr.bf16.mxu0 %v11059_v32  ;;  %v11186_v39 = vcombine.low %v557_v28, %v561_v29  ;;  %v374_v28 = vld [vmem:[#allocation5 + $0x148] sm:$0xff] }
  0xb6   : > { %v425_v35 = vld [vmem:[#allocation5 + $0x2e0] sm:$0xff]  ;;  %2702 = vmatpush2.bf16.msra.mxu0 %v11058_v38  ;;  %v378_v29 = vld [vmem:[#allocation5 + $0x168] sm:$0xff] }
  0xb7   : > { %v549_v36 = vld [vmem:[#allocation5 + $0x6c0] sm:$0xff]  ;;  %v11051_v40 = vcombine.high %v421_v34, %v425_v35  ;;  %2742 = vmatprep.subr.bf16.mxu1 %v11187_v33  ;;  %v11050_v46 = vcombine.low %v421_v34, %v425_v35  ;;  %v11005_v33 = vcombine.high %v374_v28, %v378_v29 }
  0xb8   : > { %v553_v37 = vld [vmem:[#allocation5 + $0x6e0] sm:$0xff]  ;;  %2743 = vmatpush2.bf16.msra.mxu1 %v11186_v39  ;;  %v11004_v39 = vcombine.low %v374_v28, %v378_v29 }
  0xb9   : > { %v11179_v41 = vcombine.high %v549_v36, %v553_v37  ;;  %v413_v42 = vld [vmem:[#allocation5 + $0x280] sm:$0xff]  ;;  %2703 = vmatprep.subr.bf16.mxu0 %v11051_v40  ;;  %v11178_v47 = vcombine.low %v549_v36, %v553_v37  ;;  %v366_v36 = vld [vmem:[#allocation5 + $0x108] sm:$0xff] }
  0xba   : > { %v417_v43 = vld [vmem:[#allocation5 + $0x2a0] sm:$0xff]  ;;  %2704 = vmatpush2.bf16.msra.mxu0 %v11050_v46  ;;  %v370_v37 = vld [vmem:[#allocation5 + $0x128] sm:$0xff] }
  0xbb   : > { %v541_v44 = vld [vmem:[#allocation5 + $0x680] sm:$0xff]  ;;  %v11043_v48 = vcombine.high %v413_v42, %v417_v43  ;;  %2744 = vmatprep.subr.bf16.mxu1 %v11179_v41  ;;  %v11042_v54 = vcombine.low %v413_v42, %v417_v43  ;;  %v10997_v41 = vcombine.high %v366_v36, %v370_v37 }
  0xbc   : > { %v545_v45 = vld [vmem:[#allocation5 + $0x6a0] sm:$0xff]  ;;  %2745 = vmatpush2.bf16.msra.mxu1 %v11178_v47  ;;  %v10996_v47 = vcombine.low %v366_v36, %v370_v37 }
  0xbd   : > { %v11171_v49 = vcombine.high %v541_v44, %v545_v45  ;;  %v405_v50 = vld [vmem:[#allocation5 + $0x240] sm:$0xff]  ;;  %2705 = vmatprep.subr.bf16.mxu0 %v11043_v48  ;;  %v11170_v55 = vcombine.low %v541_v44, %v545_v45  ;;  %v358_v44 = vld [vmem:[#allocation5 + $0xc8] sm:$0xff] }
  0xbe   : > { %v409_v51 = vld [vmem:[#allocation5 + $0x260] sm:$0xff]  ;;  %2706 = vmatpush2.bf16.msra.mxu0 %v11042_v54  ;;  %v362_v45 = vld [vmem:[#allocation5 + $0xe8] sm:$0xff] }
  0xbf   : > { %v533_v52 = vld [vmem:[#allocation5 + $0x640] sm:$0xff]  ;;  %v11035_v56 = vcombine.high %v405_v50, %v409_v51  ;;  %2746 = vmatprep.subr.bf16.mxu1 %v11171_v49  ;;  %v11034_v0 = vcombine.low %v405_v50, %v409_v51  ;;  %v10989_v49 = vcombine.high %v358_v44, %v362_v45 }
  0xc0   : > { %v537_v53 = vld [vmem:[#allocation5 + $0x660] sm:$0xff]  ;;  %2747 = vmatpush2.bf16.msra.mxu1 %v11170_v55  ;;  %v10988_v55 = vcombine.low %v358_v44, %v362_v45 }
  0xc1   : > { %v11163_v57 = vcombine.high %v533_v52, %v537_v53  ;;  %v397_v60 = vld [vmem:[#allocation5 + $0x200] sm:$0xff]  ;;  %2707 = vmatprep.subr.bf16.mxu0 %v11035_v56  ;;  %v11162_v1 = vcombine.low %v533_v52, %v537_v53  ;;  %v350_v52 = vld [vmem:[#allocation5 + $0x88] sm:$0xff] }
  0xc2   : > { %v401_v61 = vld [vmem:[#allocation5 + $0x220] sm:$0xff]  ;;  %2708 = vmatpush2.bf16.msra.mxu0 %v11034_v0  ;;  %v354_v53 = vld [vmem:[#allocation5 + $0xa8] sm:$0xff] }
  0xc3   : > { %v525_v62 = vld [vmem:[#allocation5 + $0x600] sm:$0xff]  ;;  %v11027_v2 = vcombine.high %v397_v60, %v401_v61  ;;  %2748 = vmatprep.subr.bf16.mxu1 %v11163_v57  ;;  %v11026_v8 = vcombine.low %v397_v60, %v401_v61  ;;  %v10981_v57 = vcombine.high %v350_v52, %v354_v53 }
  0xc4   : > { %v529_v63 = vld [vmem:[#allocation5 + $0x620] sm:$0xff]  ;;  %2749 = vmatpush2.bf16.msra.mxu1 %v11162_v1  ;;  %v10980_v1 = vcombine.low %v350_v52, %v354_v53 }
  0xc5   : > { %v11155_v3 = vcombine.high %v525_v62, %v529_v63  ;;  %v645_v4 = vld [vmem:[#allocation5 + $0x9c0] sm:$0xff]  ;;  %2709 = vmatprep.subr.bf16.mxu0 %v11027_v2  ;;  %v11154_v10 = vcombine.low %v525_v62, %v529_v63  ;;  %v342_v62 = vld [vmem:[#allocation5 + $0x48] sm:$0xff] }
  0xc6   : > { %v649_v5 = vld [vmem:[#allocation5 + $0x9e0] sm:$0xff]  ;;  %2710 = vmatpush2.bf16.msra.mxu0 %v11026_v8  ;;  %v346_v63 = vld [vmem:[#allocation5 + $0x68] sm:$0xff] }
  0xc7   : > { %v323_v11 = vld [vmem:[#allocation2 + $0x10] sm:$0xff]  ;;  %v11275_v12 = vcombine.high %v645_v4, %v649_v5  ;;  %2750 = vmatprep.subr.bf16.mxu1 %v11155_v3  ;;  %v11274_v21 = vcombine.low %v645_v4, %v649_v5  ;;  %v10973_v3 = vcombine.high %v342_v62, %v346_v63  ;;  %v10972_v9 = vcombine.low %v342_v62, %v346_v63 }
  0xc8   : > { %v637_v14 = vld [vmem:[#allocation5 + $0x980] sm:$0xff]  ;;  %v12931_v20 = vpack.c.bf16 %v323_v11, %v323_v11  ;;  %2751 = vmatpush2.bf16.msra.mxu1 %v11154_v10  ;;  %v10965_v11 = vcombine.high %v334_v6, %v338_v7 }
  0xc9   : > { %v641_v15 = vld [vmem:[#allocation5 + $0x9a0] sm:$0xff]  ;;  %2761 = vmatprep.subr.bf16.mxu0 %v11275_v12  ;;  %2802 = vmatprep.subr.bf16.mxu1 %v11021_v13 }
  0xca   : > { %v11267_v23 = vcombine.high %v637_v14, %v641_v15  ;;  %v629_v25 = vld [vmem:[#allocation5 + $0x940] sm:$0xff]  ;;  %2712 = vmatmul.mubr.bf16.vlgmr.msra.gmra.mxu0 %v12929_v16  ;;  %v11266_v30 = vcombine.low %v637_v14, %v641_v15  ;;  %v454_v14 = vld [vmem:[#allocation5 + $0x3c8] sm:$0xff] }
  0xcb   : > { %v633_v26 = vld [vmem:[#allocation5 + $0x960] sm:$0xff]  ;;  %2753 = vmatmul.mubr.bf16.vlgmr.msra.gmra.mxu1 %v12931_v20  ;;  %2762 = vmatpush1.bf16.msra.mxu0 %v11274_v21  ;;  %v458_v15 = vld [vmem:[#allocation5 + $0x3e8] sm:$0xff] }
  0xcc   : > { %2803 = vmatpush1.bf16.msra.mxu1 %v11020_v22  ;;  %2763 = vmatprep.subr.bf16.mxu0 %v11267_v23  ;;  %v11259_v32 = vcombine.high %v629_v25, %v633_v26  ;;  %v621_v34 = vld [vmem:[#allocation5 + $0x900] sm:$0xff]  ;;  %v11258_v38 = vcombine.low %v629_v25, %v633_v26  ;;  %v11085_v21 = vcombine.high %v454_v14, %v458_v15  ;;  %v450_v25 = vld [vmem:[#allocation5 + $0x3a8] sm:$0xff] }
  0xcd   : > { %2804 = vmatprep.subr.bf16.mxu1 %v11013_v24  ;;  %v625_v35 = vld [vmem:[#allocation5 + $0x920] sm:$0xff]  ;;  %2793 = vmatprep.mubr.bf16.mxu0 %v12933_v27  ;;  %v446_v24 = vld [vmem:[#allocation5 + $0x388] sm:$0xff]  ;;  %v11084_v28 = vcombine.low %v454_v14, %v458_v15 }
  0xce   : > { %2834 = vmatprep.mubr.bf16.mxu1 %v12923_v58  ;;  %v11251_v40 = vcombine.high %v621_v34, %v625_v35  ;;  %v613_v42 = vld [vmem:[#allocation5 + $0x8c0] sm:$0xff]  ;;  %v11250_v46 = vcombine.low %v621_v34, %v625_v35  ;;  %v442_v34 = vld [vmem:[#allocation5 + $0x368] sm:$0xff]  ;;  %v11076_v36 = vcombine.low %v446_v24, %v450_v25 }
  0xcf   : > { %2764 = vmatpush1.bf16.msra.mxu0 %v11266_v30  ;;  %v617_v43 = vld [vmem:[#allocation5 + $0x8e0] sm:$0xff]  ;;  %v11077_v30 = vcombine.high %v446_v24, %v450_v25  ;;  %v325_v24 = vld [vmem:[#allocation2 + $0x20] sm:$0xff] }
  0xd0   : > { %2805 = vmatpush1.bf16.msra.mxu1 %v11012_v31  ;;  %2765 = vmatprep.subr.bf16.mxu0 %v11259_v32  ;;  %v11243_v48 = vcombine.high %v613_v42, %v617_v43  ;;  %v605_v50 = vld [vmem:[#allocation5 + $0x880] sm:$0xff]  ;;  %v11242_v54 = vcombine.low %v613_v42, %v617_v43  ;;  %v434_v42 = vld [vmem:[#allocation5 + $0x328] sm:$0xff] }
  0xd1   : > { %2806 = vmatprep.subr.bf16.mxu1 %v11005_v33  ;;  %v609_v51 = vld [vmem:[#allocation5 + $0x8a0] sm:$0xff]  ;;  %v438_v33 = vld [vmem:[#allocation5 + $0x348] sm:$0xff] }
  0xd2   : > { %v11235_v56 = vcombine.high %v605_v50, %v609_v51  ;;  %v597_v60 = vld [vmem:[#allocation5 + $0x840] sm:$0xff]  ;;  %v11234_v0 = vcombine.low %v605_v50, %v609_v51  ;;  %v11068_v44 = vcombine.low %v438_v33, %v442_v34  ;;  %v426_v50 = vld [vmem:[#allocation5 + $0x2e8] sm:$0xff] }
  0xd3   : > { %2766 = vmatpush1.bf16.msra.mxu0 %v11258_v38  ;;  %v601_v61 = vld [vmem:[#allocation5 + $0x860] sm:$0xff]  ;;  %v11069_v38 = vcombine.high %v438_v33, %v442_v34  ;;  %v642_v33 = vld [vmem:[#allocation5 + $0x9a8] sm:$0xff] }
  0xd4   : > { %2807 = vmatpush1.bf16.msra.mxu1 %v11004_v39  ;;  %2767 = vmatprep.subr.bf16.mxu0 %v11251_v40  ;;  %v11227_v2 = vcombine.high %v597_v60, %v601_v61  ;;  %v589_v4 = vld [vmem:[#allocation5 + $0x800] sm:$0xff]  ;;  %v11226_v8 = vcombine.low %v597_v60, %v601_v61  ;;  %v418_v60 = vld [vmem:[#allocation5 + $0x2a8] sm:$0xff] }
  0xd5   : > { %2808 = vmatprep.subr.bf16.mxu1 %v10997_v41  ;;  %v593_v5 = vld [vmem:[#allocation5 + $0x820] sm:$0xff]  ;;  %v430_v41 = vld [vmem:[#allocation5 + $0x308] sm:$0xff] }
  0xd6   : > { %v11219_v10 = vcombine.high %v589_v4, %v593_v5  ;;  %v709_v12 = vld [vmem:[#allocation5 + $0xbc0] sm:$0xff]  ;;  %v11218_v17 = vcombine.low %v589_v4, %v593_v5  ;;  %v11060_v52 = vcombine.low %v430_v41, %v434_v42  ;;  %v410_v4 = vld [vmem:[#allocation5 + $0x268] sm:$0xff] }
  0xd7   : > { %2768 = vmatpush1.bf16.msra.mxu0 %v11250_v46  ;;  %v713_v13 = vld [vmem:[#allocation5 + $0xbe0] sm:$0xff]  ;;  %v11061_v46 = vcombine.high %v430_v41, %v434_v42  ;;  %v634_v41 = vld [vmem:[#allocation5 + $0x968] sm:$0xff] }
  0xd8   : > { %2809 = vmatpush1.bf16.msra.mxu1 %v10996_v47  ;;  %2769 = vmatprep.subr.bf16.mxu0 %v11243_v48  ;;  %v11339_v19 = vcombine.high %v709_v12, %v713_v13  ;;  %v701_v22 = vld [vmem:[#allocation5 + $0xb80] sm:$0xff]  ;;  %v11338_v26 = vcombine.low %v709_v12, %v713_v13  ;;  %v402_v12 = vld [vmem:[#allocation5 + $0x228] sm:$0xff] }
  0xd9   : > { %2810 = vmatprep.subr.bf16.mxu1 %v10989_v49  ;;  %v705_v23 = vld [vmem:[#allocation5 + $0xba0] sm:$0xff]  ;;  %v422_v49 = vld [vmem:[#allocation5 + $0x2c8] sm:$0xff] }
  0xda   : > { %v11331_v29 = vcombine.high %v701_v22, %v705_v23  ;;  %v693_v31 = vld [vmem:[#allocation5 + $0xb40] sm:$0xff]  ;;  %v11330_v35 = vcombine.low %v701_v22, %v705_v23  ;;  %v11052_v62 = vcombine.low %v422_v49, %v426_v50  ;;  %v650_v22 = vld [vmem:[#allocation5 + $0x9e8] sm:$0xff] }
  0xdb   : > { %2770 = vmatpush1.bf16.msra.mxu0 %v11242_v54  ;;  %v697_v32 = vld [vmem:[#allocation5 + $0xb60] sm:$0xff]  ;;  %v11053_v54 = vcombine.high %v422_v49, %v426_v50  ;;  %v626_v49 = vld [vmem:[#allocation5 + $0x928] sm:$0xff] }
  0xdc   : > { %2811 = vmatpush1.bf16.msra.mxu1 %v10988_v55  ;;  %2771 = vmatprep.subr.bf16.mxu0 %v11235_v56  ;;  %v11323_v37 = vcombine.high %v693_v31, %v697_v32  ;;  %v685_v39 = vld [vmem:[#allocation5 + $0xb00] sm:$0xff]  ;;  %v11322_v43 = vcombine.low %v693_v31, %v697_v32  ;;  %v12939_v31 = vpack.c.bf16 %v325_v24, %v325_v24  ;;  %v638_v32 = vld [vmem:[#allocation5 + $0x988] sm:$0xff] }
  0xdd   : > { %2812 = vmatprep.subr.bf16.mxu1 %v10981_v57  ;;  %v689_v40 = vld [vmem:[#allocation5 + $0xb20] sm:$0xff]  ;;  %v414_v57 = vld [vmem:[#allocation5 + $0x288] sm:$0xff] }
  0xde   : > { %v11315_v45 = vcombine.high %v685_v39, %v689_v40  ;;  %v677_v47 = vld [vmem:[#allocation5 + $0xac0] sm:$0xff]  ;;  %v11314_v51 = vcombine.low %v685_v39, %v689_v40  ;;  %v11044_v6 = vcombine.low %v414_v57, %v418_v60  ;;  %v506_v39 = vld [vmem:[#allocation5 + $0x568] sm:$0xff] }
  0xdf   : > { %2772 = vmatpush1.bf16.msra.mxu0 %v11234_v0  ;;  %v681_v48 = vld [vmem:[#allocation5 + $0xae0] sm:$0xff]  ;;  %v11045_v0 = vcombine.high %v414_v57, %v418_v60  ;;  %v630_v40 = vld [vmem:[#allocation5 + $0x948] sm:$0xff] }
  0xe0   : > { %2813 = vmatpush1.bf16.msra.mxu1 %v10980_v1  ;;  %2773 = vmatprep.subr.bf16.mxu0 %v11227_v2  ;;  %v11307_v53 = vcombine.high %v677_v47, %v681_v48  ;;  %v669_v55 = vld [vmem:[#allocation5 + $0xa80] sm:$0xff]  ;;  %v11306_v61 = vcombine.low %v677_v47, %v681_v48  ;;  %v498_v47 = vld [vmem:[#allocation5 + $0x528] sm:$0xff] }
  0xe1   : > { %2814 = vmatprep.subr.bf16.mxu1 %v10973_v3  ;;  %v673_v56 = vld [vmem:[#allocation5 + $0xaa0] sm:$0xff]  ;;  %v406_v3 = vld [vmem:[#allocation5 + $0x248] sm:$0xff] }
  0xe2   : > { %v11299_v63 = vcombine.high %v669_v55, %v673_v56  ;;  %v661_v1 = vld [vmem:[#allocation5 + $0xa40] sm:$0xff]  ;;  %v11298_v5 = vcombine.low %v669_v55, %v673_v56  ;;  %v11036_v14 = vcombine.low %v406_v3, %v410_v4  ;;  %v622_v48 = vld [vmem:[#allocation5 + $0x908] sm:$0xff] }
  0xe3   : > { %2774 = vmatpush1.bf16.msra.mxu0 %v11226_v8  ;;  %v665_v2 = vld [vmem:[#allocation5 + $0xa60] sm:$0xff]  ;;  %v11037_v8 = vcombine.high %v406_v3, %v410_v4  ;;  %v490_v55 = vld [vmem:[#allocation5 + $0x4e8] sm:$0xff] }
  0xe4   : > { %2815 = vmatpush1.bf16.msra.mxu1 %v10972_v9  ;;  %2775 = vmatprep.subr.bf16.mxu0 %v11219_v10  ;;  %v11291_v7 = vcombine.high %v661_v1, %v665_v2  ;;  %v653_v9 = vld [vmem:[#allocation5 + $0xa00] sm:$0xff]  ;;  %v11290_v13 = vcombine.low %v661_v1, %v665_v2  ;;  %v614_v56 = vld [vmem:[#allocation5 + $0x8c8] sm:$0xff] }
  0xe5   : > { %2816 = vmatprep.subr.bf16.mxu1 %v10965_v11  ;;  %v657_v10 = vld [vmem:[#allocation5 + $0xa20] sm:$0xff]  ;;  %v398_v11 = vld [vmem:[#allocation5 + $0x208] sm:$0xff] }
  0xe6   : > { %v11283_v15 = vcombine.high %v653_v9, %v657_v10  ;;  %v11282_v23 = vcombine.low %v653_v9, %v657_v10  ;;  %v11028_v25 = vcombine.low %v398_v11, %v402_v12  ;;  %v618_v57 = vld [vmem:[#allocation5 + $0x8e8] sm:$0xff] }
  0xe7   : > { %2776 = vmatpush1.bf16.msra.mxu0 %v11218_v17  ;;  %v11029_v17 = vcombine.high %v398_v11, %v402_v12  ;;  %v482_v1 = vld [vmem:[#allocation5 + $0x4a8] sm:$0xff] }
  0xe8   : > { %2817 = vmatpush1.bf16.msra.mxu1 %v10964_v18  ;;  %2777 = vmatprep.subr.bf16.mxu0 %v11339_v19  ;;  %v518_v18 = vld [vmem:[#allocation5 + $0x5c8] sm:$0xff] }
  0xe9   : > { %2818 = vmatprep.subr.bf16.mxu1 %v11085_v21  ;;  %v522_v19 = vld [vmem:[#allocation5 + $0x5e8] sm:$0xff] }
  0xea   : > { %v646_v21 = vld [vmem:[#allocation5 + $0x9c8] sm:$0xff]  ;;  %v11148_v34 = vcombine.low %v518_v18, %v522_v19 }
  0xeb   : > { %2778 = vmatpush2.bf16.msra.mxu0 %v11338_v26  ;;  %v11149_v26 = vcombine.high %v518_v18, %v522_v19  ;;  %v606_v2 = vld [vmem:[#allocation5 + $0x888] sm:$0xff] }
  0xec   : > { %2819 = vmatpush2.bf16.msra.mxu1 %v11084_v28  ;;  %2779 = vmatprep.subr.bf16.mxu0 %v11331_v29  ;;  %v11277_v28 = vcombine.high %v646_v21, %v650_v22  ;;  %v510_v29 = vld [vmem:[#allocation5 + $0x588] sm:$0xff] }
  0xed   : > { %2820 = vmatprep.subr.bf16.mxu1 %v11077_v30  ;;  %v514_v30 = vld [vmem:[#allocation5 + $0x5a8] sm:$0xff] }
  0xee   : > { %v11140_v42 = vcombine.low %v510_v29, %v514_v30  ;;  %v610_v3 = vld [vmem:[#allocation5 + $0x8a8] sm:$0xff] }
  0xef   : > { %2780 = vmatpush2.bf16.msra.mxu0 %v11330_v35  ;;  %v11276_v35 = vcombine.low %v646_v21, %v650_v22  ;;  %v474_v9 = vld [vmem:[#allocation5 + $0x468] sm:$0xff] }
  0xf0   : > { %2821 = vmatpush2.bf16.msra.mxu1 %v11076_v36  ;;  %2781 = vmatprep.subr.bf16.mxu0 %v11323_v37  ;;  %v11141_v36 = vcombine.high %v510_v29, %v514_v30  ;;  %v11269_v37 = vcombine.high %v638_v32, %v642_v33  ;;  %v598_v10 = vld [vmem:[#allocation5 + $0x848] sm:$0xff] }
  0xf1   : > { %2822 = vmatprep.subr.bf16.mxu1 %v11069_v38  ;;  %v502_v38 = vld [vmem:[#allocation5 + $0x548] sm:$0xff] }
  0xf2   : > { %v11132_v50 = vcombine.low %v502_v38, %v506_v39  ;;  %v602_v11 = vld [vmem:[#allocation5 + $0x868] sm:$0xff] }
  0xf3   : > { %2782 = vmatpush2.bf16.msra.mxu0 %v11322_v43  ;;  %v11268_v43 = vcombine.low %v638_v32, %v642_v33  ;;  %v466_v18 = vld [vmem:[#allocation5 + $0x428] sm:$0xff] }
  0xf4   : > { %2823 = vmatpush2.bf16.msra.mxu1 %v11068_v44  ;;  %2783 = vmatprep.subr.bf16.mxu0 %v11315_v45  ;;  %v11133_v44 = vcombine.high %v502_v38, %v506_v39  ;;  %v11261_v45 = vcombine.high %v630_v40, %v634_v41  ;;  %v590_v19 = vld [vmem:[#allocation5 + $0x808] sm:$0xff] }
  0xf5   : > { %2824 = vmatprep.subr.bf16.mxu1 %v11061_v46  ;;  %v494_v46 = vld [vmem:[#allocation5 + $0x508] sm:$0xff] }
  0xf6   : > { %v11124_v60 = vcombine.low %v494_v46, %v498_v47  ;;  %v594_v21 = vld [vmem:[#allocation5 + $0x828] sm:$0xff] }
  0xf7   : > { %2784 = vmatpush2.bf16.msra.mxu0 %v11314_v51  ;;  %v11260_v51 = vcombine.low %v630_v40, %v634_v41  ;;  %v710_v29 = vld [vmem:[#allocation5 + $0xbc8] sm:$0xff]  ;;  %v11220_v33 = vcombine.low %v590_v19, %v594_v21 }
  0xf8   : > { %2825 = vmatpush2.bf16.msra.mxu1 %v11060_v52  ;;  %2785 = vmatprep.subr.bf16.mxu0 %v11307_v53  ;;  %v11125_v52 = vcombine.high %v494_v46, %v498_v47  ;;  %v11253_v53 = vcombine.high %v622_v48, %v626_v49  ;;  %v714_v30 = vld [vmem:[#allocation5 + $0xbe8] sm:$0xff] }
  0xf9   : > { %2826 = vmatprep.subr.bf16.mxu1 %v11053_v54  ;;  %v486_v54 = vld [vmem:[#allocation5 + $0x4c8] sm:$0xff]  ;;  %v11340_v41 = vcombine.low %v710_v29, %v714_v30 }
  0xfa   : > { %v11116_v4 = vcombine.low %v486_v54, %v490_v55  ;;  %v702_v38 = vld [vmem:[#allocation5 + $0xb88] sm:$0xff] }
  0xfb   : > { %2786 = vmatpush2.bf16.msra.mxu0 %v11306_v61  ;;  %v11252_v61 = vcombine.low %v622_v48, %v626_v49  ;;  %v706_v39 = vld [vmem:[#allocation5 + $0xba8] sm:$0xff] }
  0xfc   : > { %2827 = vmatpush2.bf16.msra.mxu1 %v11052_v62  ;;  %2787 = vmatprep.subr.bf16.mxu0 %v11299_v63  ;;  %v11117_v62 = vcombine.high %v486_v54, %v490_v55  ;;  %v11245_v63 = vcombine.high %v614_v56, %v618_v57  ;;  %v694_v46 = vld [vmem:[#allocation5 + $0xb48] sm:$0xff]  ;;  %v11332_v49 = vcombine.low %v702_v38, %v706_v39 }
  0xfd   : > { %2828 = vmatprep.subr.bf16.mxu1 %v11045_v0  ;;  %v478_v0 = vld [vmem:[#allocation5 + $0x488] sm:$0xff] }
  0xfe   : > { %v11108_v12 = vcombine.low %v478_v0, %v482_v1  ;;  %v698_v47 = vld [vmem:[#allocation5 + $0xb68] sm:$0xff] }
  0xff   : > { %2788 = vmatpush2.bf16.msra.mxu0 %v11298_v5  ;;  %v11244_v5 = vcombine.low %v614_v56, %v618_v57  ;;  %v686_v54 = vld [vmem:[#allocation5 + $0xb08] sm:$0xff]  ;;  %v11324_v57 = vcombine.low %v694_v46, %v698_v47 }
 0x100   : > { %2829 = vmatpush2.bf16.msra.mxu1 %v11044_v6  ;;  %2789 = vmatprep.subr.bf16.mxu0 %v11291_v7  ;;  %v11109_v6 = vcombine.high %v478_v0, %v482_v1  ;;  %v11237_v7 = vcombine.high %v606_v2, %v610_v3  ;;  %v690_v55 = vld [vmem:[#allocation5 + $0xb28] sm:$0xff] }
 0x101   : > { %2830 = vmatprep.subr.bf16.mxu1 %v11037_v8  ;;  %v470_v8 = vld [vmem:[#allocation5 + $0x448] sm:$0xff] }
 0x102   : > { %v11100_v22 = vcombine.low %v470_v8, %v474_v9  ;;  %v678_v0 = vld [vmem:[#allocation5 + $0xac8] sm:$0xff] }
 0x103   : > { %2790 = vmatpush2.bf16.msra.mxu0 %v11290_v13  ;;  %v11236_v13 = vcombine.low %v606_v2, %v610_v3  ;;  %v682_v1 = vld [vmem:[#allocation5 + $0xae8] sm:$0xff]  ;;  %v11316_v3 = vcombine.low %v686_v54, %v690_v55 }
 0x104   : > { %2831 = vmatpush2.bf16.msra.mxu1 %v11036_v14  ;;  %2791 = vmatprep.subr.bf16.mxu0 %v11283_v15  ;;  %v11101_v14 = vcombine.high %v470_v8, %v474_v9  ;;  %v11229_v15 = vcombine.high %v598_v10, %v602_v11  ;;  %v670_v8 = vld [vmem:[#allocation5 + $0xa88] sm:$0xff] }
 0x105   : > { %2832 = vmatprep.subr.bf16.mxu1 %v11029_v17  ;;  %v462_v17 = vld [vmem:[#allocation5 + $0x408] sm:$0xff] }
 0x106   : > { %v11093_v24 = vcombine.high %v462_v17, %v466_v18  ;;  %v11092_v32 = vcombine.low %v462_v17, %v466_v18  ;;  %v674_v9 = vld [vmem:[#allocation5 + $0xaa8] sm:$0xff] }
 0x107   : > { %2792 = vmatpush2.bf16.msra.mxu0 %v11282_v23  ;;  %v11228_v23 = vcombine.low %v598_v10, %v602_v11  ;;  %v11308_v11 = vcombine.low %v678_v0, %v682_v1  ;;  %v662_v17 = vld [vmem:[#allocation5 + $0xa48] sm:$0xff] }
 0x108   : > { %2833 = vmatpush2.bf16.msra.mxu1 %v11028_v25  ;;  %2843 = vmatprep.subr.bf16.mxu0 %v11149_v26  ;;  %v11221_v25 = vcombine.high %v590_v19, %v594_v21  ;;  %v582_v26 = vld [vmem:[#allocation5 + $0x7c8] sm:$0xff]  ;;  %v11300_v21 = vcombine.low %v670_v8, %v674_v9 }
 0x109   : > { %2884 = vmatprep.subr.bf16.mxu1 %v11277_v28  ;;  %v586_v28 = vld [vmem:[#allocation5 + $0x7e8] sm:$0xff] }
 0x10a   : > { %2794 = vmatmul.mubr.bf16.vlgmr.msra.gmra.mxu0 %v12939_v31  ;;  %v11212_v40 = vcombine.low %v582_v26, %v586_v28  ;;  %v666_v18 = vld [vmem:[#allocation5 + $0xa68] sm:$0xff] }
 0x10b   : > { %2835 = vmatmul.mubr.bf16.vlgmr.msra.gmra.mxu1 %v12929_v16  ;;  %2844 = vmatpush1.bf16.msra.mxu0 %v11148_v34  ;;  %v11213_v34 = vcombine.high %v582_v26, %v586_v28  ;;  %v654_v26 = vld [vmem:[#allocation5 + $0xa08] sm:$0xff] }
 0x10c   : > { %2885 = vmatpush1.bf16.msra.mxu1 %v11276_v35  ;;  %2845 = vmatprep.subr.bf16.mxu0 %v11141_v36  ;;  %v11341_v35 = vcombine.high %v710_v29, %v714_v30  ;;  %v574_v36 = vld [vmem:[#allocation5 + $0x788] sm:$0xff]  ;;  %v11292_v30 = vcombine.low %v662_v17, %v666_v18 }
 0x10d   : > { %2886 = vmatprep.subr.bf16.mxu1 %v11269_v37  ;;  %2875 = vmatprep.mubr.bf16.mxu0 %v12925_v59  ;;  %v578_v37 = vld [vmem:[#allocation5 + $0x7a8] sm:$0xff] }
 0x10e   : > { %2916 = vmatprep.mubr.bf16.mxu1 %v12933_v27  ;;  %v11204_v48 = vcombine.low %v574_v36, %v578_v37  ;;  %v658_v28 = vld [vmem:[#allocation5 + $0xa28] sm:$0xff] }
 0x10f   : > { %2846 = vmatpush1.bf16.msra.mxu0 %v11140_v42  ;;  %v11205_v42 = vcombine.high %v574_v36, %v578_v37  ;;  %v519_v36 = vld [vmem:[#allocation5 + $0x5d0] sm:$0xff] }
 0x110   : > { %2887 = vmatpush1.bf16.msra.mxu1 %v11268_v43  ;;  %2847 = vmatprep.subr.bf16.mxu0 %v11133_v44  ;;  %v11333_v43 = vcombine.high %v702_v38, %v706_v39  ;;  %v566_v44 = vld [vmem:[#allocation5 + $0x748] sm:$0xff]  ;;  %v523_v37 = vld [vmem:[#allocation5 + $0x5f0] sm:$0xff]  ;;  %v11284_v39 = vcombine.low %v654_v26, %v658_v28 }
 0x111   : > { %2888 = vmatprep.subr.bf16.mxu1 %v11261_v45  ;;  %v570_v45 = vld [vmem:[#allocation5 + $0x768] sm:$0xff] }
 0x112   : > { %v11196_v56 = vcombine.low %v566_v44, %v570_v45 }
 0x113   : > { %2848 = vmatpush1.bf16.msra.mxu0 %v11132_v50  ;;  %v11197_v50 = vcombine.high %v566_v44, %v570_v45  ;;  %v511_v44 = vld [vmem:[#allocation5 + $0x590] sm:$0xff] }
 0x114   : > { %2889 = vmatpush1.bf16.msra.mxu1 %v11260_v51  ;;  %2849 = vmatprep.subr.bf16.mxu0 %v11125_v52  ;;  %v11325_v51 = vcombine.high %v694_v46, %v698_v47  ;;  %v558_v52 = vld [vmem:[#allocation5 + $0x708] sm:$0xff]  ;;  %v515_v45 = vld [vmem:[#allocation5 + $0x5b0] sm:$0xff]  ;;  %v11150_v47 = vcombine.low %v519_v36, %v523_v37 }
 0x115   : > { %2890 = vmatprep.subr.bf16.mxu1 %v11253_v53  ;;  %v562_v53 = vld [vmem:[#allocation5 + $0x728] sm:$0xff] }
 0x116   : > { %v11188_v2 = vcombine.low %v558_v52, %v562_v53 }
 0x117   : > { %2850 = vmatpush1.bf16.msra.mxu0 %v11124_v60  ;;  %v11189_v60 = vcombine.high %v558_v52, %v562_v53  ;;  %v503_v52 = vld [vmem:[#allocation5 + $0x550] sm:$0xff] }
 0x118   : > { %2891 = vmatpush1.bf16.msra.mxu1 %v11252_v61  ;;  %2851 = vmatprep.subr.bf16.mxu0 %v11117_v62  ;;  %v11317_v61 = vcombine.high %v686_v54, %v690_v55  ;;  %v550_v62 = vld [vmem:[#allocation5 + $0x6c8] sm:$0xff]  ;;  %v507_v53 = vld [vmem:[#allocation5 + $0x570] sm:$0xff]  ;;  %v11142_v55 = vcombine.low %v511_v44, %v515_v45 }
 0x119   : > { %2892 = vmatprep.subr.bf16.mxu1 %v11245_v63  ;;  %v554_v63 = vld [vmem:[#allocation5 + $0x6e8] sm:$0xff] }
 0x11a   : > { %v11180_v10 = vcombine.low %v550_v62, %v554_v63 }
 0x11b   : > { %2852 = vmatpush1.bf16.msra.mxu0 %v11116_v4  ;;  %v11181_v4 = vcombine.high %v550_v62, %v554_v63  ;;  %v495_v62 = vld [vmem:[#allocation5 + $0x510] sm:$0xff] }
 0x11c   : > { %2893 = vmatpush1.bf16.msra.mxu1 %v11244_v5  ;;  %2853 = vmatprep.subr.bf16.mxu0 %v11109_v6  ;;  %v11309_v5 = vcombine.high %v678_v0, %v682_v1  ;;  %v542_v6 = vld [vmem:[#allocation5 + $0x688] sm:$0xff]  ;;  %v499_v63 = vld [vmem:[#allocation5 + $0x530] sm:$0xff]  ;;  %v11134_v1 = vcombine.low %v503_v52, %v507_v53 }
 0x11d   : > { %2894 = vmatprep.subr.bf16.mxu1 %v11237_v7  ;;  %v546_v7 = vld [vmem:[#allocation5 + $0x6a8] sm:$0xff] }
 0x11e   : > { %v11172_v19 = vcombine.low %v542_v6, %v546_v7 }
 0x11f   : > { %2854 = vmatpush1.bf16.msra.mxu0 %v11108_v12  ;;  %v11173_v12 = vcombine.high %v542_v6, %v546_v7  ;;  %v487_v6 = vld [vmem:[#allocation5 + $0x4d0] sm:$0xff] }
 0x120   : > { %2895 = vmatpush1.bf16.msra.mxu1 %v11236_v13  ;;  %2855 = vmatprep.subr.bf16.mxu0 %v11101_v14  ;;  %v11301_v13 = vcombine.high %v670_v8, %v674_v9  ;;  %v534_v14 = vld [vmem:[#allocation5 + $0x648] sm:$0xff]  ;;  %v491_v7 = vld [vmem:[#allocation5 + $0x4f0] sm:$0xff]  ;;  %v11126_v9 = vcombine.low %v495_v62, %v499_v63 }
 0x121   : > { %2896 = vmatprep.subr.bf16.mxu1 %v11229_v15  ;;  %v538_v15 = vld [vmem:[#allocation5 + $0x668] sm:$0xff] }
 0x122   : > { %v11164_v29 = vcombine.low %v534_v14, %v538_v15 }
 0x123   : > { %2856 = vmatpush1.bf16.msra.mxu0 %v11100_v22  ;;  %v11165_v22 = vcombine.high %v534_v14, %v538_v15  ;;  %v479_v14 = vld [vmem:[#allocation5 + $0x490] sm:$0xff] }
 0x124   : > { %2897 = vmatpush1.bf16.msra.mxu1 %v11228_v23  ;;  %2857 = vmatprep.subr.bf16.mxu0 %v11093_v24  ;;  %v11293_v23 = vcombine.high %v662_v17, %v666_v18  ;;  %v526_v24 = vld [vmem:[#allocation5 + $0x608] sm:$0xff]  ;;  %v483_v15 = vld [vmem:[#allocation5 + $0x4b0] sm:$0xff]  ;;  %v11118_v18 = vcombine.low %v487_v6, %v491_v7 }
 0x125   : > { %2898 = vmatprep.subr.bf16.mxu1 %v11221_v25  ;;  %v530_v25 = vld [vmem:[#allocation5 + $0x628] sm:$0xff] }
 0x126   : > { %v11156_v38 = vcombine.low %v526_v24, %v530_v25 }
 0x127   : > { %2858 = vmatpush1.bf16.msra.mxu0 %v11092_v32  ;;  %v11157_v32 = vcombine.high %v526_v24, %v530_v25  ;;  %v471_v24 = vld [vmem:[#allocation5 + $0x450] sm:$0xff] }
 0x128   : > { %2899 = vmatpush1.bf16.msra.mxu1 %v11220_v33  ;;  %2859 = vmatprep.subr.bf16.mxu0 %v11213_v34  ;;  %v11285_v33 = vcombine.high %v654_v26, %v658_v28  ;;  %v391_v34 = vld [vmem:[#allocation5 + $0x1d0] sm:$0xff]  ;;  %v11110_v28 = vcombine.low %v479_v14, %v483_v15 }
 0x129   : > { %2900 = vmatprep.subr.bf16.mxu1 %v11341_v35  ;;  %v395_v35 = vld [vmem:[#allocation5 + $0x1f0] sm:$0xff] }
 0x12a   : > { %v11022_v46 = vcombine.low %v391_v34, %v395_v35  ;;  %v475_v25 = vld [vmem:[#allocation5 + $0x470] sm:$0xff] }
 0x12b   : > { %2860 = vmatpush2.bf16.msra.mxu0 %v11212_v40  ;;  %v11023_v40 = vcombine.high %v391_v34, %v395_v35  ;;  %v463_v34 = vld [vmem:[#allocation5 + $0x410] sm:$0xff] }
 0x12c   : > { %2901 = vmatpush2.bf16.msra.mxu1 %v11340_v41  ;;  %2861 = vmatprep.subr.bf16.mxu0 %v11205_v42  ;;  %v11151_v41 = vcombine.high %v519_v36, %v523_v37  ;;  %v383_v42 = vld [vmem:[#allocation5 + $0x190] sm:$0xff]  ;;  %v11102_v37 = vcombine.low %v471_v24, %v475_v25 }
 0x12d   : > { %2902 = vmatprep.subr.bf16.mxu1 %v11333_v43  ;;  %v387_v43 = vld [vmem:[#allocation5 + $0x1b0] sm:$0xff] }
 0x12e   : > { %v11014_v54 = vcombine.low %v383_v42, %v387_v43  ;;  %v467_v35 = vld [vmem:[#allocation5 + $0x430] sm:$0xff] }
 0x12f   : > { %2862 = vmatpush2.bf16.msra.mxu0 %v11204_v48  ;;  %v11015_v48 = vcombine.high %v383_v42, %v387_v43  ;;  %v583_v42 = vld [vmem:[#allocation5 + $0x7d0] sm:$0xff] }
 0x130   : > { %2903 = vmatpush2.bf16.msra.mxu1 %v11332_v49  ;;  %2863 = vmatprep.subr.bf16.mxu0 %v11197_v50  ;;  %v11143_v49 = vcombine.high %v511_v44, %v515_v45  ;;  %v375_v50 = vld [vmem:[#allocation5 + $0x150] sm:$0xff]  ;;  %v11094_v45 = vcombine.low %v463_v34, %v467_v35 }
 0x131   : > { %2904 = vmatprep.subr.bf16.mxu1 %v11325_v51  ;;  %v379_v51 = vld [vmem:[#allocation5 + $0x170] sm:$0xff] }
 0x132   : > { %v11006_v0 = vcombine.low %v375_v50, %v379_v51  ;;  %v587_v43 = vld [vmem:[#allocation5 + $0x7f0] sm:$0xff] }
 0x133   : > { %2864 = vmatpush2.bf16.msra.mxu0 %v11196_v56  ;;  %v11007_v56 = vcombine.high %v375_v50, %v379_v51  ;;  %v575_v50 = vld [vmem:[#allocation5 + $0x790] sm:$0xff] }
 0x134   : > { %2905 = vmatpush2.bf16.msra.mxu1 %v11324_v57  ;;  %2865 = vmatprep.subr.bf16.mxu0 %v11189_v60  ;;  %v11135_v57 = vcombine.high %v503_v52, %v507_v53  ;;  %v367_v60 = vld [vmem:[#allocation5 + $0x110] sm:$0xff]  ;;  %v11214_v53 = vcombine.low %v583_v42, %v587_v43 }
 0x135   : > { %2906 = vmatprep.subr.bf16.mxu1 %v11317_v61  ;;  %v371_v61 = vld [vmem:[#allocation5 + $0x130] sm:$0xff] }
 0x136   : > { %v10998_v8 = vcombine.low %v367_v60, %v371_v61  ;;  %v579_v51 = vld [vmem:[#allocation5 + $0x7b0] sm:$0xff] }
 0x137   : > { %2866 = vmatpush2.bf16.msra.mxu0 %v11188_v2  ;;  %v10999_v2 = vcombine.high %v367_v60, %v371_v61  ;;  %v567_v60 = vld [vmem:[#allocation5 + $0x750] sm:$0xff] }
 0x138   : > { %2907 = vmatpush2.bf16.msra.mxu1 %v11316_v3  ;;  %2867 = vmatprep.subr.bf16.mxu0 %v11181_v4  ;;  %v11127_v3 = vcombine.high %v495_v62, %v499_v63  ;;  %v359_v4 = vld [vmem:[#allocation5 + $0xd0] sm:$0xff]  ;;  %v11206_v63 = vcombine.low %v575_v50, %v579_v51 }
 0x139   : > { %2908 = vmatprep.subr.bf16.mxu1 %v11309_v5  ;;  %v363_v5 = vld [vmem:[#allocation5 + $0xf0] sm:$0xff] }
 0x13a   : > { %v10990_v17 = vcombine.low %v359_v4, %v363_v5  ;;  %v571_v61 = vld [vmem:[#allocation5 + $0x770] sm:$0xff] }
 0x13b   : > { %2868 = vmatpush2.bf16.msra.mxu0 %v11180_v10  ;;  %v10991_v10 = vcombine.high %v359_v4, %v363_v5  ;;  %v559_v4 = vld [vmem:[#allocation5 + $0x710] sm:$0xff] }
 0x13c   : > { %2909 = vmatpush2.bf16.msra.mxu1 %v11308_v11  ;;  %2869 = vmatprep.subr.bf16.mxu0 %v11173_v12  ;;  %v11119_v11 = vcombine.high %v487_v6, %v491_v7  ;;  %v351_v12 = vld [vmem:[#allocation5 + $0x90] sm:$0xff]  ;;  %v11198_v7 = vcombine.low %v567_v60, %v571_v61 }
 0x13d   : > { %2910 = vmatprep.subr.bf16.mxu1 %v11301_v13  ;;  %v355_v13 = vld [vmem:[#allocation5 + $0xb0] sm:$0xff] }
 0x13e   : > { %v10982_v26 = vcombine.low %v351_v12, %v355_v13  ;;  %v563_v5 = vld [vmem:[#allocation5 + $0x730] sm:$0xff] }
 0x13f   : > { %2870 = vmatpush2.bf16.msra.mxu0 %v11172_v19  ;;  %v10983_v19 = vcombine.high %v351_v12, %v355_v13  ;;  %v551_v12 = vld [vmem:[#allocation5 + $0x6d0] sm:$0xff] }
 0x140   : > { %2911 = vmatpush2.bf16.msra.mxu1 %v11300_v21  ;;  %2871 = vmatprep.subr.bf16.mxu0 %v11165_v22  ;;  %v11111_v21 = vcombine.high %v479_v14, %v483_v15  ;;  %v343_v22 = vld [vmem:[#allocation5 + $0x50] sm:$0xff]  ;;  %v11190_v15 = vcombine.low %v559_v4, %v563_v5 }
 0x141   : > { %2912 = vmatprep.subr.bf16.mxu1 %v11293_v23  ;;  %v347_v23 = vld [vmem:[#allocation5 + $0x70] sm:$0xff] }
 0x142   : > { %v10974_v36 = vcombine.low %v343_v22, %v347_v23  ;;  %v555_v13 = vld [vmem:[#allocation5 + $0x6f0] sm:$0xff] }
 0x143   : > { %2872 = vmatpush2.bf16.msra.mxu0 %v11164_v29  ;;  %v10975_v29 = vcombine.high %v343_v22, %v347_v23  ;;  %v543_v22 = vld [vmem:[#allocation5 + $0x690] sm:$0xff] }
 0x144   : > { %2913 = vmatpush2.bf16.msra.mxu1 %v11292_v30  ;;  %2873 = vmatprep.subr.bf16.mxu0 %v11157_v32  ;;  %v11103_v30 = vcombine.high %v471_v24, %v475_v25  ;;  %v335_v32 = vld [vmem:[#allocation5 + $0x10] sm:$0xff]  ;;  %v11182_v25 = vcombine.low %v551_v12, %v555_v13 }
 0x145   : > { %2914 = vmatprep.subr.bf16.mxu1 %v11285_v33  ;;  %v339_v33 = vld [vmem:[#allocation5 + $0x30] sm:$0xff] }
 0x146   : > { %v10966_v44 = vcombine.low %v335_v32, %v339_v33  ;;  %v547_v23 = vld [vmem:[#allocation5 + $0x6b0] sm:$0xff] }
 0x147   : > { %2874 = vmatpush2.bf16.msra.mxu0 %v11156_v38  ;;  %v10967_v38 = vcombine.high %v335_v32, %v339_v33  ;;  %v535_v32 = vld [vmem:[#allocation5 + $0x650] sm:$0xff] }
 0x148   : > { %2915 = vmatpush2.bf16.msra.mxu1 %v11284_v39  ;;  %2925 = vmatprep.subr.bf16.mxu0 %v11023_v40  ;;  %v11095_v39 = vcombine.high %v463_v34, %v467_v35  ;;  %v455_v40 = vld [vmem:[#allocation5 + $0x3d0] sm:$0xff]  ;;  %v719_v35 = vlaneseq }
 0x149   : > { %2966 = vmatprep.subr.bf16.mxu1 %v11151_v41  ;;  %v459_v41 = vld [vmem:[#allocation5 + $0x3f0] sm:$0xff] }
 0x14a   : > { %2876 = vmatmul.mubr.bf16.vlgmr.msra.gmra.mxu0 %v12931_v20  ;;  %v11086_v52 = vcombine.low %v455_v40, %v459_v41  ;;  %v539_v33 = vld [vmem:[#allocation5 + $0x670] sm:$0xff] }
 0x14b   : > { %2917 = vmatmul.mubr.bf16.vlgmr.msra.gmra.mxu1 %v12939_v31  ;;  %2926 = vmatpush1.bf16.msra.mxu0 %v11022_v46  ;;  %v11087_v46 = vcombine.high %v455_v40, %v459_v41  ;;  %v403_v40 = vld [vmem:[#allocation5 + $0x230] sm:$0xff] }
 0x14c   : > { %2967 = vmatpush1.bf16.msra.mxu1 %v11150_v47  ;;  %2927 = vmatprep.subr.bf16.mxu0 %v11015_v48  ;;  %v11215_v47 = vcombine.high %v583_v42, %v587_v43  ;;  %v447_v48 = vld [vmem:[#allocation5 + $0x390] sm:$0xff] }
 0x14d   : > { %2968 = vmatprep.subr.bf16.mxu1 %v11143_v49  ;;  %2957 = vmatprep.mubr.bf16.mxu0 %v12923_v58  ;;  %v451_v49 = vld [vmem:[#allocation5 + $0x3b0] sm:$0xff] }
 0x14e   : > { %2998 = vmatprep.mubr.bf16.mxu1 %v12925_v59  ;;  %v11078_v62 = vcombine.low %v447_v48, %v451_v49  ;;  %v527_v41 = vld [vmem:[#allocation5 + $0x610] sm:$0xff] }
 0x14f   : > { %2928 = vmatpush1.bf16.msra.mxu0 %v11014_v54  ;;  %v11079_v54 = vcombine.high %v447_v48, %v451_v49  ;;  %v531_v42 = vld [vmem:[#allocation5 + $0x630] sm:$0xff] }
 0x150   : > { %2969 = vmatpush1.bf16.msra.mxu1 %v11142_v55  ;;  %2929 = vmatprep.subr.bf16.mxu0 %v11007_v56  ;;  %v11207_v55 = vcombine.high %v575_v50, %v579_v51  ;;  %v439_v56 = vld [vmem:[#allocation5 + $0x350] sm:$0xff]  ;;  %v392_v50 = vld [vmem:[#allocation5 + $0x1d8] sm:$0xff] }
 0x151   : > { %2970 = vmatprep.subr.bf16.mxu1 %v11135_v57  ;;  %v443_v57 = vld [vmem:[#allocation5 + $0x370] sm:$0xff]  ;;  %v396_v51 = vld [vmem:[#allocation5 + $0x1f8] sm:$0xff] }
 0x152   : > { %v11070_v6 = vcombine.low %v439_v56, %v443_v57  ;;  %v647_v48 = vld [vmem:[#allocation5 + $0x9d0] sm:$0xff] }
 0x153   : > { %2930 = vmatpush1.bf16.msra.mxu0 %v11006_v0  ;;  %v11071_v0 = vcombine.high %v439_v56, %v443_v57  ;;  %v651_v49 = vld [vmem:[#allocation5 + $0x9f0] sm:$0xff]  ;;  %v11025_v57 = vcombine.high %v392_v50, %v396_v51 }
 0x154   : > { %2971 = vmatpush1.bf16.msra.mxu1 %v11134_v1  ;;  %2931 = vmatprep.subr.bf16.mxu0 %v10999_v2  ;;  %v11199_v1 = vcombine.high %v567_v60, %v571_v61  ;;  %v431_v2 = vld [vmem:[#allocation5 + $0x310] sm:$0xff]  ;;  %v11279_v56 = vcombine.high %v647_v48, %v651_v49 }
 0x155   : > { %2972 = vmatprep.subr.bf16.mxu1 %v11127_v3  ;;  %v435_v3 = vld [vmem:[#allocation5 + $0x330] sm:$0xff] }
 0x156   : > { %v11062_v14 = vcombine.low %v431_v2, %v435_v3  ;;  %v639_v61 = vld [vmem:[#allocation5 + $0x990] sm:$0xff] }
 0x157   : > { %2932 = vmatpush1.bf16.msra.mxu0 %v10998_v8  ;;  %v11063_v8 = vcombine.high %v431_v2, %v435_v3  ;;  %v11278_v2 = vcombine.low %v647_v48, %v651_v49  ;;  %v11024_v3 = vcombine.low %v392_v50, %v396_v51  ;;  %v611_v48 = vld [vmem:[#allocation5 + $0x8b0] sm:$0xff]  ;;  %v352_v49 = vld [vmem:[#allocation5 + $0x98] sm:$0xff] }
 0x158   : > { %2973 = vmatpush1.bf16.msra.mxu1 %v11126_v9  ;;  %2933 = vmatprep.subr.bf16.mxu0 %v10991_v10  ;;  %v11191_v9 = vcombine.high %v559_v4, %v563_v5  ;;  %v423_v10 = vld [vmem:[#allocation5 + $0x2d0] sm:$0xff]  ;;  %v356_v50 = vld [vmem:[#allocation5 + $0xb8] sm:$0xff] }
 0x159   : > { %2974 = vmatprep.subr.bf16.mxu1 %v11119_v11  ;;  %v427_v11 = vld [vmem:[#allocation5 + $0x2f0] sm:$0xff] }
 0x15a   : > { %v11054_v24 = vcombine.low %v423_v10, %v427_v11 }
 0x15b   : > { %2934 = vmatpush1.bf16.msra.mxu0 %v10990_v17  ;;  %v11055_v17 = vcombine.high %v423_v10, %v427_v11  ;;  %v376_v10 = vld [vmem:[#allocation5 + $0x158] sm:$0xff] }
 0x15c   : > { %2975 = vmatpush1.bf16.msra.mxu1 %v11118_v18  ;;  %2935 = vmatprep.subr.bf16.mxu0 %v10983_v19  ;;  %v11183_v18 = vcombine.high %v551_v12, %v555_v13  ;;  %v415_v19 = vld [vmem:[#allocation5 + $0x290] sm:$0xff]  ;;  %v380_v11 = vld [vmem:[#allocation5 + $0x178] sm:$0xff] }
 0x15d   : > { %2976 = vmatprep.subr.bf16.mxu1 %v11111_v21  ;;  %v419_v21 = vld [vmem:[#allocation5 + $0x2b0] sm:$0xff] }
 0x15e   : > { %v11046_v34 = vcombine.low %v415_v19, %v419_v21 }
 0x15f   : > { %2936 = vmatpush1.bf16.msra.mxu0 %v10982_v26  ;;  %v11047_v26 = vcombine.high %v415_v19, %v419_v21 }
 0x160   : > { %2977 = vmatpush1.bf16.msra.mxu1 %v11110_v28  ;;  %2937 = vmatprep.subr.bf16.mxu0 %v10975_v29  ;;  %v11175_v28 = vcombine.high %v543_v22, %v547_v23  ;;  %v407_v29 = vld [vmem:[#allocation5 + $0x250] sm:$0xff] }
 0x161   : > { %2978 = vmatprep.subr.bf16.mxu1 %v11103_v30  ;;  %v411_v30 = vld [vmem:[#allocation5 + $0x270] sm:$0xff] }
 0x162   : > { %v11038_v43 = vcombine.low %v407_v29, %v411_v30 }
 0x163   : > { %2938 = vmatpush1.bf16.msra.mxu0 %v10974_v36  ;;  %v11174_v36 = vcombine.low %v543_v22, %v547_v23  ;;  %v11009_v23 = vcombine.high %v376_v10, %v380_v11 }
 0x164   : > { %2979 = vmatpush1.bf16.msra.mxu1 %v11102_v37  ;;  %2939 = vmatprep.subr.bf16.mxu0 %v10967_v38  ;;  %v11039_v37 = vcombine.high %v407_v29, %v411_v30  ;;  %v11167_v38 = vcombine.high %v535_v32, %v539_v33  ;;  %v372_v29 = vld [vmem:[#allocation5 + $0x138] sm:$0xff] }
 0x165   : > { %2980 = vmatprep.subr.bf16.mxu1 %v11095_v39  ;;  %v399_v39 = vld [vmem:[#allocation5 + $0x210] sm:$0xff] }
 0x167   : > { %2940 = vmatpush1.bf16.msra.mxu0 %v10966_v44  ;;  %v12949_v44 = vshrl.u32 %v719_v35, 7  ;;  %v11008_v35 = vcombine.low %v376_v10, %v380_v11 }
 0x168   : > { %2981 = vmatpush1.bf16.msra.mxu1 %v11094_v45  ;;  %2941 = vmatprep.subr.bf16.mxu0 %v11087_v46  ;;  %v11166_v45 = vcombine.low %v535_v32, %v539_v33  ;;  %v11031_v46 = vcombine.high %v399_v39, %v403_v40 }
 0x169   : > { %2982 = vmatprep.subr.bf16.mxu1 %v11215_v47  ;;  %v11159_v47 = vcombine.high %v527_v41, %v531_v42  ;;  %v12957_v60 = vsub.s32 1, %v12949_v44 }
 0x16b   : > { %2942 = vmatpush2.bf16.msra.mxu0 %v11086_v52  ;;  %v11030_v52 = vcombine.low %v399_v39, %v403_v40  ;;  %v615_v39 = vld [vmem:[#allocation5 + $0x8d0] sm:$0xff] }
 0x16c   : > { %2983 = vmatpush2.bf16.msra.mxu1 %v11214_v53  ;;  %2943 = vmatprep.subr.bf16.mxu0 %v11079_v54  ;;  %v12952_v53 = vsub.s32 0, %v12949_v44  ;;  %v11158_v54 = vcombine.low %v527_v41, %v531_v42  ;;  %v619_v40 = vld [vmem:[#allocation5 + $0x8f0] sm:$0xff]  ;;  %v360_v41 = vld [vmem:[#allocation5 + $0xd8] sm:$0xff] }
 0x16d   : > { %2984 = vmatprep.subr.bf16.mxu1 %v11207_v55  ;;  %v12954_v55 = vld [vmem:[#allocation7] sm:$0xff]  ;;  %v364_v42 = vld [vmem:[#allocation5 + $0xf8] sm:$0xff]  ;;  %v11246_v51 = vcombine.low %v615_v39, %v619_v40 }
 0x16e   : > { %v726_v5 = vrot.slane %v12954_v55, %v12957_v60 }
 0x16f   : > { %2944 = vmatpush2.bf16.msra.mxu0 %v11078_v62  ;;  %v643_v62 = vld [vmem:[#allocation5 + $0x9b0] sm:$0xff] }
 0x170   : > { %2985 = vmatpush2.bf16.msra.mxu1 %v11206_v63  ;;  %2945 = vmatprep.subr.bf16.mxu0 %v11071_v0  ;;  %v384_v63 = vld [vmem:[#allocation5 + $0x198] sm:$0xff]  ;;  %v11271_v4 = vcombine.high %v639_v61, %v643_v62 }
 0x171   : > { %2986 = vmatprep.subr.bf16.mxu1 %v11199_v1  ;;  %v388_v0 = vld [vmem:[#allocation5 + $0x1b8] sm:$0xff]  ;;  %v722_v1 = vrot.slane %v12954_v55, %v12952_v53 }
 0x173   : > { %2946 = vmatpush2.bf16.msra.mxu0 %v11070_v6  ;;  %v11017_v6 = vcombine.high %v384_v63, %v388_v0 }
 0x174   : > { %2987 = vmatpush2.bf16.msra.mxu1 %v11198_v7  ;;  %2947 = vmatprep.subr.bf16.mxu0 %v11063_v8  ;;  %v631_v7 = vld [vmem:[#allocation5 + $0x950] sm:$0xff] }
 0x175   : > { %2988 = vmatprep.subr.bf16.mxu1 %v11191_v9  ;;  %v635_v8 = vld [vmem:[#allocation5 + $0x970] sm:$0xff] }
 0x176   : > { %v11262_v33 = vcombine.low %v631_v7, %v635_v8 }
 0x177   : > { %2948 = vmatpush2.bf16.msra.mxu0 %v11062_v14  ;;  %v11270_v14 = vcombine.low %v639_v61, %v643_v62  ;;  %v603_v61 = vld [vmem:[#allocation5 + $0x870] sm:$0xff]  ;;  %v344_v62 = vld [vmem:[#allocation5 + $0x58] sm:$0xff] }
 0x178   : > { %2989 = vmatpush2.bf16.msra.mxu1 %v11190_v15  ;;  %2949 = vmatprep.subr.bf16.mxu0 %v11055_v17  ;;  %v11016_v17 = vcombine.low %v384_v63, %v388_v0  ;;  %v348_v63 = vld [vmem:[#allocation5 + $0x78] sm:$0xff] }
 0x179   : > { %2990 = vmatprep.subr.bf16.mxu1 %v11183_v18  ;;  %v11263_v18 = vcombine.high %v631_v7, %v635_v8  ;;  %v340_v7 = vld [vmem:[#allocation5 + $0x38] sm:$0xff] }
 0x17b   : > { %2950 = vmatpush2.bf16.msra.mxu0 %v11054_v24  ;;  %v623_v24 = vld [vmem:[#allocation5 + $0x910] sm:$0xff] }
 0x17c   : > { %2991 = vmatpush2.bf16.msra.mxu1 %v11182_v25  ;;  %2951 = vmatprep.subr.bf16.mxu0 %v11047_v26  ;;  %v627_v25 = vld [vmem:[#allocation5 + $0x930] sm:$0xff] }
 0x17d   : > { %2992 = vmatprep.subr.bf16.mxu1 %v11175_v28  ;;  %v368_v28 = vld [vmem:[#allocation5 + $0x118] sm:$0xff] }
 0x17f   : > { %2952 = vmatpush2.bf16.msra.mxu0 %v11046_v34 }
 0x180   : > { %2993 = vmatpush2.bf16.msra.mxu1 %v11174_v36  ;;  %2953 = vmatprep.subr.bf16.mxu0 %v11039_v37  ;;  %v11255_v36 = vcombine.high %v623_v24, %v627_v25 }
 0x181   : > { %2994 = vmatprep.subr.bf16.mxu1 %v11167_v38  ;;  %v11001_v38 = vcombine.high %v368_v28, %v372_v29 }
 0x183   : > { %2954 = vmatpush2.bf16.msra.mxu0 %v11038_v43  ;;  %v11254_v43 = vcombine.low %v623_v24, %v627_v25  ;;  %v707_v24 = vld [vmem:[#allocation5 + $0xbb0] sm:$0xff]  ;;  %v448_v25 = vld [vmem:[#allocation5 + $0x398] sm:$0xff] }
 0x184   : > { %2995 = vmatpush2.bf16.msra.mxu1 %v11166_v45  ;;  %2955 = vmatprep.subr.bf16.mxu0 %v11031_v46  ;;  %v11247_v45 = vcombine.high %v615_v39, %v619_v40  ;;  %v10993_v46 = vcombine.high %v360_v41, %v364_v42 }
 0x185   : > { %2996 = vmatprep.subr.bf16.mxu1 %v11159_v47  ;;  %v607_v47 = vld [vmem:[#allocation5 + $0x890] sm:$0xff] }
 0x186   : > { %v11238_v0 = vcombine.low %v607_v47, %v611_v48 }
 0x187   : > { %2956 = vmatpush2.bf16.msra.mxu0 %v11030_v52  ;;  %v10992_v52 = vcombine.low %v360_v41, %v364_v42  ;;  %v687_v42 = vld [vmem:[#allocation5 + $0xb10] sm:$0xff] }
 0x188   : > { %2997 = vmatpush2.bf16.msra.mxu1 %v11158_v54  ;;  %3007 = vmatprep.subr.bf16.mxu0 %v11279_v56  ;;  %v11239_v54 = vcombine.high %v607_v47, %v611_v48  ;;  %v10985_v56 = vcombine.high %v352_v49, %v356_v50 }
 0x189   : > { %3048 = vmatprep.subr.bf16.mxu1 %v11025_v57  ;;  %v599_v57 = vld [vmem:[#allocation5 + $0x850] sm:$0xff] }
 0x18a   : > { %v2713_v9 = vpop.f32.mrf.mxu0  ;;  %2958 = vmatmul.mubr.bf16.vlgmr.msra.gmra.mxu0 %v12929_v16  ;;  %v11230_v8 = vcombine.low %v599_v57, %v603_v61 }
 0x18b   : > { %v2714_v12 = vadd.f32 %v2713_v9, %v722_v1  ;;  %v2754_v13 = vpop.f32.mrf.mxu1  ;;  %2999 = vmatmul.mubr.bf16.vlgmr.msra.gmra.mxu1 %v12931_v20  ;;  %3008 = vmatpush1.bf16.msra.mxu0 %v11278_v2  ;;  %v10984_v1 = vcombine.low %v352_v49, %v356_v50  ;;  %v11231_v2 = vcombine.high %v599_v57, %v603_v61  ;;  %v679_v50 = vld [vmem:[#allocation5 + $0xad0] sm:$0xff] }
 0x18c   : > { %3049 = vmatpush1.bf16.msra.mxu1 %v11024_v3  ;;  %v2715_v15 = vpop.f32.mrf.mxu0  ;;  %3009 = vmatprep.subr.bf16.mxu0 %v11271_v4  ;;  %v10977_v3 = vcombine.high %v344_v62, %v348_v63  ;;  %v591_v4 = vld [vmem:[#allocation5 + $0x810] sm:$0xff]  ;;  %v10976_v9 = vcombine.low %v344_v62, %v348_v63 }
 0x18d   : > { %v12965_v19 = vadd.f32 %v2754_v13, %v2714_v12  ;;  %v2716_v21 = vadd.f32 %v2715_v15, %v726_v5  ;;  %v2756_v22 = vpop.f32.mrf.mxu1  ;;  %3050 = vmatprep.subr.bf16.mxu1 %v11017_v6  ;;  %3039 = vmatprep.mubr.bf16.mxu0 %v12933_v27  ;;  %v595_v5 = vld [vmem:[#allocation5 + $0x830] sm:$0xff]  ;;  %v336_v6 = vld [vmem:[#allocation5 + $0x18] sm:$0xff] }
 0x18e   : > { %v2717_v26 = vpop.f32.mrf.mxu0  ;;  %3080 = vmatprep.mubr.bf16.mxu1 %v12923_v58  ;;  %v11000_v58 = vcombine.low %v368_v28, %v372_v29  ;;  %v11223_v10 = vcombine.high %v591_v4, %v595_v5  ;;  %v10969_v11 = vcombine.high %v336_v6, %v340_v7  ;;  %v711_v12 = vld [vmem:[#allocation5 + $0xbd0] sm:$0xff]  ;;  %v460_v15 = vld [vmem:[#allocation5 + $0x3f8] sm:$0xff] }
 0x18f   : > { %v12969_v30 = vadd.f32 %v2756_v22, %v2716_v21  ;;  %v2758_v32 = vpop.f32.mrf.mxu1  ;;  %3010 = vmatpush1.bf16.msra.mxu0 %v11270_v14  ;;  %v715_v13 = vld [vmem:[#allocation5 + $0xbf0] sm:$0xff]  ;;  %v456_v14 = vld [vmem:[#allocation5 + $0x3d8] sm:$0xff] }
 0x190   : > { %3051 = vmatpush1.bf16.msra.mxu1 %v11016_v17  ;;  %v2718_v34 = vpop.f32.mrf.mxu0  ;;  %3011 = vmatprep.subr.bf16.mxu0 %v11263_v18  ;;  %v11222_v17 = vcombine.low %v591_v4, %v595_v5  ;;  %v10968_v18 = vcombine.low %v336_v6, %v340_v7  ;;  %v11343_v21 = vcombine.high %v711_v12, %v715_v13  ;;  %v452_v26 = vld [vmem:[#allocation5 + $0x3b8] sm:$0xff]  ;;  %v671_v63 = vld [vmem:[#allocation5 + $0xa90] sm:$0xff] }
 0x191   : > { %v2759_v37 = vpop.f32.mrf.mxu1  ;;  %3052 = vmatprep.subr.bf16.mxu1 %v11009_v23  ;;  %v11089_v22 = vcombine.high %v456_v14, %v460_v15  ;;  %v703_v23 = vld [vmem:[#allocation5 + $0xb90] sm:$0xff]  ;;  %v11342_v28 = vcombine.low %v711_v12, %v715_v13  ;;  %v11088_v29 = vcombine.low %v456_v14, %v460_v15  ;;  %v11080_v39 = vcombine.low %v448_v25, %v452_v26 }
 0x192   : > { %v11335_v32 = vcombine.high %v703_v23, %v707_v24  ;;  %v695_v34 = vld [vmem:[#allocation5 + $0xb50] sm:$0xff]  ;;  %v444_v37 = vld [vmem:[#allocation5 + $0x378] sm:$0xff] }
 0x193   : > { %3012 = vmatpush1.bf16.msra.mxu0 %v11262_v33  ;;  %v11081_v33 = vcombine.high %v448_v25, %v452_v26  ;;  %v663_v7 = vld [vmem:[#allocation5 + $0xa50] sm:$0xff]  ;;  %v520_v26 = vld [vmem:[#allocation5 + $0x5d8] sm:$0xff] }
 0x194   : > { %3053 = vmatpush1.bf16.msra.mxu1 %v11008_v35  ;;  %3013 = vmatprep.subr.bf16.mxu0 %v11255_v36  ;;  %v699_v35 = vld [vmem:[#allocation5 + $0xb70] sm:$0xff]  ;;  %v440_v36 = vld [vmem:[#allocation5 + $0x358] sm:$0xff] }
 0x195   : > { %3054 = vmatprep.subr.bf16.mxu1 %v11001_v38  ;;  %v11334_v38 = vcombine.low %v703_v23, %v707_v24  ;;  %v11327_v40 = vcombine.high %v695_v34, %v699_v35  ;;  %v11073_v41 = vcombine.high %v440_v36, %v444_v37  ;;  %v11072_v47 = vcombine.low %v440_v36, %v444_v37  ;;  %v655_v15 = vld [vmem:[#allocation5 + $0xa10] sm:$0xff]  ;;  %v512_v37 = vld [vmem:[#allocation5 + $0x598] sm:$0xff] }
 0x197   : > { %3014 = vmatpush1.bf16.msra.mxu0 %v11254_v43  ;;  %v691_v43 = vld [vmem:[#allocation5 + $0xb30] sm:$0xff] }
 0x198   : > { %3055 = vmatpush1.bf16.msra.mxu1 %v11000_v58  ;;  %3015 = vmatprep.subr.bf16.mxu0 %v11247_v45  ;;  %v432_v58 = vld [vmem:[#allocation5 + $0x318] sm:$0xff]  ;;  %v11319_v48 = vcombine.high %v687_v42, %v691_v43 }
 0x199   : > { %3056 = vmatprep.subr.bf16.mxu1 %v10993_v46  ;;  %v436_v45 = vld [vmem:[#allocation5 + $0x338] sm:$0xff]  ;;  %v11326_v46 = vcombine.low %v695_v34, %v699_v35 }
 0x19a   : > { %v11065_v49 = vcombine.high %v432_v58, %v436_v45  ;;  %v11064_v57 = vcombine.low %v432_v58, %v436_v45  ;;  %v504_v45 = vld [vmem:[#allocation5 + $0x558] sm:$0xff] }
 0x19b   : > { %3016 = vmatpush1.bf16.msra.mxu0 %v11246_v51  ;;  %v683_v51 = vld [vmem:[#allocation5 + $0xaf0] sm:$0xff] }
 0x19c   : > { %3057 = vmatpush1.bf16.msra.mxu1 %v10992_v52  ;;  %3017 = vmatprep.subr.bf16.mxu0 %v11239_v54  ;;  %v424_v52 = vld [vmem:[#allocation5 + $0x2d8] sm:$0xff]  ;;  %v11311_v61 = vcombine.high %v679_v50, %v683_v51 }
 0x19d   : > { %3058 = vmatprep.subr.bf16.mxu1 %v10985_v56  ;;  %v428_v54 = vld [vmem:[#allocation5 + $0x2f8] sm:$0xff]  ;;  %v11318_v56 = vcombine.low %v687_v42, %v691_v43 }
 0x19e   : > { %v11057_v62 = vcombine.high %v424_v52, %v428_v54  ;;  %v11056_v4 = vcombine.low %v424_v52, %v428_v54 }
 0x19f   : > { %3018 = vmatpush1.bf16.msra.mxu0 %v11238_v0  ;;  %v675_v0 = vld [vmem:[#allocation5 + $0xab0] sm:$0xff] }
 0x1a0   : > { %3059 = vmatpush1.bf16.msra.mxu1 %v10984_v1  ;;  %3019 = vmatprep.subr.bf16.mxu0 %v11231_v2  ;;  %v416_v1 = vld [vmem:[#allocation5 + $0x298] sm:$0xff]  ;;  %v11303_v5 = vcombine.high %v671_v63, %v675_v0 }
 0x1a1   : > { %3060 = vmatprep.subr.bf16.mxu1 %v10977_v3  ;;  %v420_v2 = vld [vmem:[#allocation5 + $0x2b8] sm:$0xff]  ;;  %v11310_v3 = vcombine.low %v679_v50, %v683_v51 }
 0x1a2   : > { %v11049_v6 = vcombine.high %v416_v1, %v420_v2  ;;  %v11048_v12 = vcombine.low %v416_v1, %v420_v2  ;;  %v624_v1 = vld [vmem:[#allocation5 + $0x918] sm:$0xff] }
 0x1a3   : > { %3020 = vmatpush1.bf16.msra.mxu0 %v11230_v8  ;;  %v667_v8 = vld [vmem:[#allocation5 + $0xa70] sm:$0xff]  ;;  %v628_v2 = vld [vmem:[#allocation5 + $0x938] sm:$0xff] }
 0x1a4   : > { %3061 = vmatpush1.bf16.msra.mxu1 %v10976_v9  ;;  %3021 = vmatprep.subr.bf16.mxu0 %v11223_v10  ;;  %v408_v9 = vld [vmem:[#allocation5 + $0x258] sm:$0xff]  ;;  %v11295_v13 = vcombine.high %v663_v7, %v667_v8 }
 0x1a5   : > { %3062 = vmatprep.subr.bf16.mxu1 %v10969_v11  ;;  %v412_v10 = vld [vmem:[#allocation5 + $0x278] sm:$0xff]  ;;  %v11302_v11 = vcombine.low %v671_v63, %v675_v0 }
 0x1a6   : > { %v11041_v14 = vcombine.high %v408_v9, %v412_v10  ;;  %v11040_v23 = vcombine.low %v408_v9, %v412_v10  ;;  %v496_v63 = vld [vmem:[#allocation5 + $0x518] sm:$0xff] }
 0x1a7   : > { %3022 = vmatpush1.bf16.msra.mxu0 %v11222_v17  ;;  %v659_v17 = vld [vmem:[#allocation5 + $0xa30] sm:$0xff]  ;;  %v500_v0 = vld [vmem:[#allocation5 + $0x538] sm:$0xff] }
 0x1a8   : > { %3063 = vmatpush1.bf16.msra.mxu1 %v10968_v18  ;;  %3023 = vmatprep.subr.bf16.mxu0 %v11343_v21  ;;  %v400_v18 = vld [vmem:[#allocation5 + $0x218] sm:$0xff]  ;;  %v11287_v24 = vcombine.high %v655_v15, %v659_v17 }
 0x1a9   : > { %3064 = vmatprep.subr.bf16.mxu1 %v11089_v22  ;;  %v404_v21 = vld [vmem:[#allocation5 + $0x238] sm:$0xff]  ;;  %v11294_v22 = vcombine.low %v663_v7, %v667_v8  ;;  %v11257_v8 = vcombine.high %v624_v1, %v628_v2 }
 0x1aa   : > { %v11033_v25 = vcombine.high %v400_v18, %v404_v21  ;;  %v11032_v34 = vcombine.low %v400_v18, %v404_v21  ;;  %v488_v9 = vld [vmem:[#allocation5 + $0x4d8] sm:$0xff] }
 0x1ab   : > { %3024 = vmatpush2.bf16.msra.mxu0 %v11342_v28  ;;  %v524_v28 = vld [vmem:[#allocation5 + $0x5f8] sm:$0xff] }
 0x1ac   : > { %3065 = vmatpush2.bf16.msra.mxu1 %v11088_v29  ;;  %3025 = vmatprep.subr.bf16.mxu0 %v11335_v32  ;;  %v648_v29 = vld [vmem:[#allocation5 + $0x9d8] sm:$0xff]  ;;  %v11153_v35 = vcombine.high %v520_v26, %v524_v28 }
 0x1ad   : > { %3066 = vmatprep.subr.bf16.mxu1 %v11081_v33  ;;  %v652_v32 = vld [vmem:[#allocation5 + $0x9f8] sm:$0xff]  ;;  %v11286_v33 = vcombine.low %v655_v15, %v659_v17 }
 0x1ae   : > { %v11281_v36 = vcombine.high %v648_v29, %v652_v32  ;;  %v11280_v42 = vcombine.low %v648_v29, %v652_v32  ;;  %v492_v10 = vld [vmem:[#allocation5 + $0x4f8] sm:$0xff] }
 0x1af   : > { %3026 = vmatpush2.bf16.msra.mxu0 %v11334_v38  ;;  %v516_v38 = vld [vmem:[#allocation5 + $0x5b8] sm:$0xff] }
 0x1b0   : > { %3067 = vmatpush2.bf16.msra.mxu1 %v11080_v39  ;;  %3027 = vmatprep.subr.bf16.mxu0 %v11327_v40  ;;  %v640_v39 = vld [vmem:[#allocation5 + $0x998] sm:$0xff]  ;;  %v11145_v43 = vcombine.high %v512_v37, %v516_v38  ;;  %v11144_v52 = vcombine.low %v512_v37, %v516_v38 }
 0x1b1   : > { %3068 = vmatprep.subr.bf16.mxu1 %v11073_v41  ;;  %v644_v40 = vld [vmem:[#allocation5 + $0x9b8] sm:$0xff]  ;;  %v11152_v41 = vcombine.low %v520_v26, %v524_v28 }
 0x1b2   : > { %v11273_v58 = vcombine.high %v640_v39, %v644_v40  ;;  %v480_v15 = vld [vmem:[#allocation5 + $0x498] sm:$0xff] }
 0x1b3   : > { %3028 = vmatpush2.bf16.msra.mxu0 %v11326_v46  ;;  %v508_v46 = vld [vmem:[#allocation5 + $0x578] sm:$0xff] }
 0x1b4   : > { %3069 = vmatpush2.bf16.msra.mxu1 %v11072_v47  ;;  %3029 = vmatprep.subr.bf16.mxu0 %v11319_v48  ;;  %v632_v48 = vld [vmem:[#allocation5 + $0x958] sm:$0xff] }
 0x1b5   : > { %3070 = vmatprep.subr.bf16.mxu1 %v11065_v49  ;;  %v636_v49 = vld [vmem:[#allocation5 + $0x978] sm:$0xff] }
 0x1b6   : > { %v484_v17 = vld [vmem:[#allocation5 + $0x4b8] sm:$0xff] }
 0x1b7   : > { %3030 = vmatpush2.bf16.msra.mxu0 %v11318_v56  ;;  %v11272_v56 = vcombine.low %v640_v39, %v644_v40  ;;  %v608_v18 = vld [vmem:[#allocation5 + $0x898] sm:$0xff] }
 0x1b8   : > { %3071 = vmatpush2.bf16.msra.mxu1 %v11064_v57  ;;  %3031 = vmatprep.subr.bf16.mxu0 %v11311_v61  ;;  %v11137_v57 = vcombine.high %v504_v45, %v508_v46  ;;  %v612_v21 = vld [vmem:[#allocation5 + $0x8b8] sm:$0xff] }
 0x1b9   : > { %3072 = vmatprep.subr.bf16.mxu1 %v11057_v62  ;;  %v11265_v62 = vcombine.high %v632_v48, %v636_v49  ;;  %v472_v26 = vld [vmem:[#allocation5 + $0x458] sm:$0xff] }
 0x1ba   : > { %v476_v28 = vld [vmem:[#allocation5 + $0x478] sm:$0xff] }
 0x1bb   : > { %3032 = vmatpush2.bf16.msra.mxu0 %v11310_v3  ;;  %v11136_v3 = vcombine.low %v504_v45, %v508_v46  ;;  %v600_v29 = vld [vmem:[#allocation5 + $0x858] sm:$0xff] }
 0x1bc   : > { %3073 = vmatpush2.bf16.msra.mxu1 %v11056_v4  ;;  %3033 = vmatprep.subr.bf16.mxu0 %v11303_v5  ;;  %v11264_v5 = vcombine.low %v632_v48, %v636_v49  ;;  %v604_v32 = vld [vmem:[#allocation5 + $0x878] sm:$0xff] }
 0x1bd   : > { %3074 = vmatprep.subr.bf16.mxu1 %v11049_v6  ;;  %v11129_v6 = vcombine.high %v496_v63, %v500_v0  ;;  %v464_v37 = vld [vmem:[#allocation5 + $0x418] sm:$0xff] }
 0x1be   : > { %v468_v38 = vld [vmem:[#allocation5 + $0x438] sm:$0xff] }
 0x1bf   : > { %3034 = vmatpush2.bf16.msra.mxu0 %v11302_v11  ;;  %v616_v11 = vld [vmem:[#allocation5 + $0x8d8] sm:$0xff]  ;;  %v11096_v49 = vcombine.low %v464_v37, %v468_v38 }
 0x1c0   : > { %3075 = vmatpush2.bf16.msra.mxu1 %v11048_v12  ;;  %3035 = vmatprep.subr.bf16.mxu0 %v11295_v13  ;;  %v11128_v12 = vcombine.low %v496_v63, %v500_v0  ;;  %v11121_v13 = vcombine.high %v488_v9, %v492_v10  ;;  %v592_v39 = vld [vmem:[#allocation5 + $0x818] sm:$0xff] }
 0x1c1   : > { %3076 = vmatprep.subr.bf16.mxu1 %v11041_v14  ;;  %v596_v40 = vld [vmem:[#allocation5 + $0x838] sm:$0xff] }
 0x1c2   : > { %v584_v45 = vld [vmem:[#allocation5 + $0x7d8] sm:$0xff] }
 0x1c3   : > { %3036 = vmatpush2.bf16.msra.mxu0 %v11294_v22  ;;  %v11120_v22 = vcombine.low %v488_v9, %v492_v10  ;;  %v588_v46 = vld [vmem:[#allocation5 + $0x7f8] sm:$0xff] }
 0x1c4   : > { %3077 = vmatpush2.bf16.msra.mxu1 %v11040_v23  ;;  %3037 = vmatprep.subr.bf16.mxu0 %v11287_v24  ;;  %v11113_v24 = vcombine.high %v480_v15, %v484_v17  ;;  %v716_v48 = vld [vmem:[#allocation5 + $0xbf8] sm:$0xff] }
 0x1c5   : > { %3078 = vmatprep.subr.bf16.mxu1 %v11033_v25  ;;  %v11241_v25 = vcombine.high %v608_v18, %v612_v21  ;;  %v580_v63 = vld [vmem:[#allocation5 + $0x7b8] sm:$0xff] }
 0x1c6   : > { %v704_v0 = vld [vmem:[#allocation5 + $0xb98] sm:$0xff] }
 0x1c7   : > { %3038 = vmatpush2.bf16.msra.mxu0 %v11286_v33  ;;  %v11112_v33 = vcombine.low %v480_v15, %v484_v17 }
 0x1c8   : > { %3079 = vmatpush2.bf16.msra.mxu1 %v11032_v34  ;;  %3089 = vmatprep.subr.bf16.mxu0 %v11153_v35  ;;  %v11240_v34 = vcombine.low %v608_v18, %v612_v21  ;;  %v11105_v35 = vcombine.high %v472_v26, %v476_v28  ;;  %v552_v21 = vld [vmem:[#allocation5 + $0x6d8] sm:$0xff] }
 0x1c9   : > { %3130 = vmatprep.subr.bf16.mxu1 %v11281_v36  ;;  %v11233_v36 = vcombine.high %v600_v29, %v604_v32 }
 0x1ca   : > { %v2795_v47 = vpop.f32.mrf.mxu0  ;;  %3040 = vmatmul.mubr.bf16.vlgmr.msra.gmra.mxu0 %v12939_v31 }
 0x1cb   : > { %v12973_v50 = vadd.f32 %v2795_v47, %v12965_v19  ;;  %v12975_v51 = vpop.f32.mrf.mxu1  ;;  %3081 = vmatmul.mubr.bf16.vlgmr.msra.gmra.mxu1 %v12929_v16  ;;  %3090 = vmatpush1.bf16.msra.mxu0 %v11152_v41  ;;  %v11104_v41 = vcombine.low %v472_v26, %v476_v28  ;;  %v712_v47 = vld [vmem:[#allocation5 + $0xbd8] sm:$0xff] }
 0x1cc   : > { %3131 = vmatpush1.bf16.msra.mxu1 %v11280_v42  ;;  %v12978_v54 = vpop.f32.mrf.mxu0  ;;  %3091 = vmatprep.subr.bf16.mxu0 %v11145_v43  ;;  %v11232_v42 = vcombine.low %v600_v29, %v604_v32  ;;  %v11097_v43 = vcombine.high %v464_v37, %v468_v38  ;;  %v544_v32 = vld [vmem:[#allocation5 + $0x698] sm:$0xff] }
 0x1cd   : > { %v12980_v61 = vpop.f32.mrf.mxu1  ;;  %3132 = vmatprep.subr.bf16.mxu1 %v11273_v58  ;;  %3121 = vmatprep.mubr.bf16.mxu0 %v12925_v59  ;;  %v620_v59 = vld [vmem:[#allocation5 + $0x8f8] sm:$0xff]  ;;  %v11225_v58 = vcombine.high %v592_v39, %v596_v40 }
 0x1ce   : > { %v2799_v19 = vpop.f32.mrf.mxu0  ;;  %3162 = vmatprep.mubr.bf16.mxu1 %v12933_v27  ;;  %v11256_v27 = vcombine.low %v624_v1, %v628_v2  ;;  %v11249_v14 = vcombine.high %v616_v11, %v620_v59  ;;  %v11248_v23 = vcombine.low %v616_v11, %v620_v59  ;;  %v11216_v1 = vcombine.low %v584_v45, %v588_v46  ;;  %v560_v59 = vld [vmem:[#allocation5 + $0x718] sm:$0xff] }
 0x1cf   : > { %v2840_v16 = vpop.f32.mrf.mxu1  ;;  %3092 = vmatpush1.bf16.msra.mxu0 %v11144_v52  ;;  %v11224_v52 = vcombine.low %v592_v39, %v596_v40  ;;  %v708_v19 = vld [vmem:[#allocation5 + $0xbb8] sm:$0xff]  ;;  %v11344_v2 = vcombine.low %v712_v47, %v716_v48 }
 0x1d0   : > { %3133 = vmatpush1.bf16.msra.mxu1 %v11272_v56  ;;  %v2800_v4 = vpop.f32.mrf.mxu0  ;;  %3093 = vmatprep.subr.bf16.mxu0 %v11137_v57  ;;  %v11217_v56 = vcombine.high %v584_v45, %v588_v46  ;;  %v11345_v57 = vcombine.high %v712_v47, %v716_v48  ;;  %v11336_v9 = vcombine.low %v704_v0, %v708_v19  ;;  %v536_v40 = vld [vmem:[#allocation5 + $0x658] sm:$0xff] }
 0x1d1   : > { %v2841_v7 = vpop.f32.mrf.mxu1  ;;  %3134 = vmatprep.subr.bf16.mxu1 %v11265_v62  ;;  %v576_v62 = vld [vmem:[#allocation5 + $0x798] sm:$0xff] }
 0x1d2   : > { %v11209_v16 = vcombine.high %v576_v62, %v580_v63  ;;  %v568_v4 = vld [vmem:[#allocation5 + $0x758] sm:$0xff] }
 0x1d3   : > { %3094 = vmatpush1.bf16.msra.mxu0 %v11136_v3  ;;  %v11337_v3 = vcombine.high %v704_v0, %v708_v19  ;;  %v700_v7 = vld [vmem:[#allocation5 + $0xb78] sm:$0xff]  ;;  %v3291_v19 = vld [vmem:[%s12917_s27 + $0x380] sm:$0xff] }
 0x1d4   : > { %3135 = vmatpush1.bf16.msra.mxu1 %v11264_v5  ;;  %3095 = vmatprep.subr.bf16.mxu0 %v11129_v6  ;;  %v572_v5 = vld [vmem:[#allocation5 + $0x778] sm:$0xff] }
 0x1d5   : > { %3136 = vmatprep.subr.bf16.mxu1 %v11257_v8  ;;  %v696_v6 = vld [vmem:[#allocation5 + $0xb58] sm:$0xff]  ;;  %v11208_v8 = vcombine.low %v576_v62, %v580_v63  ;;  %v11201_v10 = vcombine.high %v568_v4, %v572_v5 }
 0x1d6   : > { %v11329_v11 = vcombine.high %v696_v6, %v700_v7  ;;  %v11328_v15 = vcombine.low %v696_v6, %v700_v7  ;;  %v528_v48 = vld [vmem:[#allocation5 + $0x618] sm:$0xff] }
 0x1d7   : > { %3096 = vmatpush1.bf16.msra.mxu0 %v11128_v12  ;;  %v564_v12 = vld [vmem:[#allocation5 + $0x738] sm:$0xff] }
 0x1d8   : > { %3137 = vmatpush1.bf16.msra.mxu1 %v11256_v27  ;;  %3097 = vmatprep.subr.bf16.mxu0 %v11121_v13  ;;  %v688_v27 = vld [vmem:[#allocation5 + $0xb18] sm:$0xff]  ;;  %v11193_v17 = vcombine.high %v560_v59, %v564_v12 }
 0x1d9   : > { %3138 = vmatprep.subr.bf16.mxu1 %v11249_v14  ;;  %v692_v13 = vld [vmem:[#allocation5 + $0xb38] sm:$0xff]  ;;  %v11200_v14 = vcombine.low %v568_v4, %v572_v5 }
 0x1da   : > { %v11321_v18 = vcombine.high %v688_v27, %v692_v13  ;;  %v11320_v26 = vcombine.low %v688_v27, %v692_v13 }
 0x1db   : > { %3098 = vmatpush1.bf16.msra.mxu0 %v11120_v22  ;;  %v556_v22 = vld [vmem:[#allocation5 + $0x6f8] sm:$0xff] }
 0x1dc   : > { %3139 = vmatpush1.bf16.msra.mxu1 %v11248_v23  ;;  %3099 = vmatprep.subr.bf16.mxu0 %v11113_v24  ;;  %v680_v23 = vld [vmem:[#allocation5 + $0xad8] sm:$0xff]  ;;  %v11185_v28 = vcombine.high %v552_v21, %v556_v22 }
 0x1dd   : > { %3140 = vmatprep.subr.bf16.mxu1 %v11241_v25  ;;  %v684_v24 = vld [vmem:[#allocation5 + $0xaf8] sm:$0xff]  ;;  %v11192_v25 = vcombine.low %v560_v59, %v564_v12  ;;  %v3539_v59 = vld [vmem:[%s12917_s27 + $0xb40] sm:$0xff] }
 0x1de   : > { %v11313_v29 = vcombine.high %v680_v23, %v684_v24  ;;  %v11312_v37 = vcombine.low %v680_v23, %v684_v24 }
 0x1df   : > { %3100 = vmatpush1.bf16.msra.mxu0 %v11112_v33  ;;  %v548_v33 = vld [vmem:[#allocation5 + $0x6b8] sm:$0xff] }
 0x1e0   : > { %3141 = vmatpush1.bf16.msra.mxu1 %v11240_v34  ;;  %3101 = vmatprep.subr.bf16.mxu0 %v11105_v35  ;;  %v672_v34 = vld [vmem:[#allocation5 + $0xa98] sm:$0xff]  ;;  %v11177_v38 = vcombine.high %v544_v32, %v548_v33 }
 0x1e1   : > { %3142 = vmatprep.subr.bf16.mxu1 %v11233_v36  ;;  %v676_v35 = vld [vmem:[#allocation5 + $0xab8] sm:$0xff]  ;;  %v11184_v36 = vcombine.low %v552_v21, %v556_v22  ;;  %v3523_v22 = vld [vmem:[%s12917_s27 + $0xac0] sm:$0xff] }
 0x1e2   : > { %v11305_v39 = vcombine.high %v672_v34, %v676_v35  ;;  %v11304_v45 = vcombine.low %v672_v34, %v676_v35  ;;  %v3507_v35 = vld [vmem:[%s12917_s27 + $0xa40] sm:$0xff] }
 0x1e3   : > { %3102 = vmatpush1.bf16.msra.mxu0 %v11104_v41  ;;  %v540_v41 = vld [vmem:[#allocation5 + $0x678] sm:$0xff] }
 0x1e4   : > { %3143 = vmatpush1.bf16.msra.mxu1 %v11232_v42  ;;  %3103 = vmatprep.subr.bf16.mxu0 %v11097_v43  ;;  %v664_v42 = vld [vmem:[#allocation5 + $0xa58] sm:$0xff]  ;;  %v11169_v46 = vcombine.high %v536_v40, %v540_v41 }
 0x1e5   : > { %3144 = vmatprep.subr.bf16.mxu1 %v11225_v58  ;;  %v668_v43 = vld [vmem:[#allocation5 + $0xa78] sm:$0xff]  ;;  %v11176_v58 = vcombine.low %v544_v32, %v548_v33  ;;  %v3243_v32 = vld [vmem:[%s12917_s27 + $0x200] sm:$0xff] }
 0x1e6   : > { %v11297_v47 = vcombine.high %v664_v42, %v668_v43  ;;  %v11296_v62 = vcombine.low %v664_v42, %v668_v43  ;;  %v3251_v33 = vld [vmem:[%s12917_s27 + $0x240] sm:$0xff] }
 0x1e7   : > { %3104 = vmatpush1.bf16.msra.mxu0 %v11096_v49  ;;  %v532_v49 = vld [vmem:[#allocation5 + $0x638] sm:$0xff] }
 0x1e8   : > { %3145 = vmatpush1.bf16.msra.mxu1 %v11224_v52  ;;  %3105 = vmatprep.subr.bf16.mxu0 %v11217_v56  ;;  %v656_v52 = vld [vmem:[#allocation5 + $0xa18] sm:$0xff]  ;;  %v11161_v63 = vcombine.high %v528_v48, %v532_v49  ;;  %v11160_v4 = vcombine.low %v528_v48, %v532_v49  ;;  %v3491_v48 = vld [vmem:[%s12917_s27 + $0x9c0] sm:$0xff]  ;;  %v11410_v49 = vcombine.low %v3243_v32, %v3251_v33 }
 0x1e9   : > { %3146 = vmatprep.subr.bf16.mxu1 %v11345_v57  ;;  %v660_v56 = vld [vmem:[#allocation5 + $0xa38] sm:$0xff]  ;;  %v11168_v57 = vcombine.low %v536_v40, %v540_v41  ;;  %v11411_v41 = vcombine.high %v3243_v32, %v3251_v33  ;;  %v3411_v32 = vld [vmem:[%s12917_s27 + $0x740] sm:$0xff] }
 0x1ea   : > { %v11289_v0 = vcombine.high %v656_v52, %v660_v56  ;;  %v11288_v5 = vcombine.low %v656_v52, %v660_v56  ;;  %v3659_v33 = vld [vmem:[%s12917_s27 + $0xf00] sm:$0xff] }
 0x1eb   : > { %3106 = vmatpush2.bf16.msra.mxu0 %v11216_v1  ;;  %v3299_v1 = vld [vmem:[%s12917_s27 + $0x3c0] sm:$0xff] }
 0x1ec   : > { %3147 = vmatpush2.bf16.msra.mxu1 %v11344_v2  ;;  %3107 = vmatprep.subr.bf16.mxu0 %v11209_v16  ;;  %v3547_v2 = vld [vmem:[%s12917_s27 + $0xb80] sm:$0xff]  ;;  %v11459_v6 = vcombine.high %v3291_v19, %v3299_v1  ;;  %v11458_v27 = vcombine.low %v3291_v19, %v3299_v1 }
 0x1ed   : > { %3148 = vmatprep.subr.bf16.mxu1 %v11337_v3  ;;  %v3555_v16 = vld [vmem:[%s12917_s27 + $0xbc0] sm:$0xff]  ;;  %v12989_v3 = vsub.s32 3, %v12949_v44 }
 0x1ee   : > { %v11715_v7 = vcombine.high %v3547_v2, %v3555_v16  ;;  %v11714_v13 = vcombine.low %v3547_v2, %v3555_v16  ;;  %v3475_v19 = vld [vmem:[%s12917_s27 + $0x940] sm:$0xff] }
 0x1ef   : > { %3108 = vmatpush2.bf16.msra.mxu0 %v11208_v8  ;;  %v3275_v8 = vld [vmem:[%s12917_s27 + $0x300] sm:$0xff]  ;;  %v734_v12 = vrot.slane %v12954_v55, %v12989_v3 }
 0x1f0   : > { %3149 = vmatpush2.bf16.msra.mxu1 %v11336_v9  ;;  %3109 = vmatprep.subr.bf16.mxu0 %v11201_v10  ;;  %v2798_v9 = vadd.f32 %v12978_v54, %v12969_v30  ;;  %v3283_v10 = vld [vmem:[%s12917_s27 + $0x340] sm:$0xff] }
 0x1f1   : > { %3150 = vmatprep.subr.bf16.mxu1 %v11329_v11  ;;  %v3531_v11 = vld [vmem:[%s12917_s27 + $0xb00] sm:$0xff]  ;;  %v2839_v55 = vadd.f32 %v12980_v61, %v734_v12  ;;  %v11442_v24 = vcombine.low %v3275_v8, %v3283_v10 }
 0x1f2   : > { %v13001_v21 = vpack.c.bf16 %v2798_v9, %v2798_v9  ;;  %v3515_v54 = vld [vmem:[%s12917_s27 + $0xa80] sm:$0xff] }
 0x1f3   : > { %3110 = vmatpush2.bf16.msra.mxu0 %v11200_v14  ;;  %v11443_v14 = vcombine.high %v3275_v8, %v3283_v10  ;;  %v11683_v61 = vcombine.high %v3515_v54, %v3523_v22  ;;  %v11682_v40 = vcombine.low %v3515_v54, %v3523_v22  ;;  %v3459_v8 = vld [vmem:[%s12917_s27 + $0x8c0] sm:$0xff] }
 0x1f4   : > { %3151 = vmatpush2.bf16.msra.mxu1 %v11328_v15  ;;  %3111 = vmatprep.subr.bf16.mxu0 %v11193_v17  ;;  %v11699_v15 = vcombine.high %v3531_v11, %v3539_v59  ;;  %v3259_v17 = vld [vmem:[%s12917_s27 + $0x280] sm:$0xff] }
 0x1f5   : > { %3152 = vmatprep.subr.bf16.mxu1 %v11321_v18  ;;  %v3267_v18 = vld [vmem:[%s12917_s27 + $0x2c0] sm:$0xff] }
 0x1f6   : > { %v3179_v12 = vld [vmem:[%s12917_s27] sm:$0xff] }
 0x1f7   : > { %3112 = vmatpush2.bf16.msra.mxu0 %v11192_v25  ;;  %v3419_v22 = vld [vmem:[%s12917_s27 + $0x780] sm:$0xff] }
 0x1f8   : > { %3153 = vmatpush2.bf16.msra.mxu1 %v11320_v26  ;;  %3113 = vmatprep.subr.bf16.mxu0 %v11185_v28  ;;  %v11698_v26 = vcombine.low %v3531_v11, %v3539_v59 }
 0x1f9   : > { %3154 = vmatprep.subr.bf16.mxu1 %v11313_v29 }
 0x1fb   : > { %3114 = vmatpush2.bf16.msra.mxu0 %v11184_v36 }
 0x1fc   : > { %3155 = vmatpush2.bf16.msra.mxu1 %v11312_v37  ;;  %3115 = vmatprep.subr.bf16.mxu0 %v11177_v38  ;;  %v11426_v38 = vcombine.low %v3259_v17, %v3267_v18 }
 0x1fd   : > { %3156 = vmatprep.subr.bf16.mxu1 %v11305_v39 }
 0x1ff   : > { %3116 = vmatpush2.bf16.msra.mxu0 %v11176_v58 }
 0x200   : > { %3157 = vmatpush2.bf16.msra.mxu1 %v11304_v45  ;;  %3117 = vmatprep.subr.bf16.mxu0 %v11169_v46  ;;  %v3227_v45 = vld [vmem:[%s12917_s27 + $0x180] sm:$0xff] }
 0x201   : > { %3158 = vmatprep.subr.bf16.mxu1 %v11297_v47  ;;  %v3235_v46 = vld [vmem:[%s12917_s27 + $0x1c0] sm:$0xff] }
 0x202   : > { %v3483_v47 = vld [vmem:[%s12917_s27 + $0x980] sm:$0xff]  ;;  %v11395_v56 = vcombine.high %v3227_v45, %v3235_v46  ;;  %v11394_v1 = vcombine.low %v3227_v45, %v3235_v46 }
 0x203   : > { %3118 = vmatpush2.bf16.msra.mxu0 %v11168_v57  ;;  %v11651_v57 = vcombine.high %v3483_v47, %v3491_v48  ;;  %v11650_v2 = vcombine.low %v3483_v47, %v3491_v48  ;;  %v3371_v47 = vld [vmem:[%s12917_s27 + $0x600] sm:$0xff] }
 0x204   : > { %3159 = vmatpush2.bf16.msra.mxu1 %v11296_v62  ;;  %3119 = vmatprep.subr.bf16.mxu0 %v11161_v63  ;;  %v3211_v62 = vld [vmem:[%s12917_s27 + $0x100] sm:$0xff] }
 0x205   : > { %3160 = vmatprep.subr.bf16.mxu1 %v11289_v0  ;;  %v3219_v63 = vld [vmem:[%s12917_s27 + $0x140] sm:$0xff] }
 0x206   : > { %v3467_v0 = vld [vmem:[%s12917_s27 + $0x900] sm:$0xff]  ;;  %v11379_v16 = vcombine.high %v3211_v62, %v3219_v63  ;;  %v11378_v9 = vcombine.low %v3211_v62, %v3219_v63 }
 0x207   : > { %3120 = vmatpush2.bf16.msra.mxu0 %v11160_v4  ;;  %v11635_v4 = vcombine.high %v3467_v0, %v3475_v19  ;;  %v11634_v10 = vcombine.low %v3467_v0, %v3475_v19  ;;  %v3379_v48 = vld [vmem:[%s12917_s27 + $0x640] sm:$0xff] }
 0x208   : > { %3161 = vmatpush2.bf16.msra.mxu1 %v11288_v5  ;;  %9407 = vmatprep.subr.bf16.mxu0 %v11459_v6  ;;  %v3195_v5 = vld [vmem:[%s12917_s27 + $0x80] sm:$0xff]  ;;  %v11539_v62 = vcombine.high %v3371_v47, %v3379_v48 }
 0x209   : > { %9448 = vmatprep.subr.bf16.mxu1 %v11715_v7  ;;  %v3203_v6 = vld [vmem:[%s12917_s27 + $0xc0] sm:$0xff] }
 0x20a   : > { %v13003_v30 = vpop.f32.mrf.mxu0  ;;  %3122 = vmatmul.mubr.bf16.vlgmr.msra.gmra.mxu0 %v12931_v20  ;;  %v11427_v20 = vcombine.high %v3259_v17, %v3267_v18  ;;  %v3451_v7 = vld [vmem:[%s12917_s27 + $0x880] sm:$0xff]  ;;  %v11363_v11 = vcombine.high %v3195_v5, %v3203_v6 }
 0x20b   : > { %v13009_v23 = vpop.f32.mrf.mxu1  ;;  %3163 = vmatmul.mubr.bf16.vlgmr.msra.gmra.mxu1 %v12939_v31  ;;  %9408 = vmatpush1.bf16.msra.mxu0 %v11458_v27  ;;  %v3499_v31 = vld [vmem:[%s12917_s27 + $0xa00] sm:$0xff]  ;;  %v11619_v59 = vcombine.high %v3451_v7, %v3459_v8  ;;  %v11618_v17 = vcombine.low %v3451_v7, %v3459_v8 }
 0x20c   : > { %9439 = vmatprep.mubr.bf16.mxu0 %v13001_v21  ;;  %9449 = vmatpush1.bf16.msra.mxu1 %v11714_v13  ;;  %v2879_v25 = vpop.f32.mrf.mxu0  ;;  %v11667_v58 = vcombine.high %v3499_v31, %v3507_v35  ;;  %v11666_v52 = vcombine.low %v3499_v31, %v3507_v35  ;;  %v3187_v27 = vld [vmem:[%s12917_s27 + $0x40] sm:$0xff] }
 0x20d   : > { %v2880_v28 = vadd.f32 %v2879_v25, %v2839_v55  ;;  %v2920_v29 = vpop.f32.mrf.mxu1  ;;  %9409 = vmatprep.subr.bf16.mxu0 %v11443_v14  ;;  %9450 = vmatprep.subr.bf16.mxu1 %v11699_v15  ;;  %v3435_v13 = vld [vmem:[%s12917_s27 + $0x800] sm:$0xff]  ;;  %v11362_v15 = vcombine.low %v3195_v5, %v3203_v6  ;;  %v11347_v18 = vcombine.high %v3179_v12, %v3187_v27 }
 0x20e   : > { %v2881_v34 = vpop.f32.mrf.mxu0  ;;  %v3443_v14 = vld [vmem:[%s12917_s27 + $0x840] sm:$0xff] }
 0x20f   : > { %v2921_v36 = vadd.f32 %v2920_v29, %v2880_v28  ;;  %v2922_v37 = vpop.f32.mrf.mxu1  ;;  %9410 = vmatpush1.bf16.msra.mxu0 %v11442_v24  ;;  %v11603_v54 = vcombine.high %v3435_v13, %v3443_v14  ;;  %v3427_v55 = vld [vmem:[%s12917_s27 + $0x7c0] sm:$0xff] }
 0x210   : > { %9451 = vmatpush1.bf16.msra.mxu1 %v11698_v26  ;;  %v2882_v39 = vpop.f32.mrf.mxu0  ;;  %9411 = vmatprep.subr.bf16.mxu0 %v11427_v20  ;;  %v3675_v24 = vld [vmem:[%s12917_s27 + $0xf80] sm:$0xff]  ;;  %v11346_v26 = vcombine.low %v3179_v12, %v3187_v27  ;;  %v11602_v20 = vcombine.low %v3435_v13, %v3443_v14  ;;  %v11587_v28 = vcombine.high %v3419_v22, %v3427_v55 }
 0x211   : > { %v13017_v42 = vpack.c.bf16 %v2921_v36, %v2921_v36  ;;  %v2923_v43 = vpop.f32.mrf.mxu1  ;;  %9452 = vmatprep.subr.bf16.mxu1 %v11683_v61  ;;  %v3683_v25 = vld [vmem:[%s12917_s27 + $0xfc0] sm:$0xff]  ;;  %v11586_v31 = vcombine.low %v3419_v22, %v3427_v55 }
 0x212   : > { %v11843_v29 = vcombine.high %v3675_v24, %v3683_v25  ;;  %v3403_v61 = vld [vmem:[%s12917_s27 + $0x700] sm:$0xff]  ;;  %v11842_v35 = vcombine.low %v3675_v24, %v3683_v25 }
 0x213   : > { %9412 = vmatpush1.bf16.msra.mxu0 %v11426_v38  ;;  %9480 = vmatprep.mubr.bf16.mxu1 %v13017_v42  ;;  %v3667_v34 = vld [vmem:[%s12917_s27 + $0xf40] sm:$0xff]  ;;  %v11571_v36 = vcombine.high %v3403_v61, %v3411_v32  ;;  %v11570_v43 = vcombine.low %v3403_v61, %v3411_v32 }
 0x214   : > { %9453 = vmatpush1.bf16.msra.mxu1 %v11682_v40  ;;  %9413 = vmatprep.subr.bf16.mxu0 %v11411_v41  ;;  %v11827_v37 = vcombine.high %v3659_v33, %v3667_v34  ;;  %v3387_v38 = vld [vmem:[%s12917_s27 + $0x680] sm:$0xff] }
 0x215   : > { %9454 = vmatprep.subr.bf16.mxu1 %v11667_v58  ;;  %v3395_v39 = vld [vmem:[%s12917_s27 + $0x6c0] sm:$0xff]  ;;  %v11826_v58 = vcombine.low %v3659_v33, %v3667_v34 }
 0x216   : > { %v3643_v40 = vld [vmem:[%s12917_s27 + $0xe80] sm:$0xff]  ;;  %v11555_v45 = vcombine.high %v3387_v38, %v3395_v39 }
 0x217   : > { %9414 = vmatpush1.bf16.msra.mxu0 %v11410_v49  ;;  %v3651_v41 = vld [vmem:[%s12917_s27 + $0xec0] sm:$0xff] }
 0x218   : > { %9455 = vmatpush1.bf16.msra.mxu1 %v11666_v52  ;;  %9415 = vmatprep.subr.bf16.mxu0 %v11395_v56  ;;  %v11811_v46 = vcombine.high %v3643_v40, %v3651_v41  ;;  %v3627_v49 = vld [vmem:[%s12917_s27 + $0xe00] sm:$0xff]  ;;  %v11554_v56 = vcombine.low %v3387_v38, %v3395_v39 }
 0x219   : > { %9456 = vmatprep.subr.bf16.mxu1 %v11651_v57  ;;  %v3635_v52 = vld [vmem:[%s12917_s27 + $0xe40] sm:$0xff]  ;;  %v11810_v57 = vcombine.low %v3643_v40, %v3651_v41 }
 0x21a   : > { %v11795_v63 = vcombine.high %v3627_v49, %v3635_v52  ;;  %v3355_v0 = vld [vmem:[%s12917_s27 + $0x580] sm:$0xff] }
 0x21b   : > { %9416 = vmatpush1.bf16.msra.mxu0 %v11394_v1  ;;  %v3363_v19 = vld [vmem:[%s12917_s27 + $0x5c0] sm:$0xff] }
 0x21c   : > { %9457 = vmatpush1.bf16.msra.mxu1 %v11650_v2  ;;  %9417 = vmatprep.subr.bf16.mxu0 %v11379_v16  ;;  %v3611_v1 = vld [vmem:[%s12917_s27 + $0xd80] sm:$0xff]  ;;  %v11538_v16 = vcombine.low %v3371_v47, %v3379_v48  ;;  %v11523_v5 = vcombine.high %v3355_v0, %v3363_v19 }
 0x21d   : > { %9458 = vmatprep.subr.bf16.mxu1 %v11635_v4  ;;  %v3619_v2 = vld [vmem:[%s12917_s27 + $0xdc0] sm:$0xff]  ;;  %v11794_v4 = vcombine.low %v3627_v49, %v3635_v52  ;;  %v13088_v52 = vpack.c.bf16 %v12973_v50, %v12973_v50 }
 0x21e   : > { %v11779_v6 = vcombine.high %v3611_v1, %v3619_v2  ;;  %v3339_v7 = vld [vmem:[%s12917_s27 + $0x500] sm:$0xff]  ;;  %v11778_v12 = vcombine.low %v3611_v1, %v3619_v2 }
 0x21f   : > { %9418 = vmatpush1.bf16.msra.mxu0 %v11378_v9  ;;  %v3347_v8 = vld [vmem:[%s12917_s27 + $0x540] sm:$0xff] }
 0x220   : > { %9459 = vmatpush1.bf16.msra.mxu1 %v11634_v10  ;;  %9419 = vmatprep.subr.bf16.mxu0 %v11363_v11  ;;  %v3595_v9 = vld [vmem:[%s12917_s27 + $0xd00] sm:$0xff]  ;;  %v13061_v11 = vsub.s32 2, %v12949_v44  ;;  %v11507_v27 = vcombine.high %v3339_v7, %v3347_v8  ;;  %v11506_v55 = vcombine.low %v3339_v7, %v3347_v8 }
 0x221   : > { %9460 = vmatprep.subr.bf16.mxu1 %v11619_v59  ;;  %v3603_v10 = vld [vmem:[%s12917_s27 + $0xd40] sm:$0xff]  ;;  %v11522_v59 = vcombine.low %v3355_v0, %v3363_v19 }
 0x222   : > { %v11763_v13 = vcombine.high %v3595_v9, %v3603_v10  ;;  %v3323_v14 = vld [vmem:[%s12917_s27 + $0x480] sm:$0xff]  ;;  %v11762_v24 = vcombine.low %v3595_v9, %v3603_v10 }
 0x223   : > { %9420 = vmatpush1.bf16.msra.mxu0 %v11362_v15  ;;  %v3331_v15 = vld [vmem:[%s12917_s27 + $0x4c0] sm:$0xff] }
 0x224   : > { %9461 = vmatpush1.bf16.msra.mxu1 %v11618_v17  ;;  %9421 = vmatprep.subr.bf16.mxu0 %v11347_v18  ;;  %v3579_v17 = vld [vmem:[%s12917_s27 + $0xc80] sm:$0xff]  ;;  %v11491_v25 = vcombine.high %v3323_v14, %v3331_v15  ;;  %v11490_v33 = vcombine.low %v3323_v14, %v3331_v15 }
 0x225   : > { %9462 = vmatprep.subr.bf16.mxu1 %v11603_v54  ;;  %v3587_v18 = vld [vmem:[%s12917_s27 + $0xcc0] sm:$0xff]  ;;  %v13067_v54 = vld [vmem:[#allocation7] sm:$0xff] }
 0x226   : > { %v730_v22 = vrot.slane %v13067_v54, %v13061_v11  ;;  %v3571_v61 = vld [vmem:[%s12917_s27 + $0xc40] sm:$0xff]  ;;  %v11746_v34 = vcombine.low %v3579_v17, %v3587_v18 }
 0x227   : > { %9422 = vmatpush1.bf16.msra.mxu0 %v11346_v26  ;;  %v11747_v26 = vcombine.high %v3579_v17, %v3587_v18  ;;  %v3811_v38 = vld [vmem:[%s12917_s27 + $0x13c0] sm:$0xff] }
 0x228   : > { %9463 = vmatpush1.bf16.msra.mxu1 %v11602_v20  ;;  %9423 = vmatprep.subr.bf16.mxu0 %v11587_v28  ;;  %v3307_v20 = vld [vmem:[%s12917_s27 + $0x400] sm:$0xff]  ;;  %v2837_v32 = vadd.f32 %v12975_v51, %v730_v22 }
 0x229   : > { %9464 = vmatprep.subr.bf16.mxu1 %v11843_v29  ;;  %v3315_v28 = vld [vmem:[%s12917_s27 + $0x440] sm:$0xff] }
 0x22a   : > { %v3563_v29 = vld [vmem:[%s12917_s27 + $0xc00] sm:$0xff]  ;;  %v11474_v51 = vcombine.low %v3307_v20, %v3315_v28 }
 0x22b   : > { %9424 = vmatpush2.bf16.msra.mxu0 %v11586_v31  ;;  %v11475_v31 = vcombine.high %v3307_v20, %v3315_v28  ;;  %v4059_v39 = vld [vmem:[%s12917_s27 + $0x1b80] sm:$0xff]  ;;  %v11730_v41 = vcombine.low %v3563_v29, %v3571_v61  ;;  %v13116_v20 = vld [vmem:[%s12917_s27 + $0xbc8] sm:$0xff] }
 0x22c   : > { %9465 = vmatpush2.bf16.msra.mxu1 %v11842_v35  ;;  %9425 = vmatprep.subr.bf16.mxu0 %v11571_v36  ;;  %v2878_v35 = vadd.f32 %v13003_v30, %v2837_v32  ;;  %v11731_v36 = vcombine.high %v3563_v29, %v3571_v61  ;;  %v4067_v40 = vld [vmem:[%s12917_s27 + $0x1bc0] sm:$0xff] }
 0x22d   : > { %9466 = vmatprep.subr.bf16.mxu1 %v11827_v37  ;;  %v3803_v37 = vld [vmem:[%s12917_s27 + $0x1380] sm:$0xff] }
 0x22e   : > { %v3787_v30 = vld [vmem:[%s12917_s27 + $0x1300] sm:$0xff]  ;;  %v11970_v49 = vcombine.low %v3803_v37, %v3811_v38 }
 0x22f   : > { %9426 = vmatpush2.bf16.msra.mxu0 %v11570_v43  ;;  %v11971_v43 = vcombine.high %v3803_v37, %v3811_v38  ;;  %v4043_v47 = vld [vmem:[%s12917_s27 + $0x1b00] sm:$0xff] }
 0x230   : > { %9467 = vmatpush2.bf16.msra.mxu1 %v11826_v58  ;;  %9427 = vmatprep.subr.bf16.mxu0 %v11555_v45  ;;  %v2919_v58 = vadd.f32 %v13009_v23, %v2878_v35  ;;  %v3795_v45 = vld [vmem:[%s12917_s27 + $0x1340] sm:$0xff] }
 0x231   : > { %9468 = vmatprep.subr.bf16.mxu1 %v11811_v46  ;;  %v12227_v46 = vcombine.high %v4059_v39, %v4067_v40  ;;  %v4051_v48 = vld [vmem:[%s12917_s27 + $0x1b40] sm:$0xff] }
 0x232   : > { %v13090_v23 = vpack.c.bf16 %v2919_v58, %v2919_v58  ;;  %v12211_v0 = vcombine.high %v4043_v47, %v4051_v48  ;;  %v4027_v1 = vld [vmem:[%s12917_s27 + $0x1a80] sm:$0xff] }
 0x233   : > { %9428 = vmatpush2.bf16.msra.mxu0 %v11554_v56  ;;  %v11955_v56 = vcombine.high %v3787_v30, %v3795_v45  ;;  %v4035_v2 = vld [vmem:[%s12917_s27 + $0x1ac0] sm:$0xff] }
 0x234   : > { %9469 = vmatpush2.bf16.msra.mxu1 %v11810_v57  ;;  %9429 = vmatprep.subr.bf16.mxu0 %v11539_v62  ;;  %v12226_v57 = vcombine.low %v4059_v39, %v4067_v40  ;;  %v3771_v62 = vld [vmem:[%s12917_s27 + $0x1280] sm:$0xff]  ;;  %v12195_v10 = vcombine.high %v4027_v1, %v4035_v2  ;;  %v12194_v22 = vcombine.low %v4027_v1, %v4035_v2 }
 0x235   : > { %9470 = vmatprep.subr.bf16.mxu1 %v11795_v63  ;;  %v3779_v63 = vld [vmem:[%s12917_s27 + $0x12c0] sm:$0xff] }
 0x236   : > { %v3755_v8 = vld [vmem:[%s12917_s27 + $0x1200] sm:$0xff]  ;;  %v11938_v14 = vcombine.low %v3771_v62, %v3779_v63 }
 0x237   : > { %9430 = vmatpush2.bf16.msra.mxu0 %v11538_v16  ;;  %v11954_v16 = vcombine.low %v3787_v30, %v3795_v45  ;;  %v3763_v9 = vld [vmem:[%s12917_s27 + $0x1240] sm:$0xff] }
 0x238   : > { %9471 = vmatpush2.bf16.msra.mxu1 %v11794_v4  ;;  %9431 = vmatprep.subr.bf16.mxu0 %v11523_v5  ;;  %v11939_v5 = vcombine.high %v3771_v62, %v3779_v63  ;;  %v11923_v17 = vcombine.high %v3755_v8, %v3763_v9  ;;  %v3739_v18 = vld [vmem:[%s12917_s27 + $0x1180] sm:$0xff]  ;;  %v11922_v61 = vcombine.low %v3755_v8, %v3763_v9 }
 0x239   : > { %9472 = vmatprep.subr.bf16.mxu1 %v11779_v6  ;;  %v12210_v6 = vcombine.low %v4043_v47, %v4051_v48  ;;  %v3995_v28 = vld [vmem:[%s12917_s27 + $0x1980] sm:$0xff] }
 0x23a   : > { %v4003_v29 = vld [vmem:[%s12917_s27 + $0x19c0] sm:$0xff] }
 0x23b   : > { %9432 = vmatpush2.bf16.msra.mxu0 %v11522_v59  ;;  %v3731_v35 = vld [vmem:[%s12917_s27 + $0x1140] sm:$0xff] }
 0x23c   : > { %9473 = vmatpush2.bf16.msra.mxu1 %v11778_v12  ;;  %9433 = vmatprep.subr.bf16.mxu0 %v11507_v27  ;;  %v4011_v12 = vld [vmem:[%s12917_s27 + $0x1a00] sm:$0xff] }
 0x23d   : > { %9474 = vmatprep.subr.bf16.mxu1 %v11763_v13  ;;  %v4019_v27 = vld [vmem:[%s12917_s27 + $0x1a40] sm:$0xff] }
 0x23e   : > { %v3979_v37 = vld [vmem:[%s12917_s27 + $0x1900] sm:$0xff] }
 0x23f   : > { %9434 = vmatpush2.bf16.msra.mxu0 %v11506_v55  ;;  %v3987_v38 = vld [vmem:[%s12917_s27 + $0x1940] sm:$0xff] }
 0x240   : > { %9475 = vmatpush2.bf16.msra.mxu1 %v11762_v24  ;;  %9435 = vmatprep.subr.bf16.mxu0 %v11491_v25  ;;  %v3747_v24 = vld [vmem:[%s12917_s27 + $0x11c0] sm:$0xff]  ;;  %v12179_v25 = vcombine.high %v4011_v12, %v4019_v27  ;;  %v12147_v58 = vcombine.high %v3979_v37, %v3987_v38  ;;  %v12146_v48 = vcombine.low %v3979_v37, %v3987_v38 }
 0x241   : > { %9476 = vmatprep.subr.bf16.mxu1 %v11747_v26  ;;  %v13113_v26 = vld [vmem:[%s12917_s27 + $0xb88] sm:$0xff]  ;;  %v11906_v39 = vcombine.low %v3739_v18, %v3747_v24  ;;  %v3963_v30 = vld [vmem:[%s12917_s27 + $0x1880] sm:$0xff] }
 0x242   : > { %v11716_v32 = vcombine.low %v13113_v26, %v13116_v20  ;;  %v3971_v45 = vld [vmem:[%s12917_s27 + $0x18c0] sm:$0xff] }
 0x243   : > { %9436 = vmatpush2.bf16.msra.mxu0 %v11490_v33  ;;  %v11907_v33 = vcombine.high %v3739_v18, %v3747_v24  ;;  %v3947_v62 = vld [vmem:[%s12917_s27 + $0x1800] sm:$0xff]  ;;  %v12130_v2 = vcombine.low %v3963_v30, %v3971_v45 }
 0x244   : > { %9477 = vmatpush2.bf16.msra.mxu1 %v11746_v34  ;;  %9437 = vmatprep.subr.bf16.mxu0 %v11475_v31  ;;  %v12178_v34 = vcombine.low %v4011_v12, %v4019_v27  ;;  %v3723_v31 = vld [vmem:[%s12917_s27 + $0x1100] sm:$0xff] }
 0x245   : > { %9478 = vmatprep.subr.bf16.mxu1 %v11731_v36  ;;  %v12163_v36 = vcombine.high %v3995_v28, %v4003_v29  ;;  %v11891_v40 = vcombine.high %v3723_v31, %v3731_v35  ;;  %v3955_v63 = vld [vmem:[%s12917_s27 + $0x1840] sm:$0xff] }
 0x246   : > { %v4187_v8 = vld [vmem:[%s12917_s27 + $0x1f80] sm:$0xff]  ;;  %v12114_v12 = vcombine.low %v3947_v62, %v3955_v63 }
 0x247   : > { %9438 = vmatpush2.bf16.msra.mxu0 %v11474_v51  ;;  %v12162_v51 = vcombine.low %v3995_v28, %v4003_v29  ;;  %v4195_v9 = vld [vmem:[%s12917_s27 + $0x1fc0] sm:$0xff] }
 0x248   : > { %9479 = vmatpush2.bf16.msra.mxu1 %v11730_v41  ;;  %9489 = vmatprep.subr.bf16.mxu0 %v11971_v43  ;;  %v3707_v41 = vld [vmem:[%s12917_s27 + $0x1080] sm:$0xff] }
 0x249   : > { %9530 = vmatprep.subr.bf16.mxu1 %v12227_v46  ;;  %v3715_v43 = vld [vmem:[%s12917_s27 + $0x10c0] sm:$0xff]  ;;  %v11890_v46 = vcombine.low %v3723_v31, %v3731_v35 }
 0x24a   : > { %v13094_v19 = vpop.f32.mrf.mxu0  ;;  %9440 = vmatmul.mubr.bf16.vlgmr.msra.gmra.mxu0 %v13088_v52  ;;  %v11875_v47 = vcombine.high %v3707_v41, %v3715_v43  ;;  %v3915_v27 = vld [vmem:[%s12917_s27 + $0x1700] sm:$0xff] }
 0x24b   : > { %v13099_v50 = vpop.f32.mrf.mxu1  ;;  %9481 = vmatmul.mubr.bf16.vlgmr.msra.gmra.mxu1 %v13090_v23  ;;  %9490 = vmatpush1.bf16.msra.mxu0 %v11970_v49  ;;  %v3691_v49 = vld [vmem:[%s12917_s27 + $0x1000] sm:$0xff] }
 0x24c   : > { %v13102_v4 = vpop.f32.mrf.mxu0  ;;  %9491 = vmatprep.subr.bf16.mxu0 %v11955_v56  ;;  %9531 = vmatpush1.bf16.msra.mxu1 %v12226_v57  ;;  %v3699_v56 = vld [vmem:[%s12917_s27 + $0x1040] sm:$0xff]  ;;  %v12131_v57 = vcombine.high %v3963_v30, %v3971_v45 }
 0x24d   : > { %v13104_v7 = vpop.f32.mrf.mxu1  ;;  %9532 = vmatprep.subr.bf16.mxu1 %v12211_v0  ;;  %v11874_v0 = vcombine.low %v3707_v41, %v3715_v43  ;;  %v11859_v1 = vcombine.high %v3691_v49, %v3699_v56  ;;  %v3899_v24 = vld [vmem:[%s12917_s27 + $0x1680] sm:$0xff] }
 0x24e   : > { %v2963_v59 = vpop.f32.mrf.mxu0  ;;  %v4155_v29 = vld [vmem:[%s12917_s27 + $0x1e80] sm:$0xff] }
 0x24f   : > { %v3004_v13 = vpop.f32.mrf.mxu1  ;;  %9492 = vmatpush1.bf16.msra.mxu0 %v11954_v16  ;;  %v3931_v16 = vld [vmem:[%s12917_s27 + $0x1780] sm:$0xff] }
 0x250   : > { %v2964_v15 = vpop.f32.mrf.mxu0  ;;  %9493 = vmatprep.subr.bf16.mxu0 %v11939_v5  ;;  %9533 = vmatpush1.bf16.msra.mxu1 %v12210_v6  ;;  %v3939_v5 = vld [vmem:[%s12917_s27 + $0x17c0] sm:$0xff]  ;;  %v12115_v6 = vcombine.high %v3947_v62, %v3955_v63 }
 0x251   : > { %v3005_v55 = vpop.f32.mrf.mxu1  ;;  %9534 = vmatprep.subr.bf16.mxu1 %v12195_v10  ;;  %v11858_v10 = vcombine.low %v3691_v49, %v3699_v56  ;;  %v12099_v59 = vcombine.high %v3931_v16, %v3939_v5  ;;  %v3923_v13 = vld [vmem:[%s12917_s27 + $0x1740] sm:$0xff]  ;;  %v12098_v18 = vcombine.low %v3931_v16, %v3939_v5 }
 0x252   : > { %v4171_v15 = vld [vmem:[%s12917_s27 + $0x1f00] sm:$0xff]  ;;  %v12354_v55 = vcombine.low %v4187_v8, %v4195_v9 }
 0x253   : > { %9494 = vmatpush1.bf16.msra.mxu0 %v11938_v14  ;;  %v12355_v14 = vcombine.high %v4187_v8, %v4195_v9  ;;  %v3883_v35 = vld [vmem:[%s12917_s27 + $0x1600] sm:$0xff] }
 0x254   : > { %9495 = vmatprep.subr.bf16.mxu0 %v11923_v17  ;;  %9535 = vmatpush1.bf16.msra.mxu1 %v12194_v22  ;;  %v4179_v17 = vld [vmem:[%s12917_s27 + $0x1f40] sm:$0xff]  ;;  %v12083_v22 = vcombine.high %v3915_v27, %v3923_v13 }
 0x255   : > { %9536 = vmatprep.subr.bf16.mxu1 %v12179_v25  ;;  %v3907_v25 = vld [vmem:[%s12917_s27 + $0x16c0] sm:$0xff]  ;;  %v12339_v28 = vcombine.high %v4171_v15, %v4179_v17  ;;  %v12338_v31 = vcombine.low %v4171_v15, %v4179_v17  ;;  %v13165_v17 = vsub.s32 4, %v12949_v44 }
 0x256   : > { %v4139_v38 = vld [vmem:[%s12917_s27 + $0x1e00] sm:$0xff] }
 0x257   : > { %9496 = vmatpush1.bf16.msra.mxu0 %v11922_v61  ;;  %v4163_v61 = vld [vmem:[%s12917_s27 + $0x1ec0] sm:$0xff] }
 0x258   : > { %9497 = vmatprep.subr.bf16.mxu0 %v11907_v33  ;;  %9537 = vmatpush1.bf16.msra.mxu1 %v12178_v34  ;;  %v12082_v33 = vcombine.low %v3915_v27, %v3923_v13  ;;  %v12067_v34 = vcombine.high %v3899_v24, %v3907_v25  ;;  %v12323_v37 = vcombine.high %v4155_v29, %v4163_v61  ;;  %v3867_v43 = vld [vmem:[%s12917_s27 + $0x1580] sm:$0xff] }
 0x259   : > { %9538 = vmatprep.subr.bf16.mxu1 %v12163_v36  ;;  %v3891_v36 = vld [vmem:[%s12917_s27 + $0x1640] sm:$0xff]  ;;  %v12322_v41 = vcombine.low %v4155_v29, %v4163_v61  ;;  %v3292_v29 = vld [vmem:[%s12917_s27 + $0x388] sm:$0xff] }
 0x25a   : > { %v4123_v45 = vld [vmem:[%s12917_s27 + $0x1d80] sm:$0xff]  ;;  %v3300_v61 = vld [vmem:[%s12917_s27 + $0x3c8] sm:$0xff] }
 0x25b   : > { %9498 = vmatpush1.bf16.msra.mxu0 %v11906_v39  ;;  %v4147_v39 = vld [vmem:[%s12917_s27 + $0x1e40] sm:$0xff] }
 0x25c   : > { %9499 = vmatprep.subr.bf16.mxu0 %v11891_v40  ;;  %9539 = vmatpush1.bf16.msra.mxu1 %v12162_v51  ;;  %v12066_v40 = vcombine.low %v3899_v24, %v3907_v25  ;;  %v12051_v51 = vcombine.high %v3883_v35, %v3891_v36  ;;  %v12307_v30 = vcombine.high %v4139_v38, %v4147_v39  ;;  %v3851_v56 = vld [vmem:[%s12917_s27 + $0x1500] sm:$0xff] }
 0x25d   : > { %9540 = vmatprep.subr.bf16.mxu1 %v12147_v58  ;;  %v3875_v58 = vld [vmem:[%s12917_s27 + $0x15c0] sm:$0xff]  ;;  %v12306_v49 = vcombine.low %v4139_v38, %v4147_v39  ;;  %v11717_v38 = vcombine.high %v13113_v26, %v13116_v20 }
 0x25e   : > { %v4107_v63 = vld [vmem:[%s12917_s27 + $0x1d00] sm:$0xff] }
 0x25f   : > { %9500 = vmatpush1.bf16.msra.mxu0 %v11890_v46  ;;  %v4131_v46 = vld [vmem:[%s12917_s27 + $0x1dc0] sm:$0xff] }
 0x260   : > { %9501 = vmatprep.subr.bf16.mxu0 %v11875_v47  ;;  %9541 = vmatpush1.bf16.msra.mxu1 %v12146_v48  ;;  %v12050_v47 = vcombine.low %v3883_v35, %v3891_v36  ;;  %v12035_v48 = vcombine.high %v3867_v43, %v3875_v58  ;;  %v12291_v62 = vcombine.high %v4123_v45, %v4131_v46  ;;  %v3835_v5 = vld [vmem:[%s12917_s27 + $0x1480] sm:$0xff] }
 0x261   : > { %9542 = vmatprep.subr.bf16.mxu1 %v12131_v57  ;;  %v3859_v57 = vld [vmem:[%s12917_s27 + $0x1540] sm:$0xff]  ;;  %v12290_v16 = vcombine.low %v4123_v45, %v4131_v46  ;;  %v11461_v36 = vcombine.high %v3292_v29, %v3300_v61 }
 0x262   : > { %v4091_v9 = vld [vmem:[%s12917_s27 + $0x1c80] sm:$0xff] }
 0x263   : > { %9502 = vmatpush1.bf16.msra.mxu0 %v11874_v0  ;;  %v4115_v0 = vld [vmem:[%s12917_s27 + $0x1d40] sm:$0xff] }
 0x264   : > { %9503 = vmatprep.subr.bf16.mxu0 %v11859_v1  ;;  %9543 = vmatpush1.bf16.msra.mxu1 %v12130_v2  ;;  %v12034_v1 = vcombine.low %v3867_v43, %v3875_v58  ;;  %v12019_v2 = vcombine.high %v3851_v56, %v3859_v57  ;;  %v12275_v8 = vcombine.high %v4107_v63, %v4115_v0  ;;  %v3819_v13 = vld [vmem:[%s12917_s27 + $0x1400] sm:$0xff] }
 0x265   : > { %9544 = vmatprep.subr.bf16.mxu1 %v12115_v6  ;;  %v3843_v6 = vld [vmem:[%s12917_s27 + $0x14c0] sm:$0xff]  ;;  %v12274_v27 = vcombine.low %v4107_v63, %v4115_v0  ;;  %v3260_v0 = vld [vmem:[%s12917_s27 + $0x288] sm:$0xff] }
 0x266   : > { %v12002_v24 = vcombine.low %v3835_v5, %v3843_v6 }
 0x267   : > { %9504 = vmatpush1.bf16.msra.mxu0 %v11858_v10  ;;  %v4099_v10 = vld [vmem:[%s12917_s27 + $0x1cc0] sm:$0xff] }
 0x268   : > { %9505 = vmatprep.subr.bf16.mxu0 %v12099_v59  ;;  %9545 = vmatpush1.bf16.msra.mxu1 %v12114_v12  ;;  %v12018_v59 = vcombine.low %v3851_v56, %v3859_v57  ;;  %v12003_v12 = vcombine.high %v3835_v5, %v3843_v6  ;;  %v12259_v15 = vcombine.high %v4091_v9, %v4099_v10  ;;  %v3244_v5 = vld [vmem:[%s12917_s27 + $0x208] sm:$0xff] }
 0x269   : > { %9546 = vmatprep.subr.bf16.mxu1 %v12355_v14  ;;  %v3827_v14 = vld [vmem:[%s12917_s27 + $0x1440] sm:$0xff]  ;;  %v3252_v6 = vld [vmem:[%s12917_s27 + $0x248] sm:$0xff] }
 0x26a   : > { %v11987_v25 = vcombine.high %v3819_v13, %v3827_v14  ;;  %v11986_v35 = vcombine.low %v3819_v13, %v3827_v14  ;;  %v3212_v13 = vld [vmem:[%s12917_s27 + $0x108] sm:$0xff] }
 0x26b   : > { %9506 = vmatpush2.bf16.msra.mxu0 %v12098_v18  ;;  %v4075_v18 = vld [vmem:[%s12917_s27 + $0x1c00] sm:$0xff]  ;;  %v3220_v14 = vld [vmem:[%s12917_s27 + $0x148] sm:$0xff] }
 0x26c   : > { %9507 = vmatprep.subr.bf16.mxu0 %v12083_v22  ;;  %9547 = vmatpush2.bf16.msra.mxu1 %v12354_v55  ;;  %v4083_v22 = vld [vmem:[%s12917_s27 + $0x1c40] sm:$0xff]  ;;  %v13170_v55 = vsub.s32 5, %v12949_v44 }
 0x26d   : > { %9548 = vmatprep.subr.bf16.mxu1 %v12339_v28  ;;  %v12258_v28 = vcombine.low %v4091_v9, %v4099_v10  ;;  %v11413_v9 = vcombine.high %v3244_v5, %v3252_v6  ;;  %v3228_v10 = vld [vmem:[%s12917_s27 + $0x188] sm:$0xff] }
 0x26f   : > { %9508 = vmatpush2.bf16.msra.mxu0 %v12082_v33  ;;  %v12243_v33 = vcombine.high %v4075_v18, %v4083_v22 }
 0x270   : > { %9509 = vmatprep.subr.bf16.mxu0 %v12067_v34  ;;  %9549 = vmatpush2.bf16.msra.mxu1 %v12338_v31  ;;  %v738_v34 = vrot.slane %v13067_v54, %v13165_v17  ;;  %v742_v31 = vrot.slane %v13067_v54, %v13170_v55 }
 0x271   : > { %9550 = vmatprep.subr.bf16.mxu1 %v12323_v37  ;;  %v12242_v37 = vcombine.low %v4075_v18, %v4083_v22  ;;  %v11381_v18 = vcombine.high %v3212_v13, %v3220_v14  ;;  %v3196_v22 = vld [vmem:[%s12917_s27 + $0x88] sm:$0xff] }
 0x272   : > { %v2960_v39 = vadd.f32 %v13094_v19, %v738_v34  ;;  %v3276_v19 = vld [vmem:[%s12917_s27 + $0x308] sm:$0xff] }
 0x273   : > { %9510 = vmatpush2.bf16.msra.mxu0 %v12066_v40  ;;  %v2962_v40 = vadd.f32 %v13102_v4, %v742_v31  ;;  %v3284_v4 = vld [vmem:[%s12917_s27 + $0x348] sm:$0xff] }
 0x274   : > { %9511 = vmatprep.subr.bf16.mxu0 %v12051_v51  ;;  %9551 = vmatpush2.bf16.msra.mxu1 %v12322_v41  ;;  %v3001_v51 = vadd.f32 %v13099_v50, %v2960_v39  ;;  %v11460_v50 = vcombine.low %v3292_v29, %v3300_v61  ;;  %v3180_v29 = vld [vmem:[%s12917_s27 + $0x8] sm:$0xff] }
 0x275   : > { %9552 = vmatprep.subr.bf16.mxu1 %v12307_v30  ;;  %v3003_v43 = vadd.f32 %v13104_v7, %v2962_v40  ;;  %v3188_v61 = vld [vmem:[%s12917_s27 + $0x48] sm:$0xff] }
 0x276   : > { %v11349_v34 = vcombine.high %v3180_v29, %v3188_v61  ;;  %v3420_v31 = vld [vmem:[%s12917_s27 + $0x788] sm:$0xff] }
 0x277   : > { %9512 = vmatpush2.bf16.msra.mxu0 %v12050_v47  ;;  %v3412_v39 = vld [vmem:[%s12917_s27 + $0x748] sm:$0xff] }
 0x278   : > { %9513 = vmatprep.subr.bf16.mxu0 %v12035_v48  ;;  %9553 = vmatpush2.bf16.msra.mxu1 %v12306_v49 }
 0x279   : > { %9554 = vmatprep.subr.bf16.mxu1 %v12291_v62  ;;  %v11445_v62 = vcombine.high %v3276_v19, %v3284_v4 }
 0x27b   : > { %9514 = vmatpush2.bf16.msra.mxu0 %v12034_v1  ;;  %v3268_v1 = vld [vmem:[%s12917_s27 + $0x2c8] sm:$0xff] }
 0x27c   : > { %9515 = vmatprep.subr.bf16.mxu0 %v12019_v2  ;;  %9555 = vmatpush2.bf16.msra.mxu1 %v12290_v16  ;;  %v11444_v2 = vcombine.low %v3276_v19, %v3284_v4  ;;  %v11429_v16 = vcombine.high %v3260_v0, %v3268_v1  ;;  %v3380_v19 = vld [vmem:[%s12917_s27 + $0x648] sm:$0xff] }
 0x27d   : > { %9556 = vmatprep.subr.bf16.mxu1 %v12275_v8  ;;  %v11428_v8 = vcombine.low %v3260_v0, %v3268_v1  ;;  %v3348_v0 = vld [vmem:[%s12917_s27 + $0x548] sm:$0xff] }
 0x27f   : > { %9516 = vmatpush2.bf16.msra.mxu0 %v12018_v59  ;;  %v3236_v59 = vld [vmem:[%s12917_s27 + $0x1c8] sm:$0xff] }
 0x280   : > { %9517 = vmatprep.subr.bf16.mxu0 %v12003_v12  ;;  %9557 = vmatpush2.bf16.msra.mxu1 %v12274_v27  ;;  %v11412_v12 = vcombine.low %v3244_v5, %v3252_v6  ;;  %v11397_v27 = vcombine.high %v3228_v10, %v3236_v59  ;;  %v3324_v5 = vld [vmem:[%s12917_s27 + $0x488] sm:$0xff] }
 0x281   : > { %9558 = vmatprep.subr.bf16.mxu1 %v12259_v15  ;;  %v11396_v15 = vcombine.low %v3228_v10, %v3236_v59  ;;  %v3332_v6 = vld [vmem:[%s12917_s27 + $0x4c8] sm:$0xff] }
 0x282   : > { %v11493_v10 = vcombine.high %v3324_v5, %v3332_v6 }
 0x283   : > { %9518 = vmatpush2.bf16.msra.mxu0 %v12002_v24  ;;  %v3204_v24 = vld [vmem:[%s12917_s27 + $0xc8] sm:$0xff] }
 0x284   : > { %9519 = vmatprep.subr.bf16.mxu0 %v11987_v25  ;;  %9559 = vmatpush2.bf16.msra.mxu1 %v12258_v28  ;;  %v11380_v25 = vcombine.low %v3212_v13, %v3220_v14  ;;  %v11365_v28 = vcombine.high %v3196_v22, %v3204_v24  ;;  %v11492_v14 = vcombine.low %v3324_v5, %v3332_v6 }
 0x285   : > { %9560 = vmatprep.subr.bf16.mxu1 %v12243_v33  ;;  %v11364_v33 = vcombine.low %v3196_v22, %v3204_v24  ;;  %v3812_v22 = vld [vmem:[%s12917_s27 + $0x13c8] sm:$0xff] }
 0x287   : > { %9520 = vmatpush2.bf16.msra.mxu0 %v11986_v35  ;;  %v3428_v35 = vld [vmem:[%s12917_s27 + $0x7c8] sm:$0xff] }
 0x288   : > { %9571 = vmatprep.subr.bf16.mxu0 %v11461_v36  ;;  %9561 = vmatpush2.bf16.msra.mxu1 %v12242_v37  ;;  %v11348_v36 = vcombine.low %v3180_v29, %v3188_v61  ;;  %v11589_v37 = vcombine.high %v3420_v31, %v3428_v35  ;;  %v11588_v40 = vcombine.low %v3420_v31, %v3428_v35  ;;  %v3788_v35 = vld [vmem:[%s12917_s27 + $0x1308] sm:$0xff] }
 0x289   : > { %9612 = vmatprep.subr.bf16.mxu1 %v11717_v38  ;;  %v3404_v38 = vld [vmem:[%s12917_s27 + $0x708] sm:$0xff] }
 0x28a   : > { %v3041_v41 = vpop.f32.mrf.mxu0 }
 0x28b   : > { %v13184_v58 = vpop.f32.mrf.mxu1  ;;  %v3042_v30 = vadd.f32 %v3041_v41, %v3001_v51  ;;  %v11573_v51 = vcombine.high %v3404_v38, %v3412_v39  ;;  %v3388_v41 = vld [vmem:[%s12917_s27 + $0x688] sm:$0xff] }
 0x28c   : > { %v3043_v45 = vpop.f32.mrf.mxu0 }
 0x28d   : > { %v3044_v46 = vadd.f32 %v3043_v45, %v3003_v43  ;;  %v13186_v47 = vpop.f32.mrf.mxu1  ;;  %v13192_v57 = vpack.c.bf16 %v3042_v30, %v3042_v30  ;;  %v3396_v43 = vld [vmem:[%s12917_s27 + $0x6c8] sm:$0xff]  ;;  %v11572_v30 = vcombine.low %v3404_v38, %v3412_v39 }
 0x28e   : > { %v3045_v48 = vpop.f32.mrf.mxu0  ;;  %v11557_v45 = vcombine.high %v3388_v41, %v3396_v43  ;;  %v11556_v4 = vcombine.low %v3388_v41, %v3396_v43  ;;  %v3532_v41 = vld [vmem:[%s12917_s27 + $0xb08] sm:$0xff] }
 0x28f   : > { %v13190_v49 = vpack.c.bf16 %v3044_v46, %v3044_v46  ;;  %v3086_v56 = vpop.f32.mrf.mxu1  ;;  %v3372_v46 = vld [vmem:[%s12917_s27 + $0x608] sm:$0xff] }
 0x290   : > { %v3046_v7 = vpop.f32.mrf.mxu0  ;;  %v11541_v48 = vcombine.high %v3372_v46, %v3380_v19  ;;  %v3356_v56 = vld [vmem:[%s12917_s27 + $0x588] sm:$0xff] }
 0x291   : > { %v3087_v63 = vpop.f32.mrf.mxu1  ;;  %9521 = vmatprep.mubr.bf16.mxu0 %v13190_v49  ;;  %v11540_v7 = vcombine.low %v3372_v46, %v3380_v19  ;;  %v3540_v43 = vld [vmem:[%s12917_s27 + $0xb48] sm:$0xff] }
 0x292   : > { %9522 = vmatmul.mubr.bf16.vlgmr.msra.gmra.mxu0 %v13192_v57  ;;  %v3340_v63 = vld [vmem:[%s12917_s27 + $0x508] sm:$0xff] }
 0x293   : > { %9572 = vmatpush1.bf16.msra.mxu0 %v11460_v50  ;;  %9603 = vmatprep.mubr.bf16.mxu0 %v13001_v21  ;;  %v3364_v50 = vld [vmem:[%s12917_s27 + $0x5c8] sm:$0xff] }
 0x294   : > { %9573 = vmatprep.subr.bf16.mxu0 %v11445_v62  ;;  %v11525_v62 = vcombine.high %v3356_v56, %v3364_v50  ;;  %v11524_v1 = vcombine.low %v3356_v56, %v3364_v50  ;;  %v3772_v46 = vld [vmem:[%s12917_s27 + $0x1288] sm:$0xff]  ;;  %v11701_v56 = vcombine.high %v3532_v41, %v3540_v43 }
 0x295   : > { %v3780_v19 = vld [vmem:[%s12917_s27 + $0x12c8] sm:$0xff] }
 0x296   : > { %v11941_v50 = vcombine.high %v3772_v46, %v3780_v19 }
 0x297   : > { %9574 = vmatpush1.bf16.msra.mxu0 %v11444_v2  ;;  %v11509_v2 = vcombine.high %v3340_v63, %v3348_v0 }
 0x298   : > { %9575 = vmatprep.subr.bf16.mxu0 %v11429_v16  ;;  %v13222_v16 = vsub.s32 6, %v12949_v44 }
 0x29a   : > { %v746_v59 = vrot.slane %v13067_v54, %v13222_v16 }
 0x29b   : > { %9576 = vmatpush1.bf16.msra.mxu0 %v11428_v8  ;;  %v13227_v8 = vsub.s32 7, %v12949_v44 }
 0x29c   : > { %9577 = vmatprep.subr.bf16.mxu0 %v11413_v9  ;;  %v11508_v9 = vcombine.low %v3340_v63, %v3348_v0  ;;  %v3083_v44 = vadd.f32 %v13184_v58, %v746_v59  ;;  %v3796_v58 = vld [vmem:[%s12917_s27 + $0x1348] sm:$0xff] }
 0x29d   : > { %v750_v13 = vrot.slane %v13067_v54, %v13227_v8  ;;  %v3756_v63 = vld [vmem:[%s12917_s27 + $0x1208] sm:$0xff] }
 0x29e   : > { %v3764_v0 = vld [vmem:[%s12917_s27 + $0x1248] sm:$0xff] }
 0x29f   : > { %9578 = vmatpush1.bf16.msra.mxu0 %v11412_v12  ;;  %v3308_v12 = vld [vmem:[%s12917_s27 + $0x408] sm:$0xff]  ;;  %v11925_v6 = vcombine.high %v3756_v63, %v3764_v0  ;;  %v11924_v20 = vcombine.low %v3756_v63, %v3764_v0 }
 0x2a0   : > { %9579 = vmatprep.subr.bf16.mxu0 %v11397_v27  ;;  %v3316_v27 = vld [vmem:[%s12917_s27 + $0x448] sm:$0xff] }
 0x2a1   : > { %v11476_v61 = vcombine.low %v3308_v12, %v3316_v27  ;;  %v3740_v59 = vld [vmem:[%s12917_s27 + $0x1188] sm:$0xff] }
 0x2a2   : > { %v3916_v63 = vld [vmem:[%s12917_s27 + $0x1708] sm:$0xff] }
 0x2a3   : > { %9580 = vmatpush1.bf16.msra.mxu0 %v11396_v15  ;;  %v11477_v15 = vcombine.high %v3308_v12, %v3316_v27  ;;  %v3748_v12 = vld [vmem:[%s12917_s27 + $0x11c8] sm:$0xff] }
 0x2a4   : > { %9581 = vmatprep.subr.bf16.mxu0 %v11381_v18  ;;  %v3804_v18 = vld [vmem:[%s12917_s27 + $0x1388] sm:$0xff]  ;;  %v11909_v27 = vcombine.high %v3740_v59, %v3748_v12 }
 0x2a5   : > { %v11973_v54 = vcombine.high %v3804_v18, %v3812_v22  ;;  %v3924_v0 = vld [vmem:[%s12917_s27 + $0x1748] sm:$0xff] }
 0x2a7   : > { %9582 = vmatpush1.bf16.msra.mxu0 %v11380_v25  ;;  %v3085_v25 = vadd.f32 %v13186_v47, %v750_v13  ;;  %v11972_v47 = vcombine.low %v3804_v18, %v3812_v22  ;;  %v3484_v13 = vld [vmem:[%s12917_s27 + $0x988] sm:$0xff]  ;;  %v11908_v22 = vcombine.low %v3740_v59, %v3748_v12 }
 0x2a8   : > { %9583 = vmatprep.subr.bf16.mxu0 %v11365_v28  ;;  %v3900_v59 = vld [vmem:[%s12917_s27 + $0x1688] sm:$0xff] }
 0x2a9   : > { %v3908_v12 = vld [vmem:[%s12917_s27 + $0x16c8] sm:$0xff] }
 0x2ab   : > { %9584 = vmatpush1.bf16.msra.mxu0 %v11364_v33 }
 0x2ac   : > { %9585 = vmatprep.subr.bf16.mxu0 %v11349_v34 }
 0x2af   : > { %9586 = vmatpush1.bf16.msra.mxu0 %v11348_v36 }
 0x2b0   : > { %9587 = vmatprep.subr.bf16.mxu0 %v11589_v37 }
 0x2b3   : > { %9588 = vmatpush2.bf16.msra.mxu0 %v11588_v40 }
 0x2b4   : > { %9589 = vmatprep.subr.bf16.mxu0 %v11573_v51  ;;  %v11957_v51 = vcombine.high %v3788_v35, %v3796_v58 }
 0x2b7   : > { %9590 = vmatpush2.bf16.msra.mxu0 %v11572_v30 }
 0x2b8   : > { %9591 = vmatprep.subr.bf16.mxu0 %v11557_v45 }
 0x2bb   : > { %9592 = vmatpush2.bf16.msra.mxu0 %v11556_v4 }
 0x2bc   : > { %9593 = vmatprep.subr.bf16.mxu0 %v11541_v48  ;;  %v11956_v48 = vcombine.low %v3788_v35, %v3796_v58  ;;  %v3452_v58 = vld [vmem:[%s12917_s27 + $0x888] sm:$0xff] }
 0x2bf   : > { %9594 = vmatpush2.bf16.msra.mxu0 %v11540_v7  ;;  %v3516_v7 = vld [vmem:[%s12917_s27 + $0xa88] sm:$0xff] }
 0x2c0   : > { %9595 = vmatprep.subr.bf16.mxu0 %v11525_v62  ;;  %v3524_v62 = vld [vmem:[%s12917_s27 + $0xac8] sm:$0xff] }
 0x2c1   : > { %v11685_v5 = vcombine.high %v3516_v7, %v3524_v62  ;;  %v11684_v26 = vcombine.low %v3516_v7, %v3524_v62  ;;  %v3676_v7 = vld [vmem:[%s12917_s27 + $0xf88] sm:$0xff] }
 0x2c2   : > { %v3684_v62 = vld [vmem:[%s12917_s27 + $0xfc8] sm:$0xff] }
 0x2c3   : > { %9596 = vmatpush2.bf16.msra.mxu0 %v11524_v1  ;;  %v11700_v1 = vcombine.low %v3532_v41, %v3540_v43  ;;  %v3436_v41 = vld [vmem:[%s12917_s27 + $0x808] sm:$0xff] }
 0x2c4   : > { %9597 = vmatprep.subr.bf16.mxu0 %v11509_v2  ;;  %v11940_v2 = vcombine.low %v3772_v46, %v3780_v19  ;;  %v3444_v43 = vld [vmem:[%s12917_s27 + $0x848] sm:$0xff] }
 0x2c5   : > { %v3940_v46 = vld [vmem:[%s12917_s27 + $0x17c8] sm:$0xff] }
 0x2c7   : > { %9598 = vmatpush2.bf16.msra.mxu0 %v11508_v9  ;;  %v3500_v9 = vld [vmem:[%s12917_s27 + $0xa08] sm:$0xff] }
 0x2c8   : > { %9599 = vmatprep.subr.bf16.mxu0 %v11493_v10  ;;  %v3508_v10 = vld [vmem:[%s12917_s27 + $0xa48] sm:$0xff] }
 0x2c9   : > { %v11668_v18 = vcombine.low %v3500_v9, %v3508_v10 }
 0x2ca   : > { %v3123_v24 = vpop.f32.mrf.mxu0 }
 0x2cb   : > { %v3124_v28 = vadd.f32 %v3123_v24, %v3083_v44  ;;  %v3164_v29 = vpop.f32.mrf.mxu1  ;;  %9600 = vmatpush2.bf16.msra.mxu0 %v11492_v14  ;;  %v3492_v14 = vld [vmem:[%s12917_s27 + $0x9c8] sm:$0xff] }
 0x2cc   : > { %v3125_v33 = vpop.f32.mrf.mxu0  ;;  %9601 = vmatprep.subr.bf16.mxu0 %v11477_v15  ;;  %v3724_v15 = vld [vmem:[%s12917_s27 + $0x1108] sm:$0xff]  ;;  %v11653_v24 = vcombine.high %v3484_v13, %v3492_v14 }
 0x2cd   : > { %v3126_v34 = vadd.f32 %v3125_v33, %v3085_v25  ;;  %v3166_v31 = vpop.f32.mrf.mxu1  ;;  %v3165_v37 = vadd.f32 %v3164_v29, %v3124_v28  ;;  %v3732_v44 = vld [vmem:[%s12917_s27 + $0x1148] sm:$0xff] }
 0x2ce   : > { %v3127_v36 = vpop.f32.mrf.mxu0  ;;  %v11893_v25 = vcombine.high %v3724_v15, %v3732_v44  ;;  %v3468_v28 = vld [vmem:[%s12917_s27 + $0x908] sm:$0xff] }
 0x2cf   : > { %v3167_v38 = vadd.f32 %v3166_v31, %v3126_v34  ;;  %v3168_v39 = vpop.f32.mrf.mxu1  ;;  %9602 = vmatpush2.bf16.msra.mxu0 %v11476_v61  ;;  %v13248_v4 = vpack.c.bf16 %v3165_v37, %v3165_v37  ;;  %v3476_v29 = vld [vmem:[%s12917_s27 + $0x948] sm:$0xff]  ;;  %v11892_v34 = vcombine.low %v3724_v15, %v3732_v44 }
 0x2d0   : > { %v3128_v40 = vpop.f32.mrf.mxu0  ;;  %9653 = vmatprep.subr.bf16.mxu0 %v11973_v54  ;;  %v3708_v61 = vld [vmem:[%s12917_s27 + $0x1088] sm:$0xff]  ;;  %v11652_v54 = vcombine.low %v3484_v13, %v3492_v14  ;;  %v11637_v31 = vcombine.high %v3468_v28, %v3476_v29  ;;  %v11636_v39 = vcombine.low %v3468_v28, %v3476_v29 }
 0x2d1   : > { %v13243_v30 = vpack.c.bf16 %v3167_v38, %v3167_v38  ;;  %v3169_v45 = vpop.f32.mrf.mxu1  ;;  %v3716_v33 = vld [vmem:[%s12917_s27 + $0x10c8] sm:$0xff] }
 0x2d2   : > { %9604 = vmatmul.mubr.bf16.vlgmr.msra.gmra.mxu0 %v13088_v52  ;;  %v11877_v35 = vcombine.high %v3708_v61, %v3716_v33  ;;  %v3460_v36 = vld [vmem:[%s12917_s27 + $0x8c8] sm:$0xff] }
 0x2d3   : > { %9654 = vmatpush1.bf16.msra.mxu0 %v11972_v47  ;;  %9685 = vmatprep.mubr.bf16.mxu0 %v13190_v49  ;;  %v3692_v37 = vld [vmem:[%s12917_s27 + $0x1008] sm:$0xff]  ;;  %v11876_v47 = vcombine.low %v3708_v61, %v3716_v33  ;;  %v11621_v40 = vcombine.high %v3452_v58, %v3460_v36  ;;  %v11620_v19 = vcombine.low %v3452_v58, %v3460_v36 }
 0x2d4   : > { %9562 = vmatprep.mubr.bf16.mxu1 %v13243_v30  ;;  %9655 = vmatprep.subr.bf16.mxu0 %v11957_v51  ;;  %v3700_v38 = vld [vmem:[%s12917_s27 + $0x1048] sm:$0xff] }
 0x2d5   : > { %9563 = vmatmul.mubr.bf16.vlgmr.msra.gmra.mxu1 %v13248_v4  ;;  %v11861_v51 = vcombine.high %v3692_v37, %v3700_v38  ;;  %v3932_v45 = vld [vmem:[%s12917_s27 + $0x1788] sm:$0xff] }
 0x2d6   : > { %9613 = vmatpush1.bf16.msra.mxu1 %v11716_v32  ;;  %9644 = vmatprep.mubr.bf16.mxu1 %v13017_v42  ;;  %v11669_v32 = vcombine.high %v3500_v9, %v3508_v10  ;;  %v3660_v9 = vld [vmem:[%s12917_s27 + $0xf08] sm:$0xff] }
 0x2d7   : > { %9656 = vmatpush1.bf16.msra.mxu0 %v11956_v48  ;;  %9614 = vmatprep.subr.bf16.mxu1 %v11701_v56  ;;  %v11860_v48 = vcombine.low %v3692_v37, %v3700_v38  ;;  %v11605_v56 = vcombine.high %v3436_v41, %v3444_v43  ;;  %v3668_v10 = vld [vmem:[%s12917_s27 + $0xf48] sm:$0xff] }
 0x2d8   : > { %9657 = vmatprep.subr.bf16.mxu0 %v11941_v50  ;;  %v12101_v50 = vcombine.high %v3932_v45, %v3940_v46  ;;  %v3644_v13 = vld [vmem:[%s12917_s27 + $0xe88] sm:$0xff] }
 0x2d9   : > { %v3652_v14 = vld [vmem:[%s12917_s27 + $0xec8] sm:$0xff] }
 0x2da   : > { %9615 = vmatpush1.bf16.msra.mxu1 %v11700_v1  ;;  %v11604_v1 = vcombine.low %v3436_v41, %v3444_v43  ;;  %v3884_v15 = vld [vmem:[%s12917_s27 + $0x1608] sm:$0xff] }
 0x2db   : > { %9658 = vmatpush1.bf16.msra.mxu0 %v11940_v2  ;;  %9616 = vmatprep.subr.bf16.mxu1 %v11685_v5  ;;  %v12100_v2 = vcombine.low %v3932_v45, %v3940_v46  ;;  %v11845_v5 = vcombine.high %v3676_v7, %v3684_v62  ;;  %v3892_v44 = vld [vmem:[%s12917_s27 + $0x1648] sm:$0xff] }
 0x2dc   : > { %9659 = vmatprep.subr.bf16.mxu0 %v11925_v6  ;;  %v12085_v6 = vcombine.high %v3916_v63, %v3924_v0  ;;  %v3628_v28 = vld [vmem:[%s12917_s27 + $0xe08] sm:$0xff] }
 0x2dd   : > { %v3636_v29 = vld [vmem:[%s12917_s27 + $0xe48] sm:$0xff] }
 0x2de   : > { %9617 = vmatpush1.bf16.msra.mxu1 %v11684_v26  ;;  %v11844_v26 = vcombine.low %v3676_v7, %v3684_v62  ;;  %v3868_v61 = vld [vmem:[%s12917_s27 + $0x1588] sm:$0xff]  ;;  %v4203_v7 = vld [vmem:[%s13306_s9] sm:$0xff] }
 0x2df   : > { %9660 = vmatpush1.bf16.msra.mxu0 %v11924_v20  ;;  %9618 = vmatprep.subr.bf16.mxu1 %v11669_v32  ;;  %v12084_v20 = vcombine.low %v3916_v63, %v3924_v0  ;;  %v11829_v32 = vcombine.high %v3660_v9, %v3668_v10  ;;  %v3876_v33 = vld [vmem:[%s12917_s27 + $0x15c8] sm:$0xff] }
 0x2e0   : > { %9661 = vmatprep.subr.bf16.mxu0 %v11909_v27  ;;  %v12069_v27 = vcombine.high %v3900_v59, %v3908_v12  ;;  %v3612_v58 = vld [vmem:[%s12917_s27 + $0xd88] sm:$0xff] }
 0x2e1   : > { %v3620_v36 = vld [vmem:[%s12917_s27 + $0xdc8] sm:$0xff] }
 0x2e2   : > { %9619 = vmatpush1.bf16.msra.mxu1 %v11668_v18  ;;  %v11828_v18 = vcombine.low %v3660_v9, %v3668_v10  ;;  %v3852_v37 = vld [vmem:[%s12917_s27 + $0x1508] sm:$0xff] }
 0x2e3   : > { %9662 = vmatpush1.bf16.msra.mxu0 %v11908_v22  ;;  %9620 = vmatprep.subr.bf16.mxu1 %v11653_v24  ;;  %v12068_v22 = vcombine.low %v3900_v59, %v3908_v12  ;;  %v11813_v24 = vcombine.high %v3644_v13, %v3652_v14  ;;  %v3860_v38 = vld [vmem:[%s12917_s27 + $0x1548] sm:$0xff] }
 0x2e4   : > { %9663 = vmatprep.subr.bf16.mxu0 %v11893_v25  ;;  %v12053_v25 = vcombine.high %v3884_v15, %v3892_v44  ;;  %v3596_v41 = vld [vmem:[%s12917_s27 + $0xd08] sm:$0xff] }
 0x2e5   : > { %v3604_v43 = vld [vmem:[%s12917_s27 + $0xd48] sm:$0xff] }
 0x2e6   : > { %9621 = vmatpush1.bf16.msra.mxu1 %v11652_v54  ;;  %v11812_v54 = vcombine.low %v3644_v13, %v3652_v14  ;;  %v3836_v45 = vld [vmem:[%s12917_s27 + $0x1488] sm:$0xff] }
 0x2e7   : > { %9664 = vmatpush1.bf16.msra.mxu0 %v11892_v34  ;;  %9622 = vmatprep.subr.bf16.mxu1 %v11637_v31  ;;  %v12052_v34 = vcombine.low %v3884_v15, %v3892_v44  ;;  %v11797_v31 = vcombine.high %v3628_v28, %v3636_v29  ;;  %v3844_v46 = vld [vmem:[%s12917_s27 + $0x14c8] sm:$0xff] }
 0x2e8   : > { %9665 = vmatprep.subr.bf16.mxu0 %v11877_v35  ;;  %v12037_v35 = vcombine.high %v3868_v61, %v3876_v33  ;;  %v3580_v62 = vld [vmem:[%s12917_s27 + $0xc88] sm:$0xff] }
 0x2e9   : > { %v3588_v63 = vld [vmem:[%s12917_s27 + $0xcc8] sm:$0xff] }
 0x2ea   : > { %9623 = vmatpush1.bf16.msra.mxu1 %v11636_v39  ;;  %v11796_v39 = vcombine.low %v3628_v28, %v3636_v29  ;;  %v3820_v0 = vld [vmem:[%s12917_s27 + $0x1408] sm:$0xff]  ;;  %v11749_v9 = vcombine.high %v3580_v62, %v3588_v63  ;;  %v11748_v13 = vcombine.low %v3580_v62, %v3588_v63  ;;  %v3245_v62 = vld [vmem:[%s12917_s27 + $0x210] sm:$0xff] }
 0x2eb   : > { %9666 = vmatpush1.bf16.msra.mxu0 %v11876_v47  ;;  %9624 = vmatprep.subr.bf16.mxu1 %v11621_v40  ;;  %v12036_v47 = vcombine.low %v3868_v61, %v3876_v33  ;;  %v11781_v40 = vcombine.high %v3612_v58, %v3620_v36  ;;  %v3564_v59 = vld [vmem:[%s12917_s27 + $0xc08] sm:$0xff]  ;;  %v3253_v63 = vld [vmem:[%s12917_s27 + $0x250] sm:$0xff] }
 0x2ec   : > { %9667 = vmatprep.subr.bf16.mxu0 %v11861_v51  ;;  %v12021_v51 = vcombine.high %v3852_v37, %v3860_v38  ;;  %v3572_v12 = vld [vmem:[%s12917_s27 + $0xc48] sm:$0xff] }
 0x2ed   : > { %v4068_v33 = vld [vmem:[%s12917_s27 + $0x1bc8] sm:$0xff] }
 0x2ee   : > { %9625 = vmatpush1.bf16.msra.mxu1 %v11620_v19  ;;  %v11780_v19 = vcombine.low %v3612_v58, %v3620_v36 }
 0x2ef   : > { %9668 = vmatpush1.bf16.msra.mxu0 %v11860_v48  ;;  %9626 = vmatprep.subr.bf16.mxu1 %v11605_v56  ;;  %v12020_v48 = vcombine.low %v3852_v37, %v3860_v38  ;;  %v11765_v56 = vcombine.high %v3596_v41, %v3604_v43 }
 0x2f0   : > { %9669 = vmatprep.subr.bf16.mxu0 %v12101_v50  ;;  %v12005_v50 = vcombine.high %v3836_v45, %v3844_v46 }
 0x2f2   : > { %9627 = vmatpush1.bf16.msra.mxu1 %v11604_v1  ;;  %v3828_v1 = vld [vmem:[%s12917_s27 + $0x1448] sm:$0xff] }
 0x2f3   : > { %9670 = vmatpush2.bf16.msra.mxu0 %v12100_v2  ;;  %9628 = vmatprep.subr.bf16.mxu1 %v11845_v5  ;;  %v11764_v2 = vcombine.low %v3596_v41, %v3604_v43  ;;  %v12004_v5 = vcombine.low %v3836_v45, %v3844_v46  ;;  %v11989_v10 = vcombine.high %v3820_v0, %v3828_v1  ;;  %v3261_v43 = vld [vmem:[%s12917_s27 + $0x290] sm:$0xff] }
 0x2f4   : > { %9671 = vmatprep.subr.bf16.mxu0 %v12085_v6  ;;  %v4210_v6 = vrot.slane %v4203_v7, %v12952_v53  ;;  %v11988_v44 = vcombine.low %v3820_v0, %v3828_v1  ;;  %v3269_v45 = vld [vmem:[%s12917_s27 + $0x2d0] sm:$0xff] }
 0x2f5   : > { %v11430_v1 = vcombine.low %v3261_v43, %v3269_v45 }
 0x2f6   : > { %9629 = vmatpush2.bf16.msra.mxu1 %v11844_v26  ;;  %v4214_v26 = vrot.slane %v4203_v7, %v12957_v60  ;;  %v4036_v7 = vld [vmem:[%s12917_s27 + $0x1ac8] sm:$0xff] }
 0x2f7   : > { %9672 = vmatpush2.bf16.msra.mxu0 %v12084_v20  ;;  %9630 = vmatprep.subr.bf16.mxu1 %v11829_v32  ;;  %v3293_v20 = vld [vmem:[%s12917_s27 + $0x390] sm:$0xff] }
 0x2f8   : > { %9673 = vmatprep.subr.bf16.mxu0 %v12069_v27  ;;  %v3301_v32 = vld [vmem:[%s12917_s27 + $0x3d0] sm:$0xff] }
 0x2f9   : > { %v11462_v37 = vcombine.low %v3293_v20, %v3301_v32 }
 0x2fa   : > { %9631 = vmatpush2.bf16.msra.mxu1 %v11828_v18  ;;  %v11733_v18 = vcombine.high %v3564_v59, %v3572_v12 }
 0x2fb   : > { %9674 = vmatpush2.bf16.msra.mxu0 %v12068_v22  ;;  %9632 = vmatprep.subr.bf16.mxu1 %v11813_v24  ;;  %v11463_v24 = vcombine.high %v3293_v20, %v3301_v32 }
 0x2fc   : > { %9675 = vmatprep.subr.bf16.mxu0 %v12053_v25  ;;  %v4060_v25 = vld [vmem:[%s12917_s27 + $0x1b88] sm:$0xff] }
 0x2fd   : > { %v12228_v46 = vcombine.low %v4060_v25, %v4068_v33 }
 0x2fe   : > { %9633 = vmatpush2.bf16.msra.mxu1 %v11812_v54  ;;  %v3277_v54 = vld [vmem:[%s12917_s27 + $0x310] sm:$0xff] }
 0x2ff   : > { %9676 = vmatpush2.bf16.msra.mxu0 %v12052_v34  ;;  %9634 = vmatprep.subr.bf16.mxu1 %v11797_v31  ;;  %v3285_v34 = vld [vmem:[%s12917_s27 + $0x350] sm:$0xff] }
 0x300   : > { %9677 = vmatprep.subr.bf16.mxu0 %v12037_v35  ;;  %v11732_v35 = vcombine.low %v3564_v59, %v3572_v12  ;;  %v3237_v59 = vld [vmem:[%s12917_s27 + $0x1d0] sm:$0xff] }
 0x302   : > { %9635 = vmatpush2.bf16.msra.mxu1 %v11796_v39  ;;  %v12229_v39 = vcombine.high %v4060_v25, %v4068_v33  ;;  %v3980_v25 = vld [vmem:[%s12917_s27 + $0x1908] sm:$0xff]  ;;  %v3205_v33 = vld [vmem:[%s12917_s27 + $0xd0] sm:$0xff] }
 0x303   : > { %9678 = vmatpush2.bf16.msra.mxu0 %v12036_v47  ;;  %9636 = vmatprep.subr.bf16.mxu1 %v11781_v40  ;;  %v11447_v47 = vcombine.high %v3277_v54, %v3285_v34  ;;  %v4044_v40 = vld [vmem:[%s12917_s27 + $0x1b08] sm:$0xff] }
 0x304   : > { %9679 = vmatprep.subr.bf16.mxu0 %v12021_v51  ;;  %v4052_v51 = vld [vmem:[%s12917_s27 + $0x1b48] sm:$0xff] }
 0x305   : > { %v12212_v0 = vcombine.low %v4044_v40, %v4052_v51 }
 0x306   : > { %9637 = vmatpush2.bf16.msra.mxu1 %v11780_v19  ;;  %v11446_v19 = vcombine.low %v3277_v54, %v3285_v34 }
 0x307   : > { %9680 = vmatpush2.bf16.msra.mxu0 %v12020_v48  ;;  %9638 = vmatprep.subr.bf16.mxu1 %v11765_v56  ;;  %v12213_v48 = vcombine.high %v4044_v40, %v4052_v51  ;;  %v11431_v56 = vcombine.high %v3261_v43, %v3269_v45  ;;  %v3948_v43 = vld [vmem:[%s12917_s27 + $0x1808] sm:$0xff] }
 0x308   : > { %9681 = vmatprep.subr.bf16.mxu0 %v12005_v50  ;;  %v4028_v50 = vld [vmem:[%s12917_s27 + $0x1a88] sm:$0xff] }
 0x309   : > { %v12196_v12 = vcombine.low %v4028_v50, %v4036_v7  ;;  %v3956_v45 = vld [vmem:[%s12917_s27 + $0x1848] sm:$0xff] }
 0x30a   : > { %9639 = vmatpush2.bf16.msra.mxu1 %v11764_v2  ;;  %v9441_v27 = vpop.f32.mrf.mxu0  ;;  %v12197_v2 = vcombine.high %v4028_v50, %v4036_v7  ;;  %v12117_v50 = vcombine.high %v3948_v43, %v3956_v45 }
 0x30b   : > { %v9442_v14 = vadd.f32 %v9441_v27, %v4210_v6  ;;  %v9482_v15 = vpop.f32.mrf.mxu1  ;;  %9682 = vmatpush2.bf16.msra.mxu0 %v12004_v5  ;;  %9640 = vmatprep.subr.bf16.mxu1 %v11749_v9  ;;  %v11415_v5 = vcombine.high %v3245_v62, %v3253_v63  ;;  %v4012_v6 = vld [vmem:[%s12917_s27 + $0x1a08] sm:$0xff] }
 0x30c   : > { %v9443_v22 = vpop.f32.mrf.mxu0  ;;  %9683 = vmatprep.subr.bf16.mxu0 %v11989_v10  ;;  %v4020_v9 = vld [vmem:[%s12917_s27 + $0x1a48] sm:$0xff]  ;;  %v3229_v10 = vld [vmem:[%s12917_s27 + $0x190] sm:$0xff] }
 0x30d   : > { %v13320_v28 = vadd.f32 %v9482_v15, %v9442_v14  ;;  %v9444_v29 = vadd.f32 %v9443_v22, %v4214_v26  ;;  %v9484_v61 = vpop.f32.mrf.mxu1  ;;  %v11414_v26 = vcombine.low %v3245_v62, %v3253_v63  ;;  %v12181_v20 = vcombine.high %v4012_v6, %v4020_v9  ;;  %v3996_v27 = vld [vmem:[%s12917_s27 + $0x1988] sm:$0xff]  ;;  %v3213_v14 = vld [vmem:[%s12917_s27 + $0x110] sm:$0xff] }
 0x30e   : > { %9641 = vmatpush2.bf16.msra.mxu1 %v11748_v13  ;;  %v9445_v31 = vpop.f32.mrf.mxu0  ;;  %v11399_v32 = vcombine.high %v3229_v10, %v3237_v59  ;;  %v4004_v13 = vld [vmem:[%s12917_s27 + $0x19c8] sm:$0xff]  ;;  %v3221_v15 = vld [vmem:[%s12917_s27 + $0x150] sm:$0xff] }
 0x30f   : > { %v13325_v58 = vadd.f32 %v9484_v61, %v9444_v29  ;;  %v9486_v36 = vpop.f32.mrf.mxu1  ;;  %9684 = vmatpush2.bf16.msra.mxu0 %v11988_v44  ;;  %9642 = vmatprep.subr.bf16.mxu1 %v11733_v18  ;;  %v12180_v44 = vcombine.low %v4012_v6, %v4020_v9  ;;  %v11398_v18 = vcombine.low %v3229_v10, %v3237_v59  ;;  %v3988_v29 = vld [vmem:[%s12917_s27 + $0x1948] sm:$0xff]  ;;  %v3197_v61 = vld [vmem:[%s12917_s27 + $0x90] sm:$0xff] }
 0x310   : > { %v9446_v38 = vpop.f32.mrf.mxu0  ;;  %9735 = vmatprep.subr.bf16.mxu0 %v11463_v24  ;;  %v12165_v22 = vcombine.high %v3996_v27, %v4004_v13  ;;  %v11383_v24 = vcombine.high %v3213_v14, %v3221_v15  ;;  %v12164_v54 = vcombine.low %v3996_v27, %v4004_v13  ;;  %v11382_v34 = vcombine.low %v3213_v14, %v3221_v15  ;;  %v3964_v36 = vld [vmem:[%s12917_s27 + $0x1888] sm:$0xff] }
 0x311   : > { %v9487_v41 = vpop.f32.mrf.mxu1  ;;  %v12149_v31 = vcombine.high %v3980_v25, %v3988_v29  ;;  %v3181_v38 = vld [vmem:[%s12917_s27 + $0x10] sm:$0xff]  ;;  %v11366_v40 = vcombine.low %v3197_v61, %v3205_v33  ;;  %v4188_v62 = vld [vmem:[%s12917_s27 + $0x1f88] sm:$0xff] }
 0x312   : > { %9643 = vmatpush2.bf16.msra.mxu1 %v11732_v35  ;;  %9686 = vmatmul.mubr.bf16.vlgmr.msra.gmra.mxu0 %v13192_v57  ;;  %v11367_v35 = vcombine.high %v3197_v61, %v3205_v33  ;;  %v4196_v63 = vld [vmem:[%s12917_s27 + $0x1fc8] sm:$0xff] }
 0x313   : > { %9736 = vmatpush1.bf16.msra.mxu0 %v11462_v37  ;;  %9767 = vmatprep.mubr.bf16.mxu0 %v13001_v21  ;;  %v3972_v37 = vld [vmem:[%s12917_s27 + $0x18c8] sm:$0xff]  ;;  %v12357_v6 = vcombine.high %v4188_v62, %v4196_v63 }
 0x314   : > { %9694 = vmatprep.subr.bf16.mxu1 %v12229_v39  ;;  %9737 = vmatprep.subr.bf16.mxu0 %v11447_v47  ;;  %v3189_v39 = vld [vmem:[%s12917_s27 + $0x50] sm:$0xff]  ;;  %v12148_v47 = vcombine.low %v3980_v25, %v3988_v29  ;;  %v12133_v51 = vcombine.high %v3964_v36, %v3972_v37  ;;  %v4172_v10 = vld [vmem:[%s12917_s27 + $0x1f08] sm:$0xff] }
 0x315   : > { %9645 = vmatmul.mubr.bf16.vlgmr.msra.gmra.mxu1 %v13090_v23  ;;  %v11351_v41 = vcombine.high %v3181_v38, %v3189_v39  ;;  %v4180_v59 = vld [vmem:[%s12917_s27 + $0x1f48] sm:$0xff] }
 0x316   : > { %9695 = vmatpush1.bf16.msra.mxu1 %v12228_v46  ;;  %9726 = vmatprep.mubr.bf16.mxu1 %v13243_v30  ;;  %v3421_v46 = vld [vmem:[%s12917_s27 + $0x790] sm:$0xff]  ;;  %v12341_v27 = vcombine.high %v4172_v10, %v4180_v59  ;;  %v4156_v14 = vld [vmem:[%s12917_s27 + $0x1e88] sm:$0xff] }
 0x317   : > { %9738 = vmatpush1.bf16.msra.mxu0 %v11446_v19  ;;  %9696 = vmatprep.subr.bf16.mxu1 %v12213_v48  ;;  %v3429_v19 = vld [vmem:[%s12917_s27 + $0x7d0] sm:$0xff]  ;;  %v12132_v48 = vcombine.low %v3964_v36, %v3972_v37  ;;  %v4164_v15 = vld [vmem:[%s12917_s27 + $0x1ec8] sm:$0xff] }
 0x318   : > { %9739 = vmatprep.subr.bf16.mxu0 %v11431_v56  ;;  %v11350_v56 = vcombine.low %v3181_v38, %v3189_v39  ;;  %v11591_v7 = vcombine.high %v3421_v46, %v3429_v19  ;;  %v12325_v25 = vcombine.high %v4156_v14, %v4164_v15  ;;  %v4140_v61 = vld [vmem:[%s12917_s27 + $0x1e08] sm:$0xff] }
 0x319   : > { %v4148_v33 = vld [vmem:[%s12917_s27 + $0x1e48] sm:$0xff] }
 0x31a   : > { %9697 = vmatpush1.bf16.msra.mxu1 %v12212_v0  ;;  %v3405_v0 = vld [vmem:[%s12917_s27 + $0x710] sm:$0xff]  ;;  %v12309_v36 = vcombine.high %v4140_v61, %v4148_v33  ;;  %v4124_v38 = vld [vmem:[%s12917_s27 + $0x1d88] sm:$0xff] }
 0x31b   : > { %9740 = vmatpush1.bf16.msra.mxu0 %v11430_v1  ;;  %9698 = vmatprep.subr.bf16.mxu1 %v12197_v2  ;;  %v3413_v1 = vld [vmem:[%s12917_s27 + $0x750] sm:$0xff]  ;;  %v12116_v2 = vcombine.low %v3948_v43, %v3956_v45  ;;  %v4132_v39 = vld [vmem:[%s12917_s27 + $0x1dc8] sm:$0xff] }
 0x31c   : > { %9741 = vmatprep.subr.bf16.mxu0 %v11415_v5  ;;  %v11590_v5 = vcombine.low %v3421_v46, %v3429_v19  ;;  %v11575_v9 = vcombine.high %v3405_v0, %v3413_v1  ;;  %v12293_v43 = vcombine.high %v4124_v38, %v4132_v39  ;;  %v4108_v46 = vld [vmem:[%s12917_s27 + $0x1d08] sm:$0xff] }
 0x31d   : > { %v4116_v19 = vld [vmem:[%s12917_s27 + $0x1d48] sm:$0xff] }
 0x31e   : > { %9699 = vmatpush1.bf16.msra.mxu1 %v12196_v12  ;;  %v3389_v12 = vld [vmem:[%s12917_s27 + $0x690] sm:$0xff] }
 0x31f   : > { %9742 = vmatpush1.bf16.msra.mxu0 %v11414_v26  ;;  %9700 = vmatprep.subr.bf16.mxu1 %v12181_v20  ;;  %v3397_v26 = vld [vmem:[%s12917_s27 + $0x6d0] sm:$0xff]  ;;  %v12356_v20 = vcombine.low %v4188_v62, %v4196_v63  ;;  %v12277_v62 = vcombine.high %v4108_v46, %v4116_v19 }
 0x320   : > { %9743 = vmatprep.subr.bf16.mxu0 %v11399_v32  ;;  %v11574_v32 = vcombine.low %v3405_v0, %v3413_v1  ;;  %v11559_v13 = vcombine.high %v3389_v12, %v3397_v26  ;;  %v4092_v0 = vld [vmem:[%s12917_s27 + $0x1c88] sm:$0xff] }
 0x321   : > { %v4100_v1 = vld [vmem:[%s12917_s27 + $0x1cc8] sm:$0xff] }
 0x322   : > { %9701 = vmatpush1.bf16.msra.mxu1 %v12180_v44  ;;  %v3373_v44 = vld [vmem:[%s12917_s27 + $0x610] sm:$0xff] }
 0x323   : > { %9744 = vmatpush1.bf16.msra.mxu0 %v11398_v18  ;;  %9702 = vmatprep.subr.bf16.mxu1 %v12165_v22  ;;  %v3381_v18 = vld [vmem:[%s12917_s27 + $0x650] sm:$0xff]  ;;  %v12340_v22 = vcombine.low %v4172_v10, %v4180_v59  ;;  %v12261_v10 = vcombine.high %v4092_v0, %v4100_v1 }
 0x324   : > { %9745 = vmatprep.subr.bf16.mxu0 %v11383_v24  ;;  %v11558_v24 = vcombine.low %v3389_v12, %v3397_v26  ;;  %v11543_v29 = vcombine.high %v3373_v44, %v3381_v18  ;;  %v4076_v12 = vld [vmem:[%s12917_s27 + $0x1c08] sm:$0xff] }
 0x325   : > { %v4084_v26 = vld [vmem:[%s12917_s27 + $0x1c48] sm:$0xff] }
 0x326   : > { %9703 = vmatpush1.bf16.msra.mxu1 %v12164_v54  ;;  %v3357_v54 = vld [vmem:[%s12917_s27 + $0x590] sm:$0xff] }
 0x327   : > { %9746 = vmatpush1.bf16.msra.mxu0 %v11382_v34  ;;  %9704 = vmatprep.subr.bf16.mxu1 %v12149_v31  ;;  %v3365_v34 = vld [vmem:[%s12917_s27 + $0x5d0] sm:$0xff]  ;;  %v12324_v31 = vcombine.low %v4156_v14, %v4164_v15  ;;  %v12245_v14 = vcombine.high %v4076_v12, %v4084_v26 }
 0x328   : > { %9747 = vmatprep.subr.bf16.mxu0 %v11367_v35  ;;  %v11542_v35 = vcombine.low %v3373_v44, %v3381_v18  ;;  %v11527_v37 = vcombine.high %v3357_v54, %v3365_v34  ;;  %v3549_v44 = vld [vmem:[%s12917_s27 + $0xb90] sm:$0xff] }
 0x329   : > { %v3557_v18 = vld [vmem:[%s12917_s27 + $0xbd0] sm:$0xff] }
 0x32a   : > { %9705 = vmatpush1.bf16.msra.mxu1 %v12148_v47  ;;  %v3341_v47 = vld [vmem:[%s12917_s27 + $0x510] sm:$0xff] }
 0x32b   : > { %9748 = vmatpush1.bf16.msra.mxu0 %v11366_v40  ;;  %9706 = vmatprep.subr.bf16.mxu1 %v12133_v51  ;;  %v3349_v40 = vld [vmem:[%s12917_s27 + $0x550] sm:$0xff]  ;;  %v12308_v51 = vcombine.low %v4140_v61, %v4148_v33  ;;  %v11719_v61 = vcombine.high %v3549_v44, %v3557_v18 }
 0x32c   : > { %9749 = vmatprep.subr.bf16.mxu0 %v11351_v41  ;;  %v11526_v41 = vcombine.low %v3357_v54, %v3365_v34  ;;  %v11511_v45 = vcombine.high %v3341_v47, %v3349_v40  ;;  %v3533_v54 = vld [vmem:[%s12917_s27 + $0xb10] sm:$0xff] }
 0x32d   : > { %v3541_v34 = vld [vmem:[%s12917_s27 + $0xb50] sm:$0xff] }
 0x32e   : > { %9707 = vmatpush1.bf16.msra.mxu1 %v12132_v48  ;;  %v3325_v48 = vld [vmem:[%s12917_s27 + $0x490] sm:$0xff] }
 0x32f   : > { %9750 = vmatpush1.bf16.msra.mxu0 %v11350_v56  ;;  %9708 = vmatprep.subr.bf16.mxu1 %v12117_v50  ;;  %v3333_v56 = vld [vmem:[%s12917_s27 + $0x4d0] sm:$0xff]  ;;  %v12292_v50 = vcombine.low %v4124_v38, %v4132_v39 }
 0x330   : > { %9751 = vmatprep.subr.bf16.mxu0 %v11591_v7  ;;  %v11510_v7 = vcombine.low %v3341_v47, %v3349_v40  ;;  %v11495_v63 = vcombine.high %v3325_v48, %v3333_v56  ;;  %v11703_v47 = vcombine.high %v3533_v54, %v3541_v34 }
 0x332   : > { %9709 = vmatpush1.bf16.msra.mxu1 %v12116_v2  ;;  %v3309_v2 = vld [vmem:[%s12917_s27 + $0x410] sm:$0xff] }
 0x333   : > { %9752 = vmatpush2.bf16.msra.mxu0 %v11590_v5  ;;  %9710 = vmatprep.subr.bf16.mxu1 %v12357_v6  ;;  %v3317_v5 = vld [vmem:[%s12917_s27 + $0x450] sm:$0xff]  ;;  %v12276_v6 = vcombine.low %v4108_v46, %v4116_v19 }
 0x334   : > { %9753 = vmatprep.subr.bf16.mxu0 %v11575_v9  ;;  %v11494_v9 = vcombine.low %v3325_v48, %v3333_v56  ;;  %v11479_v59 = vcombine.high %v3309_v2, %v3317_v5  ;;  %v3765_v46 = vld [vmem:[%s12917_s27 + $0x1250] sm:$0xff]  ;;  %v11702_v48 = vcombine.low %v3533_v54, %v3541_v34 }
 0x335   : > { %v3693_v54 = vld [vmem:[%s12917_s27 + $0x1010] sm:$0xff] }
 0x336   : > { %9711 = vmatpush2.bf16.msra.mxu1 %v12356_v20  ;;  %v3805_v20 = vld [vmem:[%s12917_s27 + $0x1390] sm:$0xff] }
 0x337   : > { %9754 = vmatpush2.bf16.msra.mxu0 %v11574_v32  ;;  %9712 = vmatprep.subr.bf16.mxu1 %v12341_v27  ;;  %v3813_v32 = vld [vmem:[%s12917_s27 + $0x13d0] sm:$0xff]  ;;  %v12260_v27 = vcombine.low %v4092_v0, %v4100_v1 }
 0x338   : > { %9755 = vmatprep.subr.bf16.mxu0 %v11559_v13  ;;  %v11478_v13 = vcombine.low %v3309_v2, %v3317_v5  ;;  %v11975_v15 = vcombine.high %v3805_v20, %v3813_v32  ;;  %v3741_v0 = vld [vmem:[%s12917_s27 + $0x1190] sm:$0xff] }
 0x339   : > { %v3749_v1 = vld [vmem:[%s12917_s27 + $0x11d0] sm:$0xff] }
 0x33a   : > { %9713 = vmatpush2.bf16.msra.mxu1 %v12340_v22  ;;  %v3789_v22 = vld [vmem:[%s12917_s27 + $0x1310] sm:$0xff] }
 0x33b   : > { %9756 = vmatpush2.bf16.msra.mxu0 %v11558_v24  ;;  %9714 = vmatprep.subr.bf16.mxu1 %v12325_v25  ;;  %v3797_v24 = vld [vmem:[%s12917_s27 + $0x1350] sm:$0xff]  ;;  %v12244_v25 = vcombine.low %v4076_v12, %v4084_v26 }
 0x33c   : > { %9757 = vmatprep.subr.bf16.mxu0 %v11543_v29  ;;  %v11974_v29 = vcombine.low %v3805_v20, %v3813_v32  ;;  %v11959_v33 = vcombine.high %v3789_v22, %v3797_v24  ;;  %v11958_v39 = vcombine.low %v3789_v22, %v3797_v24  ;;  %v3725_v12 = vld [vmem:[%s12917_s27 + $0x1110] sm:$0xff]  ;;  %v11910_v32 = vcombine.low %v3741_v0, %v3749_v1 }
 0x33d   : > { %v3733_v26 = vld [vmem:[%s12917_s27 + $0x1150] sm:$0xff] }
 0x33e   : > { %9715 = vmatpush2.bf16.msra.mxu1 %v12324_v31  ;;  %v3773_v31 = vld [vmem:[%s12917_s27 + $0x1290] sm:$0xff]  ;;  %v11894_v24 = vcombine.low %v3725_v12, %v3733_v26 }
 0x33f   : > { %9758 = vmatpush2.bf16.msra.mxu0 %v11542_v35  ;;  %9716 = vmatprep.subr.bf16.mxu1 %v12309_v36  ;;  %v3781_v35 = vld [vmem:[%s12917_s27 + $0x12d0] sm:$0xff] }
 0x340   : > { %9759 = vmatprep.subr.bf16.mxu0 %v11527_v37  ;;  %v11718_v37 = vcombine.low %v3549_v44, %v3557_v18  ;;  %v11942_v56 = vcombine.low %v3773_v31, %v3781_v35  ;;  %v3709_v44 = vld [vmem:[%s12917_s27 + $0x1090] sm:$0xff] }
 0x341   : > { %v3717_v18 = vld [vmem:[%s12917_s27 + $0x10d0] sm:$0xff] }
 0x342   : > { %9717 = vmatpush2.bf16.msra.mxu1 %v12308_v51  ;;  %v11943_v51 = vcombine.high %v3773_v31, %v3781_v35  ;;  %v3701_v34 = vld [vmem:[%s12917_s27 + $0x1050] sm:$0xff]  ;;  %v11878_v35 = vcombine.low %v3709_v44, %v3717_v18 }
 0x343   : > { %9760 = vmatpush2.bf16.msra.mxu0 %v11526_v41  ;;  %9718 = vmatprep.subr.bf16.mxu1 %v12293_v43  ;;  %v3517_v41 = vld [vmem:[%s12917_s27 + $0xa90] sm:$0xff] }
 0x344   : > { %9761 = vmatprep.subr.bf16.mxu0 %v11511_v45  ;;  %v3525_v43 = vld [vmem:[%s12917_s27 + $0xad0] sm:$0xff] }
 0x345   : > { %v11686_v2 = vcombine.low %v3517_v41, %v3525_v43 }
 0x346   : > { %9719 = vmatpush2.bf16.msra.mxu1 %v12292_v50  ;;  %v11687_v50 = vcombine.high %v3517_v41, %v3525_v43  ;;  %v11862_v43 = vcombine.low %v3693_v54, %v3701_v34 }
 0x347   : > { %9762 = vmatpush2.bf16.msra.mxu0 %v11510_v7  ;;  %9720 = vmatprep.subr.bf16.mxu1 %v12277_v62  ;;  %v3501_v62 = vld [vmem:[%s12917_s27 + $0xa10] sm:$0xff] }
 0x348   : > { %9763 = vmatprep.subr.bf16.mxu0 %v11495_v63  ;;  %v3509_v63 = vld [vmem:[%s12917_s27 + $0xa50] sm:$0xff] }
 0x349   : > { %v11670_v20 = vcombine.low %v3501_v62, %v3509_v63 }
 0x34a   : > { %9721 = vmatpush2.bf16.msra.mxu1 %v12276_v6  ;;  %v11671_v6 = vcombine.high %v3501_v62, %v3509_v63 }
 0x34b   : > { %9764 = vmatpush2.bf16.msra.mxu0 %v11494_v9  ;;  %9722 = vmatprep.subr.bf16.mxu1 %v12261_v10  ;;  %v11911_v9 = vcombine.high %v3741_v0, %v3749_v1  ;;  %v3485_v10 = vld [vmem:[%s12917_s27 + $0x990] sm:$0xff] }
 0x34c   : > { %9765 = vmatprep.subr.bf16.mxu0 %v11479_v59  ;;  %v3493_v59 = vld [vmem:[%s12917_s27 + $0x9d0] sm:$0xff] }
 0x34d   : > { %v11654_v22 = vcombine.low %v3485_v10, %v3493_v59  ;;  %v3661_v0 = vld [vmem:[%s12917_s27 + $0xf10] sm:$0xff] }
 0x34e   : > { %9723 = vmatpush2.bf16.msra.mxu1 %v12260_v27  ;;  %v11655_v27 = vcombine.high %v3485_v10, %v3493_v59  ;;  %v3669_v1 = vld [vmem:[%s12917_s27 + $0xf50] sm:$0xff] }
 0x34f   : > { %9766 = vmatpush2.bf16.msra.mxu0 %v11478_v13  ;;  %9724 = vmatprep.subr.bf16.mxu1 %v12245_v14  ;;  %v11895_v13 = vcombine.high %v3725_v12, %v3733_v26  ;;  %v3469_v14 = vld [vmem:[%s12917_s27 + $0x910] sm:$0xff]  ;;  %v11831_v10 = vcombine.high %v3661_v0, %v3669_v1 }
 0x350   : > { %9817 = vmatprep.subr.bf16.mxu0 %v11975_v15  ;;  %v3477_v15 = vld [vmem:[%s12917_s27 + $0x950] sm:$0xff] }
 0x351   : > { %v11638_v31 = vcombine.low %v3469_v14, %v3477_v15  ;;  %v3645_v12 = vld [vmem:[%s12917_s27 + $0xe90] sm:$0xff] }
 0x352   : > { %9725 = vmatpush2.bf16.msra.mxu1 %v12244_v25  ;;  %9768 = vmatmul.mubr.bf16.vlgmr.msra.gmra.mxu0 %v13088_v52  ;;  %v9523_v36 = vpop.f32.mrf.mxu0  ;;  %v11639_v25 = vcombine.high %v3469_v14, %v3477_v15  ;;  %v3653_v26 = vld [vmem:[%s12917_s27 + $0xed0] sm:$0xff] }
 0x353   : > { %v13401_v38 = vadd.f32 %v9523_v36, %v13320_v28  ;;  %9818 = vmatpush1.bf16.msra.mxu0 %v11974_v29  ;;  %9849 = vmatprep.mubr.bf16.mxu0 %v13190_v49  ;;  %v3757_v28 = vld [vmem:[%s12917_s27 + $0x1210] sm:$0xff]  ;;  %v11879_v29 = vcombine.high %v3709_v44, %v3717_v18  ;;  %v11815_v14 = vcombine.high %v3645_v12, %v3653_v26 }
 0x354   : > { %9776 = vmatprep.subr.bf16.mxu1 %v11719_v61  ;;  %v9525_v40 = vpop.f32.mrf.mxu0  ;;  %9819 = vmatprep.subr.bf16.mxu0 %v11959_v33  ;;  %v11926_v5 = vcombine.low %v3757_v28, %v3765_v46  ;;  %v3453_v61 = vld [vmem:[%s12917_s27 + $0x890] sm:$0xff] }
 0x355   : > { %9727 = vmatmul.mubr.bf16.vlgmr.msra.gmra.mxu1 %v13248_v4  ;;  %v13408_v45 = vadd.f32 %v9525_v40, %v13325_v58  ;;  %v11927_v58 = vcombine.high %v3757_v28, %v3765_v46  ;;  %v3461_v33 = vld [vmem:[%s12917_s27 + $0x8d0] sm:$0xff] }
 0x356   : > { %9777 = vmatpush1.bf16.msra.mxu1 %v11718_v37  ;;  %9808 = vmatprep.mubr.bf16.mxu1 %v13017_v42  ;;  %v9527_v19 = vpop.f32.mrf.mxu0  ;;  %v11623_v36 = vcombine.high %v3453_v61, %v3461_v33  ;;  %v11863_v37 = vcombine.high %v3693_v54, %v3701_v34  ;;  %v3933_v40 = vld [vmem:[%s12917_s27 + $0x1790] sm:$0xff]  ;;  %v11622_v41 = vcombine.low %v3453_v61, %v3461_v33 }
 0x357   : > { %9820 = vmatpush1.bf16.msra.mxu0 %v11958_v39  ;;  %9778 = vmatprep.subr.bf16.mxu1 %v11703_v47  ;;  %v3437_v39 = vld [vmem:[%s12917_s27 + $0x810] sm:$0xff] }
 0x358   : > { %v9528_v7 = vpop.f32.mrf.mxu0  ;;  %9821 = vmatprep.subr.bf16.mxu0 %v11943_v51  ;;  %v3445_v47 = vld [vmem:[%s12917_s27 + $0x850] sm:$0xff] }
 0x359   : > { %v3941_v51 = vld [vmem:[%s12917_s27 + $0x17d0] sm:$0xff]  ;;  %v11607_v28 = vcombine.high %v3437_v39, %v3445_v47  ;;  %v11606_v7 = vcombine.low %v3437_v39, %v3445_v47 }
 0x35a   : > { %9779 = vmatpush1.bf16.msra.mxu1 %v11702_v48  ;;  %v12103_v46 = vcombine.high %v3933_v40, %v3941_v51  ;;  %v3677_v19 = vld [vmem:[%s12917_s27 + $0xf90] sm:$0xff] }
 0x35b   : > { %9822 = vmatpush1.bf16.msra.mxu0 %v11942_v56  ;;  %9780 = vmatprep.subr.bf16.mxu1 %v11687_v50  ;;  %v3685_v48 = vld [vmem:[%s12917_s27 + $0xfd0] sm:$0xff] }
 0x35c   : > { %9823 = vmatprep.subr.bf16.mxu0 %v11927_v58  ;;  %v3917_v56 = vld [vmem:[%s12917_s27 + $0x1710] sm:$0xff]  ;;  %v12102_v58 = vcombine.low %v3933_v40, %v3941_v51  ;;  %v11847_v62 = vcombine.high %v3677_v19, %v3685_v48 }
 0x35d   : > { %v3925_v50 = vld [vmem:[%s12917_s27 + $0x1750] sm:$0xff] }
 0x35e   : > { %9781 = vmatpush1.bf16.msra.mxu1 %v11686_v2  ;;  %v12087_v63 = vcombine.high %v3917_v56, %v3925_v50  ;;  %v3901_v2 = vld [vmem:[%s12917_s27 + $0x1690] sm:$0xff] }
 0x35f   : > { %9824 = vmatpush1.bf16.msra.mxu0 %v11926_v5  ;;  %9782 = vmatprep.subr.bf16.mxu1 %v11671_v6  ;;  %v3909_v5 = vld [vmem:[%s12917_s27 + $0x16d0] sm:$0xff]  ;;  %v11846_v6 = vcombine.low %v3677_v19, %v3685_v48 }
 0x360   : > { %9825 = vmatprep.subr.bf16.mxu0 %v11911_v9  ;;  %v12086_v9 = vcombine.low %v3917_v56, %v3925_v50  ;;  %v12071_v59 = vcombine.high %v3901_v2, %v3909_v5  ;;  %v3629_v44 = vld [vmem:[%s12917_s27 + $0xe10] sm:$0xff] }
 0x361   : > { %v3637_v18 = vld [vmem:[%s12917_s27 + $0xe50] sm:$0xff] }
 0x362   : > { %9783 = vmatpush1.bf16.msra.mxu1 %v11670_v20  ;;  %v3885_v20 = vld [vmem:[%s12917_s27 + $0x1610] sm:$0xff]  ;;  %v11799_v61 = vcombine.high %v3629_v44, %v3637_v18 }
 0x363   : > { %9826 = vmatpush1.bf16.msra.mxu0 %v11910_v32  ;;  %9784 = vmatprep.subr.bf16.mxu1 %v11655_v27  ;;  %v3893_v32 = vld [vmem:[%s12917_s27 + $0x1650] sm:$0xff]  ;;  %v11830_v27 = vcombine.low %v3661_v0, %v3669_v1 }
 0x364   : > { %9827 = vmatprep.subr.bf16.mxu0 %v11895_v13  ;;  %v12070_v13 = vcombine.low %v3901_v2, %v3909_v5  ;;  %v12055_v15 = vcombine.high %v3885_v20, %v3893_v32  ;;  %v3613_v54 = vld [vmem:[%s12917_s27 + $0xd90] sm:$0xff] }
 0x365   : > { %v3621_v34 = vld [vmem:[%s12917_s27 + $0xdd0] sm:$0xff] }
 0x366   : > { %9785 = vmatpush1.bf16.msra.mxu1 %v11654_v22  ;;  %v3869_v22 = vld [vmem:[%s12917_s27 + $0x1590] sm:$0xff]  ;;  %v11783_v39 = vcombine.high %v3613_v54, %v3621_v34 }
 0x367   : > { %9828 = vmatpush1.bf16.msra.mxu0 %v11894_v24  ;;  %9786 = vmatprep.subr.bf16.mxu1 %v11639_v25  ;;  %v3877_v24 = vld [vmem:[%s12917_s27 + $0x15d0] sm:$0xff]  ;;  %v11814_v25 = vcombine.low %v3645_v12, %v3653_v26 }
 0x368   : > { %9829 = vmatprep.subr.bf16.mxu0 %v11879_v29  ;;  %v12054_v29 = vcombine.low %v3885_v20, %v3893_v32  ;;  %v12039_v33 = vcombine.high %v3869_v22, %v3877_v24  ;;  %v3597_v40 = vld [vmem:[%s12917_s27 + $0xd10] sm:$0xff] }
 0x369   : > { %v3605_v51 = vld [vmem:[%s12917_s27 + $0xd50] sm:$0xff] }
 0x36a   : > { %9787 = vmatpush1.bf16.msra.mxu1 %v11638_v31  ;;  %v3853_v31 = vld [vmem:[%s12917_s27 + $0x1510] sm:$0xff]  ;;  %v11767_v19 = vcombine.high %v3597_v40, %v3605_v51 }
 0x36b   : > { %9830 = vmatpush1.bf16.msra.mxu0 %v11878_v35  ;;  %9788 = vmatprep.subr.bf16.mxu1 %v11623_v36  ;;  %v3861_v35 = vld [vmem:[%s12917_s27 + $0x1550] sm:$0xff]  ;;  %v11798_v36 = vcombine.low %v3629_v44, %v3637_v18 }
 0x36c   : > { %9831 = vmatprep.subr.bf16.mxu0 %v11863_v37  ;;  %v12038_v37 = vcombine.low %v3869_v22, %v3877_v24  ;;  %v12023_v47 = vcombine.high %v3853_v31, %v3861_v35  ;;  %v3581_v56 = vld [vmem:[%s12917_s27 + $0xc90] sm:$0xff] }
 0x36d   : > { %v3589_v50 = vld [vmem:[%s12917_s27 + $0xcd0] sm:$0xff] }
 0x36e   : > { %9789 = vmatpush1.bf16.msra.mxu1 %v11622_v41  ;;  %v3837_v41 = vld [vmem:[%s12917_s27 + $0x1490] sm:$0xff]  ;;  %v11751_v0 = vcombine.high %v3581_v56, %v3589_v50 }
 0x36f   : > { %9832 = vmatpush1.bf16.msra.mxu0 %v11862_v43  ;;  %9790 = vmatprep.subr.bf16.mxu1 %v11607_v28  ;;  %v3845_v43 = vld [vmem:[%s12917_s27 + $0x14d0] sm:$0xff]  ;;  %v11782_v28 = vcombine.low %v3613_v54, %v3621_v34 }
 0x370   : > { %9833 = vmatprep.subr.bf16.mxu0 %v12103_v46  ;;  %v12022_v46 = vcombine.low %v3853_v31, %v3861_v35  ;;  %v12007_v48 = vcombine.high %v3837_v41, %v3845_v43  ;;  %v3565_v2 = vld [vmem:[%s12917_s27 + $0xc10] sm:$0xff] }
 0x371   : > { %v3573_v5 = vld [vmem:[%s12917_s27 + $0xc50] sm:$0xff] }
 0x372   : > { %9791 = vmatpush1.bf16.msra.mxu1 %v11606_v7  ;;  %v3821_v7 = vld [vmem:[%s12917_s27 + $0x1410] sm:$0xff]  ;;  %v11735_v12 = vcombine.high %v3565_v2, %v3573_v5 }
 0x373   : > { %9834 = vmatpush2.bf16.msra.mxu0 %v12102_v58  ;;  %9792 = vmatprep.subr.bf16.mxu1 %v11847_v62  ;;  %v3829_v58 = vld [vmem:[%s12917_s27 + $0x1450] sm:$0xff]  ;;  %v11766_v62 = vcombine.low %v3597_v40, %v3605_v51  ;;  %v3254_v40 = vld [vmem:[%s12917_s27 + $0x258] sm:$0xff] }
 0x374   : > { %9835 = vmatprep.subr.bf16.mxu0 %v12087_v63  ;;  %v12006_v63 = vcombine.low %v3837_v41, %v3845_v43  ;;  %v11991_v1 = vcombine.high %v3821_v7, %v3829_v58  ;;  %v4061_v20 = vld [vmem:[%s12917_s27 + $0x1b90] sm:$0xff] }
 0x375   : > { %v4069_v32 = vld [vmem:[%s12917_s27 + $0x1bd0] sm:$0xff] }
 0x376   : > { %9793 = vmatpush2.bf16.msra.mxu1 %v11846_v6  ;;  %v3294_v6 = vld [vmem:[%s12917_s27 + $0x398] sm:$0xff]  ;;  %v12231_v44 = vcombine.high %v4061_v20, %v4069_v32  ;;  %v4045_v22 = vld [vmem:[%s12917_s27 + $0x1b10] sm:$0xff] }
 0x377   : > { %9836 = vmatpush2.bf16.msra.mxu0 %v12086_v9  ;;  %9794 = vmatprep.subr.bf16.mxu1 %v11831_v10  ;;  %v3302_v9 = vld [vmem:[%s12917_s27 + $0x3d8] sm:$0xff]  ;;  %v11750_v10 = vcombine.low %v3581_v56, %v3589_v50  ;;  %v4053_v24 = vld [vmem:[%s12917_s27 + $0x1b50] sm:$0xff] }
 0x378   : > { %9837 = vmatprep.subr.bf16.mxu0 %v12071_v59  ;;  %v11990_v59 = vcombine.low %v3821_v7, %v3829_v58  ;;  %v11465_v26 = vcombine.high %v3294_v6, %v3302_v9  ;;  %v12215_v34 = vcombine.high %v4045_v22, %v4053_v24  ;;  %v12214_v43 = vcombine.low %v4045_v22, %v4053_v24  ;;  %v4021_v7 = vld [vmem:[%s12917_s27 + $0x1a50] sm:$0xff]  ;;  %v3206_v22 = vld [vmem:[%s12917_s27 + $0xd8] sm:$0xff] }
 0x37a   : > { %9795 = vmatpush2.bf16.msra.mxu1 %v11830_v27  ;;  %v3278_v27 = vld [vmem:[%s12917_s27 + $0x318] sm:$0xff] }
 0x37b   : > { %9838 = vmatpush2.bf16.msra.mxu0 %v12070_v13  ;;  %9796 = vmatprep.subr.bf16.mxu1 %v11815_v14  ;;  %v3286_v13 = vld [vmem:[%s12917_s27 + $0x358] sm:$0xff]  ;;  %v11734_v14 = vcombine.low %v3565_v2, %v3573_v5 }
 0x37c   : > { %9839 = vmatprep.subr.bf16.mxu0 %v12055_v15  ;;  %v11464_v15 = vcombine.low %v3294_v6, %v3302_v9  ;;  %v11449_v18 = vcombine.high %v3278_v27, %v3286_v13  ;;  %v11448_v54 = vcombine.low %v3278_v27, %v3286_v13 }
 0x37e   : > { %9797 = vmatpush2.bf16.msra.mxu1 %v11814_v25  ;;  %v3262_v25 = vld [vmem:[%s12917_s27 + $0x298] sm:$0xff] }
 0x37f   : > { %9840 = vmatpush2.bf16.msra.mxu0 %v12054_v29  ;;  %9798 = vmatprep.subr.bf16.mxu1 %v11799_v61  ;;  %v3270_v29 = vld [vmem:[%s12917_s27 + $0x2d8] sm:$0xff] }
 0x380   : > { %9841 = vmatprep.subr.bf16.mxu0 %v12039_v33  ;;  %v12230_v33 = vcombine.low %v4061_v20, %v4069_v32  ;;  %v11433_v35 = vcombine.high %v3262_v25, %v3270_v29  ;;  %v3222_v20 = vld [vmem:[%s12917_s27 + $0x158] sm:$0xff] }
 0x382   : > { %9799 = vmatpush2.bf16.msra.mxu1 %v11798_v36  ;;  %v4029_v36 = vld [vmem:[%s12917_s27 + $0x1a90] sm:$0xff] }
 0x383   : > { %9842 = vmatpush2.bf16.msra.mxu0 %v12038_v37  ;;  %9800 = vmatprep.subr.bf16.mxu1 %v11783_v39  ;;  %v4037_v37 = vld [vmem:[%s12917_s27 + $0x1ad0] sm:$0xff] }
 0x384   : > { %9843 = vmatprep.subr.bf16.mxu0 %v12023_v47  ;;  %v3246_v47 = vld [vmem:[%s12917_s27 + $0x218] sm:$0xff]  ;;  %v12198_v2 = vcombine.low %v4029_v36, %v4037_v37 }
 0x385   : > { %v11417_v50 = vcombine.high %v3246_v47, %v3254_v40 }
 0x386   : > { %9801 = vmatpush2.bf16.msra.mxu1 %v11782_v28 }
 0x387   : > { %9844 = vmatpush2.bf16.msra.mxu0 %v12022_v46  ;;  %9802 = vmatprep.subr.bf16.mxu1 %v11767_v19  ;;  %v11432_v46 = vcombine.low %v3262_v25, %v3270_v29  ;;  %v12199_v19 = vcombine.high %v4029_v36, %v4037_v37  ;;  %v3190_v36 = vld [vmem:[%s12917_s27 + $0x58] sm:$0xff] }
 0x388   : > { %9845 = vmatprep.subr.bf16.mxu0 %v12007_v48 }
 0x38a   : > { %9803 = vmatpush2.bf16.msra.mxu1 %v11766_v62  ;;  %v3230_v62 = vld [vmem:[%s12917_s27 + $0x198] sm:$0xff] }
 0x38b   : > { %9846 = vmatpush2.bf16.msra.mxu0 %v12006_v63  ;;  %9804 = vmatprep.subr.bf16.mxu1 %v11751_v0  ;;  %v3238_v63 = vld [vmem:[%s12917_s27 + $0x1d8] sm:$0xff] }
 0x38c   : > { %9847 = vmatprep.subr.bf16.mxu0 %v11991_v1  ;;  %v11400_v27 = vcombine.low %v3230_v62, %v3238_v63 }
 0x38e   : > { %9805 = vmatpush2.bf16.msra.mxu1 %v11750_v10  ;;  %v11401_v10 = vcombine.high %v3230_v62, %v3238_v63 }
 0x38f   : > { %9848 = vmatpush2.bf16.msra.mxu0 %v11990_v59  ;;  %9806 = vmatprep.subr.bf16.mxu1 %v11735_v12  ;;  %v3997_v59 = vld [vmem:[%s12917_s27 + $0x1990] sm:$0xff] }
 0x390   : > { %9899 = vmatprep.subr.bf16.mxu0 %v11465_v26  ;;  %v4005_v12 = vld [vmem:[%s12917_s27 + $0x19d0] sm:$0xff]  ;;  %v3214_v26 = vld [vmem:[%s12917_s27 + $0x118] sm:$0xff] }
 0x391   : > { %v12167_v13 = vcombine.high %v3997_v59, %v4005_v12  ;;  %v12166_v24 = vcombine.low %v3997_v59, %v4005_v12  ;;  %v11384_v25 = vcombine.low %v3214_v26, %v3222_v20 }
 0x392   : > { %9807 = vmatpush2.bf16.msra.mxu1 %v11734_v14  ;;  %v13473_v61 = vpop.f32.mrf.mxu0  ;;  %9850 = vmatmul.mubr.bf16.vlgmr.msra.gmra.mxu0 %v13192_v57  ;;  %v11385_v14 = vcombine.high %v3214_v26, %v3222_v20  ;;  %v4157_v26 = vld [vmem:[%s12917_s27 + $0x1e90] sm:$0xff] }
 0x393   : > { %9900 = vmatpush1.bf16.msra.mxu0 %v11464_v15  ;;  %9931 = vmatprep.mubr.bf16.mxu0 %v13001_v21  ;;  %v3981_v15 = vld [vmem:[%s12917_s27 + $0x1910] sm:$0xff] }
 0x394   : > { %v13477_v31 = vpop.f32.mrf.mxu0  ;;  %9858 = vmatprep.subr.bf16.mxu1 %v12231_v44  ;;  %9901 = vmatprep.subr.bf16.mxu0 %v11449_v18  ;;  %v3989_v44 = vld [vmem:[%s12917_s27 + $0x1950] sm:$0xff]  ;;  %v3198_v18 = vld [vmem:[%s12917_s27 + $0x98] sm:$0xff] }
 0x395   : > { %9809 = vmatmul.mubr.bf16.vlgmr.msra.gmra.mxu1 %v13090_v23  ;;  %v9564_v39 = vpop.f32.mrf.mxu1  ;;  %v12151_v29 = vcombine.high %v3981_v15, %v3989_v44  ;;  %v12150_v37 = vcombine.low %v3981_v15, %v3989_v44  ;;  %v4165_v20 = vld [vmem:[%s12917_s27 + $0x1ed0] sm:$0xff] }
 0x396   : > { %v9565_v51 = vadd.f32 %v9564_v39, %v13401_v38  ;;  %9859 = vmatpush1.bf16.msra.mxu1 %v12230_v33  ;;  %9890 = vmatprep.mubr.bf16.mxu1 %v13243_v30  ;;  %v9609_v41 = vpop.f32.mrf.mxu0  ;;  %v4013_v38 = vld [vmem:[%s12917_s27 + $0x1a10] sm:$0xff]  ;;  %v11369_v33 = vcombine.high %v3198_v18, %v3206_v22  ;;  %v11368_v39 = vcombine.low %v3198_v18, %v3206_v22 }
 0x397   : > { %v9566_v28 = vpop.f32.mrf.mxu1  ;;  %9902 = vmatpush1.bf16.msra.mxu0 %v11448_v54  ;;  %9860 = vmatprep.subr.bf16.mxu1 %v12215_v34  ;;  %v12183_v6 = vcombine.high %v4013_v38, %v4021_v7  ;;  %v12182_v32 = vcombine.low %v4013_v38, %v4021_v7  ;;  %v3965_v54 = vld [vmem:[%s12917_s27 + $0x1890] sm:$0xff]  ;;  %v3406_v7 = vld [vmem:[%s12917_s27 + $0x718] sm:$0xff]  ;;  %v12327_v15 = vcombine.high %v4157_v26, %v4165_v20 }
 0x398   : > { %v9567_v48 = vadd.f32 %v9566_v28, %v13408_v45  ;;  %v9610_v56 = vpop.f32.mrf.mxu0  ;;  %9903 = vmatprep.subr.bf16.mxu0 %v11433_v35  ;;  %v10719_v0 = vmax.f32 %v9565_v51, 0.0  ;;  %v11416_v45 = vcombine.low %v3246_v47, %v3254_v40  ;;  %v3973_v34 = vld [vmem:[%s12917_s27 + $0x18d0] sm:$0xff]  ;;  %v3182_v35 = vld [vmem:[%s12917_s27 + $0x18] sm:$0xff] }
 0x399   : > { %v9568_v58 = vpop.f32.mrf.mxu1  ;;  %v12135_v47 = vcombine.high %v3965_v54, %v3973_v34  ;;  %v11353_v40 = vcombine.high %v3182_v35, %v3190_v36  ;;  %v3949_v51 = vld [vmem:[%s12917_s27 + $0x1810] sm:$0xff]  ;;  %v3430_v28 = vld [vmem:[%s12917_s27 + $0x7d8] sm:$0xff] }
 0x39a   : > { %v10720_v1 = vmax.f32 %v9567_v48, 0.0  ;;  %9861 = vmatpush1.bf16.msra.mxu1 %v12214_v43  ;;  %v3957_v41 = vld [vmem:[%s12917_s27 + $0x1850] sm:$0xff]  ;;  %v3422_v43 = vld [vmem:[%s12917_s27 + $0x798] sm:$0xff] }
 0x39b   : > { %v9569_v5 = vpop.f32.mrf.mxu1  ;;  %9904 = vmatpush1.bf16.msra.mxu0 %v11432_v46  ;;  %9862 = vmatprep.subr.bf16.mxu1 %v12199_v19  ;;  %v12134_v46 = vcombine.low %v3965_v54, %v3973_v34  ;;  %v11352_v19 = vcombine.low %v3182_v35, %v3190_v36  ;;  %v12119_v48 = vcombine.high %v3949_v51, %v3957_v41  ;;  %v4197_v38 = vld [vmem:[%s12917_s27 + $0x1fd0] sm:$0xff]  ;;  %v3414_v58 = vld [vmem:[%s12917_s27 + $0x758] sm:$0xff] }
 0x39c   : > { %v12385_v9 = vpack.c.bf16 %v10720_v1, %v10719_v0  ;;  %9905 = vmatprep.subr.bf16.mxu0 %v11417_v50  ;;  %v11593_v56 = vcombine.high %v3422_v43, %v3430_v28  ;;  %v4189_v50 = vld [vmem:[%s12917_s27 + $0x1f90] sm:$0xff]  ;;  %v12118_v62 = vcombine.low %v3949_v51, %v3957_v41  ;;  %v11592_v63 = vcombine.low %v3422_v43, %v3430_v28 }
 0x39d   : > { %v12359_v0 = vcombine.high %v4189_v50, %v4197_v38  ;;  %v11577_v1 = vcombine.high %v3406_v7, %v3414_v58  ;;  %v4181_v5 = vld [vmem:[%s12917_s27 + $0x1f50] sm:$0xff] }
 0x39e   : > { %10799 = vst [vmem:[%s13496_s10] sm:$0xff] %v12385_v9  ;;  %9863 = vmatpush1.bf16.msra.mxu1 %v12198_v2  ;;  %v4173_v2 = vld [vmem:[%s12917_s27 + $0x1f10] sm:$0xff]  ;;  %v12358_v9 = vcombine.low %v4189_v50, %v4197_v38 }
 0x39f   : > { %9906 = vmatpush1.bf16.msra.mxu0 %v11416_v45  ;;  %9864 = vmatprep.subr.bf16.mxu1 %v12183_v6  ;;  %v3390_v45 = vld [vmem:[%s12917_s27 + $0x698] sm:$0xff]  ;;  %v12343_v59 = vcombine.high %v4173_v2, %v4181_v5  ;;  %v4141_v18 = vld [vmem:[%s12917_s27 + $0x1e10] sm:$0xff] }
 0x3a0   : > { %9907 = vmatprep.subr.bf16.mxu0 %v11401_v10  ;;  %v3398_v6 = vld [vmem:[%s12917_s27 + $0x6d8] sm:$0xff]  ;;  %v11576_v10 = vcombine.low %v3406_v7, %v3414_v58  ;;  %v4149_v22 = vld [vmem:[%s12917_s27 + $0x1e50] sm:$0xff] }
 0x3a1   : > { %v11561_v12 = vcombine.high %v3390_v45, %v3398_v6  ;;  %v12311_v54 = vcombine.high %v4141_v18, %v4149_v22  ;;  %v4125_v35 = vld [vmem:[%s12917_s27 + $0x1d90] sm:$0xff] }
 0x3a2   : > { %9865 = vmatpush1.bf16.msra.mxu1 %v12182_v32  ;;  %v3374_v32 = vld [vmem:[%s12917_s27 + $0x618] sm:$0xff]  ;;  %v4133_v36 = vld [vmem:[%s12917_s27 + $0x1dd0] sm:$0xff] }
 0x3a3   : > { %9908 = vmatpush1.bf16.msra.mxu0 %v11400_v27  ;;  %9866 = vmatprep.subr.bf16.mxu1 %v12167_v13  ;;  %v3382_v27 = vld [vmem:[%s12917_s27 + $0x658] sm:$0xff]  ;;  %v12342_v13 = vcombine.low %v4173_v2, %v4181_v5  ;;  %v12295_v51 = vcombine.high %v4125_v35, %v4133_v36  ;;  %v4109_v43 = vld [vmem:[%s12917_s27 + $0x1d10] sm:$0xff] }
 0x3a4   : > { %9909 = vmatprep.subr.bf16.mxu0 %v11385_v14  ;;  %v11560_v14 = vcombine.low %v3390_v45, %v3398_v6  ;;  %v11545_v44 = vcombine.high %v3374_v32, %v3382_v27  ;;  %v4117_v28 = vld [vmem:[%s12917_s27 + $0x1d50] sm:$0xff] }
 0x3a5   : > { %v12279_v50 = vcombine.high %v4109_v43, %v4117_v28  ;;  %v4093_v7 = vld [vmem:[%s12917_s27 + $0x1c90] sm:$0xff] }
 0x3a6   : > { %9867 = vmatpush1.bf16.msra.mxu1 %v12166_v24  ;;  %v3358_v24 = vld [vmem:[%s12917_s27 + $0x598] sm:$0xff]  ;;  %v4101_v58 = vld [vmem:[%s12917_s27 + $0x1cd0] sm:$0xff] }
 0x3a7   : > { %9910 = vmatpush1.bf16.msra.mxu0 %v11384_v25  ;;  %9868 = vmatprep.subr.bf16.mxu1 %v12151_v29  ;;  %v3366_v25 = vld [vmem:[%s12917_s27 + $0x5d8] sm:$0xff]  ;;  %v12326_v29 = vcombine.low %v4157_v26, %v4165_v20  ;;  %v12263_v2 = vcombine.high %v4093_v7, %v4101_v58  ;;  %v4077_v45 = vld [vmem:[%s12917_s27 + $0x1c10] sm:$0xff] }
 0x3a8   : > { %9911 = vmatprep.subr.bf16.mxu0 %v11369_v33  ;;  %v11544_v33 = vcombine.low %v3374_v32, %v3382_v27  ;;  %v11529_v34 = vcombine.high %v3358_v24, %v3366_v25  ;;  %v4085_v6 = vld [vmem:[%s12917_s27 + $0x1c50] sm:$0xff]  ;;  %v3550_v32 = vld [vmem:[%s12917_s27 + $0xb98] sm:$0xff] }
 0x3a9   : > { %v12247_v26 = vcombine.high %v4077_v45, %v4085_v6  ;;  %v3558_v27 = vld [vmem:[%s12917_s27 + $0xbd8] sm:$0xff] }
 0x3aa   : > { %9869 = vmatpush1.bf16.msra.mxu1 %v12150_v37  ;;  %v3342_v37 = vld [vmem:[%s12917_s27 + $0x518] sm:$0xff] }
 0x3ab   : > { %9912 = vmatpush1.bf16.msra.mxu0 %v11368_v39  ;;  %9870 = vmatprep.subr.bf16.mxu1 %v12135_v47  ;;  %v3350_v39 = vld [vmem:[%s12917_s27 + $0x558] sm:$0xff]  ;;  %v12310_v47 = vcombine.low %v4141_v18, %v4149_v22  ;;  %v13548_v18 = vld [vmem:[%s13306_s9] sm:$0xff] }
 0x3ac   : > { %9913 = vmatprep.subr.bf16.mxu0 %v11353_v40  ;;  %v11528_v40 = vcombine.low %v3358_v24, %v3366_v25  ;;  %v11513_v41 = vcombine.high %v3342_v37, %v3350_v39  ;;  %v4218_v22 = vrot.slane %v13548_v18, %v13061_v11  ;;  %v11721_v24 = vcombine.high %v3550_v32, %v3558_v27 }
 0x3ae   : > { %9871 = vmatpush1.bf16.msra.mxu1 %v12134_v46  ;;  %v3326_v46 = vld [vmem:[%s12917_s27 + $0x498] sm:$0xff] }
 0x3af   : > { %9914 = vmatpush1.bf16.msra.mxu0 %v11352_v19  ;;  %9872 = vmatprep.subr.bf16.mxu1 %v12119_v48  ;;  %v3334_v19 = vld [vmem:[%s12917_s27 + $0x4d8] sm:$0xff]  ;;  %v12294_v48 = vcombine.low %v4125_v35, %v4133_v36  ;;  %v4222_v35 = vrot.slane %v13548_v18, %v12989_v3 }
 0x3b0   : > { %9915 = vmatprep.subr.bf16.mxu0 %v11593_v56  ;;  %v11512_v56 = vcombine.low %v3342_v37, %v3350_v39  ;;  %v11497_v38 = vcombine.high %v3326_v46, %v3334_v19  ;;  %v11720_v37 = vcombine.low %v3550_v32, %v3558_v27  ;;  %v3486_v27 = vld [vmem:[%s12917_s27 + $0x998] sm:$0xff] }
 0x3b2   : > { %9873 = vmatpush1.bf16.msra.mxu1 %v12118_v62  ;;  %v3310_v62 = vld [vmem:[%s12917_s27 + $0x418] sm:$0xff] }
 0x3b3   : > { %9916 = vmatpush2.bf16.msra.mxu0 %v11592_v63  ;;  %9874 = vmatprep.subr.bf16.mxu1 %v12359_v0  ;;  %v3318_v63 = vld [vmem:[%s12917_s27 + $0x458] sm:$0xff]  ;;  %v12278_v0 = vcombine.low %v4109_v43, %v4117_v28 }
 0x3b4   : > { %9917 = vmatprep.subr.bf16.mxu0 %v11577_v1  ;;  %v11496_v1 = vcombine.low %v3326_v46, %v3334_v19  ;;  %v11481_v5 = vcombine.high %v3310_v62, %v3318_v63  ;;  %v3518_v43 = vld [vmem:[%s12917_s27 + $0xa98] sm:$0xff] }
 0x3b5   : > { %v3526_v28 = vld [vmem:[%s12917_s27 + $0xad8] sm:$0xff] }
 0x3b6   : > { %9875 = vmatpush2.bf16.msra.mxu1 %v12358_v9  ;;  %v3806_v9 = vld [vmem:[%s12917_s27 + $0x1398] sm:$0xff] }
 0x3b7   : > { %9918 = vmatpush2.bf16.msra.mxu0 %v11576_v10  ;;  %9876 = vmatprep.subr.bf16.mxu1 %v12343_v59  ;;  %v3814_v10 = vld [vmem:[%s12917_s27 + $0x13d8] sm:$0xff]  ;;  %v12262_v59 = vcombine.low %v4093_v7, %v4101_v58 }
 0x3b8   : > { %9919 = vmatprep.subr.bf16.mxu0 %v11561_v12  ;;  %v11480_v12 = vcombine.low %v3310_v62, %v3318_v63  ;;  %v11977_v20 = vcombine.high %v3806_v9, %v3814_v10  ;;  %v3758_v19 = vld [vmem:[%s12917_s27 + $0x1218] sm:$0xff]  ;;  %v11689_v62 = vcombine.high %v3518_v43, %v3526_v28 }
 0x3ba   : > { %9877 = vmatpush2.bf16.msra.mxu1 %v12342_v13  ;;  %v3790_v13 = vld [vmem:[%s12917_s27 + $0x1318] sm:$0xff] }
 0x3bb   : > { %9920 = vmatpush2.bf16.msra.mxu0 %v11560_v14  ;;  %9878 = vmatprep.subr.bf16.mxu1 %v12327_v15  ;;  %v3798_v14 = vld [vmem:[%s12917_s27 + $0x1358] sm:$0xff]  ;;  %v12246_v15 = vcombine.low %v4077_v45, %v4085_v6 }
 0x3bc   : > { %9921 = vmatprep.subr.bf16.mxu0 %v11545_v44  ;;  %v11976_v44 = vcombine.low %v3806_v9, %v3814_v10  ;;  %v11961_v25 = vcombine.high %v3790_v13, %v3798_v14  ;;  %v11960_v39 = vcombine.low %v3790_v13, %v3798_v14  ;;  %v3742_v6 = vld [vmem:[%s12917_s27 + $0x1198] sm:$0xff]  ;;  %v11688_v10 = vcombine.low %v3518_v43, %v3526_v28 }
 0x3bd   : > { %v3750_v9 = vld [vmem:[%s12917_s27 + $0x11d8] sm:$0xff] }
 0x3be   : > { %9879 = vmatpush2.bf16.msra.mxu1 %v12326_v29  ;;  %v3534_v29 = vld [vmem:[%s12917_s27 + $0xb18] sm:$0xff]  ;;  %v11913_v32 = vcombine.high %v3742_v6, %v3750_v9 }
 0x3bf   : > { %9922 = vmatpush2.bf16.msra.mxu0 %v11544_v33  ;;  %9880 = vmatprep.subr.bf16.mxu1 %v12311_v54  ;;  %v3542_v33 = vld [vmem:[%s12917_s27 + $0xb58] sm:$0xff] }
 0x3c0   : > { %9923 = vmatprep.subr.bf16.mxu0 %v11529_v34  ;;  %v3774_v54 = vld [vmem:[%s12917_s27 + $0x1298] sm:$0xff] }
 0x3c1   : > { %v3782_v34 = vld [vmem:[%s12917_s27 + $0x12d8] sm:$0xff] }
 0x3c2   : > { %9881 = vmatpush2.bf16.msra.mxu1 %v12310_v47  ;;  %v11705_v47 = vcombine.high %v3534_v29, %v3542_v33  ;;  %v11944_v58 = vcombine.low %v3774_v54, %v3782_v34  ;;  %v3494_v13 = vld [vmem:[%s12917_s27 + $0x9d8] sm:$0xff] }
 0x3c3   : > { %9924 = vmatpush2.bf16.msra.mxu0 %v11528_v40  ;;  %9882 = vmatprep.subr.bf16.mxu1 %v12295_v51  ;;  %v9606_v40 = vadd.f32 %v13473_v61, %v4218_v22  ;;  %v3726_v14 = vld [vmem:[%s12917_s27 + $0x1118] sm:$0xff]  ;;  %v11912_v22 = vcombine.low %v3742_v6, %v3750_v9 }
 0x3c4   : > { %9925 = vmatprep.subr.bf16.mxu0 %v11513_v41  ;;  %v11945_v41 = vcombine.high %v3774_v54, %v3782_v34  ;;  %v3710_v54 = vld [vmem:[%s12917_s27 + $0x1098] sm:$0xff] }
 0x3c5   : > { %v3718_v34 = vld [vmem:[%s12917_s27 + $0x10d8] sm:$0xff] }
 0x3c6   : > { %9883 = vmatpush2.bf16.msra.mxu1 %v12294_v48  ;;  %v3766_v48 = vld [vmem:[%s12917_s27 + $0x1258] sm:$0xff]  ;;  %v11880_v28 = vcombine.low %v3710_v54, %v3718_v34 }
 0x3c7   : > { %9926 = vmatpush2.bf16.msra.mxu0 %v11512_v56  ;;  %9884 = vmatprep.subr.bf16.mxu1 %v12279_v50  ;;  %v9608_v56 = vadd.f32 %v13477_v31, %v4222_v35  ;;  %v3510_v31 = vld [vmem:[%s12917_s27 + $0xa58] sm:$0xff]  ;;  %v11656_v35 = vcombine.low %v3486_v27, %v3494_v13 }
 0x3c8   : > { %9927 = vmatprep.subr.bf16.mxu0 %v11497_v38  ;;  %v11704_v38 = vcombine.low %v3534_v29, %v3542_v33  ;;  %v3470_v29 = vld [vmem:[%s12917_s27 + $0x918] sm:$0xff] }
 0x3c9   : > { %v3478_v33 = vld [vmem:[%s12917_s27 + $0x958] sm:$0xff] }
 0x3ca   : > { %9885 = vmatpush2.bf16.msra.mxu1 %v12278_v0  ;;  %v11640_v43 = vcombine.low %v3470_v29, %v3478_v33 }
 0x3cb   : > { %9928 = vmatpush2.bf16.msra.mxu0 %v11496_v1  ;;  %9886 = vmatprep.subr.bf16.mxu1 %v12263_v2  ;;  %v11929_v1 = vcombine.high %v3758_v19, %v3766_v48  ;;  %v3502_v2 = vld [vmem:[%s12917_s27 + $0xa18] sm:$0xff] }
 0x3cc   : > { %9929 = vmatprep.subr.bf16.mxu0 %v11481_v5 }
 0x3ce   : > { %9887 = vmatpush2.bf16.msra.mxu1 %v12262_v59 }
 0x3cf   : > { %9930 = vmatpush2.bf16.msra.mxu0 %v11480_v12  ;;  %9888 = vmatprep.subr.bf16.mxu1 %v12247_v26  ;;  %v11928_v26 = vcombine.low %v3758_v19, %v3766_v48  ;;  %v3438_v48 = vld [vmem:[%s12917_s27 + $0x818] sm:$0xff] }
 0x3d0   : > { %9981 = vmatprep.subr.bf16.mxu0 %v11977_v20  ;;  %v11673_v20 = vcombine.high %v3502_v2, %v3510_v31 }
 0x3d2   : > { %9889 = vmatpush2.bf16.msra.mxu1 %v12246_v15  ;;  %v9687_v36 = vpop.f32.mrf.mxu0  ;;  %9932 = vmatmul.mubr.bf16.vlgmr.msra.gmra.mxu0 %v13088_v52  ;;  %v3734_v15 = vld [vmem:[%s12917_s27 + $0x1158] sm:$0xff] }
 0x3d3   : > { %9982 = vmatpush1.bf16.msra.mxu0 %v11976_v44  ;;  %10013 = vmatprep.mubr.bf16.mxu0 %v13190_v49  ;;  %v11672_v44 = vcombine.low %v3502_v2, %v3510_v31  ;;  %v3926_v2 = vld [vmem:[%s12917_s27 + $0x1758] sm:$0xff] }
 0x3d4   : > { %v9689_v51 = vpop.f32.mrf.mxu0  ;;  %9940 = vmatprep.subr.bf16.mxu1 %v11721_v24  ;;  %9983 = vmatprep.subr.bf16.mxu0 %v11961_v25  ;;  %v11657_v24 = vcombine.high %v3486_v27, %v3494_v13  ;;  %v11897_v25 = vcombine.high %v3726_v14, %v3734_v15 }
 0x3d5   : > { %v9646_v46 = vpop.f32.mrf.mxu1  ;;  %9891 = vmatmul.mubr.bf16.vlgmr.msra.gmra.mxu1 %v13248_v4 }
 0x3d6   : > { %v9647_v50 = vadd.f32 %v9646_v46, %v9606_v40  ;;  %9941 = vmatpush1.bf16.msra.mxu1 %v11720_v37  ;;  %9972 = vmatprep.mubr.bf16.mxu1 %v13017_v42  ;;  %v9691_v61 = vpop.f32.mrf.mxu0  ;;  %v11641_v37 = vcombine.high %v3470_v29, %v3478_v33  ;;  %v3462_v40 = vld [vmem:[%s12917_s27 + $0x8d8] sm:$0xff] }
 0x3d7   : > { %v9648_v7 = vpop.f32.mrf.mxu1  ;;  %9984 = vmatpush1.bf16.msra.mxu0 %v11960_v39  ;;  %9942 = vmatprep.subr.bf16.mxu1 %v11705_v47  ;;  %v11881_v39 = vcombine.high %v3710_v54, %v3718_v34  ;;  %v3454_v47 = vld [vmem:[%s12917_s27 + $0x898] sm:$0xff] }
 0x3d8   : > { %v9649_v63 = vadd.f32 %v9648_v7, %v9608_v56  ;;  %v9692_v0 = vpop.f32.mrf.mxu0  ;;  %9985 = vmatprep.subr.bf16.mxu0 %v11945_v41  ;;  %v13570_v5 = vadd.f32 %v9687_v36, %v9647_v50  ;;  %v11896_v36 = vcombine.low %v3726_v14, %v3734_v15  ;;  %v3702_v41 = vld [vmem:[%s12917_s27 + $0x1058] sm:$0xff]  ;;  %v11625_v46 = vcombine.high %v3454_v47, %v3462_v40 }
 0x3d9   : > { %v9650_v45 = vpop.f32.mrf.mxu1  ;;  %v3446_v56 = vld [vmem:[%s12917_s27 + $0x858] sm:$0xff] }
 0x3da   : > { %9943 = vmatpush1.bf16.msra.mxu1 %v11704_v38  ;;  %v13574_v59 = vadd.f32 %v9689_v51, %v9649_v63  ;;  %v3694_v51 = vld [vmem:[%s12917_s27 + $0x1018] sm:$0xff]  ;;  %v11624_v38 = vcombine.low %v3454_v47, %v3462_v40  ;;  %v11608_v31 = vcombine.low %v3438_v48, %v3446_v56 }
 0x3db   : > { %v9651_v12 = vpop.f32.mrf.mxu1  ;;  %9986 = vmatpush1.bf16.msra.mxu0 %v11944_v58  ;;  %9944 = vmatprep.subr.bf16.mxu1 %v11689_v62  ;;  %v11865_v19 = vcombine.high %v3694_v51, %v3702_v41  ;;  %v3934_v50 = vld [vmem:[%s12917_s27 + $0x1798] sm:$0xff]  ;;  %v11864_v7 = vcombine.low %v3694_v51, %v3702_v41  ;;  %v11609_v58 = vcombine.high %v3438_v48, %v3446_v56 }
 0x3dc   : > { %9987 = vmatprep.subr.bf16.mxu0 %v11929_v1  ;;  %v3942_v61 = vld [vmem:[%s12917_s27 + $0x17d8] sm:$0xff] }
 0x3dd   : > { %v12105_v62 = vcombine.high %v3934_v50, %v3942_v61  ;;  %v3678_v63 = vld [vmem:[%s12917_s27 + $0xf98] sm:$0xff]  ;;  %v12104_v45 = vcombine.low %v3934_v50, %v3942_v61 }
 0x3de   : > { %9945 = vmatpush1.bf16.msra.mxu1 %v11688_v10  ;;  %v3686_v0 = vld [vmem:[%s12917_s27 + $0xfd8] sm:$0xff] }
 0x3df   : > { %9988 = vmatpush1.bf16.msra.mxu0 %v11928_v26  ;;  %9946 = vmatprep.subr.bf16.mxu1 %v11673_v20  ;;  %v3918_v1 = vld [vmem:[%s12917_s27 + $0x1718] sm:$0xff]  ;;  %v11849_v6 = vcombine.high %v3678_v63, %v3686_v0 }
 0x3e0   : > { %9989 = vmatprep.subr.bf16.mxu0 %v11913_v32  ;;  %v12089_v9 = vcombine.high %v3918_v1, %v3926_v2  ;;  %v3662_v10 = vld [vmem:[%s12917_s27 + $0xf18] sm:$0xff]  ;;  %v11848_v32 = vcombine.low %v3678_v63, %v3686_v0  ;;  %v12088_v27 = vcombine.low %v3918_v1, %v3926_v2 }
 0x3e1   : > { %v3670_v12 = vld [vmem:[%s12917_s27 + $0xf58] sm:$0xff] }
 0x3e2   : > { %9947 = vmatpush1.bf16.msra.mxu1 %v11672_v44  ;;  %v3902_v26 = vld [vmem:[%s12917_s27 + $0x1698] sm:$0xff]  ;;  %v11833_v13 = vcombine.high %v3662_v10, %v3670_v12 }
 0x3e3   : > { %9990 = vmatpush1.bf16.msra.mxu0 %v11912_v22  ;;  %9948 = vmatprep.subr.bf16.mxu1 %v11657_v24  ;;  %v3910_v20 = vld [vmem:[%s12917_s27 + $0x16d8] sm:$0xff] }
 0x3e4   : > { %9991 = vmatprep.subr.bf16.mxu0 %v11897_v25  ;;  %v12073_v14 = vcombine.high %v3902_v26, %v3910_v20  ;;  %v3646_v15 = vld [vmem:[%s12917_s27 + $0xe98] sm:$0xff]  ;;  %v11832_v25 = vcombine.low %v3662_v10, %v3670_v12  ;;  %v12072_v29 = vcombine.low %v3902_v26, %v3910_v20 }
 0x3e5   : > { %v3654_v44 = vld [vmem:[%s12917_s27 + $0xed8] sm:$0xff] }
 0x3e6   : > { %9949 = vmatpush1.bf16.msra.mxu1 %v11656_v35  ;;  %v3886_v22 = vld [vmem:[%s12917_s27 + $0x1618] sm:$0xff]  ;;  %v11817_v33 = vcombine.high %v3646_v15, %v3654_v44 }
 0x3e7   : > { %9992 = vmatpush1.bf16.msra.mxu0 %v11896_v36  ;;  %9950 = vmatprep.subr.bf16.mxu1 %v11641_v37  ;;  %v3894_v24 = vld [vmem:[%s12917_s27 + $0x1658] sm:$0xff] }
 0x3e8   : > { %9993 = vmatprep.subr.bf16.mxu0 %v11881_v39  ;;  %v12057_v54 = vcombine.high %v3886_v22, %v3894_v24  ;;  %v3630_v34 = vld [vmem:[%s12917_s27 + $0xe18] sm:$0xff]  ;;  %v11816_v39 = vcombine.low %v3646_v15, %v3654_v44  ;;  %v12056_v47 = vcombine.low %v3886_v22, %v3894_v24 }
 0x3e9   : > { %v3638_v35 = vld [vmem:[%s12917_s27 + $0xe58] sm:$0xff] }
 0x3ea   : > { %9951 = vmatpush1.bf16.msra.mxu1 %v11640_v43  ;;  %v3870_v36 = vld [vmem:[%s12917_s27 + $0x1598] sm:$0xff]  ;;  %v11801_v40 = vcombine.high %v3630_v34, %v3638_v35 }
 0x3eb   : > { %9994 = vmatpush1.bf16.msra.mxu0 %v11880_v28  ;;  %9952 = vmatprep.subr.bf16.mxu1 %v11625_v46  ;;  %v3878_v37 = vld [vmem:[%s12917_s27 + $0x15d8] sm:$0xff] }
 0x3ec   : > { %9995 = vmatprep.subr.bf16.mxu0 %v11865_v19  ;;  %v12041_v51 = vcombine.high %v3870_v36, %v3878_v37  ;;  %v3614_v41 = vld [vmem:[%s12917_s27 + $0xd98] sm:$0xff]  ;;  %v11800_v19 = vcombine.low %v3630_v34, %v3638_v35  ;;  %v12040_v48 = vcombine.low %v3870_v36, %v3878_v37 }
 0x3ed   : > { %v3622_v43 = vld [vmem:[%s12917_s27 + $0xdd8] sm:$0xff] }
 0x3ee   : > { %9953 = vmatpush1.bf16.msra.mxu1 %v11624_v38  ;;  %v3854_v28 = vld [vmem:[%s12917_s27 + $0x1518] sm:$0xff]  ;;  %v11785_v56 = vcombine.high %v3614_v41, %v3622_v43 }
 0x3ef   : > { %9996 = vmatpush1.bf16.msra.mxu0 %v11864_v7  ;;  %9954 = vmatprep.subr.bf16.mxu1 %v11609_v58  ;;  %v3862_v46 = vld [vmem:[%s12917_s27 + $0x1558] sm:$0xff] }
 0x3f0   : > { %9997 = vmatprep.subr.bf16.mxu0 %v12105_v62  ;;  %v12025_v50 = vcombine.high %v3854_v28, %v3862_v46  ;;  %v3598_v61 = vld [vmem:[%s12917_s27 + $0xd18] sm:$0xff]  ;;  %v11784_v62 = vcombine.low %v3614_v41, %v3622_v43  ;;  %v12024_v63 = vcombine.low %v3854_v28, %v3862_v46 }
 0x3f1   : > { %v3606_v38 = vld [vmem:[%s12917_s27 + $0xd58] sm:$0xff] }
 0x3f2   : > { %9955 = vmatpush1.bf16.msra.mxu1 %v11608_v31  ;;  %v3838_v7 = vld [vmem:[%s12917_s27 + $0x1498] sm:$0xff]  ;;  %v11769_v0 = vcombine.high %v3598_v61, %v3606_v38 }
 0x3f3   : > { %9998 = vmatpush2.bf16.msra.mxu0 %v12104_v45  ;;  %9956 = vmatprep.subr.bf16.mxu1 %v11849_v6  ;;  %v3846_v58 = vld [vmem:[%s12917_s27 + $0x14d8] sm:$0xff] }
 0x3f4   : > { %9999 = vmatprep.subr.bf16.mxu0 %v12089_v9  ;;  %v12009_v1 = vcombine.high %v3838_v7, %v3846_v58  ;;  %v3582_v2 = vld [vmem:[%s12917_s27 + $0xc98] sm:$0xff]  ;;  %v11768_v9 = vcombine.low %v3598_v61, %v3606_v38  ;;  %v12008_v10 = vcombine.low %v3838_v7, %v3846_v58  ;;  %v3247_v61 = vld [vmem:[%s12917_s27 + $0x220] sm:$0xff] }
 0x3f5   : > { %v3590_v31 = vld [vmem:[%s12917_s27 + $0xcd8] sm:$0xff]  ;;  %v3255_v38 = vld [vmem:[%s12917_s27 + $0x260] sm:$0xff] }
 0x3f6   : > { %9957 = vmatpush2.bf16.msra.mxu1 %v11848_v32  ;;  %v3822_v45 = vld [vmem:[%s12917_s27 + $0x1418] sm:$0xff]  ;;  %v11753_v12 = vcombine.high %v3582_v2, %v3590_v31 }
 0x3f7   : > { %10000 = vmatpush2.bf16.msra.mxu0 %v12088_v27  ;;  %9958 = vmatprep.subr.bf16.mxu1 %v11833_v13  ;;  %v3830_v6 = vld [vmem:[%s12917_s27 + $0x1458] sm:$0xff]  ;;  %v3295_v27 = vld [vmem:[%s12917_s27 + $0x3a0] sm:$0xff] }
 0x3f8   : > { %10001 = vmatprep.subr.bf16.mxu0 %v12073_v14  ;;  %v11993_v26 = vcombine.high %v3822_v45, %v3830_v6  ;;  %v3566_v20 = vld [vmem:[%s12917_s27 + $0xc18] sm:$0xff]  ;;  %v3303_v13 = vld [vmem:[%s12917_s27 + $0x3e0] sm:$0xff]  ;;  %v11752_v14 = vcombine.low %v3582_v2, %v3590_v31  ;;  %v11992_v15 = vcombine.low %v3822_v45, %v3830_v6  ;;  %v11419_v45 = vcombine.high %v3247_v61, %v3255_v38 }
 0x3f9   : > { %v3574_v32 = vld [vmem:[%s12917_s27 + $0xc58] sm:$0xff]  ;;  %v11467_v22 = vcombine.high %v3295_v27, %v3303_v13  ;;  %v11466_v34 = vcombine.low %v3295_v27, %v3303_v13 }
 0x3fa   : > { %9959 = vmatpush2.bf16.msra.mxu1 %v11832_v25  ;;  %v11737_v44 = vcombine.high %v3566_v20, %v3574_v32  ;;  %v4062_v24 = vld [vmem:[%s12917_s27 + $0x1b98] sm:$0xff] }
 0x3fb   : > { %10002 = vmatpush2.bf16.msra.mxu0 %v12072_v29  ;;  %9960 = vmatprep.subr.bf16.mxu1 %v11817_v33  ;;  %v4070_v25 = vld [vmem:[%s12917_s27 + $0x1bd8] sm:$0xff]  ;;  %v3279_v29 = vld [vmem:[%s12917_s27 + $0x320] sm:$0xff] }
 0x3fc   : > { %10003 = vmatprep.subr.bf16.mxu0 %v12057_v54  ;;  %v3287_v33 = vld [vmem:[%s12917_s27 + $0x360] sm:$0xff]  ;;  %v11736_v54 = vcombine.low %v3566_v20, %v3574_v32  ;;  %v12233_v35 = vcombine.high %v4062_v24, %v4070_v25  ;;  %v4046_v37 = vld [vmem:[%s12917_s27 + $0x1b18] sm:$0xff]  ;;  %v12232_v41 = vcombine.low %v4062_v24, %v4070_v25 }
 0x3fd   : > { %v11451_v36 = vcombine.high %v3279_v29, %v3287_v33  ;;  %v11450_v43 = vcombine.low %v3279_v29, %v3287_v33  ;;  %v4014_v6 = vld [vmem:[%s12917_s27 + $0x1a18] sm:$0xff]  ;;  %v3215_v24 = vld [vmem:[%s12917_s27 + $0x120] sm:$0xff] }
 0x3fe   : > { %9961 = vmatpush2.bf16.msra.mxu1 %v11816_v39  ;;  %v4054_v39 = vld [vmem:[%s12917_s27 + $0x1b58] sm:$0xff]  ;;  %v3223_v25 = vld [vmem:[%s12917_s27 + $0x160] sm:$0xff] }
 0x3ff   : > { %10004 = vmatpush2.bf16.msra.mxu0 %v12056_v47  ;;  %9962 = vmatprep.subr.bf16.mxu1 %v11801_v40  ;;  %v3263_v47 = vld [vmem:[%s12917_s27 + $0x2a0] sm:$0xff]  ;;  %v12217_v28 = vcombine.high %v4046_v37, %v4054_v39 }
 0x400   : > { %10005 = vmatprep.subr.bf16.mxu0 %v12041_v51  ;;  %v3271_v40 = vld [vmem:[%s12917_s27 + $0x2e0] sm:$0xff] }
 0x402   : > { %9963 = vmatpush2.bf16.msra.mxu1 %v11800_v19  ;;  %v11435_v19 = vcombine.high %v3263_v47, %v3271_v40 }
 0x403   : > { %10006 = vmatpush2.bf16.msra.mxu0 %v12040_v48  ;;  %9964 = vmatprep.subr.bf16.mxu1 %v11785_v56  ;;  %v4030_v48 = vld [vmem:[%s12917_s27 + $0x1a98] sm:$0xff] }
 0x404   : > { %10007 = vmatprep.subr.bf16.mxu0 %v12025_v50  ;;  %v4038_v56 = vld [vmem:[%s12917_s27 + $0x1ad8] sm:$0xff] }
 0x405   : > { %v12200_v32 = vcombine.low %v4030_v48, %v4038_v56 }
 0x406   : > { %9965 = vmatpush2.bf16.msra.mxu1 %v11784_v62  ;;  %v12216_v62 = vcombine.low %v4046_v37, %v4054_v39  ;;  %v3199_v37 = vld [vmem:[%s12917_s27 + $0xa0] sm:$0xff] }
 0x407   : > { %10008 = vmatpush2.bf16.msra.mxu0 %v12024_v63  ;;  %9966 = vmatprep.subr.bf16.mxu1 %v11769_v0  ;;  %v11434_v0 = vcombine.low %v3263_v47, %v3271_v40  ;;  %v3207_v39 = vld [vmem:[%s12917_s27 + $0xe0] sm:$0xff]  ;;  %v11386_v40 = vcombine.low %v3215_v24, %v3223_v25 }
 0x408   : > { %10009 = vmatprep.subr.bf16.mxu0 %v12009_v1  ;;  %v12201_v1 = vcombine.high %v4030_v48, %v4038_v56  ;;  %v3183_v48 = vld [vmem:[%s12917_s27 + $0x20] sm:$0xff] }
 0x409   : > { %v3191_v56 = vld [vmem:[%s12917_s27 + $0x60] sm:$0xff] }
 0x40a   : > { %9967 = vmatpush2.bf16.msra.mxu1 %v11768_v9  ;;  %v4022_v9 = vld [vmem:[%s12917_s27 + $0x1a58] sm:$0xff] }
 0x40b   : > { %10010 = vmatpush2.bf16.msra.mxu0 %v12008_v10  ;;  %9968 = vmatprep.subr.bf16.mxu1 %v11753_v12  ;;  %v3231_v10 = vld [vmem:[%s12917_s27 + $0x1a0] sm:$0xff]  ;;  %v12185_v13 = vcombine.high %v4014_v6, %v4022_v9  ;;  %v12184_v29 = vcombine.low %v4014_v6, %v4022_v9  ;;  %v4190_v6 = vld [vmem:[%s12917_s27 + $0x1f98] sm:$0xff] }
 0x40c   : > { %10011 = vmatprep.subr.bf16.mxu0 %v11993_v26  ;;  %v3239_v12 = vld [vmem:[%s12917_s27 + $0x1e0] sm:$0xff]  ;;  %v4198_v9 = vld [vmem:[%s12917_s27 + $0x1fd8] sm:$0xff] }
 0x40d   : > { %v11402_v33 = vcombine.low %v3231_v10, %v3239_v12 }
 0x40e   : > { %9969 = vmatpush2.bf16.msra.mxu1 %v11752_v14 }
 0x40f   : > { %10012 = vmatpush2.bf16.msra.mxu0 %v11992_v15  ;;  %9970 = vmatprep.subr.bf16.mxu1 %v11737_v44  ;;  %v11403_v15 = vcombine.high %v3231_v10, %v3239_v12  ;;  %v3998_v44 = vld [vmem:[%s12917_s27 + $0x1998] sm:$0xff]  ;;  %v3415_v10 = vld [vmem:[%s12917_s27 + $0x760] sm:$0xff] }
 0x410   : > { %10063 = vmatprep.subr.bf16.mxu0 %v11467_v22  ;;  %v4006_v22 = vld [vmem:[%s12917_s27 + $0x19d8] sm:$0xff] }
 0x411   : > { %v12168_v47 = vcombine.low %v3998_v44, %v4006_v22 }
 0x412   : > { %9971 = vmatpush2.bf16.msra.mxu1 %v11736_v54  ;;  %v13632_v51 = vpop.f32.mrf.mxu0  ;;  %10014 = vmatmul.mubr.bf16.vlgmr.msra.gmra.mxu0 %v13192_v57  ;;  %v12169_v54 = vcombine.high %v3998_v44, %v4006_v22 }
 0x413   : > { %10064 = vmatpush1.bf16.msra.mxu0 %v11466_v34  ;;  %10095 = vmatprep.mubr.bf16.mxu0 %v13001_v21  ;;  %v11387_v34 = vcombine.high %v3215_v24, %v3223_v25  ;;  %v4158_v25 = vld [vmem:[%s12917_s27 + $0x1e98] sm:$0xff] }
 0x414   : > { %v13636_v46 = vpop.f32.mrf.mxu0  ;;  %10022 = vmatprep.subr.bf16.mxu1 %v12233_v35  ;;  %10065 = vmatprep.subr.bf16.mxu0 %v11451_v36  ;;  %v3982_v35 = vld [vmem:[%s12917_s27 + $0x1918] sm:$0xff] }
 0x415   : > { %v9728_v50 = vpop.f32.mrf.mxu1  ;;  %9973 = vmatmul.mubr.bf16.vlgmr.msra.gmra.mxu1 %v13090_v23  ;;  %v3990_v36 = vld [vmem:[%s12917_s27 + $0x1958] sm:$0xff] }
 0x416   : > { %v9729_v7 = vadd.f32 %v9728_v50, %v13570_v5  ;;  %10023 = vmatpush1.bf16.msra.mxu1 %v12232_v41  ;;  %10054 = vmatprep.mubr.bf16.mxu1 %v13243_v30  ;;  %v9773_v58 = vpop.f32.mrf.mxu0  ;;  %v12153_v41 = vcombine.high %v3982_v35, %v3990_v36  ;;  %v12152_v50 = vcombine.low %v3982_v35, %v3990_v36 }
 0x417   : > { %v9730_v63 = vpop.f32.mrf.mxu1  ;;  %10066 = vmatpush1.bf16.msra.mxu0 %v11450_v43  ;;  %10024 = vmatprep.subr.bf16.mxu1 %v12217_v28  ;;  %v11371_v43 = vcombine.high %v3199_v37, %v3207_v39  ;;  %v3966_v28 = vld [vmem:[%s12917_s27 + $0x1898] sm:$0xff] }
 0x418   : > { %v9731_v2 = vadd.f32 %v9730_v63, %v13574_v59  ;;  %v9774_v31 = vpop.f32.mrf.mxu0  ;;  %10067 = vmatprep.subr.bf16.mxu0 %v11435_v19  ;;  %v10721_v26 = vmax.f32 %v9729_v7, 0.0  ;;  %v11418_v59 = vcombine.low %v3247_v61, %v3255_v38  ;;  %v3974_v19 = vld [vmem:[%s12917_s27 + $0x18d8] sm:$0xff]  ;;  %v11370_v61 = vcombine.low %v3199_v37, %v3207_v39  ;;  %v3423_v63 = vld [vmem:[%s12917_s27 + $0x7a0] sm:$0xff] }
 0x419   : > { %v9732_v5 = vpop.f32.mrf.mxu1  ;;  %v12137_v38 = vcombine.high %v3966_v28, %v3974_v19  ;;  %v11355_v7 = vcombine.high %v3183_v48, %v3191_v56  ;;  %v3950_v58 = vld [vmem:[%s12917_s27 + $0x1818] sm:$0xff] }
 0x41a   : > { %v10722_v20 = vmax.f32 %v9731_v2, 0.0  ;;  %10025 = vmatpush1.bf16.msra.mxu1 %v12216_v62  ;;  %v3958_v62 = vld [vmem:[%s12917_s27 + $0x1858] sm:$0xff]  ;;  %v11354_v2 = vcombine.low %v3183_v48, %v3191_v56  ;;  %v3407_v5 = vld [vmem:[%s12917_s27 + $0x720] sm:$0xff] }
 0x41b   : > { %v9733_v27 = vpop.f32.mrf.mxu1  ;;  %10068 = vmatpush1.bf16.msra.mxu0 %v11434_v0  ;;  %10026 = vmatprep.subr.bf16.mxu1 %v12201_v1  ;;  %v3431_v0 = vld [vmem:[%s12917_s27 + $0x7e0] sm:$0xff]  ;;  %v12136_v1 = vcombine.low %v3966_v28, %v3974_v19  ;;  %v12121_v31 = vcombine.high %v3950_v58, %v3958_v62  ;;  %v12120_v12 = vcombine.low %v3950_v58, %v3958_v62  ;;  %v4142_v39 = vld [vmem:[%s12917_s27 + $0x1e18] sm:$0xff] }
 0x41c   : > { %v12386_v14 = vpack.c.bf16 %v10722_v20, %v10721_v26  ;;  %10069 = vmatprep.subr.bf16.mxu0 %v11419_v45  ;;  %v11595_v45 = vcombine.high %v3423_v63, %v3431_v0  ;;  %v11594_v26 = vcombine.low %v3423_v63, %v3431_v0  ;;  %v12361_v20 = vcombine.high %v4190_v6, %v4198_v9  ;;  %v4174_v27 = vld [vmem:[%s12917_s27 + $0x1f18] sm:$0xff] }
 0x41d   : > { %v11578_v44 = vcombine.low %v3407_v5, %v3415_v10  ;;  %v4126_v56 = vld [vmem:[%s12917_s27 + $0x1d98] sm:$0xff] }
 0x41e   : > { %10800 = vst [vmem:[%s13496_s10 + $0x8] sm:$0xff] %v12386_v14  ;;  %10027 = vmatpush1.bf16.msra.mxu1 %v12200_v32  ;;  %v11579_v32 = vcombine.high %v3407_v5, %v3415_v10  ;;  %v3399_v14 = vld [vmem:[%s12917_s27 + $0x6e0] sm:$0xff]  ;;  %v4110_v0 = vld [vmem:[%s12917_s27 + $0x1d18] sm:$0xff] }
 0x41f   : > { %10070 = vmatpush1.bf16.msra.mxu0 %v11418_v59  ;;  %10028 = vmatprep.subr.bf16.mxu1 %v12185_v13  ;;  %v4182_v59 = vld [vmem:[%s12917_s27 + $0x1f58] sm:$0xff]  ;;  %v3391_v13 = vld [vmem:[%s12917_s27 + $0x6a0] sm:$0xff] }
 0x420   : > { %10071 = vmatprep.subr.bf16.mxu0 %v11403_v15  ;;  %v12360_v15 = vcombine.low %v4190_v6, %v4198_v9  ;;  %v12345_v22 = vcombine.high %v4174_v27, %v4182_v59  ;;  %v11563_v24 = vcombine.high %v3391_v13, %v3399_v14  ;;  %v11562_v35 = vcombine.low %v3391_v13, %v3399_v14  ;;  %v4094_v10 = vld [vmem:[%s12917_s27 + $0x1c98] sm:$0xff] }
 0x421   : > { %v4078_v14 = vld [vmem:[%s12917_s27 + $0x1c18] sm:$0xff] }
 0x422   : > { %10029 = vmatpush1.bf16.msra.mxu1 %v12184_v29  ;;  %v4166_v29 = vld [vmem:[%s12917_s27 + $0x1ed8] sm:$0xff] }
 0x423   : > { %10072 = vmatpush1.bf16.msra.mxu0 %v11402_v33  ;;  %10030 = vmatprep.subr.bf16.mxu1 %v12169_v54  ;;  %v3375_v33 = vld [vmem:[%s12917_s27 + $0x620] sm:$0xff]  ;;  %v12329_v36 = vcombine.high %v4158_v25, %v4166_v29 }
 0x424   : > { %10073 = vmatprep.subr.bf16.mxu0 %v11387_v34  ;;  %v3383_v54 = vld [vmem:[%s12917_s27 + $0x660] sm:$0xff]  ;;  %v12344_v34 = vcombine.low %v4174_v27, %v4182_v59 }
 0x425   : > { %v11547_v37 = vcombine.high %v3375_v33, %v3383_v54  ;;  %v11546_v28 = vcombine.low %v3375_v33, %v3383_v54  ;;  %v3551_v54 = vld [vmem:[%s12917_s27 + $0xba0] sm:$0xff] }
 0x426   : > { %10031 = vmatpush1.bf16.msra.mxu1 %v12168_v47  ;;  %v4150_v47 = vld [vmem:[%s12917_s27 + $0x1e58] sm:$0xff] }
 0x427   : > { %10074 = vmatpush1.bf16.msra.mxu0 %v11386_v40  ;;  %10032 = vmatprep.subr.bf16.mxu1 %v12153_v41  ;;  %v3359_v40 = vld [vmem:[%s12917_s27 + $0x5a0] sm:$0xff]  ;;  %v12313_v19 = vcombine.high %v4142_v39, %v4150_v47 }
 0x428   : > { %10075 = vmatprep.subr.bf16.mxu0 %v11371_v43  ;;  %v3367_v41 = vld [vmem:[%s12917_s27 + $0x5e0] sm:$0xff]  ;;  %v12328_v43 = vcombine.low %v4158_v25, %v4166_v29 }
 0x429   : > { %v11531_v48 = vcombine.high %v3359_v40, %v3367_v41  ;;  %v11530_v58 = vcombine.low %v3359_v40, %v3367_v41 }
 0x42a   : > { %10033 = vmatpush1.bf16.msra.mxu1 %v12152_v50  ;;  %v4134_v50 = vld [vmem:[%s12917_s27 + $0x1dd8] sm:$0xff] }
 0x42b   : > { %10076 = vmatpush1.bf16.msra.mxu0 %v11370_v61  ;;  %10034 = vmatprep.subr.bf16.mxu1 %v12137_v38  ;;  %v3343_v61 = vld [vmem:[%s12917_s27 + $0x520] sm:$0xff]  ;;  %v12297_v62 = vcombine.high %v4126_v56, %v4134_v50 }
 0x42c   : > { %10077 = vmatprep.subr.bf16.mxu0 %v11355_v7  ;;  %v3351_v38 = vld [vmem:[%s12917_s27 + $0x560] sm:$0xff]  ;;  %v12312_v7 = vcombine.low %v4142_v39, %v4150_v47  ;;  %v4226_v47 = vrot.slane %v13548_v18, %v13165_v17 }
 0x42d   : > { %v11515_v63 = vcombine.high %v3343_v61, %v3351_v38  ;;  %v11514_v6 = vcombine.low %v3343_v61, %v3351_v38 }
 0x42e   : > { %10035 = vmatpush1.bf16.msra.mxu1 %v12136_v1  ;;  %v4118_v1 = vld [vmem:[%s12917_s27 + $0x1d58] sm:$0xff] }
 0x42f   : > { %10078 = vmatpush1.bf16.msra.mxu0 %v11354_v2  ;;  %10036 = vmatprep.subr.bf16.mxu1 %v12121_v31  ;;  %v3327_v2 = vld [vmem:[%s12917_s27 + $0x4a0] sm:$0xff]  ;;  %v12281_v9 = vcombine.high %v4110_v0, %v4118_v1 }
 0x430   : > { %10079 = vmatprep.subr.bf16.mxu0 %v11595_v45  ;;  %v3335_v31 = vld [vmem:[%s12917_s27 + $0x4e0] sm:$0xff]  ;;  %v12296_v45 = vcombine.low %v4126_v56, %v4134_v50  ;;  %v4230_v56 = vrot.slane %v13548_v18, %v13170_v55 }
 0x431   : > { %v11499_v5 = vcombine.high %v3327_v2, %v3335_v31  ;;  %v11498_v27 = vcombine.low %v3327_v2, %v3335_v31  ;;  %v3527_v18 = vld [vmem:[%s12917_s27 + $0xae0] sm:$0xff] }
 0x432   : > { %10037 = vmatpush1.bf16.msra.mxu1 %v12120_v12  ;;  %v4102_v12 = vld [vmem:[%s12917_s27 + $0x1cd8] sm:$0xff]  ;;  %v3759_v2 = vld [vmem:[%s12917_s27 + $0x1220] sm:$0xff] }
 0x433   : > { %10080 = vmatpush2.bf16.msra.mxu0 %v11594_v26  ;;  %10038 = vmatprep.subr.bf16.mxu1 %v12361_v20  ;;  %v3311_v26 = vld [vmem:[%s12917_s27 + $0x420] sm:$0xff]  ;;  %v12265_v59 = vcombine.high %v4094_v10, %v4102_v12 }
 0x434   : > { %10081 = vmatprep.subr.bf16.mxu0 %v11579_v32  ;;  %v3319_v20 = vld [vmem:[%s12917_s27 + $0x460] sm:$0xff]  ;;  %v12280_v32 = vcombine.low %v4110_v0, %v4118_v1 }
 0x435   : > { %v11483_v13 = vcombine.high %v3311_v26, %v3319_v20  ;;  %v11482_v25 = vcombine.low %v3311_v26, %v3319_v20  ;;  %v3519_v0 = vld [vmem:[%s12917_s27 + $0xaa0] sm:$0xff] }
 0x436   : > { %10039 = vmatpush2.bf16.msra.mxu1 %v12360_v15  ;;  %v4086_v15 = vld [vmem:[%s12917_s27 + $0x1c58] sm:$0xff]  ;;  %v3767_v31 = vld [vmem:[%s12917_s27 + $0x1260] sm:$0xff] }
 0x437   : > { %10082 = vmatpush2.bf16.msra.mxu0 %v11578_v44  ;;  %10040 = vmatprep.subr.bf16.mxu1 %v12345_v22  ;;  %v3807_v44 = vld [vmem:[%s12917_s27 + $0x13a0] sm:$0xff]  ;;  %v12249_v29 = vcombine.high %v4078_v14, %v4086_v15 }
 0x438   : > { %10083 = vmatprep.subr.bf16.mxu0 %v11563_v24  ;;  %v3815_v22 = vld [vmem:[%s12917_s27 + $0x13e0] sm:$0xff]  ;;  %v12264_v24 = vcombine.low %v4094_v10, %v4102_v12  ;;  %v11691_v12 = vcombine.high %v3519_v0, %v3527_v18 }
 0x439   : > { %v11979_v33 = vcombine.high %v3807_v44, %v3815_v22  ;;  %v11978_v39 = vcombine.low %v3807_v44, %v3815_v22  ;;  %v11690_v44 = vcombine.low %v3519_v0, %v3527_v18 }
 0x43a   : > { %10041 = vmatpush2.bf16.msra.mxu1 %v12344_v34  ;;  %v3559_v34 = vld [vmem:[%s12917_s27 + $0xbe0] sm:$0xff] }
 0x43b   : > { %10084 = vmatpush2.bf16.msra.mxu0 %v11562_v35  ;;  %10042 = vmatprep.subr.bf16.mxu1 %v12329_v36  ;;  %v3791_v35 = vld [vmem:[%s12917_s27 + $0x1320] sm:$0xff]  ;;  %v11723_v40 = vcombine.high %v3551_v54, %v3559_v34  ;;  %v11722_v61 = vcombine.low %v3551_v54, %v3559_v34 }
 0x43c   : > { %10085 = vmatprep.subr.bf16.mxu0 %v11547_v37  ;;  %v3799_v36 = vld [vmem:[%s12917_s27 + $0x1360] sm:$0xff]  ;;  %v12248_v37 = vcombine.low %v4078_v14, %v4086_v15 }
 0x43d   : > { %v11963_v41 = vcombine.high %v3791_v35, %v3799_v36  ;;  %v11962_v38 = vcombine.low %v3791_v35, %v3799_v36  ;;  %v3743_v14 = vld [vmem:[%s12917_s27 + $0x11a0] sm:$0xff] }
 0x43e   : > { %10043 = vmatpush2.bf16.msra.mxu1 %v12328_v43  ;;  %v3535_v43 = vld [vmem:[%s12917_s27 + $0xb20] sm:$0xff] }
 0x43f   : > { %10086 = vmatpush2.bf16.msra.mxu0 %v11546_v28  ;;  %10044 = vmatprep.subr.bf16.mxu1 %v12313_v19  ;;  %v3543_v28 = vld [vmem:[%s12917_s27 + $0xb60] sm:$0xff] }
 0x440   : > { %10087 = vmatprep.subr.bf16.mxu0 %v11531_v48  ;;  %v3775_v19 = vld [vmem:[%s12917_s27 + $0x12a0] sm:$0xff] }
 0x441   : > { %v3783_v48 = vld [vmem:[%s12917_s27 + $0x12e0] sm:$0xff] }
 0x442   : > { %10045 = vmatpush2.bf16.msra.mxu1 %v12312_v7  ;;  %v11707_v7 = vcombine.high %v3535_v43, %v3543_v28  ;;  %v11946_v10 = vcombine.low %v3775_v19, %v3783_v48  ;;  %v3751_v15 = vld [vmem:[%s12917_s27 + $0x11e0] sm:$0xff] }
 0x443   : > { %10088 = vmatpush2.bf16.msra.mxu0 %v11530_v58  ;;  %10046 = vmatprep.subr.bf16.mxu1 %v12297_v62  ;;  %v9770_v58 = vadd.f32 %v13632_v51, %v4226_v47  ;;  %v3487_v54 = vld [vmem:[%s12917_s27 + $0x9a0] sm:$0xff] }
 0x444   : > { %10089 = vmatprep.subr.bf16.mxu0 %v11515_v63  ;;  %v11947_v63 = vcombine.high %v3775_v19, %v3783_v48  ;;  %v3495_v34 = vld [vmem:[%s12917_s27 + $0x9e0] sm:$0xff] }
 0x445   : > { %v3727_v35 = vld [vmem:[%s12917_s27 + $0x1120] sm:$0xff]  ;;  %v11659_v47 = vcombine.high %v3487_v54, %v3495_v34  ;;  %v11658_v48 = vcombine.low %v3487_v54, %v3495_v34 }
 0x446   : > { %10047 = vmatpush2.bf16.msra.mxu1 %v12296_v45  ;;  %v9772_v45 = vadd.f32 %v13636_v46, %v4230_v56  ;;  %v3511_v46 = vld [vmem:[%s12917_s27 + $0xa60] sm:$0xff] }
 0x447   : > { %10090 = vmatpush2.bf16.msra.mxu0 %v11514_v6  ;;  %10048 = vmatprep.subr.bf16.mxu1 %v12281_v9  ;;  %v11706_v9 = vcombine.low %v3535_v43, %v3543_v28  ;;  %v3735_v36 = vld [vmem:[%s12917_s27 + $0x1160] sm:$0xff] }
 0x448   : > { %10091 = vmatprep.subr.bf16.mxu0 %v11499_v5  ;;  %v3479_v43 = vld [vmem:[%s12917_s27 + $0x960] sm:$0xff]  ;;  %v11898_v56 = vcombine.low %v3727_v35, %v3735_v36 }
 0x449   : > { %v3711_v28 = vld [vmem:[%s12917_s27 + $0x10a0] sm:$0xff] }
 0x44a   : > { %10049 = vmatpush2.bf16.msra.mxu1 %v12280_v32  ;;  %v11931_v32 = vcombine.high %v3759_v2, %v3767_v31  ;;  %v3719_v19 = vld [vmem:[%s12917_s27 + $0x10e0] sm:$0xff] }
 0x44b   : > { %10092 = vmatpush2.bf16.msra.mxu0 %v11498_v27  ;;  %10050 = vmatprep.subr.bf16.mxu1 %v12265_v59  ;;  %v3503_v27 = vld [vmem:[%s12917_s27 + $0xa20] sm:$0xff]  ;;  %v11882_v0 = vcombine.low %v3711_v28, %v3719_v19 }
 0x44c   : > { %10093 = vmatprep.subr.bf16.mxu0 %v11483_v13 }
 0x44e   : > { %10051 = vmatpush2.bf16.msra.mxu1 %v12264_v24 }
 0x44f   : > { %10094 = vmatpush2.bf16.msra.mxu0 %v11482_v25  ;;  %10052 = vmatprep.subr.bf16.mxu1 %v12249_v29  ;;  %v11930_v25 = vcombine.low %v3759_v2, %v3767_v31  ;;  %v11675_v29 = vcombine.high %v3503_v27, %v3511_v46  ;;  %v3439_v2 = vld [vmem:[%s12917_s27 + $0x820] sm:$0xff] }
 0x450   : > { %10145 = vmatprep.subr.bf16.mxu0 %v11979_v33  ;;  %v11915_v33 = vcombine.high %v3743_v14, %v3751_v15  ;;  %v3447_v31 = vld [vmem:[%s12917_s27 + $0x860] sm:$0xff] }
 0x452   : > { %10053 = vmatpush2.bf16.msra.mxu1 %v12248_v37  ;;  %v9851_v50 = vpop.f32.mrf.mxu0  ;;  %10096 = vmatmul.mubr.bf16.vlgmr.msra.gmra.mxu0 %v13088_v52  ;;  %v11674_v37 = vcombine.low %v3503_v27, %v3511_v46  ;;  %v11610_v27 = vcombine.low %v3439_v2, %v3447_v31 }
 0x453   : > { %10146 = vmatpush1.bf16.msra.mxu0 %v11978_v39  ;;  %10177 = vmatprep.mubr.bf16.mxu0 %v13190_v49  ;;  %v11914_v39 = vcombine.low %v3743_v14, %v3751_v15  ;;  %v3663_v15 = vld [vmem:[%s12917_s27 + $0xf20] sm:$0xff] }
 0x454   : > { %v9853_v62 = vpop.f32.mrf.mxu0  ;;  %10104 = vmatprep.subr.bf16.mxu1 %v11723_v40  ;;  %10147 = vmatprep.subr.bf16.mxu0 %v11963_v41  ;;  %v11899_v40 = vcombine.high %v3727_v35, %v3735_v36  ;;  %v3471_v41 = vld [vmem:[%s12917_s27 + $0x920] sm:$0xff] }
 0x455   : > { %v9810_v1 = vpop.f32.mrf.mxu1  ;;  %10055 = vmatmul.mubr.bf16.vlgmr.msra.gmra.mxu1 %v13248_v4  ;;  %v3647_v35 = vld [vmem:[%s12917_s27 + $0xea0] sm:$0xff] }
 0x456   : > { %v9811_v6 = vadd.f32 %v9810_v1, %v9770_v58  ;;  %10105 = vmatpush1.bf16.msra.mxu1 %v11722_v61  ;;  %10136 = vmatprep.mubr.bf16.mxu1 %v13017_v42  ;;  %v9855_v51 = vpop.f32.mrf.mxu0  ;;  %v11883_v61 = vcombine.high %v3711_v28, %v3719_v19  ;;  %v3695_v58 = vld [vmem:[%s12917_s27 + $0x1020] sm:$0xff] }
 0x457   : > { %v9812_v5 = vpop.f32.mrf.mxu1  ;;  %10148 = vmatpush1.bf16.msra.mxu0 %v11962_v38  ;;  %10106 = vmatprep.subr.bf16.mxu1 %v11707_v7  ;;  %v3455_v38 = vld [vmem:[%s12917_s27 + $0x8a0] sm:$0xff] }
 0x458   : > { %v9813_v26 = vadd.f32 %v9812_v5, %v9772_v45  ;;  %v9856_v20 = vpop.f32.mrf.mxu0  ;;  %10149 = vmatprep.subr.bf16.mxu0 %v11947_v63  ;;  %v13723_v59 = vadd.f32 %v9851_v50, %v9811_v6  ;;  %v11643_v50 = vcombine.high %v3471_v41, %v3479_v43  ;;  %v3463_v7 = vld [vmem:[%s12917_s27 + $0x8e0] sm:$0xff]  ;;  %v11642_v63 = vcombine.low %v3471_v41, %v3479_v43 }
 0x459   : > { %v9814_v13 = vpop.f32.mrf.mxu1  ;;  %v11627_v18 = vcombine.high %v3455_v38, %v3463_v7  ;;  %v3935_v45 = vld [vmem:[%s12917_s27 + $0x17a0] sm:$0xff]  ;;  %v11626_v51 = vcombine.low %v3455_v38, %v3463_v7  ;;  %v11611_v5 = vcombine.high %v3439_v2, %v3447_v31 }
 0x45a   : > { %10107 = vmatpush1.bf16.msra.mxu1 %v11706_v9  ;;  %v13727_v22 = vadd.f32 %v9853_v62, %v9813_v26  ;;  %v3703_v62 = vld [vmem:[%s12917_s27 + $0x1060] sm:$0xff] }
 0x45b   : > { %v9815_v24 = vpop.f32.mrf.mxu1  ;;  %10150 = vmatpush1.bf16.msra.mxu0 %v11946_v10  ;;  %10108 = vmatprep.subr.bf16.mxu1 %v11691_v12  ;;  %v11867_v1 = vcombine.high %v3695_v58, %v3703_v62  ;;  %v3943_v6 = vld [vmem:[%s12917_s27 + $0x17e0] sm:$0xff]  ;;  %v11866_v9 = vcombine.low %v3695_v58, %v3703_v62 }
 0x45c   : > { %10151 = vmatprep.subr.bf16.mxu0 %v11931_v32  ;;  %v12107_v10 = vcombine.high %v3935_v45, %v3943_v6  ;;  %v3679_v12 = vld [vmem:[%s12917_s27 + $0xfa0] sm:$0xff]  ;;  %v12106_v46 = vcombine.low %v3935_v45, %v3943_v6 }
 0x45d   : > { %v3687_v26 = vld [vmem:[%s12917_s27 + $0xfe0] sm:$0xff] }
 0x45e   : > { %10109 = vmatpush1.bf16.msra.mxu1 %v11690_v44  ;;  %v3919_v20 = vld [vmem:[%s12917_s27 + $0x1720] sm:$0xff]  ;;  %v11851_v13 = vcombine.high %v3679_v12, %v3687_v26 }
 0x45f   : > { %10152 = vmatpush1.bf16.msra.mxu0 %v11930_v25  ;;  %10110 = vmatprep.subr.bf16.mxu1 %v11675_v29  ;;  %v3927_v32 = vld [vmem:[%s12917_s27 + $0x1760] sm:$0xff]  ;;  %v11850_v29 = vcombine.low %v3679_v12, %v3687_v26 }
 0x460   : > { %10153 = vmatprep.subr.bf16.mxu0 %v11915_v33  ;;  %v12091_v14 = vcombine.high %v3919_v20, %v3927_v32  ;;  %v3671_v44 = vld [vmem:[%s12917_s27 + $0xf60] sm:$0xff]  ;;  %v12090_v33 = vcombine.low %v3919_v20, %v3927_v32 }
 0x461   : > { %v3903_v24 = vld [vmem:[%s12917_s27 + $0x16a0] sm:$0xff]  ;;  %v11835_v54 = vcombine.high %v3663_v15, %v3671_v44 }
 0x462   : > { %10111 = vmatpush1.bf16.msra.mxu1 %v11674_v37  ;;  %v3911_v25 = vld [vmem:[%s12917_s27 + $0x16e0] sm:$0xff] }
 0x463   : > { %10154 = vmatpush1.bf16.msra.mxu0 %v11914_v39  ;;  %10112 = vmatprep.subr.bf16.mxu1 %v11659_v47  ;;  %v12075_v34 = vcombine.high %v3903_v24, %v3911_v25  ;;  %v3655_v36 = vld [vmem:[%s12917_s27 + $0xee0] sm:$0xff]  ;;  %v11834_v47 = vcombine.low %v3663_v15, %v3671_v44 }
 0x464   : > { %10155 = vmatprep.subr.bf16.mxu0 %v11899_v40  ;;  %v3887_v37 = vld [vmem:[%s12917_s27 + $0x1620] sm:$0xff]  ;;  %v12074_v40 = vcombine.low %v3903_v24, %v3911_v25  ;;  %v11819_v41 = vcombine.high %v3647_v35, %v3655_v36 }
 0x465   : > { %v3895_v39 = vld [vmem:[%s12917_s27 + $0x1660] sm:$0xff] }
 0x466   : > { %10113 = vmatpush1.bf16.msra.mxu1 %v11658_v48  ;;  %v12059_v43 = vcombine.high %v3887_v37, %v3895_v39  ;;  %v3631_v28 = vld [vmem:[%s12917_s27 + $0xe20] sm:$0xff] }
 0x467   : > { %10156 = vmatpush1.bf16.msra.mxu0 %v11898_v56  ;;  %10114 = vmatprep.subr.bf16.mxu1 %v11643_v50  ;;  %v3639_v19 = vld [vmem:[%s12917_s27 + $0xe60] sm:$0xff]  ;;  %v11818_v50 = vcombine.low %v3647_v35, %v3655_v36 }
 0x468   : > { %10157 = vmatprep.subr.bf16.mxu0 %v11883_v61  ;;  %v3871_v48 = vld [vmem:[%s12917_s27 + $0x15a0] sm:$0xff]  ;;  %v12058_v61 = vcombine.low %v3887_v37, %v3895_v39  ;;  %v11803_v38 = vcombine.high %v3631_v28, %v3639_v19 }
 0x469   : > { %v3879_v56 = vld [vmem:[%s12917_s27 + $0x15e0] sm:$0xff] }
 0x46a   : > { %10115 = vmatpush1.bf16.msra.mxu1 %v11642_v63  ;;  %v12043_v7 = vcombine.high %v3871_v48, %v3879_v56  ;;  %v3615_v58 = vld [vmem:[%s12917_s27 + $0xda0] sm:$0xff] }
 0x46b   : > { %10158 = vmatpush1.bf16.msra.mxu0 %v11882_v0  ;;  %10116 = vmatprep.subr.bf16.mxu1 %v11627_v18  ;;  %v3623_v62 = vld [vmem:[%s12917_s27 + $0xde0] sm:$0xff]  ;;  %v11802_v18 = vcombine.low %v3631_v28, %v3639_v19 }
 0x46c   : > { %10159 = vmatprep.subr.bf16.mxu0 %v11867_v1  ;;  %v3855_v63 = vld [vmem:[%s12917_s27 + $0x1520] sm:$0xff]  ;;  %v12042_v1 = vcombine.low %v3871_v48, %v3879_v56  ;;  %v11787_v2 = vcombine.high %v3615_v58, %v3623_v62 }
 0x46d   : > { %v3863_v0 = vld [vmem:[%s12917_s27 + $0x1560] sm:$0xff] }
 0x46e   : > { %10117 = vmatpush1.bf16.msra.mxu1 %v11626_v51  ;;  %v12027_v31 = vcombine.high %v3855_v63, %v3863_v0  ;;  %v3599_v45 = vld [vmem:[%s12917_s27 + $0xd20] sm:$0xff] }
 0x46f   : > { %10160 = vmatpush1.bf16.msra.mxu0 %v11866_v9  ;;  %10118 = vmatprep.subr.bf16.mxu1 %v11611_v5  ;;  %v3607_v6 = vld [vmem:[%s12917_s27 + $0xd60] sm:$0xff]  ;;  %v11786_v5 = vcombine.low %v3615_v58, %v3623_v62 }
 0x470   : > { %10161 = vmatprep.subr.bf16.mxu0 %v12107_v10  ;;  %v3839_v51 = vld [vmem:[%s12917_s27 + $0x14a0] sm:$0xff]  ;;  %v12026_v10 = vcombine.low %v3855_v63, %v3863_v0  ;;  %v11771_v12 = vcombine.high %v3599_v45, %v3607_v6 }
 0x471   : > { %v3847_v9 = vld [vmem:[%s12917_s27 + $0x14e0] sm:$0xff] }
 0x472   : > { %10119 = vmatpush1.bf16.msra.mxu1 %v11610_v27  ;;  %v12011_v26 = vcombine.high %v3839_v51, %v3847_v9  ;;  %v3583_v20 = vld [vmem:[%s12917_s27 + $0xca0] sm:$0xff] }
 0x473   : > { %10162 = vmatpush2.bf16.msra.mxu0 %v12106_v46  ;;  %10120 = vmatprep.subr.bf16.mxu1 %v11851_v13  ;;  %v3591_v32 = vld [vmem:[%s12917_s27 + $0xce0] sm:$0xff]  ;;  %v11770_v13 = vcombine.low %v3599_v45, %v3607_v6  ;;  %v3256_v45 = vld [vmem:[%s12917_s27 + $0x268] sm:$0xff] }
 0x474   : > { %10163 = vmatprep.subr.bf16.mxu0 %v12091_v14  ;;  %v3823_v27 = vld [vmem:[%s12917_s27 + $0x1420] sm:$0xff]  ;;  %v12010_v14 = vcombine.low %v3839_v51, %v3847_v9  ;;  %v11755_v15 = vcombine.high %v3583_v20, %v3591_v32 }
 0x475   : > { %v3831_v46 = vld [vmem:[%s12917_s27 + $0x1460] sm:$0xff] }
 0x476   : > { %10121 = vmatpush2.bf16.msra.mxu1 %v11850_v29  ;;  %v11995_v44 = vcombine.high %v3823_v27, %v3831_v46  ;;  %v3567_v24 = vld [vmem:[%s12917_s27 + $0xc20] sm:$0xff]  ;;  %v3296_v29 = vld [vmem:[%s12917_s27 + $0x3a8] sm:$0xff] }
 0x477   : > { %10164 = vmatpush2.bf16.msra.mxu0 %v12090_v33  ;;  %10122 = vmatprep.subr.bf16.mxu1 %v11835_v54  ;;  %v3575_v25 = vld [vmem:[%s12917_s27 + $0xc60] sm:$0xff]  ;;  %v3304_v33 = vld [vmem:[%s12917_s27 + $0x3e8] sm:$0xff]  ;;  %v11754_v54 = vcombine.low %v3583_v20, %v3591_v32 }
 0x478   : > { %10165 = vmatprep.subr.bf16.mxu0 %v12075_v34  ;;  %v11994_v34 = vcombine.low %v3823_v27, %v3831_v46  ;;  %v11739_v35 = vcombine.high %v3567_v24, %v3575_v25  ;;  %v11469_v36 = vcombine.high %v3296_v29, %v3304_v33  ;;  %v4063_v37 = vld [vmem:[%s12917_s27 + $0x1ba0] sm:$0xff] }
 0x479   : > { %v4071_v39 = vld [vmem:[%s12917_s27 + $0x1be0] sm:$0xff] }
 0x47a   : > { %10123 = vmatpush2.bf16.msra.mxu1 %v11834_v47  ;;  %v3280_v47 = vld [vmem:[%s12917_s27 + $0x328] sm:$0xff]  ;;  %v12235_v28 = vcombine.high %v4063_v37, %v4071_v39  ;;  %v4047_v48 = vld [vmem:[%s12917_s27 + $0x1b20] sm:$0xff] }
 0x47b   : > { %10166 = vmatpush2.bf16.msra.mxu0 %v12074_v40  ;;  %10124 = vmatprep.subr.bf16.mxu1 %v11819_v41  ;;  %v3288_v40 = vld [vmem:[%s12917_s27 + $0x368] sm:$0xff]  ;;  %v11738_v41 = vcombine.low %v3567_v24, %v3575_v25  ;;  %v4055_v56 = vld [vmem:[%s12917_s27 + $0x1b60] sm:$0xff] }
 0x47c   : > { %10167 = vmatprep.subr.bf16.mxu0 %v12059_v43  ;;  %v11468_v43 = vcombine.low %v3296_v29, %v3304_v33  ;;  %v11453_v19 = vcombine.high %v3280_v47, %v3288_v40  ;;  %v11452_v58 = vcombine.low %v3280_v47, %v3288_v40  ;;  %v12219_v62 = vcombine.high %v4047_v48, %v4055_v56  ;;  %v4015_v27 = vld [vmem:[%s12917_s27 + $0x1a20] sm:$0xff] }
 0x47d   : > { %v12218_v9 = vcombine.low %v4047_v48, %v4055_v56  ;;  %v4023_v46 = vld [vmem:[%s12917_s27 + $0x1a60] sm:$0xff]  ;;  %v3208_v48 = vld [vmem:[%s12917_s27 + $0xe8] sm:$0xff] }
 0x47e   : > { %10125 = vmatpush2.bf16.msra.mxu1 %v11818_v50  ;;  %v3264_v50 = vld [vmem:[%s12917_s27 + $0x2a8] sm:$0xff]  ;;  %v12187_v29 = vcombine.high %v4015_v27, %v4023_v46 }
 0x47f   : > { %10168 = vmatpush2.bf16.msra.mxu0 %v12058_v61  ;;  %10126 = vmatprep.subr.bf16.mxu1 %v11803_v38  ;;  %v3272_v61 = vld [vmem:[%s12917_s27 + $0x2e8] sm:$0xff] }
 0x480   : > { %10169 = vmatprep.subr.bf16.mxu0 %v12043_v7  ;;  %v12234_v7 = vcombine.low %v4063_v37, %v4071_v39  ;;  %v11437_v0 = vcombine.high %v3264_v50, %v3272_v61  ;;  %v3224_v37 = vld [vmem:[%s12917_s27 + $0x168] sm:$0xff]  ;;  %v12186_v39 = vcombine.low %v4015_v27, %v4023_v46  ;;  %v4199_v27 = vld [vmem:[%s12917_s27 + $0x1fe0] sm:$0xff] }
 0x481   : > { %v3408_v46 = vld [vmem:[%s12917_s27 + $0x728] sm:$0xff] }
 0x482   : > { %10127 = vmatpush2.bf16.msra.mxu1 %v11802_v18  ;;  %v4031_v18 = vld [vmem:[%s12917_s27 + $0x1aa0] sm:$0xff] }
 0x483   : > { %10170 = vmatpush2.bf16.msra.mxu0 %v12042_v1  ;;  %10128 = vmatprep.subr.bf16.mxu1 %v11787_v2  ;;  %v4039_v1 = vld [vmem:[%s12917_s27 + $0x1ae0] sm:$0xff] }
 0x484   : > { %10171 = vmatprep.subr.bf16.mxu0 %v12027_v31  ;;  %v3248_v31 = vld [vmem:[%s12917_s27 + $0x228] sm:$0xff]  ;;  %v12202_v24 = vcombine.low %v4031_v18, %v4039_v1 }
 0x485   : > { %v11421_v32 = vcombine.high %v3248_v31, %v3256_v45 }
 0x486   : > { %10129 = vmatpush2.bf16.msra.mxu1 %v11786_v5 }
 0x487   : > { %10172 = vmatpush2.bf16.msra.mxu0 %v12026_v10  ;;  %10130 = vmatprep.subr.bf16.mxu1 %v11771_v12  ;;  %v11436_v10 = vcombine.low %v3264_v50, %v3272_v61  ;;  %v12203_v12 = vcombine.high %v4031_v18, %v4039_v1  ;;  %v3192_v18 = vld [vmem:[%s12917_s27 + $0x68] sm:$0xff] }
 0x488   : > { %10173 = vmatprep.subr.bf16.mxu0 %v12011_v26 }
 0x48a   : > { %10131 = vmatpush2.bf16.msra.mxu1 %v11770_v13  ;;  %v3232_v13 = vld [vmem:[%s12917_s27 + $0x1a8] sm:$0xff] }
 0x48b   : > { %10174 = vmatpush2.bf16.msra.mxu0 %v12010_v14  ;;  %10132 = vmatprep.subr.bf16.mxu1 %v11755_v15  ;;  %v3240_v14 = vld [vmem:[%s12917_s27 + $0x1e8] sm:$0xff] }
 0x48c   : > { %10175 = vmatprep.subr.bf16.mxu0 %v11995_v44  ;;  %v11404_v47 = vcombine.low %v3232_v13, %v3240_v14 }
 0x48e   : > { %10133 = vmatpush2.bf16.msra.mxu1 %v11754_v54  ;;  %v11405_v54 = vcombine.high %v3232_v13, %v3240_v14 }
 0x48f   : > { %10176 = vmatpush2.bf16.msra.mxu0 %v11994_v34  ;;  %10134 = vmatprep.subr.bf16.mxu1 %v11739_v35  ;;  %v3999_v34 = vld [vmem:[%s12917_s27 + $0x19a0] sm:$0xff] }
 0x490   : > { %10227 = vmatprep.subr.bf16.mxu0 %v11469_v36  ;;  %v4007_v35 = vld [vmem:[%s12917_s27 + $0x19e0] sm:$0xff]  ;;  %v3216_v36 = vld [vmem:[%s12917_s27 + $0x128] sm:$0xff] }
 0x491   : > { %v12171_v40 = vcombine.high %v3999_v34, %v4007_v35  ;;  %v12170_v56 = vcombine.low %v3999_v34, %v4007_v35  ;;  %v11388_v50 = vcombine.low %v3216_v36, %v3224_v37 }
 0x492   : > { %10135 = vmatpush2.bf16.msra.mxu1 %v11738_v41  ;;  %v13785_v38 = vpop.f32.mrf.mxu0  ;;  %10178 = vmatmul.mubr.bf16.vlgmr.msra.gmra.mxu0 %v13192_v57  ;;  %v11389_v41 = vcombine.high %v3216_v36, %v3224_v37  ;;  %v4159_v36 = vld [vmem:[%s12917_s27 + $0x1ea0] sm:$0xff] }
 0x493   : > { %10228 = vmatpush1.bf16.msra.mxu0 %v11468_v43  ;;  %10259 = vmatprep.mubr.bf16.mxu0 %v13001_v21  ;;  %v3983_v43 = vld [vmem:[%s12917_s27 + $0x1920] sm:$0xff] }
 0x494   : > { %v13789_v63 = vpop.f32.mrf.mxu0  ;;  %10186 = vmatprep.subr.bf16.mxu1 %v12235_v28  ;;  %10229 = vmatprep.subr.bf16.mxu0 %v11453_v19  ;;  %v3991_v28 = vld [vmem:[%s12917_s27 + $0x1960] sm:$0xff]  ;;  %v3200_v19 = vld [vmem:[%s12917_s27 + $0xa8] sm:$0xff] }
 0x495   : > { %v9892_v2 = vpop.f32.mrf.mxu1  ;;  %10137 = vmatmul.mubr.bf16.vlgmr.msra.gmra.mxu1 %v13090_v23  ;;  %v12155_v61 = vcombine.high %v3983_v43, %v3991_v28  ;;  %v12154_v1 = vcombine.low %v3983_v43, %v3991_v28  ;;  %v4167_v37 = vld [vmem:[%s12917_s27 + $0x1ee0] sm:$0xff] }
 0x496   : > { %v9893_v6 = vadd.f32 %v9892_v2, %v13723_v59  ;;  %10187 = vmatpush1.bf16.msra.mxu1 %v12234_v7  ;;  %10218 = vmatprep.mubr.bf16.mxu1 %v13243_v30  ;;  %v9937_v51 = vpop.f32.mrf.mxu0  ;;  %v11373_v7 = vcombine.high %v3200_v19, %v3208_v48  ;;  %v11372_v2 = vcombine.low %v3200_v19, %v3208_v48  ;;  %v4143_v19 = vld [vmem:[%s12917_s27 + $0x1e20] sm:$0xff] }
 0x497   : > { %v9894_v5 = vpop.f32.mrf.mxu1  ;;  %10230 = vmatpush1.bf16.msra.mxu0 %v11452_v58  ;;  %10188 = vmatprep.subr.bf16.mxu1 %v12219_v62  ;;  %v3967_v58 = vld [vmem:[%s12917_s27 + $0x18a0] sm:$0xff]  ;;  %v12331_v43 = vcombine.high %v4159_v36, %v4167_v37 }
 0x498   : > { %v9895_v26 = vadd.f32 %v9894_v5, %v13727_v22  ;;  %v9938_v20 = vpop.f32.mrf.mxu0  ;;  %10231 = vmatprep.subr.bf16.mxu0 %v11437_v0  ;;  %v10723_v15 = vmax.f32 %v9893_v6, 0.0  ;;  %v11420_v22 = vcombine.low %v3248_v31, %v3256_v45  ;;  %v3975_v62 = vld [vmem:[%s12917_s27 + $0x18e0] sm:$0xff]  ;;  %v3184_v0 = vld [vmem:[%s12917_s27 + $0x28] sm:$0xff] }
 0x499   : > { %v9896_v59 = vpop.f32.mrf.mxu1  ;;  %v12139_v31 = vcombine.high %v3967_v58, %v3975_v62  ;;  %v11357_v45 = vcombine.high %v3184_v0, %v3192_v18  ;;  %v3951_v6 = vld [vmem:[%s12917_s27 + $0x1820] sm:$0xff]  ;;  %v3432_v5 = vld [vmem:[%s12917_s27 + $0x7e8] sm:$0xff] }
 0x49a   : > { %v10724_v44 = vmax.f32 %v9895_v26, 0.0  ;;  %10189 = vmatpush1.bf16.msra.mxu1 %v12218_v9  ;;  %v3959_v51 = vld [vmem:[%s12917_s27 + $0x1860] sm:$0xff]  ;;  %v3424_v9 = vld [vmem:[%s12917_s27 + $0x7a8] sm:$0xff] }
 0x49b   : > { %v9897_v25 = vpop.f32.mrf.mxu1  ;;  %10232 = vmatpush1.bf16.msra.mxu0 %v11436_v10  ;;  %10190 = vmatprep.subr.bf16.mxu1 %v12203_v12  ;;  %v12138_v10 = vcombine.low %v3967_v58, %v3975_v62  ;;  %v11356_v12 = vcombine.low %v3184_v0, %v3192_v18  ;;  %v12123_v26 = vcombine.high %v3951_v6, %v3959_v51  ;;  %v3416_v59 = vld [vmem:[%s12917_s27 + $0x768] sm:$0xff]  ;;  %v4151_v48 = vld [vmem:[%s12917_s27 + $0x1e60] sm:$0xff] }
 0x49c   : > { %v12387_v33 = vpack.c.bf16 %v10724_v44, %v10723_v15  ;;  %10233 = vmatprep.subr.bf16.mxu0 %v11421_v32  ;;  %v11597_v20 = vcombine.high %v3424_v9, %v3432_v5  ;;  %v4191_v32 = vld [vmem:[%s12917_s27 + $0x1fa0] sm:$0xff]  ;;  %v12122_v13 = vcombine.low %v3951_v6, %v3959_v51  ;;  %v11596_v14 = vcombine.low %v3424_v9, %v3432_v5 }
 0x49d   : > { %v12363_v15 = vcombine.high %v4191_v32, %v4199_v27  ;;  %v11581_v44 = vcombine.high %v3408_v46, %v3416_v59  ;;  %v4183_v25 = vld [vmem:[%s12917_s27 + $0x1f60] sm:$0xff]  ;;  %v12315_v58 = vcombine.high %v4143_v19, %v4151_v48 }
 0x49e   : > { %10801 = vst [vmem:[%s13496_s10 + $0x10] sm:$0xff] %v12387_v33  ;;  %10191 = vmatpush1.bf16.msra.mxu1 %v12202_v24  ;;  %v4175_v24 = vld [vmem:[%s12917_s27 + $0x1f20] sm:$0xff]  ;;  %v12362_v33 = vcombine.low %v4191_v32, %v4199_v27 }
 0x49f   : > { %10234 = vmatpush1.bf16.msra.mxu0 %v11420_v22  ;;  %10192 = vmatprep.subr.bf16.mxu1 %v12187_v29  ;;  %v3392_v22 = vld [vmem:[%s12917_s27 + $0x6a8] sm:$0xff]  ;;  %v12347_v34 = vcombine.high %v4175_v24, %v4183_v25  ;;  %v4127_v0 = vld [vmem:[%s12917_s27 + $0x1da0] sm:$0xff] }
 0x4a0   : > { %10235 = vmatprep.subr.bf16.mxu0 %v11405_v54  ;;  %v3400_v29 = vld [vmem:[%s12917_s27 + $0x6e8] sm:$0xff]  ;;  %v11580_v54 = vcombine.low %v3408_v46, %v3416_v59  ;;  %v4135_v18 = vld [vmem:[%s12917_s27 + $0x1de0] sm:$0xff] }
 0x4a1   : > { %v11565_v35 = vcombine.high %v3392_v22, %v3400_v29  ;;  %v12299_v6 = vcombine.high %v4127_v0, %v4135_v18  ;;  %v4111_v9 = vld [vmem:[%s12917_s27 + $0x1d20] sm:$0xff] }
 0x4a2   : > { %10193 = vmatpush1.bf16.msra.mxu1 %v12186_v39  ;;  %v3376_v39 = vld [vmem:[%s12917_s27 + $0x628] sm:$0xff]  ;;  %v4119_v5 = vld [vmem:[%s12917_s27 + $0x1d60] sm:$0xff] }
 0x4a3   : > { %10236 = vmatpush1.bf16.msra.mxu0 %v11404_v47  ;;  %10194 = vmatprep.subr.bf16.mxu1 %v12171_v40  ;;  %v3384_v47 = vld [vmem:[%s12917_s27 + $0x668] sm:$0xff]  ;;  %v12346_v40 = vcombine.low %v4175_v24, %v4183_v25  ;;  %v12283_v32 = vcombine.high %v4111_v9, %v4119_v5  ;;  %v4095_v46 = vld [vmem:[%s12917_s27 + $0x1ca0] sm:$0xff] }
 0x4a4   : > { %10237 = vmatprep.subr.bf16.mxu0 %v11389_v41  ;;  %v11564_v41 = vcombine.low %v3392_v22, %v3400_v29  ;;  %v11549_v28 = vcombine.high %v3376_v39, %v3384_v47  ;;  %v4103_v59 = vld [vmem:[%s12917_s27 + $0x1ce0] sm:$0xff] }
 0x4a5   : > { %v12267_v24 = vcombine.high %v4095_v46, %v4103_v59  ;;  %v4079_v22 = vld [vmem:[%s12917_s27 + $0x1c20] sm:$0xff] }
 0x4a6   : > { %10195 = vmatpush1.bf16.msra.mxu1 %v12170_v56  ;;  %v3360_v56 = vld [vmem:[%s12917_s27 + $0x5a8] sm:$0xff]  ;;  %v4087_v29 = vld [vmem:[%s12917_s27 + $0x1c60] sm:$0xff] }
 0x4a7   : > { %10238 = vmatpush1.bf16.msra.mxu0 %v11388_v50  ;;  %10196 = vmatprep.subr.bf16.mxu1 %v12155_v61  ;;  %v3368_v50 = vld [vmem:[%s12917_s27 + $0x5e8] sm:$0xff]  ;;  %v12330_v61 = vcombine.low %v4159_v36, %v4167_v37  ;;  %v12251_v36 = vcombine.high %v4079_v22, %v4087_v29 }
 0x4a8   : > { %10239 = vmatprep.subr.bf16.mxu0 %v11373_v7  ;;  %v11548_v7 = vcombine.low %v3376_v39, %v3384_v47  ;;  %v11533_v62 = vcombine.high %v3360_v56, %v3368_v50  ;;  %v3552_v39 = vld [vmem:[%s12917_s27 + $0xba8] sm:$0xff] }
 0x4a9   : > { %v3560_v47 = vld [vmem:[%s12917_s27 + $0xbe8] sm:$0xff] }
 0x4aa   : > { %10197 = vmatpush1.bf16.msra.mxu1 %v12154_v1  ;;  %v3344_v1 = vld [vmem:[%s12917_s27 + $0x528] sm:$0xff] }
 0x4ab   : > { %10240 = vmatpush1.bf16.msra.mxu0 %v11372_v2  ;;  %10198 = vmatprep.subr.bf16.mxu1 %v12139_v31  ;;  %v3352_v2 = vld [vmem:[%s12917_s27 + $0x568] sm:$0xff]  ;;  %v12314_v31 = vcombine.low %v4143_v19, %v4151_v48  ;;  %v12483_v19 = vld [vmem:[%s13306_s9] sm:$0xff] }
 0x4ac   : > { %10241 = vmatprep.subr.bf16.mxu0 %v11357_v45  ;;  %v11532_v45 = vcombine.low %v3360_v56, %v3368_v50  ;;  %v11517_v51 = vcombine.high %v3344_v1, %v3352_v2  ;;  %v4234_v48 = vrot.slane %v12483_v19, %v13222_v16  ;;  %v11725_v56 = vcombine.high %v3552_v39, %v3560_v47 }
 0x4ae   : > { %10199 = vmatpush1.bf16.msra.mxu1 %v12138_v10  ;;  %v3328_v10 = vld [vmem:[%s12917_s27 + $0x4a8] sm:$0xff] }
 0x4af   : > { %10242 = vmatpush1.bf16.msra.mxu0 %v11356_v12  ;;  %10200 = vmatprep.subr.bf16.mxu1 %v12123_v26  ;;  %v3336_v12 = vld [vmem:[%s12917_s27 + $0x4e8] sm:$0xff]  ;;  %v12298_v26 = vcombine.low %v4127_v0, %v4135_v18  ;;  %v4238_v0 = vrot.slane %v12483_v19, %v13227_v8 }
 0x4b0   : > { %10243 = vmatprep.subr.bf16.mxu0 %v11597_v20  ;;  %v11516_v20 = vcombine.low %v3344_v1, %v3352_v2  ;;  %v11501_v27 = vcombine.high %v3328_v10, %v3336_v12  ;;  %v11724_v1 = vcombine.low %v3552_v39, %v3560_v47  ;;  %v3488_v47 = vld [vmem:[%s12917_s27 + $0x9a8] sm:$0xff] }
 0x4b2   : > { %10201 = vmatpush1.bf16.msra.mxu1 %v12122_v13  ;;  %v3312_v13 = vld [vmem:[%s12917_s27 + $0x428] sm:$0xff] }
 0x4b3   : > { %10244 = vmatpush2.bf16.msra.mxu0 %v11596_v14  ;;  %10202 = vmatprep.subr.bf16.mxu1 %v12363_v15  ;;  %v3320_v14 = vld [vmem:[%s12917_s27 + $0x468] sm:$0xff]  ;;  %v12282_v15 = vcombine.low %v4111_v9, %v4119_v5 }
 0x4b4   : > { %10245 = vmatprep.subr.bf16.mxu0 %v11581_v44  ;;  %v11500_v44 = vcombine.low %v3328_v10, %v3336_v12  ;;  %v11485_v25 = vcombine.high %v3312_v13, %v3320_v14  ;;  %v3520_v9 = vld [vmem:[%s12917_s27 + $0xaa8] sm:$0xff] }
 0x4b5   : > { %v3528_v5 = vld [vmem:[%s12917_s27 + $0xae8] sm:$0xff] }
 0x4b6   : > { %10203 = vmatpush2.bf16.msra.mxu1 %v12362_v33  ;;  %v3808_v33 = vld [vmem:[%s12917_s27 + $0x13a8] sm:$0xff] }
 0x4b7   : > { %10246 = vmatpush2.bf16.msra.mxu0 %v11580_v54  ;;  %10204 = vmatprep.subr.bf16.mxu1 %v12347_v34  ;;  %v3816_v54 = vld [vmem:[%s12917_s27 + $0x13e8] sm:$0xff]  ;;  %v12266_v34 = vcombine.low %v4095_v46, %v4103_v59 }
 0x4b8   : > { %10247 = vmatprep.subr.bf16.mxu0 %v11565_v35  ;;  %v11484_v35 = vcombine.low %v3312_v13, %v3320_v14  ;;  %v11981_v37 = vcombine.high %v3808_v33, %v3816_v54  ;;  %v3760_v12 = vld [vmem:[%s12917_s27 + $0x1228] sm:$0xff]  ;;  %v11693_v13 = vcombine.high %v3520_v9, %v3528_v5 }
 0x4ba   : > { %10205 = vmatpush2.bf16.msra.mxu1 %v12346_v40  ;;  %v3792_v40 = vld [vmem:[%s12917_s27 + $0x1328] sm:$0xff] }
 0x4bb   : > { %10248 = vmatpush2.bf16.msra.mxu0 %v11564_v41  ;;  %10206 = vmatprep.subr.bf16.mxu1 %v12331_v43  ;;  %v3800_v41 = vld [vmem:[%s12917_s27 + $0x1368] sm:$0xff]  ;;  %v12250_v43 = vcombine.low %v4079_v22, %v4087_v29 }
 0x4bc   : > { %10249 = vmatprep.subr.bf16.mxu0 %v11549_v28  ;;  %v11980_v28 = vcombine.low %v3808_v33, %v3816_v54  ;;  %v11965_v50 = vcombine.high %v3792_v40, %v3800_v41  ;;  %v11964_v2 = vcombine.low %v3792_v40, %v3800_v41  ;;  %v3744_v29 = vld [vmem:[%s12917_s27 + $0x11a8] sm:$0xff]  ;;  %v11692_v54 = vcombine.low %v3520_v9, %v3528_v5 }
 0x4bd   : > { %v3752_v33 = vld [vmem:[%s12917_s27 + $0x11e8] sm:$0xff] }
 0x4be   : > { %10207 = vmatpush2.bf16.msra.mxu1 %v12330_v61  ;;  %v3536_v61 = vld [vmem:[%s12917_s27 + $0xb28] sm:$0xff]  ;;  %v11917_v39 = vcombine.high %v3744_v29, %v3752_v33  ;;  %v11916_v19 = vcombine.low %v3744_v29, %v3752_v33 }
 0x4bf   : > { %10250 = vmatpush2.bf16.msra.mxu0 %v11548_v7  ;;  %10208 = vmatprep.subr.bf16.mxu1 %v12315_v58  ;;  %v3544_v7 = vld [vmem:[%s12917_s27 + $0xb68] sm:$0xff] }
 0x4c0   : > { %10251 = vmatprep.subr.bf16.mxu0 %v11533_v62  ;;  %v3776_v58 = vld [vmem:[%s12917_s27 + $0x12a8] sm:$0xff] }
 0x4c1   : > { %v3784_v62 = vld [vmem:[%s12917_s27 + $0x12e8] sm:$0xff] }
 0x4c2   : > { %10209 = vmatpush2.bf16.msra.mxu1 %v12314_v31  ;;  %v11709_v31 = vcombine.high %v3536_v61, %v3544_v7  ;;  %v11948_v59 = vcombine.low %v3776_v58, %v3784_v62  ;;  %v3496_v40 = vld [vmem:[%s12917_s27 + $0x9e8] sm:$0xff] }
 0x4c3   : > { %10252 = vmatpush2.bf16.msra.mxu0 %v11532_v45  ;;  %10210 = vmatprep.subr.bf16.mxu1 %v12299_v6  ;;  %v9934_v45 = vadd.f32 %v13785_v38, %v4234_v48  ;;  %v3728_v41 = vld [vmem:[%s12917_s27 + $0x1128] sm:$0xff]  ;;  %v11661_v48 = vcombine.high %v3488_v47, %v3496_v40 }
 0x4c4   : > { %10253 = vmatprep.subr.bf16.mxu0 %v11517_v51  ;;  %v11949_v51 = vcombine.high %v3776_v58, %v3784_v62  ;;  %v3720_v58 = vld [vmem:[%s12917_s27 + $0x10e8] sm:$0xff]  ;;  %v11660_v62 = vcombine.low %v3488_v47, %v3496_v40 }
 0x4c5   : > { %v3664_v33 = vld [vmem:[%s12917_s27 + $0xf28] sm:$0xff] }
 0x4c6   : > { %10211 = vmatpush2.bf16.msra.mxu1 %v12298_v26  ;;  %v3768_v26 = vld [vmem:[%s12917_s27 + $0x1268] sm:$0xff] }
 0x4c7   : > { %10254 = vmatpush2.bf16.msra.mxu0 %v11516_v20  ;;  %10212 = vmatprep.subr.bf16.mxu1 %v12283_v32  ;;  %v9936_v20 = vadd.f32 %v13789_v63, %v4238_v0  ;;  %v3512_v63 = vld [vmem:[%s12917_s27 + $0xa68] sm:$0xff] }
 0x4c8   : > { %10255 = vmatprep.subr.bf16.mxu0 %v11501_v27  ;;  %v11708_v27 = vcombine.low %v3536_v61, %v3544_v7  ;;  %v3480_v61 = vld [vmem:[%s12917_s27 + $0x968] sm:$0xff] }
 0x4c9   : > { %v3712_v7 = vld [vmem:[%s12917_s27 + $0x10a8] sm:$0xff] }
 0x4ca   : > { %10213 = vmatpush2.bf16.msra.mxu1 %v12282_v15  ;;  %v11884_v9 = vcombine.low %v3712_v7, %v3720_v58 }
 0x4cb   : > { %10256 = vmatpush2.bf16.msra.mxu0 %v11500_v44  ;;  %10214 = vmatprep.subr.bf16.mxu1 %v12267_v24  ;;  %v11933_v44 = vcombine.high %v3760_v12, %v3768_v26  ;;  %v3504_v24 = vld [vmem:[%s12917_s27 + $0xa28] sm:$0xff] }
 0x4cc   : > { %10257 = vmatprep.subr.bf16.mxu0 %v11485_v25 }
 0x4ce   : > { %10215 = vmatpush2.bf16.msra.mxu1 %v12266_v34 }
 0x4cf   : > { %10258 = vmatpush2.bf16.msra.mxu0 %v11484_v35  ;;  %10216 = vmatprep.subr.bf16.mxu1 %v12251_v36  ;;  %v11932_v36 = vcombine.low %v3760_v12, %v3768_v26  ;;  %v3440_v12 = vld [vmem:[%s12917_s27 + $0x828] sm:$0xff] }
 0x4d0   : > { %10309 = vmatprep.subr.bf16.mxu0 %v11981_v37  ;;  %v11677_v37 = vcombine.high %v3504_v24, %v3512_v63  ;;  %v3448_v26 = vld [vmem:[%s12917_s27 + $0x868] sm:$0xff] }
 0x4d2   : > { %10217 = vmatpush2.bf16.msra.mxu1 %v12250_v43  ;;  %v10015_v18 = vpop.f32.mrf.mxu0  ;;  %10260 = vmatmul.mubr.bf16.vlgmr.msra.gmra.mxu0 %v13088_v52  ;;  %v3736_v43 = vld [vmem:[%s12917_s27 + $0x1168] sm:$0xff] }
 0x4d3   : > { %10310 = vmatpush1.bf16.msra.mxu0 %v11980_v28  ;;  %10341 = vmatprep.mubr.bf16.mxu0 %v13190_v49  ;;  %v11676_v28 = vcombine.low %v3504_v24, %v3512_v63  ;;  %v11900_v0 = vcombine.low %v3728_v41, %v3736_v43  ;;  %v11612_v24 = vcombine.low %v3440_v12, %v3448_v26 }
 0x4d4   : > { %v10017_v6 = vpop.f32.mrf.mxu0  ;;  %10268 = vmatprep.subr.bf16.mxu1 %v11725_v56  ;;  %10311 = vmatprep.subr.bf16.mxu0 %v11965_v50  ;;  %v11901_v56 = vcombine.high %v3728_v41, %v3736_v43  ;;  %v3472_v50 = vld [vmem:[%s12917_s27 + $0x928] sm:$0xff] }
 0x4d5   : > { %v9974_v10 = vpop.f32.mrf.mxu1  ;;  %10219 = vmatmul.mubr.bf16.vlgmr.msra.gmra.mxu1 %v13248_v4  ;;  %v3648_v41 = vld [vmem:[%s12917_s27 + $0xea8] sm:$0xff] }
 0x4d6   : > { %v9975_v32 = vadd.f32 %v9974_v10, %v9934_v45  ;;  %10269 = vmatpush1.bf16.msra.mxu1 %v11724_v1  ;;  %10300 = vmatprep.mubr.bf16.mxu1 %v13017_v42  ;;  %v10019_v38 = vpop.f32.mrf.mxu0  ;;  %v11885_v1 = vcombine.high %v3712_v7, %v3720_v58  ;;  %v3696_v45 = vld [vmem:[%s12917_s27 + $0x1028] sm:$0xff] }
 0x4d7   : > { %v9976_v46 = vpop.f32.mrf.mxu1  ;;  %10312 = vmatpush1.bf16.msra.mxu0 %v11964_v2  ;;  %10270 = vmatprep.subr.bf16.mxu1 %v11709_v31  ;;  %v3456_v2 = vld [vmem:[%s12917_s27 + $0x8a8] sm:$0xff] }
 0x4d8   : > { %v9977_v14 = vadd.f32 %v9976_v46, %v9936_v20  ;;  %v10020_v15 = vpop.f32.mrf.mxu0  ;;  %10313 = vmatprep.subr.bf16.mxu0 %v11949_v51  ;;  %v13875_v25 = vadd.f32 %v10015_v18, %v9975_v32  ;;  %v11645_v18 = vcombine.high %v3472_v50, %v3480_v61  ;;  %v3464_v31 = vld [vmem:[%s12917_s27 + $0x8e8] sm:$0xff]  ;;  %v11644_v51 = vcombine.low %v3472_v50, %v3480_v61 }
 0x4d9   : > { %v9978_v22 = vpop.f32.mrf.mxu1  ;;  %v11629_v5 = vcombine.high %v3456_v2, %v3464_v31  ;;  %v3936_v20 = vld [vmem:[%s12917_s27 + $0x17a8] sm:$0xff]  ;;  %v11628_v38 = vcombine.low %v3456_v2, %v3464_v31  ;;  %v11613_v46 = vcombine.high %v3440_v12, %v3448_v26 }
 0x4da   : > { %10271 = vmatpush1.bf16.msra.mxu1 %v11708_v27  ;;  %v13879_v34 = vadd.f32 %v10017_v6, %v9977_v14  ;;  %v3704_v6 = vld [vmem:[%s12917_s27 + $0x1068] sm:$0xff] }
 0x4db   : > { %v9979_v35 = vpop.f32.mrf.mxu1  ;;  %10314 = vmatpush1.bf16.msra.mxu0 %v11948_v59  ;;  %10272 = vmatprep.subr.bf16.mxu1 %v11693_v13  ;;  %v11869_v10 = vcombine.high %v3696_v45, %v3704_v6  ;;  %v3944_v32 = vld [vmem:[%s12917_s27 + $0x17e8] sm:$0xff]  ;;  %v11868_v27 = vcombine.low %v3696_v45, %v3704_v6 }
 0x4dc   : > { %10315 = vmatprep.subr.bf16.mxu0 %v11933_v44  ;;  %v12109_v59 = vcombine.high %v3936_v20, %v3944_v32  ;;  %v3680_v13 = vld [vmem:[%s12917_s27 + $0xfa8] sm:$0xff]  ;;  %v12108_v63 = vcombine.low %v3936_v20, %v3944_v32 }
 0x4dd   : > { %v3688_v14 = vld [vmem:[%s12917_s27 + $0xfe8] sm:$0xff] }
 0x4de   : > { %10273 = vmatpush1.bf16.msra.mxu1 %v11692_v54  ;;  %v3920_v15 = vld [vmem:[%s12917_s27 + $0x1728] sm:$0xff]  ;;  %v11853_v22 = vcombine.high %v3680_v13, %v3688_v14 }
 0x4df   : > { %10316 = vmatpush1.bf16.msra.mxu0 %v11932_v36  ;;  %10274 = vmatprep.subr.bf16.mxu1 %v11677_v37  ;;  %v3928_v44 = vld [vmem:[%s12917_s27 + $0x1768] sm:$0xff]  ;;  %v11852_v37 = vcombine.low %v3680_v13, %v3688_v14 }
 0x4e0   : > { %10317 = vmatprep.subr.bf16.mxu0 %v11917_v39  ;;  %v12093_v29 = vcombine.high %v3920_v15, %v3928_v44  ;;  %v3672_v54 = vld [vmem:[%s12917_s27 + $0xf68] sm:$0xff]  ;;  %v12092_v39 = vcombine.low %v3920_v15, %v3928_v44 }
 0x4e1   : > { %v3904_v35 = vld [vmem:[%s12917_s27 + $0x16a8] sm:$0xff]  ;;  %v11837_v47 = vcombine.high %v3664_v33, %v3672_v54 }
 0x4e2   : > { %10275 = vmatpush1.bf16.msra.mxu1 %v11676_v28  ;;  %v3912_v36 = vld [vmem:[%s12917_s27 + $0x16e8] sm:$0xff] }
 0x4e3   : > { %10318 = vmatpush1.bf16.msra.mxu0 %v11916_v19  ;;  %10276 = vmatprep.subr.bf16.mxu1 %v11661_v48  ;;  %v12077_v40 = vcombine.high %v3904_v35, %v3912_v36  ;;  %v3656_v43 = vld [vmem:[%s12917_s27 + $0xee8] sm:$0xff]  ;;  %v11836_v48 = vcombine.low %v3664_v33, %v3672_v54 }
 0x4e4   : > { %10319 = vmatprep.subr.bf16.mxu0 %v11901_v56  ;;  %v3888_v28 = vld [vmem:[%s12917_s27 + $0x1628] sm:$0xff]  ;;  %v12076_v56 = vcombine.low %v3904_v35, %v3912_v36  ;;  %v11821_v50 = vcombine.high %v3648_v41, %v3656_v43 }
 0x4e5   : > { %v3896_v19 = vld [vmem:[%s12917_s27 + $0x1668] sm:$0xff] }
 0x4e6   : > { %10277 = vmatpush1.bf16.msra.mxu1 %v11660_v62  ;;  %v12061_v61 = vcombine.high %v3888_v28, %v3896_v19  ;;  %v3632_v7 = vld [vmem:[%s12917_s27 + $0xe28] sm:$0xff] }
 0x4e7   : > { %10320 = vmatpush1.bf16.msra.mxu0 %v11900_v0  ;;  %10278 = vmatprep.subr.bf16.mxu1 %v11645_v18  ;;  %v3640_v58 = vld [vmem:[%s12917_s27 + $0xe68] sm:$0xff]  ;;  %v11820_v18 = vcombine.low %v3648_v41, %v3656_v43 }
 0x4e8   : > { %10321 = vmatprep.subr.bf16.mxu0 %v11885_v1  ;;  %v3872_v62 = vld [vmem:[%s12917_s27 + $0x15a8] sm:$0xff]  ;;  %v12060_v1 = vcombine.low %v3888_v28, %v3896_v19  ;;  %v11805_v2 = vcombine.high %v3632_v7, %v3640_v58 }
 0x4e9   : > { %v3880_v0 = vld [vmem:[%s12917_s27 + $0x15e8] sm:$0xff] }
 0x4ea   : > { %10279 = vmatpush1.bf16.msra.mxu1 %v11644_v51  ;;  %v12045_v31 = vcombine.high %v3872_v62, %v3880_v0  ;;  %v3616_v45 = vld [vmem:[%s12917_s27 + $0xda8] sm:$0xff] }
 0x4eb   : > { %10322 = vmatpush1.bf16.msra.mxu0 %v11884_v9  ;;  %10280 = vmatprep.subr.bf16.mxu1 %v11629_v5  ;;  %v3624_v6 = vld [vmem:[%s12917_s27 + $0xde8] sm:$0xff]  ;;  %v11804_v5 = vcombine.low %v3632_v7, %v3640_v58 }
 0x4ec   : > { %10323 = vmatprep.subr.bf16.mxu0 %v11869_v10  ;;  %v3856_v51 = vld [vmem:[%s12917_s27 + $0x1528] sm:$0xff]  ;;  %v12044_v10 = vcombine.low %v3872_v62, %v3880_v0  ;;  %v11789_v12 = vcombine.high %v3616_v45, %v3624_v6 }
 0x4ed   : > { %v3864_v9 = vld [vmem:[%s12917_s27 + $0x1568] sm:$0xff] }
 0x4ee   : > { %10281 = vmatpush1.bf16.msra.mxu1 %v11628_v38  ;;  %v12029_v26 = vcombine.high %v3856_v51, %v3864_v9  ;;  %v3600_v20 = vld [vmem:[%s12917_s27 + $0xd28] sm:$0xff] }
 0x4ef   : > { %10324 = vmatpush1.bf16.msra.mxu0 %v11868_v27  ;;  %10282 = vmatprep.subr.bf16.mxu1 %v11613_v46  ;;  %v3608_v32 = vld [vmem:[%s12917_s27 + $0xd68] sm:$0xff]  ;;  %v11788_v46 = vcombine.low %v3616_v45, %v3624_v6 }
 0x4f0   : > { %10325 = vmatprep.subr.bf16.mxu0 %v12109_v59  ;;  %v3840_v38 = vld [vmem:[%s12917_s27 + $0x14a8] sm:$0xff]  ;;  %v12028_v59 = vcombine.low %v3856_v51, %v3864_v9  ;;  %v11773_v13 = vcombine.high %v3600_v20, %v3608_v32 }
 0x4f1   : > { %v3848_v27 = vld [vmem:[%s12917_s27 + $0x14e8] sm:$0xff] }
 0x4f2   : > { %10283 = vmatpush1.bf16.msra.mxu1 %v11612_v24  ;;  %v12013_v14 = vcombine.high %v3840_v38, %v3848_v27  ;;  %v3584_v15 = vld [vmem:[%s12917_s27 + $0xca8] sm:$0xff] }
 0x4f3   : > { %10326 = vmatpush2.bf16.msra.mxu0 %v12108_v63  ;;  %10284 = vmatprep.subr.bf16.mxu1 %v11853_v22  ;;  %v3592_v44 = vld [vmem:[%s12917_s27 + $0xce8] sm:$0xff]  ;;  %v11772_v22 = vcombine.low %v3600_v20, %v3608_v32  ;;  %v3257_v20 = vld [vmem:[%s12917_s27 + $0x270] sm:$0xff] }
 0x4f4   : > { %10327 = vmatprep.subr.bf16.mxu0 %v12093_v29  ;;  %v3824_v24 = vld [vmem:[%s12917_s27 + $0x1428] sm:$0xff]  ;;  %v12012_v29 = vcombine.low %v3840_v38, %v3848_v27  ;;  %v11757_v33 = vcombine.high %v3584_v15, %v3592_v44 }
 0x4f5   : > { %v3832_v63 = vld [vmem:[%s12917_s27 + $0x1468] sm:$0xff] }
 0x4f6   : > { %10285 = vmatpush2.bf16.msra.mxu1 %v11852_v37  ;;  %v11997_v54 = vcombine.high %v3824_v24, %v3832_v63  ;;  %v3568_v35 = vld [vmem:[%s12917_s27 + $0xc28] sm:$0xff]  ;;  %v3297_v37 = vld [vmem:[%s12917_s27 + $0x3b0] sm:$0xff] }
 0x4f7   : > { %10328 = vmatpush2.bf16.msra.mxu0 %v12092_v39  ;;  %10286 = vmatprep.subr.bf16.mxu1 %v11837_v47  ;;  %v3576_v36 = vld [vmem:[%s12917_s27 + $0xc68] sm:$0xff]  ;;  %v3305_v39 = vld [vmem:[%s12917_s27 + $0x3f0] sm:$0xff]  ;;  %v11756_v47 = vcombine.low %v3584_v15, %v3592_v44 }
 0x4f8   : > { %10329 = vmatprep.subr.bf16.mxu0 %v12077_v40  ;;  %v11996_v40 = vcombine.low %v3824_v24, %v3832_v63  ;;  %v11741_v41 = vcombine.high %v3568_v35, %v3576_v36  ;;  %v11471_v43 = vcombine.high %v3297_v37, %v3305_v39  ;;  %v4064_v28 = vld [vmem:[%s12917_s27 + $0x1ba8] sm:$0xff] }
 0x4f9   : > { %v4072_v19 = vld [vmem:[%s12917_s27 + $0x1be8] sm:$0xff] }
 0x4fa   : > { %10287 = vmatpush2.bf16.msra.mxu1 %v11836_v48  ;;  %v3281_v48 = vld [vmem:[%s12917_s27 + $0x330] sm:$0xff]  ;;  %v12237_v7 = vcombine.high %v4064_v28, %v4072_v19  ;;  %v4048_v62 = vld [vmem:[%s12917_s27 + $0x1b28] sm:$0xff] }
 0x4fb   : > { %10330 = vmatpush2.bf16.msra.mxu0 %v12076_v56  ;;  %10288 = vmatprep.subr.bf16.mxu1 %v11821_v50  ;;  %v3289_v56 = vld [vmem:[%s12917_s27 + $0x370] sm:$0xff]  ;;  %v11740_v50 = vcombine.low %v3568_v35, %v3576_v36  ;;  %v4056_v0 = vld [vmem:[%s12917_s27 + $0x1b68] sm:$0xff] }
 0x4fc   : > { %10331 = vmatprep.subr.bf16.mxu0 %v12061_v61  ;;  %v11470_v61 = vcombine.low %v3297_v37, %v3305_v39  ;;  %v11455_v58 = vcombine.high %v3281_v48, %v3289_v56  ;;  %v11454_v45 = vcombine.low %v3281_v48, %v3289_v56  ;;  %v12221_v6 = vcombine.high %v4048_v62, %v4056_v0  ;;  %v4016_v24 = vld [vmem:[%s12917_s27 + $0x1a28] sm:$0xff] }
 0x4fd   : > { %v12220_v27 = vcombine.low %v4048_v62, %v4056_v0  ;;  %v4024_v63 = vld [vmem:[%s12917_s27 + $0x1a68] sm:$0xff]  ;;  %v3209_v62 = vld [vmem:[%s12917_s27 + $0xf0] sm:$0xff] }
 0x4fe   : > { %10289 = vmatpush2.bf16.msra.mxu1 %v11820_v18  ;;  %v3265_v18 = vld [vmem:[%s12917_s27 + $0x2b0] sm:$0xff]  ;;  %v12189_v37 = vcombine.high %v4016_v24, %v4024_v63 }
 0x4ff   : > { %10332 = vmatpush2.bf16.msra.mxu0 %v12060_v1  ;;  %10290 = vmatprep.subr.bf16.mxu1 %v11805_v2  ;;  %v3273_v1 = vld [vmem:[%s12917_s27 + $0x2f0] sm:$0xff] }
 0x500   : > { %10333 = vmatprep.subr.bf16.mxu0 %v12045_v31  ;;  %v12236_v31 = vcombine.low %v4064_v28, %v4072_v19  ;;  %v11439_v9 = vcombine.high %v3265_v18, %v3273_v1  ;;  %v3225_v28 = vld [vmem:[%s12917_s27 + $0x170] sm:$0xff]  ;;  %v12188_v19 = vcombine.low %v4016_v24, %v4024_v63  ;;  %v4200_v24 = vld [vmem:[%s12917_s27 + $0x1fe8] sm:$0xff] }
 0x501   : > { %v3409_v63 = vld [vmem:[%s12917_s27 + $0x730] sm:$0xff] }
 0x502   : > { %10291 = vmatpush2.bf16.msra.mxu1 %v11804_v5  ;;  %v4032_v5 = vld [vmem:[%s12917_s27 + $0x1aa8] sm:$0xff] }
 0x503   : > { %10334 = vmatpush2.bf16.msra.mxu0 %v12044_v10  ;;  %10292 = vmatprep.subr.bf16.mxu1 %v11789_v12  ;;  %v4040_v10 = vld [vmem:[%s12917_s27 + $0x1ae8] sm:$0xff] }
 0x504   : > { %10335 = vmatprep.subr.bf16.mxu0 %v12029_v26  ;;  %v3249_v26 = vld [vmem:[%s12917_s27 + $0x230] sm:$0xff]  ;;  %v12204_v35 = vcombine.low %v4032_v5, %v4040_v10 }
 0x505   : > { %v11423_v44 = vcombine.high %v3249_v26, %v3257_v20 }
 0x506   : > { %10293 = vmatpush2.bf16.msra.mxu1 %v11788_v46 }
 0x507   : > { %10336 = vmatpush2.bf16.msra.mxu0 %v12028_v59  ;;  %10294 = vmatprep.subr.bf16.mxu1 %v11773_v13  ;;  %v11438_v59 = vcombine.low %v3265_v18, %v3273_v1  ;;  %v12205_v13 = vcombine.high %v4032_v5, %v4040_v10  ;;  %v3193_v5 = vld [vmem:[%s12917_s27 + $0x70] sm:$0xff] }
 0x508   : > { %10337 = vmatprep.subr.bf16.mxu0 %v12013_v14 }
 0x50a   : > { %10295 = vmatpush2.bf16.msra.mxu1 %v11772_v22  ;;  %v3233_v22 = vld [vmem:[%s12917_s27 + $0x1b0] sm:$0xff] }
 0x50b   : > { %10338 = vmatpush2.bf16.msra.mxu0 %v12012_v29  ;;  %10296 = vmatprep.subr.bf16.mxu1 %v11757_v33  ;;  %v3241_v29 = vld [vmem:[%s12917_s27 + $0x1f0] sm:$0xff] }
 0x50c   : > { %10339 = vmatprep.subr.bf16.mxu0 %v11997_v54  ;;  %v11406_v48 = vcombine.low %v3233_v22, %v3241_v29 }
 0x50e   : > { %10297 = vmatpush2.bf16.msra.mxu1 %v11756_v47  ;;  %v11407_v47 = vcombine.high %v3233_v22, %v3241_v29 }
 0x50f   : > { %10340 = vmatpush2.bf16.msra.mxu0 %v11996_v40  ;;  %10298 = vmatprep.subr.bf16.mxu1 %v11741_v41  ;;  %v4000_v40 = vld [vmem:[%s12917_s27 + $0x19a8] sm:$0xff] }
 0x510   : > { %10391 = vmatprep.subr.bf16.mxu0 %v11471_v43  ;;  %v4008_v41 = vld [vmem:[%s12917_s27 + $0x19e8] sm:$0xff]  ;;  %v3217_v43 = vld [vmem:[%s12917_s27 + $0x130] sm:$0xff] }
 0x511   : > { %v12173_v56 = vcombine.high %v4000_v40, %v4008_v41  ;;  %v12172_v0 = vcombine.low %v4000_v40, %v4008_v41  ;;  %v11390_v18 = vcombine.low %v3217_v43, %v3225_v28 }
 0x512   : > { %10299 = vmatpush2.bf16.msra.mxu1 %v11740_v50  ;;  %v13937_v2 = vpop.f32.mrf.mxu0  ;;  %10342 = vmatmul.mubr.bf16.vlgmr.msra.gmra.mxu0 %v13192_v57  ;;  %v11391_v50 = vcombine.high %v3217_v43, %v3225_v28  ;;  %v4160_v43 = vld [vmem:[%s12917_s27 + $0x1ea8] sm:$0xff] }
 0x513   : > { %10392 = vmatpush1.bf16.msra.mxu0 %v11470_v61  ;;  %10423 = vmatprep.mubr.bf16.mxu0 %v13001_v21  ;;  %v3984_v61 = vld [vmem:[%s12917_s27 + $0x1928] sm:$0xff] }
 0x514   : > { %v13941_v51 = vpop.f32.mrf.mxu0  ;;  %10350 = vmatprep.subr.bf16.mxu1 %v12237_v7  ;;  %10393 = vmatprep.subr.bf16.mxu0 %v11455_v58  ;;  %v3992_v7 = vld [vmem:[%s12917_s27 + $0x1968] sm:$0xff]  ;;  %v3201_v58 = vld [vmem:[%s12917_s27 + $0xb0] sm:$0xff] }
 0x515   : > { %v10056_v12 = vpop.f32.mrf.mxu1  ;;  %10301 = vmatmul.mubr.bf16.vlgmr.msra.gmra.mxu1 %v13090_v23  ;;  %v12157_v1 = vcombine.high %v3984_v61, %v3992_v7  ;;  %v12156_v10 = vcombine.low %v3984_v61, %v3992_v7  ;;  %v4168_v28 = vld [vmem:[%s12917_s27 + $0x1ee8] sm:$0xff] }
 0x516   : > { %v10057_v32 = vadd.f32 %v10056_v12, %v13875_v25  ;;  %10351 = vmatpush1.bf16.msra.mxu1 %v12236_v31  ;;  %10382 = vmatprep.mubr.bf16.mxu1 %v13243_v30  ;;  %v10101_v38 = vpop.f32.mrf.mxu0  ;;  %v11375_v31 = vcombine.high %v3201_v58, %v3209_v62  ;;  %v11374_v12 = vcombine.low %v3201_v58, %v3209_v62  ;;  %v4144_v58 = vld [vmem:[%s12917_s27 + $0x1e28] sm:$0xff] }
 0x517   : > { %v10058_v46 = vpop.f32.mrf.mxu1  ;;  %10394 = vmatpush1.bf16.msra.mxu0 %v11454_v45  ;;  %10352 = vmatprep.subr.bf16.mxu1 %v12221_v6  ;;  %v3968_v45 = vld [vmem:[%s12917_s27 + $0x18a8] sm:$0xff]  ;;  %v12333_v61 = vcombine.high %v4160_v43, %v4168_v28 }
 0x518   : > { %v10059_v14 = vadd.f32 %v10058_v46, %v13879_v34  ;;  %v10102_v15 = vpop.f32.mrf.mxu0  ;;  %10395 = vmatprep.subr.bf16.mxu0 %v11439_v9  ;;  %v10725_v33 = vmax.f32 %v10057_v32, 0.0  ;;  %v11422_v34 = vcombine.low %v3249_v26, %v3257_v20  ;;  %v3976_v6 = vld [vmem:[%s12917_s27 + $0x18e8] sm:$0xff]  ;;  %v3185_v9 = vld [vmem:[%s12917_s27 + $0x30] sm:$0xff] }
 0x519   : > { %v10060_v25 = vpop.f32.mrf.mxu1  ;;  %v12141_v26 = vcombine.high %v3968_v45, %v3976_v6  ;;  %v11359_v20 = vcombine.high %v3185_v9, %v3193_v5  ;;  %v3952_v32 = vld [vmem:[%s12917_s27 + $0x1828] sm:$0xff]  ;;  %v3433_v46 = vld [vmem:[%s12917_s27 + $0x7f0] sm:$0xff] }
 0x51a   : > { %v10726_v54 = vmax.f32 %v10059_v14, 0.0  ;;  %10353 = vmatpush1.bf16.msra.mxu1 %v12220_v27  ;;  %v3960_v38 = vld [vmem:[%s12917_s27 + $0x1868] sm:$0xff]  ;;  %v3425_v27 = vld [vmem:[%s12917_s27 + $0x7b0] sm:$0xff] }
 0x51b   : > { %v10061_v36 = vpop.f32.mrf.mxu1  ;;  %10396 = vmatpush1.bf16.msra.mxu0 %v11438_v59  ;;  %10354 = vmatprep.subr.bf16.mxu1 %v12205_v13  ;;  %v12140_v59 = vcombine.low %v3968_v45, %v3976_v6  ;;  %v11358_v13 = vcombine.low %v3185_v9, %v3193_v5  ;;  %v12125_v14 = vcombine.high %v3952_v32, %v3960_v38  ;;  %v3417_v25 = vld [vmem:[%s12917_s27 + $0x770] sm:$0xff]  ;;  %v4152_v62 = vld [vmem:[%s12917_s27 + $0x1e68] sm:$0xff] }
 0x51c   : > { %v12388_v39 = vpack.c.bf16 %v10726_v54, %v10725_v33  ;;  %10397 = vmatprep.subr.bf16.mxu0 %v11423_v44  ;;  %v11599_v15 = vcombine.high %v3425_v27, %v3433_v46  ;;  %v4192_v44 = vld [vmem:[%s12917_s27 + $0x1fa8] sm:$0xff]  ;;  %v12124_v22 = vcombine.low %v3952_v32, %v3960_v38  ;;  %v11598_v29 = vcombine.low %v3425_v27, %v3433_v46 }
 0x51d   : > { %v12365_v33 = vcombine.high %v4192_v44, %v4200_v24  ;;  %v11583_v54 = vcombine.high %v3409_v63, %v3417_v25  ;;  %v4184_v36 = vld [vmem:[%s12917_s27 + $0x1f68] sm:$0xff]  ;;  %v12317_v45 = vcombine.high %v4144_v58, %v4152_v62 }
 0x51e   : > { %10802 = vst [vmem:[%s13496_s10 + $0x18] sm:$0xff] %v12388_v39  ;;  %10355 = vmatpush1.bf16.msra.mxu1 %v12204_v35  ;;  %v4176_v35 = vld [vmem:[%s12917_s27 + $0x1f28] sm:$0xff]  ;;  %v12364_v39 = vcombine.low %v4192_v44, %v4200_v24 }
 0x51f   : > { %10398 = vmatpush1.bf16.msra.mxu0 %v11422_v34  ;;  %10356 = vmatprep.subr.bf16.mxu1 %v12189_v37  ;;  %v3393_v34 = vld [vmem:[%s12917_s27 + $0x6b0] sm:$0xff]  ;;  %v12349_v40 = vcombine.high %v4176_v35, %v4184_v36  ;;  %v4128_v9 = vld [vmem:[%s12917_s27 + $0x1da8] sm:$0xff] }
 0x520   : > { %10399 = vmatprep.subr.bf16.mxu0 %v11407_v47  ;;  %v3401_v37 = vld [vmem:[%s12917_s27 + $0x6f0] sm:$0xff]  ;;  %v11582_v47 = vcombine.low %v3409_v63, %v3417_v25  ;;  %v4136_v5 = vld [vmem:[%s12917_s27 + $0x1de8] sm:$0xff] }
 0x521   : > { %v11567_v41 = vcombine.high %v3393_v34, %v3401_v37  ;;  %v12301_v32 = vcombine.high %v4128_v9, %v4136_v5  ;;  %v4112_v27 = vld [vmem:[%s12917_s27 + $0x1d28] sm:$0xff] }
 0x522   : > { %10357 = vmatpush1.bf16.msra.mxu1 %v12188_v19  ;;  %v3377_v19 = vld [vmem:[%s12917_s27 + $0x630] sm:$0xff]  ;;  %v4120_v46 = vld [vmem:[%s12917_s27 + $0x1d68] sm:$0xff] }
 0x523   : > { %10400 = vmatpush1.bf16.msra.mxu0 %v11406_v48  ;;  %10358 = vmatprep.subr.bf16.mxu1 %v12173_v56  ;;  %v3385_v48 = vld [vmem:[%s12917_s27 + $0x670] sm:$0xff]  ;;  %v12348_v56 = vcombine.low %v4176_v35, %v4184_v36  ;;  %v12285_v44 = vcombine.high %v4112_v27, %v4120_v46  ;;  %v4096_v63 = vld [vmem:[%s12917_s27 + $0x1ca8] sm:$0xff] }
 0x524   : > { %10401 = vmatprep.subr.bf16.mxu0 %v11391_v50  ;;  %v11566_v50 = vcombine.low %v3393_v34, %v3401_v37  ;;  %v11551_v7 = vcombine.high %v3377_v19, %v3385_v48  ;;  %v4104_v25 = vld [vmem:[%s12917_s27 + $0x1ce8] sm:$0xff] }
 0x525   : > { %v12269_v35 = vcombine.high %v4096_v63, %v4104_v25  ;;  %v4080_v34 = vld [vmem:[%s12917_s27 + $0x1c28] sm:$0xff] }
 0x526   : > { %10359 = vmatpush1.bf16.msra.mxu1 %v12172_v0  ;;  %v3361_v0 = vld [vmem:[%s12917_s27 + $0x5b0] sm:$0xff]  ;;  %v4088_v37 = vld [vmem:[%s12917_s27 + $0x1c68] sm:$0xff] }
 0x527   : > { %10402 = vmatpush1.bf16.msra.mxu0 %v11390_v18  ;;  %10360 = vmatprep.subr.bf16.mxu1 %v12157_v1  ;;  %v3369_v18 = vld [vmem:[%s12917_s27 + $0x5f0] sm:$0xff]  ;;  %v12332_v1 = vcombine.low %v4160_v43, %v4168_v28  ;;  %v12253_v43 = vcombine.high %v4080_v34, %v4088_v37  ;;  %v14005_v28 = vld [vmem:[%s13306_s9 + $0x8] sm:$0xff] }
 0x528   : > { %10403 = vmatprep.subr.bf16.mxu0 %v11375_v31  ;;  %v11550_v31 = vcombine.low %v3377_v19, %v3385_v48  ;;  %v11535_v6 = vcombine.high %v3361_v0, %v3369_v18  ;;  %v3553_v48 = vld [vmem:[%s12917_s27 + $0xbb0] sm:$0xff] }
 0x52a   : > { %10361 = vmatpush1.bf16.msra.mxu1 %v12156_v10  ;;  %v3345_v10 = vld [vmem:[%s12917_s27 + $0x530] sm:$0xff] }
 0x52b   : > { %10404 = vmatpush1.bf16.msra.mxu0 %v11374_v12  ;;  %10362 = vmatprep.subr.bf16.mxu1 %v12141_v26  ;;  %v3353_v12 = vld [vmem:[%s12917_s27 + $0x570] sm:$0xff]  ;;  %v12316_v26 = vcombine.low %v4144_v58, %v4152_v62  ;;  %v4242_v62 = vrot.slane %v14005_v28, %v12952_v53 }
 0x52c   : > { %10405 = vmatprep.subr.bf16.mxu0 %v11359_v20  ;;  %v11534_v20 = vcombine.low %v3361_v0, %v3369_v18  ;;  %v11519_v38 = vcombine.high %v3345_v10, %v3353_v12 }
 0x52e   : > { %10363 = vmatpush1.bf16.msra.mxu1 %v12140_v59  ;;  %v3329_v59 = vld [vmem:[%s12917_s27 + $0x4b0] sm:$0xff] }
 0x52f   : > { %10406 = vmatpush1.bf16.msra.mxu0 %v11358_v13  ;;  %10364 = vmatprep.subr.bf16.mxu1 %v12125_v14  ;;  %v3337_v13 = vld [vmem:[%s12917_s27 + $0x4f0] sm:$0xff]  ;;  %v12300_v14 = vcombine.low %v4128_v9, %v4136_v5  ;;  %v4246_v9 = vrot.slane %v14005_v28, %v12957_v60 }
 0x530   : > { %10407 = vmatprep.subr.bf16.mxu0 %v11599_v15  ;;  %v11518_v15 = vcombine.low %v3345_v10, %v3353_v12  ;;  %v11503_v24 = vcombine.high %v3329_v59, %v3337_v13  ;;  %v3529_v60 = vld [vmem:[%s12917_s27 + $0xaf0] sm:$0xff] }
 0x532   : > { %10365 = vmatpush1.bf16.msra.mxu1 %v12124_v22  ;;  %v3313_v22 = vld [vmem:[%s12917_s27 + $0x430] sm:$0xff] }
 0x533   : > { %10408 = vmatpush2.bf16.msra.mxu0 %v11598_v29  ;;  %10366 = vmatprep.subr.bf16.mxu1 %v12365_v33  ;;  %v3321_v29 = vld [vmem:[%s12917_s27 + $0x470] sm:$0xff]  ;;  %v12284_v33 = vcombine.low %v4112_v27, %v4120_v46 }
 0x534   : > { %10409 = vmatprep.subr.bf16.mxu0 %v11583_v54  ;;  %v11502_v54 = vcombine.low %v3329_v59, %v3337_v13  ;;  %v11487_v36 = vcombine.high %v3313_v22, %v3321_v29  ;;  %v3761_v46 = vld [vmem:[%s12917_s27 + $0x1230] sm:$0xff]  ;;  %v10100_v13 = vadd.f32 %v13941_v51, %v4246_v9 }
 0x535   : > { %v3769_v59 = vld [vmem:[%s12917_s27 + $0x1270] sm:$0xff] }
 0x536   : > { %10367 = vmatpush2.bf16.msra.mxu1 %v12364_v39  ;;  %v3809_v39 = vld [vmem:[%s12917_s27 + $0x13b0] sm:$0xff] }
 0x537   : > { %10410 = vmatpush2.bf16.msra.mxu0 %v11582_v47  ;;  %10368 = vmatprep.subr.bf16.mxu1 %v12349_v40  ;;  %v3817_v47 = vld [vmem:[%s12917_s27 + $0x13f0] sm:$0xff]  ;;  %v12268_v40 = vcombine.low %v4096_v63, %v4104_v25 }
 0x538   : > { %10411 = vmatprep.subr.bf16.mxu0 %v11567_v41  ;;  %v11486_v41 = vcombine.low %v3313_v22, %v3321_v29  ;;  %v11983_v19 = vcombine.high %v3809_v39, %v3817_v47  ;;  %v11982_v58 = vcombine.low %v3809_v39, %v3817_v47  ;;  %v11935_v29 = vcombine.high %v3761_v46, %v3769_v59  ;;  %v3513_v51 = vld [vmem:[%s12917_s27 + $0xa70] sm:$0xff] }
 0x53a   : > { %10369 = vmatpush2.bf16.msra.mxu1 %v12348_v56  ;;  %v3561_v56 = vld [vmem:[%s12917_s27 + $0xbf0] sm:$0xff] }
 0x53b   : > { %10412 = vmatpush2.bf16.msra.mxu0 %v11566_v50  ;;  %10370 = vmatprep.subr.bf16.mxu1 %v12333_v61  ;;  %v3793_v50 = vld [vmem:[%s12917_s27 + $0x1330] sm:$0xff]  ;;  %v11727_v0 = vcombine.high %v3553_v48, %v3561_v56  ;;  %v11726_v10 = vcombine.low %v3553_v48, %v3561_v56 }
 0x53c   : > { %10413 = vmatprep.subr.bf16.mxu0 %v11551_v7  ;;  %v3801_v61 = vld [vmem:[%s12917_s27 + $0x1370] sm:$0xff]  ;;  %v12252_v7 = vcombine.low %v4080_v34, %v4088_v37 }
 0x53d   : > { %v11967_v18 = vcombine.high %v3793_v50, %v3801_v61  ;;  %v11966_v53 = vcombine.low %v3793_v50, %v3801_v61  ;;  %v3753_v34 = vld [vmem:[%s12917_s27 + $0x11f0] sm:$0xff] }
 0x53e   : > { %10371 = vmatpush2.bf16.msra.mxu1 %v12332_v1  ;;  %v3537_v1 = vld [vmem:[%s12917_s27 + $0xb30] sm:$0xff] }
 0x53f   : > { %10414 = vmatpush2.bf16.msra.mxu0 %v11550_v31  ;;  %10372 = vmatprep.subr.bf16.mxu1 %v12317_v45  ;;  %v3545_v31 = vld [vmem:[%s12917_s27 + $0xb70] sm:$0xff] }
 0x540   : > { %10415 = vmatprep.subr.bf16.mxu0 %v11535_v6  ;;  %v3777_v45 = vld [vmem:[%s12917_s27 + $0x12b0] sm:$0xff]  ;;  %v11711_v12 = vcombine.high %v3537_v1, %v3545_v31 }
 0x541   : > { %v3785_v6 = vld [vmem:[%s12917_s27 + $0x12f0] sm:$0xff] }
 0x542   : > { %10373 = vmatpush2.bf16.msra.mxu1 %v12316_v26  ;;  %v10098_v26 = vadd.f32 %v13937_v2, %v4242_v62  ;;  %v3497_v48 = vld [vmem:[%s12917_s27 + $0x9f0] sm:$0xff] }
 0x543   : > { %10416 = vmatpush2.bf16.msra.mxu0 %v11534_v20  ;;  %10374 = vmatprep.subr.bf16.mxu1 %v12301_v32  ;;  %v11951_v32 = vcombine.high %v3777_v45, %v3785_v6  ;;  %v3729_v56 = vld [vmem:[%s12917_s27 + $0x1130] sm:$0xff] }
 0x544   : > { %10417 = vmatprep.subr.bf16.mxu0 %v11519_v38  ;;  %v3521_v38 = vld [vmem:[%s12917_s27 + $0xab0] sm:$0xff] }
 0x545   : > { %v11695_v63 = vcombine.high %v3521_v38, %v3529_v60  ;;  %v11694_v37 = vcombine.low %v3521_v38, %v3529_v60  ;;  %v3737_v50 = vld [vmem:[%s12917_s27 + $0x1170] sm:$0xff] }
 0x546   : > { %10375 = vmatpush2.bf16.msra.mxu1 %v12300_v14  ;;  %v11903_v62 = vcombine.high %v3729_v56, %v3737_v50 }
 0x547   : > { %10418 = vmatpush2.bf16.msra.mxu0 %v11518_v15  ;;  %10376 = vmatprep.subr.bf16.mxu1 %v12285_v44  ;;  %v11710_v15 = vcombine.low %v3537_v1, %v3545_v31  ;;  %v3713_v1 = vld [vmem:[%s12917_s27 + $0x10b0] sm:$0xff] }
 0x548   : > { %10419 = vmatprep.subr.bf16.mxu0 %v11503_v24  ;;  %v11950_v24 = vcombine.low %v3777_v45, %v3785_v6  ;;  %v3721_v31 = vld [vmem:[%s12917_s27 + $0x10f0] sm:$0xff]  ;;  %v11902_v6 = vcombine.low %v3729_v56, %v3737_v50 }
 0x549   : > { %v3657_v56 = vld [vmem:[%s12917_s27 + $0xef0] sm:$0xff] }
 0x54a   : > { %10377 = vmatpush2.bf16.msra.mxu1 %v12284_v33  ;;  %v3505_v33 = vld [vmem:[%s12917_s27 + $0xa30] sm:$0xff] }
 0x54b   : > { %10420 = vmatpush2.bf16.msra.mxu0 %v11502_v54  ;;  %10378 = vmatprep.subr.bf16.mxu1 %v12269_v35  ;;  %v11678_v61 = vcombine.low %v3505_v33, %v3513_v51  ;;  %v3889_v50 = vld [vmem:[%s12917_s27 + $0x1630] sm:$0xff] }
 0x54c   : > { %10421 = vmatprep.subr.bf16.mxu0 %v11487_v36  ;;  %v3745_v36 = vld [vmem:[%s12917_s27 + $0x11b0] sm:$0xff] }
 0x54e   : > { %10379 = vmatpush2.bf16.msra.mxu1 %v12268_v40  ;;  %v11934_v40 = vcombine.low %v3761_v46, %v3769_v59  ;;  %v3449_v46 = vld [vmem:[%s12917_s27 + $0x870] sm:$0xff] }
 0x54f   : > { %10422 = vmatpush2.bf16.msra.mxu0 %v11486_v41  ;;  %10380 = vmatprep.subr.bf16.mxu1 %v12253_v43  ;;  %v11679_v41 = vcombine.high %v3505_v33, %v3513_v51  ;;  %v11919_v43 = vcombine.high %v3745_v36, %v3753_v34  ;;  %v3937_v59 = vld [vmem:[%s12917_s27 + $0x17b0] sm:$0xff] }
 0x550   : > { %10473 = vmatprep.subr.bf16.mxu0 %v11983_v19  ;;  %v3489_v19 = vld [vmem:[%s12917_s27 + $0x9b0] sm:$0xff] }
 0x551   : > { %v11662_v45 = vcombine.low %v3489_v19, %v3497_v48 }
 0x552   : > { %10381 = vmatpush2.bf16.msra.mxu1 %v12252_v7  ;;  %v10179_v5 = vpop.f32.mrf.mxu0  ;;  %10424 = vmatmul.mubr.bf16.vlgmr.msra.gmra.mxu0 %v13088_v52  ;;  %v11918_v7 = vcombine.low %v3745_v36, %v3753_v34  ;;  %v3665_v36 = vld [vmem:[%s12917_s27 + $0xf30] sm:$0xff] }
 0x553   : > { %10474 = vmatpush1.bf16.msra.mxu0 %v11982_v58  ;;  %10505 = vmatprep.mubr.bf16.mxu0 %v13190_v49  ;;  %v11663_v58 = vcombine.high %v3489_v19, %v3497_v48  ;;  %v3673_v34 = vld [vmem:[%s12917_s27 + $0xf70] sm:$0xff] }
 0x554   : > { %v10181_v20 = vpop.f32.mrf.mxu0  ;;  %10432 = vmatprep.subr.bf16.mxu1 %v11727_v0  ;;  %10475 = vmatprep.subr.bf16.mxu0 %v11967_v18  ;;  %v3473_v0 = vld [vmem:[%s12917_s27 + $0x930] sm:$0xff] }
 0x555   : > { %v10138_v27 = vpop.f32.mrf.mxu1  ;;  %10383 = vmatmul.mubr.bf16.vlgmr.msra.gmra.mxu1 %v13248_v4  ;;  %v3481_v18 = vld [vmem:[%s12917_s27 + $0x970] sm:$0xff] }
 0x556   : > { %v10139_v14 = vadd.f32 %v10138_v27, %v10098_v26  ;;  %10433 = vmatpush1.bf16.msra.mxu1 %v11726_v10  ;;  %10464 = vmatprep.mubr.bf16.mxu1 %v13017_v42  ;;  %v10183_v2 = vpop.f32.mrf.mxu0  ;;  %v11647_v9 = vcombine.high %v3473_v0, %v3481_v18  ;;  %v3457_v10 = vld [vmem:[%s12917_s27 + $0x8b0] sm:$0xff] }
 0x557   : > { %v10140_v44 = vpop.f32.mrf.mxu1  ;;  %10476 = vmatpush1.bf16.msra.mxu0 %v11966_v53  ;;  %10434 = vmatprep.subr.bf16.mxu1 %v11711_v12  ;;  %v3465_v53 = vld [vmem:[%s12917_s27 + $0x8f0] sm:$0xff] }
 0x558   : > { %v10141_v25 = vadd.f32 %v10140_v44, %v10100_v13  ;;  %v10184_v22 = vpop.f32.mrf.mxu0  ;;  %10477 = vmatprep.subr.bf16.mxu0 %v11951_v32  ;;  %v14031_v54 = vadd.f32 %v10179_v5, %v10139_v14  ;;  %v11887_v5 = vcombine.high %v3713_v1, %v3721_v31  ;;  %v3697_v12 = vld [vmem:[%s12917_s27 + $0x1030] sm:$0xff]  ;;  %v11886_v32 = vcombine.low %v3713_v1, %v3721_v31 }
 0x559   : > { %v10142_v35 = vpop.f32.mrf.mxu1  ;;  %v3705_v26 = vld [vmem:[%s12917_s27 + $0x1070] sm:$0xff]  ;;  %v11631_v38 = vcombine.high %v3457_v10, %v3465_v53  ;;  %v11630_v14 = vcombine.low %v3457_v10, %v3465_v53 }
 0x55a   : > { %10435 = vmatpush1.bf16.msra.mxu1 %v11710_v15  ;;  %v14035_v39 = vadd.f32 %v10181_v20, %v10141_v25  ;;  %v11646_v20 = vcombine.low %v3473_v0, %v3481_v18  ;;  %v11871_v60 = vcombine.high %v3697_v12, %v3705_v26  ;;  %v3441_v27 = vld [vmem:[%s12917_s27 + $0x830] sm:$0xff]  ;;  %v11870_v2 = vcombine.low %v3697_v12, %v3705_v26 }
 0x55b   : > { %v10143_v47 = vpop.f32.mrf.mxu1  ;;  %10478 = vmatpush1.bf16.msra.mxu0 %v11950_v24  ;;  %10436 = vmatprep.subr.bf16.mxu1 %v11695_v63  ;;  %v3945_v13 = vld [vmem:[%s12917_s27 + $0x17f0] sm:$0xff]  ;;  %v11615_v15 = vcombine.high %v3441_v27, %v3449_v46 }
 0x55c   : > { %10479 = vmatprep.subr.bf16.mxu0 %v11935_v29  ;;  %v12111_v44 = vcombine.high %v3937_v59, %v3945_v13  ;;  %v3681_v24 = vld [vmem:[%s12917_s27 + $0xfb0] sm:$0xff]  ;;  %v11614_v29 = vcombine.low %v3441_v27, %v3449_v46  ;;  %v12110_v33 = vcombine.low %v3937_v59, %v3945_v13 }
 0x55d   : > { %v3689_v63 = vld [vmem:[%s12917_s27 + $0xff0] sm:$0xff] }
 0x55e   : > { %10437 = vmatpush1.bf16.msra.mxu1 %v11694_v37  ;;  %v3921_v25 = vld [vmem:[%s12917_s27 + $0x1730] sm:$0xff]  ;;  %v11855_v51 = vcombine.high %v3681_v24, %v3689_v63 }
 0x55f   : > { %10480 = vmatpush1.bf16.msra.mxu0 %v11934_v40  ;;  %10438 = vmatprep.subr.bf16.mxu1 %v11679_v41  ;;  %v3929_v22 = vld [vmem:[%s12917_s27 + $0x1770] sm:$0xff]  ;;  %v11854_v40 = vcombine.low %v3681_v24, %v3689_v63 }
 0x560   : > { %10481 = vmatprep.subr.bf16.mxu0 %v11919_v43  ;;  %v12095_v35 = vcombine.high %v3921_v25, %v3929_v22  ;;  %v3905_v37 = vld [vmem:[%s12917_s27 + $0x16b0] sm:$0xff]  ;;  %v12094_v41 = vcombine.low %v3921_v25, %v3929_v22  ;;  %v11839_v43 = vcombine.high %v3665_v36, %v3673_v34 }
 0x561   : > { %v3913_v47 = vld [vmem:[%s12917_s27 + $0x16f0] sm:$0xff] }
 0x562   : > { %10439 = vmatpush1.bf16.msra.mxu1 %v11678_v61  ;;  %v12079_v19 = vcombine.high %v3905_v37, %v3913_v47  ;;  %v3649_v48 = vld [vmem:[%s12917_s27 + $0xeb0] sm:$0xff] }
 0x563   : > { %10482 = vmatpush1.bf16.msra.mxu0 %v11918_v7  ;;  %10440 = vmatprep.subr.bf16.mxu1 %v11663_v58  ;;  %v3897_v61 = vld [vmem:[%s12917_s27 + $0x1670] sm:$0xff]  ;;  %v11838_v7 = vcombine.low %v3665_v36, %v3673_v34  ;;  %v12078_v58 = vcombine.low %v3905_v37, %v3913_v47  ;;  %v3298_v47 = vld [vmem:[%s12917_s27 + $0x3b8] sm:$0xff] }
 0x564   : > { %10483 = vmatprep.subr.bf16.mxu0 %v11903_v62  ;;  %v11823_v62 = vcombine.high %v3649_v48, %v3657_v56  ;;  %v12063_v0 = vcombine.high %v3889_v50, %v3897_v61  ;;  %v3633_v18 = vld [vmem:[%s12917_s27 + $0xe30] sm:$0xff] }
 0x565   : > { %v3641_v1 = vld [vmem:[%s12917_s27 + $0xe70] sm:$0xff] }
 0x566   : > { %10441 = vmatpush1.bf16.msra.mxu1 %v11662_v45  ;;  %v3873_v31 = vld [vmem:[%s12917_s27 + $0x15b0] sm:$0xff] }
 0x567   : > { %10484 = vmatpush1.bf16.msra.mxu0 %v11902_v6  ;;  %10442 = vmatprep.subr.bf16.mxu1 %v11647_v9  ;;  %v3881_v45 = vld [vmem:[%s12917_s27 + $0x15f0] sm:$0xff]  ;;  %v11822_v6 = vcombine.low %v3649_v48, %v3657_v56  ;;  %v12062_v9 = vcombine.low %v3889_v50, %v3897_v61  ;;  %v3282_v61 = vld [vmem:[%s12917_s27 + $0x338] sm:$0xff] }
 0x568   : > { %10485 = vmatprep.subr.bf16.mxu0 %v11887_v5  ;;  %v11807_v5 = vcombine.high %v3633_v18, %v3641_v1  ;;  %v12047_v10 = vcombine.high %v3873_v31, %v3881_v45  ;;  %v3617_v53 = vld [vmem:[%s12917_s27 + $0xdb0] sm:$0xff] }
 0x569   : > { %v3625_v12 = vld [vmem:[%s12917_s27 + $0xdf0] sm:$0xff] }
 0x56a   : > { %10443 = vmatpush1.bf16.msra.mxu1 %v11646_v20  ;;  %v3857_v26 = vld [vmem:[%s12917_s27 + $0x1530] sm:$0xff] }
 0x56b   : > { %10486 = vmatpush1.bf16.msra.mxu0 %v11886_v32  ;;  %10444 = vmatprep.subr.bf16.mxu1 %v11631_v38  ;;  %v3865_v20 = vld [vmem:[%s12917_s27 + $0x1570] sm:$0xff]  ;;  %v11806_v32 = vcombine.low %v3633_v18, %v3641_v1  ;;  %v12046_v38 = vcombine.low %v3873_v31, %v3881_v45  ;;  %v3266_v45 = vld [vmem:[%s12917_s27 + $0x2b8] sm:$0xff] }
 0x56c   : > { %10487 = vmatprep.subr.bf16.mxu0 %v11871_v60  ;;  %v11791_v60 = vcombine.high %v3617_v53, %v3625_v12  ;;  %v12031_v27 = vcombine.high %v3857_v26, %v3865_v20  ;;  %v3601_v46 = vld [vmem:[%s12917_s27 + $0xd30] sm:$0xff] }
 0x56d   : > { %v3609_v59 = vld [vmem:[%s12917_s27 + $0xd70] sm:$0xff] }
 0x56e   : > { %10445 = vmatpush1.bf16.msra.mxu1 %v11630_v14  ;;  %v3841_v13 = vld [vmem:[%s12917_s27 + $0x14b0] sm:$0xff] }
 0x56f   : > { %10488 = vmatpush1.bf16.msra.mxu0 %v11870_v2  ;;  %10446 = vmatprep.subr.bf16.mxu1 %v11615_v15  ;;  %v3849_v14 = vld [vmem:[%s12917_s27 + $0x14f0] sm:$0xff]  ;;  %v11790_v2 = vcombine.low %v3617_v53, %v3625_v12  ;;  %v12030_v15 = vcombine.low %v3857_v26, %v3865_v20 }
 0x570   : > { %10489 = vmatprep.subr.bf16.mxu0 %v12111_v44  ;;  %v11775_v44 = vcombine.high %v3601_v46, %v3609_v59  ;;  %v12015_v24 = vcombine.high %v3841_v13, %v3849_v14  ;;  %v3585_v63 = vld [vmem:[%s12917_s27 + $0xcb0] sm:$0xff] }
 0x571   : > { %v3593_v25 = vld [vmem:[%s12917_s27 + $0xcf0] sm:$0xff] }
 0x572   : > { %10447 = vmatpush1.bf16.msra.mxu1 %v11614_v29  ;;  %v3825_v22 = vld [vmem:[%s12917_s27 + $0x1430] sm:$0xff] }
 0x573   : > { %10490 = vmatpush2.bf16.msra.mxu0 %v12110_v33  ;;  %10448 = vmatprep.subr.bf16.mxu1 %v11855_v51  ;;  %v3833_v29 = vld [vmem:[%s12917_s27 + $0x1470] sm:$0xff]  ;;  %v11774_v33 = vcombine.low %v3601_v46, %v3609_v59  ;;  %v12014_v51 = vcombine.low %v3841_v13, %v3849_v14 }
 0x574   : > { %10491 = vmatprep.subr.bf16.mxu0 %v12095_v35  ;;  %v11759_v35 = vcombine.high %v3585_v63, %v3593_v25  ;;  %v11999_v36 = vcombine.high %v3825_v22, %v3833_v29  ;;  %v3569_v34 = vld [vmem:[%s12917_s27 + $0xc30] sm:$0xff] }
 0x575   : > { %v3577_v37 = vld [vmem:[%s12917_s27 + $0xc70] sm:$0xff] }
 0x576   : > { %10449 = vmatpush2.bf16.msra.mxu1 %v11854_v40  ;;  %v3306_v40 = vld [vmem:[%s12917_s27 + $0x3f8] sm:$0xff]  ;;  %v4065_v56 = vld [vmem:[%s12917_s27 + $0x1bb0] sm:$0xff] }
 0x577   : > { %10492 = vmatpush2.bf16.msra.mxu0 %v12094_v41  ;;  %10450 = vmatprep.subr.bf16.mxu1 %v11839_v43  ;;  %v11758_v41 = vcombine.low %v3585_v63, %v3593_v25  ;;  %v11998_v43 = vcombine.low %v3825_v22, %v3833_v29  ;;  %v11473_v48 = vcombine.high %v3298_v47, %v3306_v40  ;;  %v4073_v50 = vld [vmem:[%s12917_s27 + $0x1bf0] sm:$0xff]  ;;  %v3234_v22 = vld [vmem:[%s12917_s27 + $0x1b8] sm:$0xff] }
 0x578   : > { %10493 = vmatprep.subr.bf16.mxu0 %v12079_v19  ;;  %v11743_v19 = vcombine.high %v3569_v34, %v3577_v37  ;;  %v4049_v1 = vld [vmem:[%s12917_s27 + $0x1b30] sm:$0xff]  ;;  %v3242_v29 = vld [vmem:[%s12917_s27 + $0x1f8] sm:$0xff] }
 0x579   : > { %v4057_v31 = vld [vmem:[%s12917_s27 + $0x1b70] sm:$0xff] }
 0x57a   : > { %10451 = vmatpush2.bf16.msra.mxu1 %v11838_v7  ;;  %v3290_v7 = vld [vmem:[%s12917_s27 + $0x378] sm:$0xff]  ;;  %v12223_v53 = vcombine.high %v4049_v1, %v4057_v31  ;;  %v4033_v20 = vld [vmem:[%s12917_s27 + $0x1ab0] sm:$0xff]  ;;  %v12222_v59 = vcombine.low %v4049_v1, %v4057_v31 }
 0x57b   : > { %10494 = vmatpush2.bf16.msra.mxu0 %v12078_v58  ;;  %10452 = vmatprep.subr.bf16.mxu1 %v11823_v62  ;;  %v11742_v58 = vcombine.low %v3569_v34, %v3577_v37  ;;  %v11472_v62 = vcombine.low %v3298_v47, %v3306_v40  ;;  %v11457_v18 = vcombine.high %v3282_v61, %v3290_v7  ;;  %v4017_v63 = vld [vmem:[%s12917_s27 + $0x1a30] sm:$0xff] }
 0x57c   : > { %10495 = vmatprep.subr.bf16.mxu0 %v12063_v0  ;;  %v12239_v0 = vcombine.high %v4065_v56, %v4073_v50  ;;  %v4025_v25 = vld [vmem:[%s12917_s27 + $0x1a70] sm:$0xff]  ;;  %v11409_v47 = vcombine.high %v3234_v22, %v3242_v29 }
 0x57d   : > { %v12191_v34 = vcombine.high %v4017_v63, %v4025_v25  ;;  %v4001_v40 = vld [vmem:[%s12917_s27 + $0x19b0] sm:$0xff] }
 0x57e   : > { %10453 = vmatpush2.bf16.msra.mxu1 %v11822_v6  ;;  %v3274_v6 = vld [vmem:[%s12917_s27 + $0x2f8] sm:$0xff] }
 0x57f   : > { %10496 = vmatpush2.bf16.msra.mxu0 %v12062_v9  ;;  %10454 = vmatprep.subr.bf16.mxu1 %v11807_v5  ;;  %v12238_v5 = vcombine.low %v4065_v56, %v4073_v50  ;;  %v11441_v26 = vcombine.high %v3266_v45, %v3274_v6  ;;  %v11440_v14 = vcombine.low %v3266_v45, %v3274_v6  ;;  %v3969_v6 = vld [vmem:[%s12917_s27 + $0x18b0] sm:$0xff] }
 0x580   : > { %10497 = vmatprep.subr.bf16.mxu0 %v12047_v10  ;;  %v11456_v10 = vcombine.low %v3282_v61, %v3290_v7  ;;  %v11408_v56 = vcombine.low %v3234_v22, %v3242_v29  ;;  %v3985_v7 = vld [vmem:[%s12917_s27 + $0x1930] sm:$0xff] }
 0x582   : > { %10455 = vmatpush2.bf16.msra.mxu1 %v11806_v32  ;;  %v4041_v32 = vld [vmem:[%s12917_s27 + $0x1af0] sm:$0xff] }
 0x583   : > { %10498 = vmatpush2.bf16.msra.mxu0 %v12046_v38  ;;  %10456 = vmatprep.subr.bf16.mxu1 %v11791_v60  ;;  %v3250_v60 = vld [vmem:[%s12917_s27 + $0x238] sm:$0xff] }
 0x584   : > { %10499 = vmatprep.subr.bf16.mxu0 %v12031_v27  ;;  %v3258_v27 = vld [vmem:[%s12917_s27 + $0x278] sm:$0xff] }
 0x586   : > { %10457 = vmatpush2.bf16.msra.mxu1 %v11790_v2  ;;  %v12207_v2 = vcombine.high %v4033_v20, %v4041_v32 }
 0x587   : > { %10500 = vmatpush2.bf16.msra.mxu0 %v12030_v15  ;;  %10458 = vmatprep.subr.bf16.mxu1 %v11775_v44 }
 0x588   : > { %10501 = vmatprep.subr.bf16.mxu0 %v12015_v24  ;;  %v11425_v24 = vcombine.high %v3250_v60, %v3258_v27 }
 0x58a   : > { %10459 = vmatpush2.bf16.msra.mxu1 %v11774_v33 }
 0x58b   : > { %10502 = vmatpush2.bf16.msra.mxu0 %v12014_v51  ;;  %10460 = vmatprep.subr.bf16.mxu1 %v11759_v35  ;;  %v12206_v35 = vcombine.low %v4033_v20, %v4041_v32 }
 0x58c   : > { %10503 = vmatprep.subr.bf16.mxu0 %v11999_v36 }
 0x58e   : > { %10461 = vmatpush2.bf16.msra.mxu1 %v11758_v41  ;;  %v4009_v41 = vld [vmem:[%s12917_s27 + $0x19f0] sm:$0xff] }
 0x58f   : > { %10504 = vmatpush2.bf16.msra.mxu0 %v11998_v43  ;;  %10462 = vmatprep.subr.bf16.mxu1 %v11743_v19  ;;  %v3218_v43 = vld [vmem:[%s12917_s27 + $0x138] sm:$0xff]  ;;  %v12175_v50 = vcombine.high %v4001_v40, %v4009_v41 }
 0x590   : > { %10555 = vmatprep.subr.bf16.mxu0 %v11473_v48  ;;  %v3226_v19 = vld [vmem:[%s12917_s27 + $0x178] sm:$0xff]  ;;  %v12190_v48 = vcombine.low %v4017_v63, %v4025_v25 }
 0x591   : > { %v11393_v61 = vcombine.high %v3218_v43, %v3226_v19  ;;  %v11392_v1 = vcombine.low %v3218_v43, %v3226_v19  ;;  %v3418_v63 = vld [vmem:[%s12917_s27 + $0x778] sm:$0xff] }
 0x592   : > { %10463 = vmatpush2.bf16.msra.mxu1 %v11742_v58  ;;  %v14093_v9 = vpop.f32.mrf.mxu0  ;;  %10506 = vmatmul.mubr.bf16.vlgmr.msra.gmra.mxu0 %v13192_v57  ;;  %v3993_v58 = vld [vmem:[%s12917_s27 + $0x1970] sm:$0xff]  ;;  %v3378_v43 = vld [vmem:[%s12917_s27 + $0x638] sm:$0xff] }
 0x593   : > { %10556 = vmatpush1.bf16.msra.mxu0 %v11472_v62  ;;  %10587 = vmatprep.mubr.bf16.mxu0 %v13001_v21  ;;  %v3202_v62 = vld [vmem:[%s12917_s27 + $0xb8] sm:$0xff]  ;;  %v12159_v31 = vcombine.high %v3985_v7, %v3993_v58 }
 0x594   : > { %v14097_v12 = vpop.f32.mrf.mxu0  ;;  %10514 = vmatprep.subr.bf16.mxu1 %v12239_v0  ;;  %10557 = vmatprep.subr.bf16.mxu0 %v11457_v18  ;;  %v3210_v0 = vld [vmem:[%s12917_s27 + $0xf8] sm:$0xff]  ;;  %v12174_v18 = vcombine.low %v4001_v40, %v4009_v41  ;;  %v4161_v40 = vld [vmem:[%s12917_s27 + $0x1eb0] sm:$0xff] }
 0x595   : > { %v10220_v38 = vpop.f32.mrf.mxu1  ;;  %10465 = vmatmul.mubr.bf16.vlgmr.msra.gmra.mxu1 %v13090_v23  ;;  %v11377_v45 = vcombine.high %v3202_v62, %v3210_v0  ;;  %v11376_v20 = vcombine.low %v3202_v62, %v3210_v0  ;;  %v4169_v41 = vld [vmem:[%s12917_s27 + $0x1ef0] sm:$0xff]  ;;  %v3386_v19 = vld [vmem:[%s12917_s27 + $0x678] sm:$0xff] }
 0x596   : > { %v10221_v46 = vadd.f32 %v10220_v38, %v14031_v54  ;;  %10515 = vmatpush1.bf16.msra.mxu1 %v12238_v5  ;;  %10546 = vmatprep.mubr.bf16.mxu1 %v13243_v30  ;;  %v10265_v21 = vpop.f32.mrf.mxu0  ;;  %v3977_v5 = vld [vmem:[%s12917_s27 + $0x18f0] sm:$0xff]  ;;  %v3362_v62 = vld [vmem:[%s12917_s27 + $0x5b8] sm:$0xff] }
 0x597   : > { %v10222_v13 = vpop.f32.mrf.mxu1  ;;  %10558 = vmatpush1.bf16.msra.mxu0 %v11456_v10  ;;  %10516 = vmatprep.subr.bf16.mxu1 %v12223_v53  ;;  %v3186_v10 = vld [vmem:[%s12917_s27 + $0x38] sm:$0xff]  ;;  %v12143_v32 = vcombine.high %v3969_v6, %v3977_v5 }
 0x598   : > { %v10223_v15 = vadd.f32 %v10222_v13, %v14035_v39  ;;  %v10266_v44 = vpop.f32.mrf.mxu0  ;;  %10559 = vmatprep.subr.bf16.mxu0 %v11441_v26  ;;  %v10727_v33 = vmax.f32 %v10221_v46, 0.0  ;;  %v11424_v39 = vcombine.low %v3250_v60, %v3258_v27  ;;  %v3194_v53 = vld [vmem:[%s12917_s27 + $0x78] sm:$0xff]  ;;  %v12158_v26 = vcombine.low %v3985_v7, %v3993_v58  ;;  %v3953_v60 = vld [vmem:[%s12917_s27 + $0x1830] sm:$0xff] }
 0x599   : > { %v10224_v54 = vpop.f32.mrf.mxu1  ;;  %v11361_v38 = vcombine.high %v3186_v10, %v3194_v53  ;;  %v3961_v27 = vld [vmem:[%s12917_s27 + $0x1870] sm:$0xff]  ;;  %v3426_v46 = vld [vmem:[%s12917_s27 + $0x7b8] sm:$0xff]  ;;  %v11360_v13 = vcombine.low %v3186_v10, %v3194_v53 }
 0x59a   : > { %v10728_v51 = vmax.f32 %v10223_v15, 0.0  ;;  %10517 = vmatpush1.bf16.msra.mxu1 %v12222_v59  ;;  %v3434_v21 = vld [vmem:[%s12917_s27 + $0x7f8] sm:$0xff]  ;;  %v12142_v59 = vcombine.low %v3969_v6, %v3977_v5  ;;  %v4193_v15 = vld [vmem:[%s12917_s27 + $0x1fb0] sm:$0xff]  ;;  %v12126_v25 = vcombine.low %v3953_v60, %v3961_v27 }
 0x59b   : > { %v10225_v36 = vpop.f32.mrf.mxu1  ;;  %10560 = vmatpush1.bf16.msra.mxu0 %v11440_v14  ;;  %10518 = vmatprep.subr.bf16.mxu1 %v12207_v2  ;;  %v12127_v14 = vcombine.high %v3953_v60, %v3961_v27  ;;  %v11601_v2 = vcombine.high %v3426_v46, %v3434_v21  ;;  %v4201_v44 = vld [vmem:[%s12917_s27 + $0x1ff0] sm:$0xff]  ;;  %v11600_v54 = vcombine.low %v3426_v46, %v3434_v21  ;;  %v3370_v0 = vld [vmem:[%s12917_s27 + $0x5f8] sm:$0xff] }
 0x59c   : > { %v12389_v37 = vpack.c.bf16 %v10728_v51, %v10727_v33  ;;  %10561 = vmatprep.subr.bf16.mxu0 %v11425_v24  ;;  %v3410_v24 = vld [vmem:[%s12917_s27 + $0x738] sm:$0xff]  ;;  %v12367_v22 = vcombine.high %v4193_v15, %v4201_v44  ;;  %v4177_v33 = vld [vmem:[%s12917_s27 + $0x1f30] sm:$0xff] }
 0x59d   : > { %v11585_v29 = vcombine.high %v3410_v24, %v3418_v63  ;;  %v4185_v51 = vld [vmem:[%s12917_s27 + $0x1f70] sm:$0xff]  ;;  %v3402_v36 = vld [vmem:[%s12917_s27 + $0x6f8] sm:$0xff] }
 0x59e   : > { %10803 = vst [vmem:[%s13496_s10 + $0x20] sm:$0xff] %v12389_v37  ;;  %10519 = vmatpush1.bf16.msra.mxu1 %v12206_v35  ;;  %v3394_v35 = vld [vmem:[%s12917_s27 + $0x6b8] sm:$0xff]  ;;  %v12351_v37 = vcombine.high %v4177_v33, %v4185_v51  ;;  %v4145_v7 = vld [vmem:[%s12917_s27 + $0x1e30] sm:$0xff] }
 0x59f   : > { %10562 = vmatpush1.bf16.msra.mxu0 %v11424_v39  ;;  %10520 = vmatprep.subr.bf16.mxu1 %v12191_v34  ;;  %v12366_v39 = vcombine.low %v4193_v15, %v4201_v44  ;;  %v11584_v34 = vcombine.low %v3410_v24, %v3418_v63  ;;  %v4153_v58 = vld [vmem:[%s12917_s27 + $0x1e70] sm:$0xff]  ;;  %v3346_v10 = vld [vmem:[%s12917_s27 + $0x538] sm:$0xff] }
 0x5a0   : > { %10563 = vmatprep.subr.bf16.mxu0 %v11409_v47  ;;  %v11569_v47 = vcombine.high %v3394_v35, %v3402_v36  ;;  %v4129_v6 = vld [vmem:[%s12917_s27 + $0x1db0] sm:$0xff]  ;;  %v3354_v53 = vld [vmem:[%s12917_s27 + $0x578] sm:$0xff] }
 0x5a1   : > { %v4137_v5 = vld [vmem:[%s12917_s27 + $0x1df0] sm:$0xff]  ;;  %v3330_v46 = vld [vmem:[%s12917_s27 + $0x4b8] sm:$0xff] }
 0x5a2   : > { %10521 = vmatpush1.bf16.msra.mxu1 %v12190_v48  ;;  %v12350_v48 = vcombine.low %v4177_v33, %v4185_v51  ;;  %v4113_v60 = vld [vmem:[%s12917_s27 + $0x1d30] sm:$0xff]  ;;  %v3338_v21 = vld [vmem:[%s12917_s27 + $0x4f8] sm:$0xff] }
 0x5a3   : > { %10564 = vmatpush1.bf16.msra.mxu0 %v11408_v56  ;;  %10522 = vmatprep.subr.bf16.mxu1 %v12175_v50  ;;  %v11568_v56 = vcombine.low %v3394_v35, %v3402_v36  ;;  %v12335_v50 = vcombine.high %v4161_v40, %v4169_v41  ;;  %v4121_v27 = vld [vmem:[%s12917_s27 + $0x1d70] sm:$0xff]  ;;  %v3314_v24 = vld [vmem:[%s12917_s27 + $0x438] sm:$0xff] }
 0x5a4   : > { %10565 = vmatprep.subr.bf16.mxu0 %v11393_v61  ;;  %v11553_v61 = vcombine.high %v3378_v43, %v3386_v19  ;;  %v4097_v15 = vld [vmem:[%s12917_s27 + $0x1cb0] sm:$0xff]  ;;  %v3322_v63 = vld [vmem:[%s12917_s27 + $0x478] sm:$0xff] }
 0x5a5   : > { %v4105_v44 = vld [vmem:[%s12917_s27 + $0x1cf0] sm:$0xff]  ;;  %v3810_v35 = vld [vmem:[%s12917_s27 + $0x13b8] sm:$0xff] }
 0x5a6   : > { %10523 = vmatpush1.bf16.msra.mxu1 %v12174_v18  ;;  %v12334_v18 = vcombine.low %v4161_v40, %v4169_v41  ;;  %v4081_v33 = vld [vmem:[%s12917_s27 + $0x1c30] sm:$0xff]  ;;  %v3818_v36 = vld [vmem:[%s12917_s27 + $0x13f8] sm:$0xff] }
 0x5a7   : > { %10566 = vmatpush1.bf16.msra.mxu0 %v11392_v1  ;;  %10524 = vmatprep.subr.bf16.mxu1 %v12159_v31  ;;  %v11552_v1 = vcombine.low %v3378_v43, %v3386_v19  ;;  %v12319_v31 = vcombine.high %v4145_v7, %v4153_v58  ;;  %v4089_v51 = vld [vmem:[%s12917_s27 + $0x1c70] sm:$0xff]  ;;  %v3554_v40 = vld [vmem:[%s12917_s27 + $0xbb8] sm:$0xff] }
 0x5a8   : > { %10567 = vmatprep.subr.bf16.mxu0 %v11377_v45  ;;  %v11537_v45 = vcombine.high %v3362_v62, %v3370_v0  ;;  %v3562_v41 = vld [vmem:[%s12917_s27 + $0xbf8] sm:$0xff] }
 0x5a9   : > { %v3794_v43 = vld [vmem:[%s12917_s27 + $0x1338] sm:$0xff] }
 0x5aa   : > { %10525 = vmatpush1.bf16.msra.mxu1 %v12158_v26  ;;  %v12318_v26 = vcombine.low %v4145_v7, %v4153_v58  ;;  %v3802_v19 = vld [vmem:[%s12917_s27 + $0x1378] sm:$0xff] }
 0x5ab   : > { %10568 = vmatpush1.bf16.msra.mxu0 %v11376_v20  ;;  %10526 = vmatprep.subr.bf16.mxu1 %v12143_v32  ;;  %v11536_v20 = vcombine.low %v3362_v62, %v3370_v0  ;;  %v12303_v32 = vcombine.high %v4129_v6, %v4137_v5  ;;  %v11969_v7 = vcombine.high %v3794_v43, %v3802_v19  ;;  %v3538_v58 = vld [vmem:[%s12917_s27 + $0xb38] sm:$0xff] }
 0x5ac   : > { %10569 = vmatprep.subr.bf16.mxu0 %v11361_v38  ;;  %v11521_v38 = vcombine.high %v3346_v10, %v3354_v53  ;;  %v3546_v62 = vld [vmem:[%s12917_s27 + $0xb78] sm:$0xff] }
 0x5ad   : > { %v3778_v0 = vld [vmem:[%s12917_s27 + $0x12b8] sm:$0xff] }
 0x5ae   : > { %10527 = vmatpush1.bf16.msra.mxu1 %v12142_v59  ;;  %v12302_v59 = vcombine.low %v4129_v6, %v4137_v5  ;;  %v11713_v6 = vcombine.high %v3538_v58, %v3546_v62 }
 0x5af   : > { %10570 = vmatpush1.bf16.msra.mxu0 %v11360_v13  ;;  %10528 = vmatprep.subr.bf16.mxu1 %v12127_v14  ;;  %v11520_v13 = vcombine.low %v3346_v10, %v3354_v53  ;;  %v12287_v14 = vcombine.high %v4113_v60, %v4121_v27 }
 0x5b0   : > { %10571 = vmatprep.subr.bf16.mxu0 %v11601_v2  ;;  %v11505_v2 = vcombine.high %v3330_v46, %v3338_v21 }
 0x5b2   : > { %10529 = vmatpush1.bf16.msra.mxu1 %v12126_v25  ;;  %v12286_v25 = vcombine.low %v4113_v60, %v4121_v27 }
 0x5b3   : > { %10572 = vmatpush2.bf16.msra.mxu0 %v11600_v54  ;;  %10530 = vmatprep.subr.bf16.mxu1 %v12367_v22  ;;  %v11504_v54 = vcombine.low %v3330_v46, %v3338_v21  ;;  %v12271_v22 = vcombine.high %v4097_v15, %v4105_v44 }
 0x5b4   : > { %10573 = vmatprep.subr.bf16.mxu0 %v11585_v29  ;;  %v11489_v29 = vcombine.high %v3314_v24, %v3322_v63 }
 0x5b6   : > { %10531 = vmatpush2.bf16.msra.mxu1 %v12366_v39  ;;  %v12270_v39 = vcombine.low %v4097_v15, %v4105_v44  ;;  %v3746_v15 = vld [vmem:[%s12917_s27 + $0x11b8] sm:$0xff] }
 0x5b7   : > { %10574 = vmatpush2.bf16.msra.mxu0 %v11584_v34  ;;  %10532 = vmatprep.subr.bf16.mxu1 %v12351_v37  ;;  %v11488_v34 = vcombine.low %v3314_v24, %v3322_v63  ;;  %v12255_v37 = vcombine.high %v4081_v33, %v4089_v51  ;;  %v3754_v44 = vld [vmem:[%s12917_s27 + $0x11f8] sm:$0xff] }
 0x5b8   : > { %10575 = vmatprep.subr.bf16.mxu0 %v11569_v47  ;;  %v11985_v47 = vcombine.high %v3810_v35, %v3818_v36 }
 0x5ba   : > { %10533 = vmatpush2.bf16.msra.mxu1 %v12350_v48  ;;  %v12254_v48 = vcombine.low %v4081_v33, %v4089_v51  ;;  %v3490_v33 = vld [vmem:[%s12917_s27 + $0x9b8] sm:$0xff] }
 0x5bb   : > { %10576 = vmatpush2.bf16.msra.mxu0 %v11568_v56  ;;  %10534 = vmatprep.subr.bf16.mxu1 %v12335_v50  ;;  %v11984_v56 = vcombine.low %v3810_v35, %v3818_v36  ;;  %v4250_v50 = vrot.slane %v14005_v28, %v13061_v11  ;;  %v11968_v11 = vcombine.low %v3794_v43, %v3802_v19  ;;  %v3498_v51 = vld [vmem:[%s12917_s27 + $0x9f8] sm:$0xff] }
 0x5bc   : > { %10577 = vmatprep.subr.bf16.mxu0 %v11553_v61  ;;  %v11729_v61 = vcombine.high %v3554_v40, %v3562_v41  ;;  %v3730_v35 = vld [vmem:[%s12917_s27 + $0x1138] sm:$0xff] }
 0x5bd   : > { %v10262_v5 = vadd.f32 %v14093_v9, %v4250_v50  ;;  %v3738_v36 = vld [vmem:[%s12917_s27 + $0x1178] sm:$0xff] }
 0x5be   : > { %10535 = vmatpush2.bf16.msra.mxu1 %v12334_v18  ;;  %v3786_v18 = vld [vmem:[%s12917_s27 + $0x12f8] sm:$0xff] }
 0x5bf   : > { %10578 = vmatpush2.bf16.msra.mxu0 %v11552_v1  ;;  %10536 = vmatprep.subr.bf16.mxu1 %v12319_v31  ;;  %v4254_v1 = vrot.slane %v14005_v28, %v12989_v3  ;;  %v11953_v53 = vcombine.high %v3778_v0, %v3786_v18  ;;  %v3530_v3 = vld [vmem:[%s12917_s27 + $0xaf8] sm:$0xff]  ;;  %v11952_v27 = vcombine.low %v3778_v0, %v3786_v18 }
 0x5c0   : > { %10579 = vmatprep.subr.bf16.mxu0 %v11537_v45  ;;  %v11728_v45 = vcombine.low %v3554_v40, %v3562_v41  ;;  %v3474_v40 = vld [vmem:[%s12917_s27 + $0x938] sm:$0xff] }
 0x5c1   : > { %v3482_v41 = vld [vmem:[%s12917_s27 + $0x978] sm:$0xff] }
 0x5c2   : > { %10537 = vmatpush2.bf16.msra.mxu1 %v12318_v26  ;;  %v3522_v26 = vld [vmem:[%s12917_s27 + $0xab8] sm:$0xff]  ;;  %v11649_v50 = vcombine.high %v3474_v40, %v3482_v41  ;;  %v11648_v18 = vcombine.low %v3474_v40, %v3482_v41 }
 0x5c3   : > { %10580 = vmatpush2.bf16.msra.mxu0 %v11536_v20  ;;  %10538 = vmatprep.subr.bf16.mxu1 %v12303_v32  ;;  %v3762_v20 = vld [vmem:[%s12917_s27 + $0x1238] sm:$0xff]  ;;  %v10264_v32 = vadd.f32 %v14097_v12, %v4254_v1  ;;  %v11697_v46 = vcombine.high %v3522_v26, %v3530_v3  ;;  %v11696_v24 = vcombine.low %v3522_v26, %v3530_v3 }
 0x5c4   : > { %10581 = vmatprep.subr.bf16.mxu0 %v11521_v38  ;;  %v11712_v38 = vcombine.low %v3538_v58, %v3546_v62  ;;  %v3514_v12 = vld [vmem:[%s12917_s27 + $0xa78] sm:$0xff] }
 0x5c5   : > { %v3714_v43 = vld [vmem:[%s12917_s27 + $0x10b8] sm:$0xff] }
 0x5c6   : > { %10539 = vmatpush2.bf16.msra.mxu1 %v12302_v59  ;;  %v3722_v19 = vld [vmem:[%s12917_s27 + $0x10f8] sm:$0xff] }
 0x5c7   : > { %10582 = vmatpush2.bf16.msra.mxu0 %v11520_v13  ;;  %10540 = vmatprep.subr.bf16.mxu1 %v12287_v14  ;;  %v3506_v14 = vld [vmem:[%s12917_s27 + $0xa38] sm:$0xff]  ;;  %v11888_v1 = vcombine.low %v3714_v43, %v3722_v19 }
 0x5c8   : > { %10583 = vmatprep.subr.bf16.mxu0 %v11505_v2  ;;  %v3466_v58 = vld [vmem:[%s12917_s27 + $0x8f8] sm:$0xff] }
 0x5c9   : > { %v3698_v62 = vld [vmem:[%s12917_s27 + $0x1038] sm:$0xff] }
 0x5ca   : > { %10541 = vmatpush2.bf16.msra.mxu1 %v12286_v25  ;;  %v3706_v0 = vld [vmem:[%s12917_s27 + $0x1078] sm:$0xff] }
 0x5cb   : > { %10584 = vmatpush2.bf16.msra.mxu0 %v11504_v54  ;;  %10542 = vmatprep.subr.bf16.mxu1 %v12271_v22  ;;  %v11681_v22 = vcombine.high %v3506_v14, %v3514_v12  ;;  %v11872_v26 = vcombine.low %v3698_v62, %v3706_v0 }
 0x5cc   : > { %10585 = vmatprep.subr.bf16.mxu0 %v11489_v29  ;;  %v11921_v29 = vcombine.high %v3746_v15, %v3754_v44 }
 0x5ce   : > { %10543 = vmatpush2.bf16.msra.mxu1 %v12270_v39  ;;  %v11680_v39 = vcombine.low %v3506_v14, %v3514_v12 }
 0x5cf   : > { %10586 = vmatpush2.bf16.msra.mxu0 %v11488_v34  ;;  %10544 = vmatprep.subr.bf16.mxu1 %v12255_v37  ;;  %v11920_v34 = vcombine.low %v3746_v15, %v3754_v44  ;;  %v11665_v37 = vcombine.high %v3490_v33, %v3498_v51  ;;  %v3650_v44 = vld [vmem:[%s12917_s27 + $0xeb8] sm:$0xff] }
 0x5d0   : > { %10637 = vmatprep.subr.bf16.mxu0 %v11985_v47  ;;  %v11905_v47 = vcombine.high %v3730_v35, %v3738_v36 }
 0x5d2   : > { %10545 = vmatpush2.bf16.msra.mxu1 %v12254_v48  ;;  %v10343_v31 = vpop.f32.mrf.mxu0  ;;  %10588 = vmatmul.mubr.bf16.vlgmr.msra.gmra.mxu0 %v13088_v52  ;;  %v3770_v52 = vld [vmem:[%s12917_s27 + $0x1278] sm:$0xff]  ;;  %v11664_v48 = vcombine.low %v3490_v33, %v3498_v51 }
 0x5d3   : > { %10638 = vmatpush1.bf16.msra.mxu0 %v11984_v56  ;;  %10669 = vmatprep.mubr.bf16.mxu0 %v13190_v49  ;;  %v11937_v13 = vcombine.high %v3762_v20, %v3770_v52  ;;  %v11936_v54 = vcombine.low %v3762_v20, %v3770_v52  ;;  %v11904_v56 = vcombine.low %v3730_v35, %v3738_v36  ;;  %v3682_v20 = vld [vmem:[%s12917_s27 + $0xfb8] sm:$0xff] }
 0x5d4   : > { %v10345_v10 = vpop.f32.mrf.mxu0  ;;  %10596 = vmatprep.subr.bf16.mxu1 %v11729_v61  ;;  %10639 = vmatprep.subr.bf16.mxu0 %v11969_v7  ;;  %v11889_v61 = vcombine.high %v3714_v43, %v3722_v19  ;;  %v3458_v7 = vld [vmem:[%s12917_s27 + $0x8b8] sm:$0xff] }
 0x5d5   : > { %v10302_v28 = vpop.f32.mrf.mxu1  ;;  %10547 = vmatmul.mubr.bf16.vlgmr.msra.gmra.mxu1 %v13248_v4  ;;  %v3690_v52 = vld [vmem:[%s12917_s27 + $0xff8] sm:$0xff] }
 0x5d6   : > { %v10303_v49 = vadd.f32 %v10302_v28, %v10262_v5  ;;  %10597 = vmatpush1.bf16.msra.mxu1 %v11728_v45  ;;  %10628 = vmatprep.mubr.bf16.mxu1 %v13017_v42  ;;  %v10347_v9 = vpop.f32.mrf.mxu0  ;;  %v11873_v45 = vcombine.high %v3698_v62, %v3706_v0  ;;  %v3938_v5 = vld [vmem:[%s12917_s27 + $0x17b8] sm:$0xff]  ;;  %v11856_v14 = vcombine.low %v3682_v20, %v3690_v52 }
 0x5d7   : > { %v10304_v60 = vpop.f32.mrf.mxu1  ;;  %10640 = vmatpush1.bf16.msra.mxu0 %v11968_v11  ;;  %10598 = vmatprep.subr.bf16.mxu1 %v11713_v6  ;;  %v3442_v11 = vld [vmem:[%s12917_s27 + $0x838] sm:$0xff] }
 0x5d8   : > { %v10305_v21 = vadd.f32 %v10304_v60, %v10264_v32  ;;  %v10348_v59 = vpop.f32.mrf.mxu0  ;;  %10641 = vmatprep.subr.bf16.mxu0 %v11953_v53  ;;  %v14184_v2 = vadd.f32 %v10343_v31, %v10303_v49  ;;  %v11633_v31 = vcombine.high %v3458_v7, %v3466_v58  ;;  %v3450_v6 = vld [vmem:[%s12917_s27 + $0x878] sm:$0xff]  ;;  %v11632_v53 = vcombine.low %v3458_v7, %v3466_v58 }
 0x5d9   : > { %v10306_v42 = vpop.f32.mrf.mxu1  ;;  %v11617_v3 = vcombine.high %v3442_v11, %v3450_v6  ;;  %v3922_v32 = vld [vmem:[%s12917_s27 + $0x1738] sm:$0xff]  ;;  %v11616_v9 = vcombine.low %v3442_v11, %v3450_v6  ;;  %v11857_v60 = vcombine.high %v3682_v20, %v3690_v52 }
 0x5da   : > { %10599 = vmatpush1.bf16.msra.mxu1 %v11712_v38  ;;  %v14188_v63 = vadd.f32 %v10345_v10, %v10305_v21  ;;  %v3946_v10 = vld [vmem:[%s12917_s27 + $0x17f8] sm:$0xff] }
 0x5db   : > { %v10307_v25 = vpop.f32.mrf.mxu1  ;;  %10642 = vmatpush1.bf16.msra.mxu0 %v11952_v27  ;;  %10600 = vmatprep.subr.bf16.mxu1 %v11697_v46  ;;  %v12113_v28 = vcombine.high %v3938_v5, %v3946_v10  ;;  %v3930_v49 = vld [vmem:[%s12917_s27 + $0x1778] sm:$0xff]  ;;  %v12112_v38 = vcombine.low %v3938_v5, %v3946_v10 }
 0x5dc   : > { %10643 = vmatprep.subr.bf16.mxu0 %v11937_v13  ;;  %v12097_v27 = vcombine.high %v3922_v32, %v3930_v49  ;;  %v3666_v46 = vld [vmem:[%s12917_s27 + $0xf38] sm:$0xff]  ;;  %v12096_v12 = vcombine.low %v3922_v32, %v3930_v49 }
 0x5dd   : > { %v3674_v21 = vld [vmem:[%s12917_s27 + $0xf78] sm:$0xff] }
 0x5de   : > { %10601 = vmatpush1.bf16.msra.mxu1 %v11696_v24  ;;  %v3906_v59 = vld [vmem:[%s12917_s27 + $0x16b8] sm:$0xff]  ;;  %v11841_v42 = vcombine.high %v3666_v46, %v3674_v21 }
 0x5df   : > { %10644 = vmatpush1.bf16.msra.mxu0 %v11936_v54  ;;  %10602 = vmatprep.subr.bf16.mxu1 %v11681_v22  ;;  %v3914_v13 = vld [vmem:[%s12917_s27 + $0x16f8] sm:$0xff]  ;;  %v11840_v22 = vcombine.low %v3666_v46, %v3674_v21 }
 0x5e0   : > { %10645 = vmatprep.subr.bf16.mxu0 %v11921_v29  ;;  %v12081_v15 = vcombine.high %v3906_v59, %v3914_v13  ;;  %v3658_v24 = vld [vmem:[%s12917_s27 + $0xef8] sm:$0xff]  ;;  %v12080_v29 = vcombine.low %v3906_v59, %v3914_v13 }
 0x5e1   : > { %v3890_v25 = vld [vmem:[%s12917_s27 + $0x1638] sm:$0xff]  ;;  %v11825_v33 = vcombine.high %v3650_v44, %v3658_v24 }
 0x5e2   : > { %10603 = vmatpush1.bf16.msra.mxu1 %v11680_v39  ;;  %v3898_v54 = vld [vmem:[%s12917_s27 + $0x1678] sm:$0xff] }
 0x5e3   : > { %10646 = vmatpush1.bf16.msra.mxu0 %v11920_v34  ;;  %10604 = vmatprep.subr.bf16.mxu1 %v11665_v37  ;;  %v12065_v51 = vcombine.high %v3890_v25, %v3898_v54  ;;  %v3634_v35 = vld [vmem:[%s12917_s27 + $0xe38] sm:$0xff]  ;;  %v11824_v37 = vcombine.low %v3650_v44, %v3658_v24 }
 0x5e4   : > { %10647 = vmatprep.subr.bf16.mxu0 %v11905_v47  ;;  %v3642_v36 = vld [vmem:[%s12917_s27 + $0xe78] sm:$0xff]  ;;  %v12064_v47 = vcombine.low %v3890_v25, %v3898_v54 }
 0x5e5   : > { %v3874_v39 = vld [vmem:[%s12917_s27 + $0x15b8] sm:$0xff]  ;;  %v11809_v40 = vcombine.high %v3634_v35, %v3642_v36 }
 0x5e6   : > { %10605 = vmatpush1.bf16.msra.mxu1 %v11664_v48  ;;  %v3882_v34 = vld [vmem:[%s12917_s27 + $0x15f8] sm:$0xff] }
 0x5e7   : > { %10648 = vmatpush1.bf16.msra.mxu0 %v11904_v56  ;;  %10606 = vmatprep.subr.bf16.mxu1 %v11649_v50  ;;  %v12049_v41 = vcombine.high %v3874_v39, %v3882_v34  ;;  %v3618_v43 = vld [vmem:[%s12917_s27 + $0xdb8] sm:$0xff]  ;;  %v11808_v50 = vcombine.low %v3634_v35, %v3642_v36 }
 0x5e8   : > { %10649 = vmatprep.subr.bf16.mxu0 %v11889_v61  ;;  %v3626_v19 = vld [vmem:[%s12917_s27 + $0xdf8] sm:$0xff]  ;;  %v12048_v61 = vcombine.low %v3874_v39, %v3882_v34 }
 0x5e9   : > { %v3858_v48 = vld [vmem:[%s12917_s27 + $0x1538] sm:$0xff]  ;;  %v11793_v7 = vcombine.high %v3618_v43, %v3626_v19 }
 0x5ea   : > { %10607 = vmatpush1.bf16.msra.mxu1 %v11648_v18  ;;  %v3866_v56 = vld [vmem:[%s12917_s27 + $0x1578] sm:$0xff] }
 0x5eb   : > { %10650 = vmatpush1.bf16.msra.mxu0 %v11888_v1  ;;  %10608 = vmatprep.subr.bf16.mxu1 %v11633_v31  ;;  %v12033_v58 = vcombine.high %v3858_v48, %v3866_v56  ;;  %v3602_v62 = vld [vmem:[%s12917_s27 + $0xd38] sm:$0xff]  ;;  %v11792_v31 = vcombine.low %v3618_v43, %v3626_v19 }
 0x5ec   : > { %10651 = vmatprep.subr.bf16.mxu0 %v11873_v45  ;;  %v3610_v0 = vld [vmem:[%s12917_s27 + $0xd78] sm:$0xff]  ;;  %v12032_v45 = vcombine.low %v3858_v48, %v3866_v56 }
 0x5ed   : > { %v3842_v18 = vld [vmem:[%s12917_s27 + $0x14b8] sm:$0xff]  ;;  %v11777_v11 = vcombine.high %v3602_v62, %v3610_v0 }
 0x5ee   : > { %10609 = vmatpush1.bf16.msra.mxu1 %v11632_v53  ;;  %v3850_v1 = vld [vmem:[%s12917_s27 + $0x14f8] sm:$0xff] }
 0x5ef   : > { %10652 = vmatpush1.bf16.msra.mxu0 %v11872_v26  ;;  %10610 = vmatprep.subr.bf16.mxu1 %v11617_v3  ;;  %v12017_v6 = vcombine.high %v3842_v18, %v3850_v1  ;;  %v3586_v5 = vld [vmem:[%s12917_s27 + $0xcb8] sm:$0xff]  ;;  %v11776_v3 = vcombine.low %v3602_v62, %v3610_v0 }
 0x5f0   : > { %10653 = vmatprep.subr.bf16.mxu0 %v12113_v28  ;;  %v3594_v10 = vld [vmem:[%s12917_s27 + $0xcf8] sm:$0xff]  ;;  %v12016_v28 = vcombine.low %v3842_v18, %v3850_v1 }
 0x5f1   : > { %v3826_v53 = vld [vmem:[%s12917_s27 + $0x1438] sm:$0xff]  ;;  %v11761_v20 = vcombine.high %v3586_v5, %v3594_v10 }
 0x5f2   : > { %10611 = vmatpush1.bf16.msra.mxu1 %v11616_v9  ;;  %v3834_v26 = vld [vmem:[%s12917_s27 + $0x1478] sm:$0xff]  ;;  %v11760_v9 = vcombine.low %v3586_v5, %v3594_v10 }
 0x5f3   : > { %10654 = vmatpush2.bf16.msra.mxu0 %v12112_v38  ;;  %10612 = vmatprep.subr.bf16.mxu1 %v11857_v60  ;;  %v12001_v52 = vcombine.high %v3826_v53, %v3834_v26  ;;  %v3570_v32 = vld [vmem:[%s12917_s27 + $0xc38] sm:$0xff]  ;;  %v12000_v38 = vcombine.low %v3826_v53, %v3834_v26 }
 0x5f4   : > { %10655 = vmatprep.subr.bf16.mxu0 %v12097_v27  ;;  %v3578_v49 = vld [vmem:[%s12917_s27 + $0xc78] sm:$0xff] }
 0x5f5   : > { %v11745_v60 = vcombine.high %v3570_v32, %v3578_v49  ;;  %v4066_v27 = vld [vmem:[%s12917_s27 + $0x1bb8] sm:$0xff]  ;;  %v11744_v21 = vcombine.low %v3570_v32, %v3578_v49 }
 0x5f6   : > { %10613 = vmatpush2.bf16.msra.mxu1 %v11856_v14  ;;  %v4074_v46 = vld [vmem:[%s12917_s27 + $0x1bf8] sm:$0xff] }
 0x5f7   : > { %10656 = vmatpush2.bf16.msra.mxu0 %v12096_v12  ;;  %10614 = vmatprep.subr.bf16.mxu1 %v11841_v42  ;;  %v12241_v59 = vcombine.high %v4066_v27, %v4074_v46  ;;  %v4050_v13 = vld [vmem:[%s12917_s27 + $0x1b38] sm:$0xff]  ;;  %v12240_v42 = vcombine.low %v4066_v27, %v4074_v46 }
 0x5f8   : > { %10657 = vmatprep.subr.bf16.mxu0 %v12081_v15  ;;  %v4058_v14 = vld [vmem:[%s12917_s27 + $0x1b78] sm:$0xff] }
 0x5f9   : > { %v12225_v15 = vcombine.high %v4050_v13, %v4058_v14  ;;  %v4034_v24 = vld [vmem:[%s12917_s27 + $0x1ab8] sm:$0xff] }
 0x5fa   : > { %10615 = vmatpush2.bf16.msra.mxu1 %v11840_v22  ;;  %v4042_v25 = vld [vmem:[%s12917_s27 + $0x1af8] sm:$0xff] }
 0x5fb   : > { %10658 = vmatpush2.bf16.msra.mxu0 %v12080_v29  ;;  %10616 = vmatprep.subr.bf16.mxu1 %v11825_v33  ;;  %v12224_v33 = vcombine.low %v4050_v13, %v4058_v14  ;;  %v4018_v39 = vld [vmem:[%s12917_s27 + $0x1a38] sm:$0xff] }
 0x5fc   : > { %10659 = vmatprep.subr.bf16.mxu0 %v12065_v51  ;;  %v12209_v51 = vcombine.high %v4034_v24, %v4042_v25  ;;  %v4026_v34 = vld [vmem:[%s12917_s27 + $0x1a78] sm:$0xff] }
 0x5fd   : > { %v4002_v43 = vld [vmem:[%s12917_s27 + $0x19b8] sm:$0xff] }
 0x5fe   : > { %10617 = vmatpush2.bf16.msra.mxu1 %v11824_v37  ;;  %v4010_v19 = vld [vmem:[%s12917_s27 + $0x19f8] sm:$0xff] }
 0x5ff   : > { %10660 = vmatpush2.bf16.msra.mxu0 %v12064_v47  ;;  %10618 = vmatprep.subr.bf16.mxu1 %v11809_v40  ;;  %v12193_v40 = vcombine.high %v4018_v39, %v4026_v34  ;;  %v12177_v48 = vcombine.high %v4002_v43, %v4010_v19  ;;  %v3986_v56 = vld [vmem:[%s12917_s27 + $0x1938] sm:$0xff] }
 0x600   : > { %10661 = vmatprep.subr.bf16.mxu0 %v12049_v41  ;;  %v3978_v62 = vld [vmem:[%s12917_s27 + $0x18f8] sm:$0xff] }
 0x601   : > { %v3954_v1 = vld [vmem:[%s12917_s27 + $0x1838] sm:$0xff] }
 0x602   : > { %10619 = vmatpush2.bf16.msra.mxu1 %v11808_v50  ;;  %v3994_v50 = vld [vmem:[%s12917_s27 + $0x1978] sm:$0xff] }
 0x603   : > { %10662 = vmatpush2.bf16.msra.mxu0 %v12048_v61  ;;  %10620 = vmatprep.subr.bf16.mxu1 %v11793_v7  ;;  %v12176_v61 = vcombine.low %v4002_v43, %v4010_v19  ;;  %v12161_v7 = vcombine.high %v3986_v56, %v3994_v50  ;;  %v12160_v0 = vcombine.low %v3986_v56, %v3994_v50  ;;  %v4202_v5 = vld [vmem:[%s12917_s27 + $0x1ff8] sm:$0xff] }
 0x604   : > { %10663 = vmatprep.subr.bf16.mxu0 %v12033_v58  ;;  %v3970_v58 = vld [vmem:[%s12917_s27 + $0x18b8] sm:$0xff] }
 0x605   : > { %v12145_v18 = vcombine.high %v3970_v58, %v3978_v62  ;;  %v4178_v26 = vld [vmem:[%s12917_s27 + $0x1f38] sm:$0xff] }
 0x606   : > { %10621 = vmatpush2.bf16.msra.mxu1 %v11792_v31  ;;  %v3962_v31 = vld [vmem:[%s12917_s27 + $0x1878] sm:$0xff] }
 0x607   : > { %10664 = vmatpush2.bf16.msra.mxu0 %v12032_v45  ;;  %10622 = vmatprep.subr.bf16.mxu1 %v11777_v11  ;;  %v12144_v45 = vcombine.low %v3970_v58, %v3978_v62  ;;  %v12129_v11 = vcombine.high %v3954_v1, %v3962_v31  ;;  %v12128_v10 = vcombine.low %v3954_v1, %v3962_v31  ;;  %v4170_v32 = vld [vmem:[%s12917_s27 + $0x1ef8] sm:$0xff] }
 0x608   : > { %10665 = vmatprep.subr.bf16.mxu0 %v12017_v6  ;;  %v4194_v6 = vld [vmem:[%s12917_s27 + $0x1fb8] sm:$0xff] }
 0x609   : > { %v12369_v53 = vcombine.high %v4194_v6, %v4202_v5 }
 0x60a   : > { %10623 = vmatpush2.bf16.msra.mxu1 %v11776_v3  ;;  %v4186_v3 = vld [vmem:[%s12917_s27 + $0x1f78] sm:$0xff] }
 0x60b   : > { %10666 = vmatpush2.bf16.msra.mxu0 %v12016_v28  ;;  %10624 = vmatprep.subr.bf16.mxu1 %v11761_v20  ;;  %v12368_v28 = vcombine.low %v4194_v6, %v4202_v5  ;;  %v12353_v20 = vcombine.high %v4178_v26, %v4186_v3  ;;  %v12352_v49 = vcombine.low %v4178_v26, %v4186_v3 }
 0x60c   : > { %10667 = vmatprep.subr.bf16.mxu0 %v12001_v52  ;;  %v4162_v52 = vld [vmem:[%s12917_s27 + $0x1eb8] sm:$0xff] }
 0x60d   : > { %v12336_v27 = vcombine.low %v4162_v52, %v4170_v32 }
 0x60e   : > { %10625 = vmatpush2.bf16.msra.mxu1 %v11760_v9  ;;  %v12337_v9 = vcombine.high %v4162_v52, %v4170_v32 }
 0x60f   : > { %10668 = vmatpush2.bf16.msra.mxu0 %v12000_v38  ;;  %10626 = vmatprep.subr.bf16.mxu1 %v11745_v60  ;;  %v4146_v38 = vld [vmem:[%s12917_s27 + $0x1e38] sm:$0xff] }
 0x610   : > { %v4154_v60 = vld [vmem:[%s12917_s27 + $0x1e78] sm:$0xff] }
 0x611   : > { %v12321_v46 = vcombine.high %v4146_v38, %v4154_v60  ;;  %v12320_v13 = vcombine.low %v4146_v38, %v4154_v60 }
 0x612   : > { %10627 = vmatpush2.bf16.msra.mxu1 %v11744_v21  ;;  %v14240_v12 = vpop.f32.mrf.mxu0  ;;  %10670 = vmatmul.mubr.bf16.vlgmr.msra.gmra.mxu0 %v13192_v57  ;;  %v4130_v21 = vld [vmem:[%s12917_s27 + $0x1db8] sm:$0xff] }
 0x613   : > { %10678 = vmatprep.subr.bf16.mxu1 %v12241_v59  ;;  %v4138_v59 = vld [vmem:[%s12917_s27 + $0x1df8] sm:$0xff] }
 0x614   : > { %v14243_v44 = vpop.f32.mrf.mxu0  ;;  %v12305_v14 = vcombine.high %v4130_v21, %v4138_v59 }
 0x615   : > { %v10384_v54 = vpop.f32.mrf.mxu1  ;;  %10629 = vmatmul.mubr.bf16.vlgmr.msra.gmra.mxu1 %v13090_v23 }
 0x616   : > { %v10385_v22 = vadd.f32 %v10384_v54, %v14184_v2  ;;  %10679 = vmatpush1.bf16.msra.mxu1 %v12240_v42  ;;  %10710 = vmatprep.mubr.bf16.mxu1 %v13243_v30  ;;  %v10429_v29 = vpop.f32.mrf.mxu0  ;;  %v12208_v30 = vcombine.low %v4034_v24, %v4042_v25  ;;  %v4114_v42 = vld [vmem:[%s12917_s27 + $0x1d38] sm:$0xff]  ;;  %v12304_v24 = vcombine.low %v4130_v21, %v4138_v59 }
 0x617   : > { %v10386_v57 = vpop.f32.mrf.mxu1  ;;  %10680 = vmatprep.subr.bf16.mxu1 %v12225_v15  ;;  %v4122_v15 = vld [vmem:[%s12917_s27 + $0x1d78] sm:$0xff] }
 0x618   : > { %v10387_v35 = vadd.f32 %v10386_v57, %v14188_v63  ;;  %v10430_v36 = vpop.f32.mrf.mxu0  ;;  %v10729_v23 = vmax.f32 %v10385_v22, 0.0  ;;  %v12192_v63 = vcombine.low %v4018_v39, %v4026_v34  ;;  %v12289_v25 = vcombine.high %v4114_v42, %v4122_v15  ;;  %v4098_v54 = vld [vmem:[%s12917_s27 + $0x1cb8] sm:$0xff] }
 0x619   : > { %v10388_v37 = vpop.f32.mrf.mxu1  ;;  %v4106_v22 = vld [vmem:[%s12917_s27 + $0x1cf8] sm:$0xff]  ;;  %v12288_v29 = vcombine.low %v4114_v42, %v4122_v15 }
 0x61a   : > { %v10730_v2 = vmax.f32 %v10387_v35, 0.0  ;;  %10681 = vmatpush1.bf16.msra.mxu1 %v12224_v33  ;;  %v12273_v33 = vcombine.high %v4098_v54, %v4106_v22  ;;  %v4082_v57 = vld [vmem:[%s12917_s27 + $0x1c38] sm:$0xff]  ;;  %v12272_v35 = vcombine.low %v4098_v54, %v4106_v22 }
 0x61b   : > { %v10389_v47 = vpop.f32.mrf.mxu1  ;;  %10682 = vmatprep.subr.bf16.mxu1 %v12209_v51  ;;  %v4090_v51 = vld [vmem:[%s12917_s27 + $0x1c78] sm:$0xff] }
 0x61c   : > { %v12390_v41 = vpack.c.bf16 %v10730_v2, %v10729_v23  ;;  %v12257_v36 = vcombine.high %v4082_v57, %v4090_v51  ;;  %v12256_v39 = vcombine.low %v4082_v57, %v4090_v51  ;;  %v12484_v34 = vld [vmem:[%s13306_s9 + $0x8] sm:$0xff] }
 0x61d   : > { %v4258_v37 = vrot.slane %v12484_v34, %v13165_v17  ;;  %v4262_v23 = vrot.slane %v12484_v34, %v13170_v55  ;;  %v4266_v5 = vrot.slane %v12484_v34, %v13222_v16 }
 0x61e   : > { %10804 = vst [vmem:[%s13496_s10 + $0x28] sm:$0xff] %v12390_v41  ;;  %10683 = vmatpush1.bf16.msra.mxu1 %v12208_v30 }
 0x61f   : > { %10684 = vmatprep.subr.bf16.mxu1 %v12193_v40  ;;  %v10426_v30 = vadd.f32 %v14240_v12, %v4258_v37  ;;  %v10428_v41 = vadd.f32 %v14243_v44, %v4262_v23 }
 0x622   : > { %10685 = vmatpush1.bf16.msra.mxu1 %v12192_v63 }
 0x623   : > { %10686 = vmatprep.subr.bf16.mxu1 %v12177_v48 }
 0x626   : > { %10687 = vmatpush1.bf16.msra.mxu1 %v12176_v61 }
 0x627   : > { %10688 = vmatprep.subr.bf16.mxu1 %v12161_v7 }
 0x62a   : > { %10689 = vmatpush1.bf16.msra.mxu1 %v12160_v0 }
 0x62b   : > { %10690 = vmatprep.subr.bf16.mxu1 %v12145_v18 }
 0x62e   : > { %10691 = vmatpush1.bf16.msra.mxu1 %v12144_v45 }
 0x62f   : > { %10692 = vmatprep.subr.bf16.mxu1 %v12129_v11 }
 0x632   : > { %10693 = vmatpush1.bf16.msra.mxu1 %v12128_v10  ;;  %v4270_v10 = vrot.slane %v12484_v34, %v13227_v8 }
 0x633   : > { %10694 = vmatprep.subr.bf16.mxu1 %v12369_v53 }
 0x636   : > { %10695 = vmatpush2.bf16.msra.mxu1 %v12368_v28 }
 0x637   : > { %10696 = vmatprep.subr.bf16.mxu1 %v12353_v20 }
 0x63a   : > { %10697 = vmatpush2.bf16.msra.mxu1 %v12352_v49 }
 0x63b   : > { %10698 = vmatprep.subr.bf16.mxu1 %v12337_v9 }
 0x63e   : > { %10699 = vmatpush2.bf16.msra.mxu1 %v12336_v27 }
 0x63f   : > { %10700 = vmatprep.subr.bf16.mxu1 %v12321_v46 }
 0x642   : > { %10701 = vmatpush2.bf16.msra.mxu1 %v12320_v13 }
 0x643   : > { %10702 = vmatprep.subr.bf16.mxu1 %v12305_v14 }
 0x646   : > { %10703 = vmatpush2.bf16.msra.mxu1 %v12304_v24 }
 0x647   : > { %10704 = vmatprep.subr.bf16.mxu1 %v12289_v25 }
 0x64a   : > { %10705 = vmatpush2.bf16.msra.mxu1 %v12288_v29 }
 0x64b   : > { %10706 = vmatprep.subr.bf16.mxu1 %v12273_v33 }
 0x64e   : > { %10707 = vmatpush2.bf16.msra.mxu1 %v12272_v35 }
 0x64f   : > { %10708 = vmatprep.subr.bf16.mxu1 %v12257_v36 }
 0x652   : > { %10709 = vmatpush2.bf16.msra.mxu1 %v12256_v39  ;;  %v10507_v2 = vpop.f32.mrf.mxu0 }
 0x654   : > { %v10509_v47 = vpop.f32.mrf.mxu0 }
 0x655   : > { %v10466_v40 = vpop.f32.mrf.mxu1  ;;  %10711 = vmatmul.mubr.bf16.vlgmr.msra.gmra.mxu1 %v13248_v4 }
 0x656   : > { %v10467_v43 = vadd.f32 %v10466_v40, %v10426_v30  ;;  %v10511_v19 = vpop.f32.mrf.mxu0 }
 0x657   : > { %v10468_v63 = vpop.f32.mrf.mxu1 }
 0x658   : > { %v10469_v48 = vadd.f32 %v10468_v63, %v10428_v41  ;;  %v10512_v56 = vpop.f32.mrf.mxu0  ;;  %v10508_v50 = vadd.f32 %v10507_v2, %v10467_v43 }
 0x659   : > { %v10470_v61 = vpop.f32.mrf.mxu1 }
 0x65a   : > { %v10510_v17 = vadd.f32 %v10509_v47, %v10469_v48 }
 0x65b   : > { %v10471_v55 = vpop.f32.mrf.mxu1 }
 0x692   : > { %v10589_v7 = vpop.f32.mrf.mxu0 }
 0x693   : > { %v10590_v26 = vadd.f32 %v10589_v7, %v4266_v5 }
 0x694   : > { %v10591_v58 = vpop.f32.mrf.mxu0 }
 0x695   : > { %v10548_v62 = vpop.f32.mrf.mxu1  ;;  %v10592_v20 = vadd.f32 %v10591_v58, %v4270_v10 }
 0x696   : > { %v10549_v12 = vadd.f32 %v10548_v62, %v10508_v50  ;;  %v10593_v0 = vpop.f32.mrf.mxu0 }
 0x697   : > { %v10550_v18 = vpop.f32.mrf.mxu1 }
 0x698   : > { %v10551_v1 = vadd.f32 %v10550_v18, %v10510_v17  ;;  %v10594_v4 = vpop.f32.mrf.mxu0  ;;  %v10731_v44 = vmax.f32 %v10549_v12, 0.0 }
 0x699   : > { %v10552_v31 = vpop.f32.mrf.mxu1 }
 0x69a   : > { %v10732_v45 = vmax.f32 %v10551_v1, 0.0 }
 0x69b   : > { %v10553_v11 = vpop.f32.mrf.mxu1 }
 0x69c   : > { %v12391_v6 = vpack.c.bf16 %v10732_v45, %v10731_v44 }
 0x69e   : > { %10805 = vst [vmem:[%s13496_s10 + $0x30] sm:$0xff] %v12391_v6 }
 0x6d2   : > { %v10671_v53 = vpop.f32.mrf.mxu0 }
 0x6d4   : > { %v10673_v3 = vpop.f32.mrf.mxu0 }
 0x6d5   : > { %v10630_v28 = vpop.f32.mrf.mxu1 }
 0x6d6   : > { %v10631_v52 = vadd.f32 %v10630_v28, %v10590_v26  ;;  %v10675_v32 = vpop.f32.mrf.mxu0 }
 0x6d7   : > { %v10632_v49 = vpop.f32.mrf.mxu1 }
 0x6d8   : > { %v10633_v9 = vadd.f32 %v10632_v49, %v10592_v20  ;;  %v10676_v38 = vpop.f32.mrf.mxu0  ;;  %v10672_v60 = vadd.f32 %v10671_v53, %v10631_v52 }
 0x6d9   : > { %v10634_v27 = vpop.f32.mrf.mxu1 }
 0x6da   : > { %v10674_v46 = vadd.f32 %v10673_v3, %v10633_v9 }
 0x6db   : > { %v10635_v16 = vpop.f32.mrf.mxu1 }
 0x715   : > { %v10712_v21 = vpop.f32.mrf.mxu1 }
 0x716   : > { %v10713_v8 = vadd.f32 %v10712_v21, %v10672_v60 }
 0x717   : > { %v10714_v59 = vpop.f32.mrf.mxu1 }
 0x718   : > { %v10715_v13 = vadd.f32 %v10714_v59, %v10674_v46  ;;  %v10733_v42 = vmax.f32 %v10713_v8, 0.0 }
 0x719   : > { %v10716_v14 = vpop.f32.mrf.mxu1 }
 0x71a   : > { %v10734_v15 = vmax.f32 %v10715_v13, 0.0 }
 0x71b   : > { %v10717_v24 = vpop.f32.mrf.mxu1 }
 0x71c   : > { %v12392_v25 = vpack.c.bf16 %v10734_v15, %v10733_v42 }
 0x71e   : > { %10806 = vst [vmem:[%s13496_s10 + $0x38] sm:$0xff] %v12392_v25 }
 0x71f   : > { %12632 = shalt.err (!%p12629_p12)
}
 0x720   : > { %s12633_s7 = scalar_lea.hbm %s10820_s26, 1024  ;;  %s12637_s27 = scalar_lea.hbm %s14329_s5, 2048 }
 0x721   : > { %p12634_p9 = scmp.ne.s32.totalorder %s10820_s26, %s12633_s7  ;;  %p12638_p1 = scmp.lt.s32.totalorder %s10820_s26, %s14329_s5 }
 0x722   : > { %p12639_p5 = scmp.lt.s32.totalorder %s12637_s27, %s12633_s7 }
 0x723   : > { %p12635_p2 = pnand %p12634_p9, %p14359_p3 }
 0x724   : > { %p12640_p6 = por %p12639_p5, %p12638_p1 }
 0x725   : > { %p12636_p10 = pneg %p12635_p2 }
 0x727   : > { %p12641_p11 = pnand %p12640_p6, %p12636_p10 }
 0x729   : > { %12644 = shalt.err (!%p12641_p11)
}
 0x72a   : > { %12410 = dma.vmem_to_hbm [thread:$0]  (%p14359_p3), %s10823_s23, 1024, %s10820_s26, %s10808_s8  }
 0x72b PF: > { %s10834_s28 = sand.u32 1, %s12679_s18   ;;  %p14360_p4 = scmp.ne.s32.totalorder %s14343_s6, 0 }
 0x72c   : > { %p14361_p13 = scmp.ge.s32.totalorder %s12691_s21, 2  ;;  %s10835_s10 = scalar_lea.sflag [#allocation4], %s10834_s28 }
 0x72e   : > { %p12430_p0 = pnand %p14361_p13, %p14360_p4 }
 0x730   : > { %p12431_p8 = pneg %p12430_p0 }
 0x732   : > { %12674 = dma.done.wait (%p12431_p8), %s10835_s10, 1024  }
 0x733   : > { %12676 = vsyncadd (%p12431_p8), %s10835_s10, 4294966272  ;;  %s14362_s15 = sld [smem:[#allocation16_spill]]  ;;  %p20_p7 = scmp.ge.s32.totalorder %s12759_s24, 4  }
 0x734   : > { %s14363_s18 = smov %s12683_s19  ;;  %s14364_s19 = smov %s12687_s20 }
 0x735   : > { %s14366_s21 = smov %s12759_s24  ;;  %22 = sbr.rel (!%p20_p7) target bundleno = 7 (0x7), region = 109 }
 0x739   : > { %s14365_s20 = smov %s14362_s15 }
 0x73a   :  { %10840 = vsyncpa [#allocation3], 1 }
 0x73b   :  { %10842 = vsyncpa [#allocation3 + $0x1], 1 }
 0x73c   :  { %10843 = vsyncpa [#allocation6], 1 }
 0x73d   :  { %10844 = vsyncpa [#allocation9], 1 }
 0x73e   :  { %10846 = vsyncpa [#allocation9 + $0x1], 1 }
 0x73f   :  { %10847 = vsyncpa [#allocation4], 1 }
 0x740   :  { %10849 = vsyncpa [#allocation4 + $0x1], 1 }

</bundles_post_ra>
